<compile_context>
chip_gen: v5e
topology: v5e:2x2
jax: 0.10.0
libtpu: 0.0.40
codegen_flags: <defaults>
</compile_context>

<pallas_src>
import functools

import numpy as np
import jax
import jax.numpy as jnp
from jax.experimental import pallas as pl
from jax.experimental.pallas import tpu as pltpu


# ---------------------------------------------------------------------------
# Conv 3x3 (stride 1, padding 1) + bias + ReLU
# ---------------------------------------------------------------------------
def _conv3x3_relu_kernel(x_ref, w_ref, b_ref, o_ref):
    # x_ref: (1, 9, H*W, Cin)  shifted-window taps for one image
    # w_ref: (9, Cin, Cout)    conv weights, tap-major
    # b_ref: (1, Cout)
    # o_ref: (1, H*W, Cout)
    acc = jnp.zeros(o_ref.shape[1:], jnp.float32)
    for t in range(9):  # static unroll: 9 MXU matmuls accumulated in f32
        acc = acc + jnp.dot(x_ref[0, t], w_ref[t],
                            preferred_element_type=jnp.float32)
    o_ref[0] = jnp.maximum(acc + b_ref[...], 0.0)


def conv3x3_relu(x, w, b):
    """x: (B,H,W,Cin) NHWC, w: (3,3,Cin,Cout), b: (Cout,) -> (B,H,W,Cout)."""
    B, H, W, Cin = x.shape
    Cout = w.shape[-1]
    HW = H * W

    # Wrapper-side layout plumbing: zero-pad and build the 9 shifted views
    # (tap-major im2col).  All arithmetic happens inside the Pallas kernel.
    xp = jnp.pad(x, ((0, 0), (1, 1), (1, 1), (0, 0)))
    taps = jnp.stack(
        [xp[:, dy:dy + H, dx:dx + W, :] for dy in range(3) for dx in range(3)],
        axis=1,
    ).reshape(B, 9, HW, Cin)
    w9 = w.reshape(9, Cin, Cout)
    b2 = b.reshape(1, Cout)

    out = pl.pallas_call(
        _conv3x3_relu_kernel,
        out_shape=jax.ShapeDtypeStruct((B, HW, Cout), jnp.float32),
        grid=(B,),
        in_specs=[
            pl.BlockSpec((1, 9, HW, Cin), lambda i: (i, 0, 0, 0)),
            pl.BlockSpec((9, Cin, Cout), lambda i: (0, 0, 0)),   # resident
            pl.BlockSpec((1, Cout), lambda i: (0, 0)),           # resident
        ],
        out_specs=pl.BlockSpec((1, HW, Cout), lambda i: (i, 0, 0)),
        compiler_params=pltpu.CompilerParams(
            dimension_semantics=("parallel",),
            vmem_limit_bytes=40 * 1024 * 1024,
        ),
    )(taps, w9, b2)
    return out.reshape(B, H, W, Cout)


# ---------------------------------------------------------------------------
# MaxPool 2x2, stride 2
# ---------------------------------------------------------------------------
def _maxpool_kernel(x_ref, o_ref):
    # x_ref: (1, 4, Ho*Wo, C) -- the 4 elements of each 2x2 window, stacked
    a = x_ref[0, 0]
    b = x_ref[0, 1]
    c = x_ref[0, 2]
    d = x_ref[0, 3]
    o_ref[0] = jnp.maximum(jnp.maximum(a, b), jnp.maximum(c, d))


def maxpool2x2(x):
    """x: (B,H,W,C) -> (B,H//2,W//2,C)."""
    B, H, W, C = x.shape
    Ho, Wo = H // 2, W // 2
    xr = x.reshape(B, Ho, 2, Wo, 2, C)
    views = jnp.stack(
        [xr[:, :, i, :, j, :] for i in range(2) for j in range(2)], axis=1
    ).reshape(B, 4, Ho * Wo, C)

    out = pl.pallas_call(
        _maxpool_kernel,
        out_shape=jax.ShapeDtypeStruct((B, Ho * Wo, C), jnp.float32),
        grid=(B,),
        in_specs=[pl.BlockSpec((1, 4, Ho * Wo, C), lambda i: (i, 0, 0, 0))],
        out_specs=pl.BlockSpec((1, Ho * Wo, C), lambda i: (i, 0, 0)),
        compiler_params=pltpu.CompilerParams(dimension_semantics=("parallel",)),
    )(views)
    return out.reshape(B, Ho, Wo, C)


# ---------------------------------------------------------------------------
# Linear (+ optional fused ReLU): tiled matmul, y = x @ W(in,out) + b
# ---------------------------------------------------------------------------
def _linear_kernel(x_ref, w_ref, b_ref, o_ref, acc_ref, *, relu):
    k = pl.program_id(1)

    @pl.when(k == 0)
    def _():
        acc_ref[...] = jnp.zeros_like(acc_ref)

    acc_ref[...] += jnp.dot(x_ref[...], w_ref[...],
                            preferred_element_type=jnp.float32)

    @pl.when(k == pl.num_programs(1) - 1)
    def _():
        y = acc_ref[...] + b_ref[...]
        if relu:
            y = jnp.maximum(y, 0.0)
        o_ref[...] = y.astype(o_ref.dtype)


def linear(x, w, b, *, relu, tn=512, tk=512):
    """x: (B,K), w: (K,N) (= PyTorch weight.T), b: (N,) -> (B,N)."""
    B, K = x.shape
    N = w.shape[1]
    tn = min(tn, N)
    tk = min(tk, K)
    assert N % tn == 0 and K % tk == 0
    grid = (N // tn, K // tk)   # reduction axis (K) last

    return pl.pallas_call(
        functools.partial(_linear_kernel, relu=relu),
        out_shape=jax.ShapeDtypeStruct((B, N), jnp.float32),
        grid=grid,
        in_specs=[
            pl.BlockSpec((B, tk), lambda j, k: (0, k)),
            pl.BlockSpec((tk, tn), lambda j, k: (k, j)),
            pl.BlockSpec((1, tn), lambda j, k: (0, j)),
        ],
        out_specs=pl.BlockSpec((B, tn), lambda j, k: (0, j)),
        scratch_shapes=[pltpu.VMEM((B, tn), jnp.float32)],
        compiler_params=pltpu.CompilerParams(
            dimension_semantics=("parallel", "arbitrary")),
    )(x, w, b.reshape(1, N))


# ---------------------------------------------------------------------------
# VGG model (compact feature cfg; classifier matches the spec exactly)
# ---------------------------------------------------------------------------
CFG = [64, "M", 128, "M", 256, "M", 512, "M", 512, "M"]


def init_params(key, cfg=CFG, in_ch=3, num_class=100):
    n_conv = sum(1 for v in cfg if v != "M")
    keys = jax.random.split(key, n_conv + 3)

    def uniform(k, shape, fan_in):
        bound = 1.0 / np.sqrt(fan_in)
        return jax.random.uniform(k, shape, jnp.float32, -bound, bound)

    feats = []
    ki = 0
    c = in_ch
    for v in cfg:
        if v == "M":
            feats.append(("pool", None, None))
        else:
            kw, kb = jax.random.split(keys[ki]); ki += 1
            fan_in = c * 9
            feats.append(("conv", uniform(kw, (3, 3, c, v), fan_in),
                          uniform(kb, (v,), fan_in)))
            c = v

    def lin(k, fin, fout):
        kw, kb = jax.random.split(k)
        return uniform(kw, (fin, fout), fin), uniform(kb, (fout,), fin)

    w1, b1 = lin(keys[ki], 512, 4096)
    w2, b2 = lin(keys[ki + 1], 4096, 4096)
    w3, b3 = lin(keys[ki + 2], 4096, num_class)
    return {"features": feats, "classifier": (w1, b1, w2, b2, w3, b3)}


def vgg_forward(x_nchw, params):
    """Pallas forward pass. x_nchw: (B, 3, H, W), same layout as PyTorch."""
    x = jnp.transpose(x_nchw, (0, 2, 3, 1))          # NCHW -> NHWC (lane-dense C)
    for kind, w, b in params["features"]:
        if kind == "conv":
            x = conv3x3_relu(x, w, b)
        else:
            x = maxpool2x2(x)
    x = x.reshape(x.shape[0], -1)                    # (B, 512); spatial is 1x1
    w1, b1, w2, b2, w3, b3 = params["classifier"]
    h = linear(x, w1, b1, relu=True)
    # TODO(synk): nn.Dropout is identity in eval mode; training-mode random
    # masking (pltpu.prng_*) is not implemented here.
    h = linear(h, w2, b2, relu=True)
    return linear(h, w3, b3, relu=False)


def reference(x_nchw, params):
    """Pure JAX/XLA reference for correctness checking."""
    hp = jax.lax.Precision.HIGHEST
    x = jnp.transpose(x_nchw, (0, 2, 3, 1))
    for kind, w, b in params["features"]:
        if kind == "conv":
            y = jax.lax.conv_general_dilated(
                x, w, (1, 1), "SAME",
                dimension_numbers=("NHWC", "HWIO", "NHWC"), precision=hp)
            x = jnp.maximum(y + b, 0.0)
        else:
            x = jax.lax.reduce_window(x, -jnp.inf, jax.lax.max,
                                      (1, 2, 2, 1), (1, 2, 2, 1), "VALID")
    x = x.reshape(x.shape[0], -1)
    w1, b1, w2, b2, w3, b3 = params["classifier"]
    h = jnp.maximum(jnp.dot(x, w1, precision=hp) + b1, 0.0)
    h = jnp.maximum(jnp.dot(h, w2, precision=hp) + b2, 0.0)
    return jnp.dot(h, w3, precision=hp) + b3


if __name__ == "__main__":
    key = jax.random.PRNGKey(0)
    kx, kp = jax.random.split(key)

    batch, num_class = 2, 100
    x = jax.random.normal(kx, (batch, 3, 32, 32), dtype=jnp.float32)
    params = init_params(kp, num_class=num_class)

    out = vgg_forward(x, params)
    out = jax.block_until_ready(out)
    assert out.shape == (batch, num_class)

    ref = reference(x, params)
    np.testing.assert_allclose(np.asarray(out), np.asarray(ref),
                               rtol=1e-2, atol=1e-2)

    print("KERNEL_OK")
</pallas_src>

<mosaic_0001>
module attributes {stable_mosaic.version = 11 : i64} {
  func.func @_conv3x3_relu_kernel(%arg0: i32, %arg1: memref<1x9x1024x3xf32, #tpu.memory_space<vmem>>, %arg2: memref<9x3x64xf32, #tpu.memory_space<vmem>>, %arg3: memref<1x64xf32, #tpu.memory_space<vmem>>, %arg4: memref<1x1024x64xf32, #tpu.memory_space<vmem>>) attributes {dimension_semantics = [#tpu.dimension_semantics<parallel>], iteration_bounds = array<i64: 2>, scalar_prefetch = 0 : i64, scratch_operands = 0 : i64, tpu.core_type = #tpu.core_type<tc>, window_params = [{transform_indices = @transform_0, window_bounds = array<i64: 1, 9, 1024, 3>}, {pipeline_mode = #tpu.pipeline_mode<synchronous>, transform_indices = @transform_1, window_bounds = array<i64: 9, 3, 64>}, {pipeline_mode = #tpu.pipeline_mode<synchronous>, transform_indices = @transform_2, window_bounds = array<i64: 1, 64>}, {transform_indices = @transform_3, window_bounds = array<i64: 1, 1024, 64>}]} {
    %cst = arith.constant 0.000000e+00 : f32
    %0 = vector.broadcast %cst : f32 to vector<1024x64xf32>
    %c0 = arith.constant 0 : index
    %c0_0 = arith.constant 0 : index
    %c0_1 = arith.constant 0 : index
    %c0_2 = arith.constant 0 : index
    %1 = vector.load %arg1[%c0, %c0_0, %c0_1, %c0_2] : memref<1x9x1024x3xf32, #tpu.memory_space<vmem>>, vector<1x1x1024x3xf32>
    %2 = vector.shape_cast %1 : vector<1x1x1024x3xf32> to vector<1024x3xf32>
    %c0_3 = arith.constant 0 : index
    %c0_4 = arith.constant 0 : index
    %c0_5 = arith.constant 0 : index
    %3 = vector.load %arg2[%c0_3, %c0_4, %c0_5] : memref<9x3x64xf32, #tpu.memory_space<vmem>>, vector<1x3x64xf32>
    %4 = vector.shape_cast %3 : vector<1x3x64xf32> to vector<3x64xf32>
    %cst_6 = arith.constant dense<0.000000e+00> : vector<1024x64xf32>
    %5 = tpu.matmul %2, %4, %cst_6 {dimension_numbers = #tpu.dot_dimension_numbers<[1], [0], [0], [1], [0, 0, 1, 1], [], []>} : vector<1024x3xf32>, vector<3x64xf32>, vector<1024x64xf32> -> vector<1024x64xf32>
    %6 = arith.addf %0, %5 : vector<1024x64xf32>
    %c0_7 = arith.constant 0 : index
    %c1 = arith.constant 1 : index
    %c0_8 = arith.constant 0 : index
    %c0_9 = arith.constant 0 : index
    %7 = vector.load %arg1[%c0_7, %c1, %c0_8, %c0_9] : memref<1x9x1024x3xf32, #tpu.memory_space<vmem>>, vector<1x1x1024x3xf32>
    %8 = vector.shape_cast %7 : vector<1x1x1024x3xf32> to vector<1024x3xf32>
    %c1_10 = arith.constant 1 : index
    %c0_11 = arith.constant 0 : index
    %c0_12 = arith.constant 0 : index
    %9 = vector.load %arg2[%c1_10, %c0_11, %c0_12] : memref<9x3x64xf32, #tpu.memory_space<vmem>>, vector<1x3x64xf32>
    %10 = vector.shape_cast %9 : vector<1x3x64xf32> to vector<3x64xf32>
    %cst_13 = arith.constant dense<0.000000e+00> : vector<1024x64xf32>
    %11 = tpu.matmul %8, %10, %cst_13 {dimension_numbers = #tpu.dot_dimension_numbers<[1], [0], [0], [1], [0, 0, 1, 1], [], []>} : vector<1024x3xf32>, vector<3x64xf32>, vector<1024x64xf32> -> vector<1024x64xf32>
    %12 = arith.addf %6, %11 : vector<1024x64xf32>
    %c0_14 = arith.constant 0 : index
    %c2 = arith.constant 2 : index
    %c0_15 = arith.constant 0 : index
    %c0_16 = arith.constant 0 : index
    %13 = vector.load %arg1[%c0_14, %c2, %c0_15, %c0_16] : memref<1x9x1024x3xf32, #tpu.memory_space<vmem>>, vector<1x1x1024x3xf32>
    %14 = vector.shape_cast %13 : vector<1x1x1024x3xf32> to vector<1024x3xf32>
    %c2_17 = arith.constant 2 : index
    %c0_18 = arith.constant 0 : index
    %c0_19 = arith.constant 0 : index
    %15 = vector.load %arg2[%c2_17, %c0_18, %c0_19] : memref<9x3x64xf32, #tpu.memory_space<vmem>>, vector<1x3x64xf32>
    %16 = vector.shape_cast %15 : vector<1x3x64xf32> to vector<3x64xf32>
    %cst_20 = arith.constant dense<0.000000e+00> : vector<1024x64xf32>
    %17 = tpu.matmul %14, %16, %cst_20 {dimension_numbers = #tpu.dot_dimension_numbers<[1], [0], [0], [1], [0, 0, 1, 1], [], []>} : vector<1024x3xf32>, vector<3x64xf32>, vector<1024x64xf32> -> vector<1024x64xf32>
    %18 = arith.addf %12, %17 : vector<1024x64xf32>
    %c0_21 = arith.constant 0 : index
    %c3 = arith.constant 3 : index
    %c0_22 = arith.constant 0 : index
    %c0_23 = arith.constant 0 : index
    %19 = vector.load %arg1[%c0_21, %c3, %c0_22, %c0_23] : memref<1x9x1024x3xf32, #tpu.memory_space<vmem>>, vector<1x1x1024x3xf32>
    %20 = vector.shape_cast %19 : vector<1x1x1024x3xf32> to vector<1024x3xf32>
    %c3_24 = arith.constant 3 : index
    %c0_25 = arith.constant 0 : index
    %c0_26 = arith.constant 0 : index
    %21 = vector.load %arg2[%c3_24, %c0_25, %c0_26] : memref<9x3x64xf32, #tpu.memory_space<vmem>>, vector<1x3x64xf32>
    %22 = vector.shape_cast %21 : vector<1x3x64xf32> to vector<3x64xf32>
    %cst_27 = arith.constant dense<0.000000e+00> : vector<1024x64xf32>
    %23 = tpu.matmul %20, %22, %cst_27 {dimension_numbers = #tpu.dot_dimension_numbers<[1], [0], [0], [1], [0, 0, 1, 1], [], []>} : vector<1024x3xf32>, vector<3x64xf32>, vector<1024x64xf32> -> vector<1024x64xf32>
    %24 = arith.addf %18, %23 : vector<1024x64xf32>
    %c0_28 = arith.constant 0 : index
    %c4 = arith.constant 4 : index
    %c0_29 = arith.constant 0 : index
    %c0_30 = arith.constant 0 : index
    %25 = vector.load %arg1[%c0_28, %c4, %c0_29, %c0_30] : memref<1x9x1024x3xf32, #tpu.memory_space<vmem>>, vector<1x1x1024x3xf32>
    %26 = vector.shape_cast %25 : vector<1x1x1024x3xf32> to vector<1024x3xf32>
    %c4_31 = arith.constant 4 : index
    %c0_32 = arith.constant 0 : index
    %c0_33 = arith.constant 0 : index
    %27 = vector.load %arg2[%c4_31, %c0_32, %c0_33] : memref<9x3x64xf32, #tpu.memory_space<vmem>>, vector<1x3x64xf32>
    %28 = vector.shape_cast %27 : vector<1x3x64xf32> to vector<3x64xf32>
    %cst_34 = arith.constant dense<0.000000e+00> : vector<1024x64xf32>
    %29 = tpu.matmul %26, %28, %cst_34 {dimension_numbers = #tpu.dot_dimension_numbers<[1], [0], [0], [1], [0, 0, 1, 1], [], []>} : vector<1024x3xf32>, vector<3x64xf32>, vector<1024x64xf32> -> vector<1024x64xf32>
    %30 = arith.addf %24, %29 : vector<1024x64xf32>
    %c0_35 = arith.constant 0 : index
    %c5 = arith.constant 5 : index
    %c0_36 = arith.constant 0 : index
    %c0_37 = arith.constant 0 : index
    %31 = vector.load %arg1[%c0_35, %c5, %c0_36, %c0_37] : memref<1x9x1024x3xf32, #tpu.memory_space<vmem>>, vector<1x1x1024x3xf32>
    %32 = vector.shape_cast %31 : vector<1x1x1024x3xf32> to vector<1024x3xf32>
    %c5_38 = arith.constant 5 : index
    %c0_39 = arith.constant 0 : index
    %c0_40 = arith.constant 0 : index
    %33 = vector.load %arg2[%c5_38, %c0_39, %c0_40] : memref<9x3x64xf32, #tpu.memory_space<vmem>>, vector<1x3x64xf32>
    %34 = vector.shape_cast %33 : vector<1x3x64xf32> to vector<3x64xf32>
    %cst_41 = arith.constant dense<0.000000e+00> : vector<1024x64xf32>
    %35 = tpu.matmul %32, %34, %cst_41 {dimension_numbers = #tpu.dot_dimension_numbers<[1], [0], [0], [1], [0, 0, 1, 1], [], []>} : vector<1024x3xf32>, vector<3x64xf32>, vector<1024x64xf32> -> vector<1024x64xf32>
    %36 = arith.addf %30, %35 : vector<1024x64xf32>
    %c0_42 = arith.constant 0 : index
    %c6 = arith.constant 6 : index
    %c0_43 = arith.constant 0 : index
    %c0_44 = arith.constant 0 : index
    %37 = vector.load %arg1[%c0_42, %c6, %c0_43, %c0_44] : memref<1x9x1024x3xf32, #tpu.memory_space<vmem>>, vector<1x1x1024x3xf32>
    %38 = vector.shape_cast %37 : vector<1x1x1024x3xf32> to vector<1024x3xf32>
    %c6_45 = arith.constant 6 : index
    %c0_46 = arith.constant 0 : index
    %c0_47 = arith.constant 0 : index
    %39 = vector.load %arg2[%c6_45, %c0_46, %c0_47] : memref<9x3x64xf32, #tpu.memory_space<vmem>>, vector<1x3x64xf32>
    %40 = vector.shape_cast %39 : vector<1x3x64xf32> to vector<3x64xf32>
    %cst_48 = arith.constant dense<0.000000e+00> : vector<1024x64xf32>
    %41 = tpu.matmul %38, %40, %cst_48 {dimension_numbers = #tpu.dot_dimension_numbers<[1], [0], [0], [1], [0, 0, 1, 1], [], []>} : vector<1024x3xf32>, vector<3x64xf32>, vector<1024x64xf32> -> vector<1024x64xf32>
    %42 = arith.addf %36, %41 : vector<1024x64xf32>
    %c0_49 = arith.constant 0 : index
    %c7 = arith.constant 7 : index
    %c0_50 = arith.constant 0 : index
    %c0_51 = arith.constant 0 : index
    %43 = vector.load %arg1[%c0_49, %c7, %c0_50, %c0_51] : memref<1x9x1024x3xf32, #tpu.memory_space<vmem>>, vector<1x1x1024x3xf32>
    %44 = vector.shape_cast %43 : vector<1x1x1024x3xf32> to vector<1024x3xf32>
    %c7_52 = arith.constant 7 : index
    %c0_53 = arith.constant 0 : index
    %c0_54 = arith.constant 0 : index
    %45 = vector.load %arg2[%c7_52, %c0_53, %c0_54] : memref<9x3x64xf32, #tpu.memory_space<vmem>>, vector<1x3x64xf32>
    %46 = vector.shape_cast %45 : vector<1x3x64xf32> to vector<3x64xf32>
    %cst_55 = arith.constant dense<0.000000e+00> : vector<1024x64xf32>
    %47 = tpu.matmul %44, %46, %cst_55 {dimension_numbers = #tpu.dot_dimension_numbers<[1], [0], [0], [1], [0, 0, 1, 1], [], []>} : vector<1024x3xf32>, vector<3x64xf32>, vector<1024x64xf32> -> vector<1024x64xf32>
    %48 = arith.addf %42, %47 : vector<1024x64xf32>
    %c0_56 = arith.constant 0 : index
    %c8 = arith.constant 8 : index
    %c0_57 = arith.constant 0 : index
    %c0_58 = arith.constant 0 : index
    %49 = vector.load %arg1[%c0_56, %c8, %c0_57, %c0_58] : memref<1x9x1024x3xf32, #tpu.memory_space<vmem>>, vector<1x1x1024x3xf32>
    %50 = vector.shape_cast %49 : vector<1x1x1024x3xf32> to vector<1024x3xf32>
    %c8_59 = arith.constant 8 : index
    %c0_60 = arith.constant 0 : index
    %c0_61 = arith.constant 0 : index
    %51 = vector.load %arg2[%c8_59, %c0_60, %c0_61] : memref<9x3x64xf32, #tpu.memory_space<vmem>>, vector<1x3x64xf32>
    %52 = vector.shape_cast %51 : vector<1x3x64xf32> to vector<3x64xf32>
    %cst_62 = arith.constant dense<0.000000e+00> : vector<1024x64xf32>
    %53 = tpu.matmul %50, %52, %cst_62 {dimension_numbers = #tpu.dot_dimension_numbers<[1], [0], [0], [1], [0, 0, 1, 1], [], []>} : vector<1024x3xf32>, vector<3x64xf32>, vector<1024x64xf32> -> vector<1024x64xf32>
    %54 = arith.addf %48, %53 : vector<1024x64xf32>
    %c0_63 = arith.constant 0 : index
    %c0_64 = arith.constant 0 : index
    %55 = vector.load %arg3[%c0_63, %c0_64] : memref<1x64xf32, #tpu.memory_space<vmem>>, vector<1x64xf32>
    %56 = vector.broadcast %55 : vector<1x64xf32> to vector<1024x64xf32>
    %57 = arith.addf %54, %56 : vector<1024x64xf32>
    %cst_65 = arith.constant 0.000000e+00 : f32
    %58 = vector.broadcast %cst_65 : f32 to vector<1024x64xf32>
    %59 = arith.maximumf %57, %58 : vector<1024x64xf32>
    %c0_66 = arith.constant 0 : index
    %c0_67 = arith.constant 0 : index
    %c0_68 = arith.constant 0 : index
    %60 = vector.load %arg4[%c0_66, %c0_67, %c0_68] : memref<1x1024x64xf32, #tpu.memory_space<vmem>>, vector<1x1024x64xf32>
    %61 = vector.shape_cast %60 : vector<1x1024x64xf32> to vector<1024x64xf32>
    %62 = vector.shape_cast %59 : vector<1024x64xf32> to vector<1x1024x64xf32>
    tpu.vector_store %arg4[%c0_66, %c0_67, %c0_68], %62 {strides = array<i32>} : memref<1x1024x64xf32, #tpu.memory_space<vmem>>, vector<1x1024x64xf32>,
    return
  }
  func.func @transform_0(%arg0: i32) -> (i32, i32, i32, i32) {
    %c0_i32 = arith.constant 0 : i32
    %c0_i32_0 = arith.constant 0 : i32
    %c0_i32_1 = arith.constant 0 : i32
    %c0_i32_2 = arith.constant 0 : i32
    return %arg0, %c0_i32, %c0_i32_0, %c0_i32_1 : i32, i32, i32, i32
  }
  func.func @transform_1(%arg0: i32) -> (i32, i32, i32) {
    %c0_i32 = arith.constant 0 : i32
    %c0_i32_0 = arith.constant 0 : i32
    %c0_i32_1 = arith.constant 0 : i32
    %c0_i32_2 = arith.constant 0 : i32
    return %c0_i32, %c0_i32_0, %c0_i32_1 : i32, i32, i32
  }
  func.func @transform_2(%arg0: i32) -> (i32, i32) {
    %c0_i32 = arith.constant 0 : i32
    %c0_i32_0 = arith.constant 0 : i32
    %c0_i32_1 = arith.constant 0 : i32
    return %c0_i32, %c0_i32_0 : i32, i32
  }
  func.func @transform_3(%arg0: i32) -> (i32, i32, i32) {
    %c0_i32 = arith.constant 0 : i32
    %c0_i32_0 = arith.constant 0 : i32
    %c0_i32_1 = arith.constant 0 : i32
    return %arg0, %c0_i32, %c0_i32_0 : i32, i32, i32
  }
}

</mosaic_0001>

<bundles_post_ra>
// kernel: tpu_custom_call.1
= control target key start
LH: loop header
LB: loop body
LE: loop exit
PB: predicated region body
PF: predicated region fallthrough
CT: control target
= control target key end

     0   :  { %s12031_s12 = smov 0   ;;  %s15576_s0 = inlined_call_operand.vmem [shape: f32[2,9,1024,3], index: 0, kind: input, shape index: {}]   ;;  %s15577_s1 = inlined_call_operand.vmem [shape: f32[9,3,64], index: 1, kind: input, shape index: {}]   ;;  %s15578_s2 = inlined_call_operand.vmem [shape: f32[1,64], index: 2, kind: input, shape index: {}]   ;;  %s15579_s3 = inlined_call_operand.vmem [shape: f32[2,1024,64], index: 3, kind: output, shape index: {}]  }
   0x1 LB: > { %s9782_s13 = sadd.s32 4294967295, %s12009_s12   ;;  %p9786_p0 = scmp.ge.s32.totalorder %s12009_s12, 1  ;;  %s12009_s12 = sphi %s12031_s12, %s13_s12  }
   0x2   : > { %p137_p1 = scmp.lt.s32.totalorder %s12009_s12, 3 }
   0x4   : > { %p138_p2 = pnand %p9786_p0, %p137_p1 }
   0x6   : > { %141 = sbr.rel (%p138_p2) target bundleno = 2458 (0x99a), region = 32 }
   0xb   : > { %v9918_v0 = vld [vmem:[%s15577_s1 + $0x4] sm:$0x7]  ;;  %vm816_vm0 = vcmask 1042432   ;;  %p161_p3 = scmp.lt.s32.totalorder %s9782_s13, 1  ;;  %v10305_v1 = vld [vmem:[%s15577_s1 + $0x8] sm:$0x7] }
   0xc   : > { %11986 = vmatpush.msk.msra.mxu1 %vm816_vm0, %v9918_v0  ;;  %11987 = vmatpush.msk.msra.mxu2 %vm816_vm0, %v9918_v0  ;;  %v10563_v2 = vld [vmem:[%s15577_s1 + $0xc] sm:$0x7]  ;;  %v299_v3 = vld [vmem:[%s15577_s1] sm:$0x7]  ;;  %v10821_v4 = vld [vmem:[%s15577_s1 + $0x10] sm:$0x7] }
   0xd   : > { %s15901_s13 = smov (!%p161_p3, %s9782_s13), 1  ;;  %11988 = vmatpush.msk.msra.mxu3 %vm816_vm0, %v9918_v0  ;;  %9919 = vmatpush.msk.msra.mxu0 %vm816_vm0, %v9918_v0  ;;  %vm431_vm1 = vcmask 23552   ;;  %vm9598_vm2 = vcmask 523264  }
   0xe   : > { %10306 = vmatpush.msk.msrb.mxu2 %vm816_vm0, %v10305_v1  ;;  %10048 = vmatpush.msk.msrb.mxu1 %vm816_vm0, %v299_v3  ;;  %s11989_s24 = smul.u32 9216, %s15901_s13  ;;  %s11985_s11 = sshll.u32 %s15901_s13, 10 }
   0xf   : > { %10564 = vmatpush.msk.msrb.mxu3 %vm816_vm0, %v10563_v2  ;;  %10822 = vmatpush.msk.msrb.mxu0 %vm816_vm0, %v10821_v4  ;;  %s14162_s13 = scalar_lea.vmem %s15579_s3, %s11985_s11 }
  0x10   : > { %s12068_s27 = scalar_lea.vmem %s15576_s0, %s11989_s24 }
  0x11   : > { %v9822_v5 = vld [vmem:[%s12068_s27 + $0x500] sm:$0xff]  ;;  %v9823_v9 = vld [vmem:[%s12068_s27 + $0x508] sm:$0xff]  ;;  %v9824_v13 = vld [vmem:[%s12068_s27 + $0x510] sm:$0xff] }
  0x12   : > { %v9854_v6 = vld [vmem:[%s12068_s27 + $0x600] sm:$0xff]  ;;  %9952 = vmatmul.msk.f32.vlgmr.msra.gmra.mxu1 %vm431_vm1, %v9822_v5  ;;  %v9855_v10 = vld [vmem:[%s12068_s27 + $0x608] sm:$0xff]  ;;  %v9856_v14 = vld [vmem:[%s12068_s27 + $0x610] sm:$0xff] }
  0x13   : > { %v9886_v7 = vld [vmem:[%s12068_s27 + $0x700] sm:$0xff]  ;;  %9984 = vmatmul.msk.f32.vlgmr.msra.gmra.mxu2 %vm431_vm1, %v9854_v6  ;;  %v9887_v11 = vld [vmem:[%s12068_s27 + $0x708] sm:$0xff]  ;;  %v9888_v15 = vld [vmem:[%s12068_s27 + $0x710] sm:$0xff] }
  0x14   : > { %v9790_v8 = vld [vmem:[%s12068_s27 + $0x400] sm:$0xff]  ;;  %10016 = vmatmul.msk.f32.vlgmr.msra.gmra.mxu3 %vm431_vm1, %v9886_v7  ;;  %v9791_v12 = vld [vmem:[%s12068_s27 + $0x408] sm:$0xff]  ;;  %v9792_v16 = vld [vmem:[%s12068_s27 + $0x410] sm:$0xff] }
  0x15   : > { %9920 = vmatmul.msk.f32.vlgmr.msra.gmra.mxu0 %vm431_vm1, %v9790_v8  ;;  %v9825_v17 = vld [vmem:[%s12068_s27 + $0x518] sm:$0xff]  ;;  %v9826_v21 = vld [vmem:[%s12068_s27 + $0x520] sm:$0xff]  ;;  %v9827_v25 = vld [vmem:[%s12068_s27 + $0x528] sm:$0xff] }
  0x16   : > { %v9857_v18 = vld [vmem:[%s12068_s27 + $0x618] sm:$0xff]  ;;  %v9858_v22 = vld [vmem:[%s12068_s27 + $0x620] sm:$0xff]  ;;  %v9859_v26 = vld [vmem:[%s12068_s27 + $0x628] sm:$0xff] }
  0x17   : > { %v9889_v19 = vld [vmem:[%s12068_s27 + $0x718] sm:$0xff]  ;;  %v9890_v23 = vld [vmem:[%s12068_s27 + $0x720] sm:$0xff]  ;;  %v9891_v27 = vld [vmem:[%s12068_s27 + $0x728] sm:$0xff] }
  0x18   : > { %v9793_v20 = vld [vmem:[%s12068_s27 + $0x418] sm:$0xff]  ;;  %v9794_v24 = vld [vmem:[%s12068_s27 + $0x420] sm:$0xff]  ;;  %v9795_v28 = vld [vmem:[%s12068_s27 + $0x428] sm:$0xff] }
  0x19   : > { %v9828_v29 = vld [vmem:[%s12068_s27 + $0x530] sm:$0xff]  ;;  %v9829_v33 = vld [vmem:[%s12068_s27 + $0x538] sm:$0xff]  ;;  %v9830_v37 = vld [vmem:[%s12068_s27 + $0x540] sm:$0xff] }
  0x1a   : > { %9953 = vmatmul.msk.f32.gmra.mxu1 %vm431_vm1, %v9823_v9  ;;  %v9860_v30 = vld [vmem:[%s12068_s27 + $0x630] sm:$0xff]  ;;  %v9861_v34 = vld [vmem:[%s12068_s27 + $0x638] sm:$0xff]  ;;  %v9862_v38 = vld [vmem:[%s12068_s27 + $0x640] sm:$0xff] }
  0x1b   : > { %9985 = vmatmul.msk.f32.gmra.mxu2 %vm431_vm1, %v9855_v10  ;;  %v9892_v31 = vld [vmem:[%s12068_s27 + $0x730] sm:$0xff]  ;;  %v9893_v35 = vld [vmem:[%s12068_s27 + $0x738] sm:$0xff]  ;;  %v9894_v39 = vld [vmem:[%s12068_s27 + $0x740] sm:$0xff] }
  0x1c   : > { %10017 = vmatmul.msk.f32.gmra.mxu3 %vm431_vm1, %v9887_v11  ;;  %v9796_v32 = vld [vmem:[%s12068_s27 + $0x430] sm:$0xff]  ;;  %v9797_v36 = vld [vmem:[%s12068_s27 + $0x438] sm:$0xff]  ;;  %v9798_v40 = vld [vmem:[%s12068_s27 + $0x440] sm:$0xff] }
  0x1d   : > { %9921 = vmatmul.msk.f32.gmra.mxu0 %vm431_vm1, %v9791_v12  ;;  %v9831_v41 = vld [vmem:[%s12068_s27 + $0x548] sm:$0xff]  ;;  %v9832_v45 = vld [vmem:[%s12068_s27 + $0x550] sm:$0xff]  ;;  %v9833_v49 = vld [vmem:[%s12068_s27 + $0x558] sm:$0xff] }
  0x1e   : > { %v9863_v42 = vld [vmem:[%s12068_s27 + $0x648] sm:$0xff]  ;;  %v9864_v46 = vld [vmem:[%s12068_s27 + $0x650] sm:$0xff]  ;;  %v9865_v50 = vld [vmem:[%s12068_s27 + $0x658] sm:$0xff] }
  0x1f   : > { %v9895_v43 = vld [vmem:[%s12068_s27 + $0x748] sm:$0xff]  ;;  %v9896_v47 = vld [vmem:[%s12068_s27 + $0x750] sm:$0xff]  ;;  %v9897_v51 = vld [vmem:[%s12068_s27 + $0x758] sm:$0xff] }
  0x20   : > { %v9799_v44 = vld [vmem:[%s12068_s27 + $0x448] sm:$0xff]  ;;  %v9800_v48 = vld [vmem:[%s12068_s27 + $0x450] sm:$0xff]  ;;  %v9801_v52 = vld [vmem:[%s12068_s27 + $0x458] sm:$0xff] }
  0x21   : > { %v9834_v53 = vld [vmem:[%s12068_s27 + $0x560] sm:$0xff]  ;;  %v9835_v57 = vld [vmem:[%s12068_s27 + $0x568] sm:$0xff]  ;;  %v9836_v61 = vld [vmem:[%s12068_s27 + $0x570] sm:$0xff] }
  0x22   : > { %9954 = vmatmul.msk.f32.gmra.mxu1 %vm431_vm1, %v9824_v13  ;;  %v9866_v54 = vld [vmem:[%s12068_s27 + $0x660] sm:$0xff]  ;;  %v9867_v58 = vld [vmem:[%s12068_s27 + $0x668] sm:$0xff]  ;;  %v9868_v62 = vld [vmem:[%s12068_s27 + $0x670] sm:$0xff] }
  0x23   : > { %9986 = vmatmul.msk.f32.gmra.mxu2 %vm431_vm1, %v9856_v14  ;;  %v9898_v55 = vld [vmem:[%s12068_s27 + $0x760] sm:$0xff]  ;;  %v9899_v59 = vld [vmem:[%s12068_s27 + $0x768] sm:$0xff]  ;;  %v9900_v63 = vld [vmem:[%s12068_s27 + $0x770] sm:$0xff] }
  0x24   : > { %10018 = vmatmul.msk.f32.gmra.mxu3 %vm431_vm1, %v9888_v15  ;;  %v9802_v56 = vld [vmem:[%s12068_s27 + $0x460] sm:$0xff]  ;;  %v9803_v60 = vld [vmem:[%s12068_s27 + $0x468] sm:$0xff]  ;;  %v9804_v0 = vld [vmem:[%s12068_s27 + $0x470] sm:$0xff] }
  0x25   : > { %9922 = vmatmul.msk.f32.gmra.mxu0 %vm431_vm1, %v9792_v16  ;;  %v9837_v1 = vld [vmem:[%s12068_s27 + $0x578] sm:$0xff]  ;;  %v9838_v6 = vld [vmem:[%s12068_s27 + $0x580] sm:$0xff]  ;;  %v9839_v14 = vld [vmem:[%s12068_s27 + $0x588] sm:$0xff] }
  0x26   : > { %v9869_v2 = vld [vmem:[%s12068_s27 + $0x678] sm:$0xff]  ;;  %v9870_v7 = vld [vmem:[%s12068_s27 + $0x680] sm:$0xff]  ;;  %v9871_v15 = vld [vmem:[%s12068_s27 + $0x688] sm:$0xff] }
  0x27   : > { %v9901_v3 = vld [vmem:[%s12068_s27 + $0x778] sm:$0xff]  ;;  %v9902_v8 = vld [vmem:[%s12068_s27 + $0x780] sm:$0xff]  ;;  %v9903_v16 = vld [vmem:[%s12068_s27 + $0x788] sm:$0xff] }
  0x28   : > { %v9805_v4 = vld [vmem:[%s12068_s27 + $0x478] sm:$0xff]  ;;  %v9806_v10 = vld [vmem:[%s12068_s27 + $0x480] sm:$0xff] }
  0x2a   : > { %9955 = vmatmul.msk.f32.gmra.mxu1 %vm431_vm1, %v9825_v17 }
  0x2b   : > { %9987 = vmatmul.msk.f32.gmra.mxu2 %vm431_vm1, %v9857_v18  ;;  %v9807_v18 = vld [vmem:[%s12068_s27 + $0x488] sm:$0xff] }
  0x2c   : > { %10019 = vmatmul.msk.f32.gmra.mxu3 %vm431_vm1, %v9889_v19 }
  0x2d   : > { %9923 = vmatmul.msk.f32.gmra.mxu0 %vm431_vm1, %v9793_v20 }
  0x32   : > { %9956 = vmatmul.msk.f32.gmra.mxu1 %vm431_vm1, %v9826_v21 }
  0x33   : > { %9988 = vmatmul.msk.f32.gmra.mxu2 %vm431_vm1, %v9858_v22  ;;  %v9840_v22 = vld [vmem:[%s12068_s27 + $0x590] sm:$0xff] }
  0x34   : > { %10020 = vmatmul.msk.f32.gmra.mxu3 %vm431_vm1, %v9890_v23  ;;  %v9872_v23 = vld [vmem:[%s12068_s27 + $0x690] sm:$0xff] }
  0x35   : > { %9924 = vmatmul.msk.f32.gmra.mxu0 %vm431_vm1, %v9794_v24  ;;  %v9904_v24 = vld [vmem:[%s12068_s27 + $0x790] sm:$0xff] }
  0x3a   : > { %9957 = vmatmul.msk.f32.gmra.mxu1 %vm431_vm1, %v9827_v25 }
  0x3b   : > { %9989 = vmatmul.msk.f32.gmra.mxu2 %vm431_vm1, %v9859_v26  ;;  %v9808_v26 = vld [vmem:[%s12068_s27 + $0x490] sm:$0xff] }
  0x3c   : > { %10021 = vmatmul.msk.f32.gmra.mxu3 %vm431_vm1, %v9891_v27 }
  0x3d   : > { %9925 = vmatmul.msk.f32.gmra.mxu0 %vm431_vm1, %v9795_v28 }
  0x42   : > { %9958 = vmatmul.msk.f32.gmra.mxu1 %vm431_vm1, %v9828_v29 }
  0x43   : > { %9990 = vmatmul.msk.f32.gmra.mxu2 %vm431_vm1, %v9860_v30  ;;  %v9841_v30 = vld [vmem:[%s12068_s27 + $0x598] sm:$0xff] }
  0x44   : > { %10022 = vmatmul.msk.f32.gmra.mxu3 %vm431_vm1, %v9892_v31  ;;  %v9873_v31 = vld [vmem:[%s12068_s27 + $0x698] sm:$0xff] }
  0x45   : > { %9926 = vmatmul.msk.f32.gmra.mxu0 %vm431_vm1, %v9796_v32  ;;  %v9905_v32 = vld [vmem:[%s12068_s27 + $0x798] sm:$0xff] }
  0x4a   : > { %9959 = vmatmul.msk.f32.gmra.mxu1 %vm431_vm1, %v9829_v33 }
  0x4b   : > { %9991 = vmatmul.msk.f32.gmra.mxu2 %vm431_vm1, %v9861_v34  ;;  %v9809_v34 = vld [vmem:[%s12068_s27 + $0x498] sm:$0xff] }
  0x4c   : > { %10023 = vmatmul.msk.f32.gmra.mxu3 %vm431_vm1, %v9893_v35 }
  0x4d   : > { %9927 = vmatmul.msk.f32.gmra.mxu0 %vm431_vm1, %v9797_v36 }
  0x52   : > { %9960 = vmatmul.msk.f32.gmra.mxu1 %vm431_vm1, %v9830_v37 }
  0x53   : > { %9992 = vmatmul.msk.f32.gmra.mxu2 %vm431_vm1, %v9862_v38  ;;  %v9842_v38 = vld [vmem:[%s12068_s27 + $0x5a0] sm:$0xff] }
  0x54   : > { %10024 = vmatmul.msk.f32.gmra.mxu3 %vm431_vm1, %v9894_v39  ;;  %v9874_v39 = vld [vmem:[%s12068_s27 + $0x6a0] sm:$0xff] }
  0x55   : > { %9928 = vmatmul.msk.f32.gmra.mxu0 %vm431_vm1, %v9798_v40  ;;  %v9906_v40 = vld [vmem:[%s12068_s27 + $0x7a0] sm:$0xff] }
  0x5a   : > { %9961 = vmatmul.msk.f32.gmra.mxu1 %vm431_vm1, %v9831_v41 }
  0x5b   : > { %9993 = vmatmul.msk.f32.gmra.mxu2 %vm431_vm1, %v9863_v42  ;;  %v9810_v42 = vld [vmem:[%s12068_s27 + $0x4a0] sm:$0xff] }
  0x5c   : > { %10025 = vmatmul.msk.f32.gmra.mxu3 %vm431_vm1, %v9895_v43 }
  0x5d   : > { %9929 = vmatmul.msk.f32.gmra.mxu0 %vm431_vm1, %v9799_v44 }
  0x62   : > { %9962 = vmatmul.msk.f32.gmra.mxu1 %vm431_vm1, %v9832_v45 }
  0x63   : > { %9994 = vmatmul.msk.f32.gmra.mxu2 %vm431_vm1, %v9864_v46  ;;  %v9843_v46 = vld [vmem:[%s12068_s27 + $0x5a8] sm:$0xff] }
  0x64   : > { %10026 = vmatmul.msk.f32.gmra.mxu3 %vm431_vm1, %v9896_v47  ;;  %v9875_v47 = vld [vmem:[%s12068_s27 + $0x6a8] sm:$0xff] }
  0x65   : > { %9930 = vmatmul.msk.f32.gmra.mxu0 %vm431_vm1, %v9800_v48  ;;  %v9907_v48 = vld [vmem:[%s12068_s27 + $0x7a8] sm:$0xff] }
  0x6a   : > { %9963 = vmatmul.msk.f32.gmra.mxu1 %vm431_vm1, %v9833_v49 }
  0x6b   : > { %9995 = vmatmul.msk.f32.gmra.mxu2 %vm431_vm1, %v9865_v50  ;;  %v9811_v50 = vld [vmem:[%s12068_s27 + $0x4a8] sm:$0xff] }
  0x6c   : > { %10027 = vmatmul.msk.f32.gmra.mxu3 %vm431_vm1, %v9897_v51 }
  0x6d   : > { %9931 = vmatmul.msk.f32.gmra.mxu0 %vm431_vm1, %v9801_v52 }
  0x72   : > { %9964 = vmatmul.msk.f32.gmra.mxu1 %vm431_vm1, %v9834_v53 }
  0x73   : > { %9996 = vmatmul.msk.f32.gmra.mxu2 %vm431_vm1, %v9866_v54  ;;  %v9844_v54 = vld [vmem:[%s12068_s27 + $0x5b0] sm:$0xff] }
  0x74   : > { %10028 = vmatmul.msk.f32.gmra.mxu3 %vm431_vm1, %v9898_v55  ;;  %v9876_v55 = vld [vmem:[%s12068_s27 + $0x6b0] sm:$0xff] }
  0x75   : > { %9932 = vmatmul.msk.f32.gmra.mxu0 %vm431_vm1, %v9802_v56  ;;  %v9908_v56 = vld [vmem:[%s12068_s27 + $0x7b0] sm:$0xff] }
  0x7a   : > { %9965 = vmatmul.msk.f32.gmra.mxu1 %vm431_vm1, %v9835_v57 }
  0x7b   : > { %9997 = vmatmul.msk.f32.gmra.mxu2 %vm431_vm1, %v9867_v58  ;;  %v9812_v58 = vld [vmem:[%s12068_s27 + $0x4b0] sm:$0xff] }
  0x7c   : > { %10029 = vmatmul.msk.f32.gmra.mxu3 %vm431_vm1, %v9899_v59 }
  0x7d   : > { %9933 = vmatmul.msk.f32.gmra.mxu0 %vm431_vm1, %v9803_v60 }
  0x82   : > { %9966 = vmatmul.msk.f32.gmra.mxu1 %vm431_vm1, %v9836_v61 }
  0x83   : > { %9998 = vmatmul.msk.f32.gmra.mxu2 %vm431_vm1, %v9868_v62  ;;  %v9845_v62 = vld [vmem:[%s12068_s27 + $0x5b8] sm:$0xff] }
  0x84   : > { %10030 = vmatmul.msk.f32.gmra.mxu3 %vm431_vm1, %v9900_v63  ;;  %v9877_v63 = vld [vmem:[%s12068_s27 + $0x6b8] sm:$0xff] }
  0x85   : > { %9934 = vmatmul.msk.f32.gmra.mxu0 %vm431_vm1, %v9804_v0  ;;  %v9909_v0 = vld [vmem:[%s12068_s27 + $0x7b8] sm:$0xff] }
  0x8a   : > { %9967 = vmatmul.msk.f32.gmra.mxu1 %vm431_vm1, %v9837_v1 }
  0x8b   : > { %9999 = vmatmul.msk.f32.gmra.mxu2 %vm431_vm1, %v9869_v2  ;;  %v9813_v2 = vld [vmem:[%s12068_s27 + $0x4b8] sm:$0xff] }
  0x8c   : > { %10031 = vmatmul.msk.f32.gmra.mxu3 %vm431_vm1, %v9901_v3 }
  0x8d   : > { %9935 = vmatmul.msk.f32.gmra.mxu0 %vm431_vm1, %v9805_v4 }
  0x8f   : > { %v12198_v5 = vpop.f32.mrf.mxu1 }
  0x92   : > { %v12203_v9 = vpop.f32.mrf.mxu0  ;;  %9968 = vmatmul.msk.f32.gmra.mxu1 %vm431_vm1, %v9838_v6 }
  0x93   : > { %10000 = vmatmul.msk.f32.gmra.mxu2 %vm431_vm1, %v9870_v7  ;;  %v9846_v7 = vld [vmem:[%s12068_s27 + $0x5c0] sm:$0xff] }
  0x94   : > { %10032 = vmatmul.msk.f32.gmra.mxu3 %vm431_vm1, %v9902_v8  ;;  %v9878_v8 = vld [vmem:[%s12068_s27 + $0x6c0] sm:$0xff] }
  0x95   : > { %9936 = vmatmul.msk.f32.gmra.mxu0 %vm431_vm1, %v9806_v10  ;;  %v9910_v10 = vld [vmem:[%s12068_s27 + $0x7c0] sm:$0xff] }
  0x96   : > { %v12210_v11 = vpop.f32.mrf.mxu2 }
  0x97   : > { %15580 = vst [vmem:[#allocation2_spill] sm:$0xff] %v12210_v11  ;;  %v12212_v12 = vpop.f32.mrf.mxu3  ;;  %v12214_v13 = vpop.f32.mrf.mxu1  ;;  %v10446_v11 = vld [vmem:[%s12068_s27 + $0xc58] sm:$0xff] }
  0x98   : > { %15581 = vst [vmem:[#allocation3_spill] sm:$0xff] %v12212_v12  ;;  %v174_v12 = vld [vmem:[%s12068_s27 + $0x18] sm:$0xff] }
  0x9a   : > { %v12219_v17 = vpop.f32.mrf.mxu0  ;;  %9969 = vmatmul.msk.f32.gmra.mxu1 %vm431_vm1, %v9839_v14 }
  0x9b   : > { %10001 = vmatmul.msk.f32.gmra.mxu2 %vm431_vm1, %v9871_v15  ;;  %v9814_v15 = vld [vmem:[%s12068_s27 + $0x4c0] sm:$0xff] }
  0x9c   : > { %10033 = vmatmul.msk.f32.gmra.mxu3 %vm431_vm1, %v9903_v16 }
  0x9d   : > { %9937 = vmatmul.msk.f32.gmra.mxu0 %vm431_vm1, %v9807_v18 }
  0x9e   : > { %v12226_v19 = vpop.f32.mrf.mxu2 }
  0x9f   : > { %15582 = vst [vmem:[#allocation4_spill] sm:$0xff] %v12226_v19  ;;  %v12228_v20 = vpop.f32.mrf.mxu3  ;;  %v12230_v21 = vpop.f32.mrf.mxu1  ;;  %v10188_v19 = vld [vmem:[%s12068_s27 + $0x858] sm:$0xff] }
  0xa0   : > { %15583 = vst [vmem:[#allocation5_spill] sm:$0xff] %v12228_v20  ;;  %v10437_v20 = vld [vmem:[%s12068_s27 + $0xc10] sm:$0xff] }
  0xa2   : > { %v12235_v25 = vpop.f32.mrf.mxu0  ;;  %9970 = vmatmul.msk.f32.gmra.mxu1 %vm431_vm1, %v9840_v22 }
  0xa3   : > { %10002 = vmatmul.msk.f32.gmra.mxu2 %vm431_vm1, %v9872_v23  ;;  %v9847_v23 = vld [vmem:[%s12068_s27 + $0x5c8] sm:$0xff] }
  0xa4   : > { %10034 = vmatmul.msk.f32.gmra.mxu3 %vm431_vm1, %v9904_v24  ;;  %v9879_v24 = vld [vmem:[%s12068_s27 + $0x6c8] sm:$0xff] }
  0xa5   : > { %9938 = vmatmul.msk.f32.gmra.mxu0 %vm431_vm1, %v9808_v26  ;;  %v9911_v26 = vld [vmem:[%s12068_s27 + $0x7c8] sm:$0xff] }
  0xa6   : > { %v12242_v27 = vpop.f32.mrf.mxu2 }
  0xa7   : > { %15584 = vst [vmem:[#allocation6_spill] sm:$0xff] %v12242_v27  ;;  %v12244_v28 = vpop.f32.mrf.mxu3  ;;  %v12246_v29 = vpop.f32.mrf.mxu1  ;;  %v10445_v27 = vld [vmem:[%s12068_s27 + $0xc50] sm:$0xff] }
  0xa8   : > { %15585 = vst [vmem:[#allocation7_spill] sm:$0xff] %v12244_v28  ;;  %v10179_v28 = vld [vmem:[%s12068_s27 + $0x810] sm:$0xff] }
  0xaa   : > { %v12251_v33 = vpop.f32.mrf.mxu0  ;;  %9971 = vmatmul.msk.f32.gmra.mxu1 %vm431_vm1, %v9841_v30 }
  0xab   : > { %10003 = vmatmul.msk.f32.gmra.mxu2 %vm431_vm1, %v9873_v31  ;;  %v9815_v31 = vld [vmem:[%s12068_s27 + $0x4c8] sm:$0xff] }
  0xac   : > { %10035 = vmatmul.msk.f32.gmra.mxu3 %vm431_vm1, %v9905_v32 }
  0xad   : > { %9939 = vmatmul.msk.f32.gmra.mxu0 %vm431_vm1, %v9809_v34 }
  0xae   : > { %v12258_v35 = vpop.f32.mrf.mxu2 }
  0xaf   : > { %15586 = vst [vmem:[#allocation8_spill] sm:$0xff] %v12258_v35  ;;  %v12260_v36 = vpop.f32.mrf.mxu3  ;;  %v12262_v37 = vpop.f32.mrf.mxu1  ;;  %v10187_v35 = vld [vmem:[%s12068_s27 + $0x850] sm:$0xff] }
  0xb0   : > { %15587 = vst [vmem:[#allocation9_spill] sm:$0xff] %v12260_v36  ;;  %v173_v36 = vld [vmem:[%s12068_s27 + $0x10] sm:$0xff] }
  0xb2   : > { %v12267_v41 = vpop.f32.mrf.mxu0  ;;  %9972 = vmatmul.msk.f32.gmra.mxu1 %vm431_vm1, %v9842_v38 }
  0xb3   : > { %10004 = vmatmul.msk.f32.gmra.mxu2 %vm431_vm1, %v9874_v39  ;;  %v9848_v39 = vld [vmem:[%s12068_s27 + $0x5d0] sm:$0xff] }
  0xb4   : > { %10036 = vmatmul.msk.f32.gmra.mxu3 %vm431_vm1, %v9906_v40  ;;  %v9880_v40 = vld [vmem:[%s12068_s27 + $0x6d0] sm:$0xff] }
  0xb5   : > { %9940 = vmatmul.msk.f32.gmra.mxu0 %vm431_vm1, %v9810_v42  ;;  %v9912_v42 = vld [vmem:[%s12068_s27 + $0x7d0] sm:$0xff] }
  0xb6   : > { %v12274_v43 = vpop.f32.mrf.mxu2 }
  0xb7   : > { %15588 = vst [vmem:[#allocation10_spill] sm:$0xff] %v12274_v43  ;;  %v12276_v44 = vpop.f32.mrf.mxu3  ;;  %v12278_v45 = vpop.f32.mrf.mxu1  ;;  %v10444_v43 = vld [vmem:[%s12068_s27 + $0xc48] sm:$0xff] }
  0xb8   : > { %15589 = vst [vmem:[#allocation11_spill] sm:$0xff] %v12276_v44  ;;  %v10436_v44 = vld [vmem:[%s12068_s27 + $0xc08] sm:$0xff] }
  0xba   : > { %v12283_v49 = vpop.f32.mrf.mxu0  ;;  %9973 = vmatmul.msk.f32.gmra.mxu1 %vm431_vm1, %v9843_v46 }
  0xbb   : > { %10005 = vmatmul.msk.f32.gmra.mxu2 %vm431_vm1, %v9875_v47  ;;  %v9816_v47 = vld [vmem:[%s12068_s27 + $0x4d0] sm:$0xff] }
  0xbc   : > { %10037 = vmatmul.msk.f32.gmra.mxu3 %vm431_vm1, %v9907_v48 }
  0xbd   : > { %9941 = vmatmul.msk.f32.gmra.mxu0 %vm431_vm1, %v9811_v50 }
  0xbe   : > { %v12290_v51 = vpop.f32.mrf.mxu2 }
  0xbf   : > { %15590 = vst [vmem:[#allocation12_spill] sm:$0xff] %v12290_v51  ;;  %v12292_v52 = vpop.f32.mrf.mxu3  ;;  %v12294_v53 = vpop.f32.mrf.mxu1  ;;  %v10186_v51 = vld [vmem:[%s12068_s27 + $0x848] sm:$0xff] }
  0xc0   : > { %15591 = vst [vmem:[#allocation13_spill] sm:$0xff] %v12292_v52  ;;  %v10178_v52 = vld [vmem:[%s12068_s27 + $0x808] sm:$0xff] }
  0xc2   : > { %v12299_v57 = vpop.f32.mrf.mxu0  ;;  %9974 = vmatmul.msk.f32.gmra.mxu1 %vm431_vm1, %v9844_v54 }
  0xc3   : > { %10006 = vmatmul.msk.f32.gmra.mxu2 %vm431_vm1, %v9876_v55  ;;  %v9849_v55 = vld [vmem:[%s12068_s27 + $0x5d8] sm:$0xff] }
  0xc4   : > { %10038 = vmatmul.msk.f32.gmra.mxu3 %vm431_vm1, %v9908_v56  ;;  %v9881_v56 = vld [vmem:[%s12068_s27 + $0x6d8] sm:$0xff] }
  0xc5   : > { %9942 = vmatmul.msk.f32.gmra.mxu0 %vm431_vm1, %v9812_v58  ;;  %v9913_v58 = vld [vmem:[%s12068_s27 + $0x7d8] sm:$0xff] }
  0xc6   : > { %v12306_v59 = vpop.f32.mrf.mxu2 }
  0xc7   : > { %15592 = vst [vmem:[#allocation14_spill] sm:$0xff] %v12306_v59  ;;  %v12308_v60 = vpop.f32.mrf.mxu3  ;;  %v12310_v61 = vpop.f32.mrf.mxu1  ;;  %v10443_v59 = vld [vmem:[%s12068_s27 + $0xc40] sm:$0xff] }
  0xc8   : > { %15593 = vst [vmem:[#allocation15_spill] sm:$0xff] %v12308_v60  ;;  %v172_v60 = vld [vmem:[%s12068_s27 + $0x8] sm:$0xff] }
  0xca   : > { %v12315_v1 = vpop.f32.mrf.mxu0  ;;  %9975 = vmatmul.msk.f32.gmra.mxu1 %vm431_vm1, %v9845_v62 }
  0xcb   : > { %10007 = vmatmul.msk.f32.gmra.mxu2 %vm431_vm1, %v9877_v63  ;;  %v9817_v63 = vld [vmem:[%s12068_s27 + $0x4d8] sm:$0xff] }
  0xcc   : > { %10039 = vmatmul.msk.f32.gmra.mxu3 %vm431_vm1, %v9909_v0 }
  0xcd   : > { %9943 = vmatmul.msk.f32.gmra.mxu0 %vm431_vm1, %v9813_v2 }
  0xce   : > { %v12322_v3 = vpop.f32.mrf.mxu2 }
  0xcf   : > { %15594 = vst [vmem:[#allocation16_spill] sm:$0xff] %v12322_v3  ;;  %v12324_v4 = vpop.f32.mrf.mxu3  ;;  %v12326_v6 = vpop.f32.mrf.mxu1  ;;  %v10185_v3 = vld [vmem:[%s12068_s27 + $0x840] sm:$0xff] }
  0xd0   : > { %15595 = vst [vmem:[#allocation17_spill] sm:$0xff] %v12324_v4  ;;  %v10435_v4 = vld [vmem:[%s12068_s27 + $0xc00] sm:$0xff] }
  0xd2   : > { %v12331_v14 = vpop.f32.mrf.mxu0  ;;  %9976 = vmatmul.msk.f32.gmra.mxu1 %vm431_vm1, %v9846_v7 }
  0xd3   : > { %10008 = vmatmul.msk.f32.gmra.mxu2 %vm431_vm1, %v9878_v8  ;;  %v9850_v8 = vld [vmem:[%s12068_s27 + $0x5e0] sm:$0xff] }
  0xd4   : > { %10040 = vmatmul.msk.f32.gmra.mxu3 %vm431_vm1, %v9910_v10  ;;  %v9882_v10 = vld [vmem:[%s12068_s27 + $0x6e0] sm:$0xff] }
  0xd5   : > { %9944 = vmatmul.msk.f32.gmra.mxu0 %vm431_vm1, %v9814_v15  ;;  %v9914_v15 = vld [vmem:[%s12068_s27 + $0x7e0] sm:$0xff] }
  0xd6   : > { %v12338_v16 = vpop.f32.mrf.mxu2 }
  0xd7   : > { %15596 = vst [vmem:[#allocation18_spill] sm:$0xff] %v12338_v16  ;;  %v12340_v18 = vpop.f32.mrf.mxu3  ;;  %v12342_v22 = vpop.f32.mrf.mxu1  ;;  %v10442_v16 = vld [vmem:[%s12068_s27 + $0xc38] sm:$0xff] }
  0xd8   : > { %15597 = vst [vmem:[#allocation19_spill] sm:$0xff] %v12340_v18  ;;  %v10177_v18 = vld [vmem:[%s12068_s27 + $0x800] sm:$0xff] }
  0xda   : > { %v12347_v30 = vpop.f32.mrf.mxu0  ;;  %9977 = vmatmul.msk.f32.gmra.mxu1 %vm431_vm1, %v9847_v23 }
  0xdb   : > { %10009 = vmatmul.msk.f32.gmra.mxu2 %vm431_vm1, %v9879_v24  ;;  %v9818_v24 = vld [vmem:[%s12068_s27 + $0x4e0] sm:$0xff] }
  0xdc   : > { %10041 = vmatmul.msk.f32.gmra.mxu3 %vm431_vm1, %v9911_v26  ;;  %v11337_v26 = vld [vmem:[%s15577_s1 + $0x18] sm:$0x7] }
  0xdd   : > { %9945 = vmatmul.msk.f32.gmra.mxu0 %vm431_vm1, %v9815_v31  ;;  %v11595_v31 = vld [vmem:[%s15577_s1 + $0x1c] sm:$0x7]  ;;  %11338 = vmatpush.msk.msra.mxu2 %vm816_vm0, %v11337_v26 }
  0xde   : > { %v12354_v32 = vpop.f32.mrf.mxu2  ;;  %11596 = vmatpush.msk.msra.mxu3 %vm816_vm0, %v11595_v31  ;;  %v9852_v31 = vld [vmem:[%s12068_s27 + $0x5f0] sm:$0xff] }
  0xdf   : > { %15598 = vst [vmem:[#allocation20_spill] sm:$0xff] %v12354_v32  ;;  %v12356_v34 = vpop.f32.mrf.mxu3  ;;  %v12358_v38 = vpop.f32.mrf.mxu1  ;;  %v10184_v32 = vld [vmem:[%s12068_s27 + $0x838] sm:$0xff] }
  0xe0   : > { %15599 = vst [vmem:[#allocation21_spill] sm:$0xff] %v12356_v34  ;;  %v171_v34 = vld [vmem:[%s12068_s27] sm:$0xff] }
  0xe2   : > { %v12363_v46 = vpop.f32.mrf.mxu0  ;;  %9978 = vmatmul.msk.f32.gmra.mxu1 %vm431_vm1, %v9848_v39 }
  0xe3   : > { %10010 = vmatmul.msk.f32.gmra.mxu2 %vm431_vm1, %v9880_v40  ;;  %v11079_v40 = vld [vmem:[%s15577_s1 + $0x14] sm:$0x7] }
  0xe4   : > { %10042 = vmatmul.msk.f32.gmra.mxu3 %vm431_vm1, %v9912_v42  ;;  %11080 = vmatpush.msk.msra.mxu1 %vm816_vm0, %v11079_v40  ;;  %v9884_v40 = vld [vmem:[%s12068_s27 + $0x6f0] sm:$0xff] }
  0xe5   : > { %9946 = vmatmul.msk.f32.gmra.mxu0 %vm431_vm1, %v9816_v47 }
  0xe6   : > { %v12370_v48 = vpop.f32.mrf.mxu2 }
  0xe7   : > { %15600 = vst [vmem:[#allocation22_spill] sm:$0xff] %v12370_v48  ;;  %v12372_v50 = vpop.f32.mrf.mxu3  ;;  %v12374_v54 = vpop.f32.mrf.mxu1  ;;  %v10441_v48 = vld [vmem:[%s12068_s27 + $0xc30] sm:$0xff] }
  0xe8   : > { %15601 = vst [vmem:[#allocation23_spill] sm:$0xff] %v12372_v50  ;;  %v9917_v50 = vld [vmem:[%s12068_s27 + $0x7f8] sm:$0xff] }
  0xea   : > { %v12379_v62 = vpop.f32.mrf.mxu0  ;;  %9979 = vmatmul.msk.f32.gmra.mxu1 %vm431_vm1, %v9849_v55  ;;  %v9851_v55 = vld [vmem:[%s12068_s27 + $0x5e8] sm:$0xff] }
  0xeb   : > { %10011 = vmatmul.msk.f32.gmra.mxu2 %vm431_vm1, %v9881_v56  ;;  %v9883_v56 = vld [vmem:[%s12068_s27 + $0x6e8] sm:$0xff] }
  0xec   : > { %10043 = vmatmul.msk.f32.gmra.mxu3 %vm431_vm1, %v9913_v58  ;;  %v9915_v58 = vld [vmem:[%s12068_s27 + $0x7e8] sm:$0xff] }
  0xed   : > { %9947 = vmatmul.msk.f32.gmra.mxu0 %vm431_vm1, %v9817_v63 }
  0xee   : > { %v12386_v0 = vpop.f32.mrf.mxu2 }
  0xef   : > { %15602 = vst [vmem:[#allocation24_spill] sm:$0xff] %v12386_v0  ;;  %v12388_v2 = vpop.f32.mrf.mxu3  ;;  %v12390_v7 = vpop.f32.mrf.mxu1  ;;  %v10183_v0 = vld [vmem:[%s12068_s27 + $0x830] sm:$0xff] }
  0xf0   : > { %15603 = vst [vmem:[#allocation25_spill] sm:$0xff] %v12388_v2  ;;  %v9885_v2 = vld [vmem:[%s12068_s27 + $0x6f8] sm:$0xff] }
  0xf2   : > { %v12395_v23 = vpop.f32.mrf.mxu0  ;;  %9980 = vmatmul.msk.f32.gmra.mxu1 %vm431_vm1, %v9850_v8  ;;  %v9819_v8 = vld [vmem:[%s12068_s27 + $0x4e8] sm:$0xff] }
  0xf3   : > { %10012 = vmatmul.msk.f32.gmra.mxu2 %vm431_vm1, %v9882_v10  ;;  %v11853_v10 = vld [vmem:[%s15577_s1 + $0x20] sm:$0x7] }
  0xf4   : > { %10044 = vmatmul.msk.f32.gmra.mxu3 %vm431_vm1, %v9914_v15  ;;  %11854 = vmatpush.msk.msra.mxu0 %vm816_vm0, %v11853_v10 }
  0xf5   : > { %9948 = vmatmul.msk.f32.gmra.mxu0 %vm431_vm1, %v9818_v24 }
  0xf6   : > { %v12410_v39 = vpop.f32.mrf.mxu2 }
  0xf7   : > { %15604 = vst [vmem:[#allocation26_spill] sm:$0xff] %v12410_v39  ;;  %v12415_v42 = vpop.f32.mrf.mxu3  ;;  %v12418_v47 = vpop.f32.mrf.mxu1  ;;  %v10440_v39 = vld [vmem:[%s12068_s27 + $0xc28] sm:$0xff] }
  0xf8   : > { %15605 = vst [vmem:[#allocation27_spill] sm:$0xff] %v12415_v42  ;;  %v9853_v42 = vld [vmem:[%s12068_s27 + $0x5f8] sm:$0xff] }
  0xfa   : > { %v12423_v63 = vpop.f32.mrf.mxu0  ;;  %9981 = vmatmul.msk.f32.gmra.mxu1 %vm431_vm1, %v9851_v55  ;;  %v9916_v55 = vld [vmem:[%s12068_s27 + $0x7f0] sm:$0xff] }
  0xfb   : > { %10013 = vmatmul.msk.f32.gmra.mxu2 %vm431_vm1, %v9883_v56 }
  0xfc   : > { %10045 = vmatmul.msk.f32.gmra.mxu3 %vm431_vm1, %v9915_v58  ;;  %v9820_v58 = vld [vmem:[%s12068_s27 + $0x4f0] sm:$0xff] }
  0xfd   : > { %9949 = vmatmul.msk.f32.gmra.mxu0 %vm431_vm1, %v9819_v8 }
  0xfe   : > { %v12434_v15 = vpop.f32.mrf.mxu2 }
  0xff   : > { %15606 = vst [vmem:[#allocation28_spill] sm:$0xff] %v12434_v15  ;;  %v12436_v24 = vpop.f32.mrf.mxu3  ;;  %v12438_v26 = vpop.f32.mrf.mxu1  ;;  %v10182_v15 = vld [vmem:[%s12068_s27 + $0x828] sm:$0xff] }
 0x100   : > { %15607 = vst [vmem:[#allocation29_spill] sm:$0xff] %v12436_v24 }
 0x102   : > { %v12443_v56 = vpop.f32.mrf.mxu0  ;;  %9982 = vmatmul.msk.f32.gmra.mxu1 %vm431_vm1, %v9852_v31 }
 0x103   : > { %10014 = vmatmul.msk.f32.gmra.mxu2 %vm431_vm1, %v9884_v40  ;;  %v9821_v40 = vld [vmem:[%s12068_s27 + $0x4f8] sm:$0xff] }
 0x104   : > { %10046 = vmatmul.msk.f32.gmra.mxu3 %vm431_vm1, %v9916_v55 }
 0x105   : > { %9950 = vmatmul.msk.f32.gmra.mxu0 %vm431_vm1, %v9820_v58 }
 0x106   : > { %v12450_v8 = vpop.f32.mrf.mxu2 }
 0x107   : > { %15608 = vst [vmem:[#allocation30_spill] sm:$0xff] %v12450_v8  ;;  %v12452_v10 = vpop.f32.mrf.mxu3  ;;  %v12454_v24 = vpop.f32.mrf.mxu1  ;;  %v10439_v8 = vld [vmem:[%s12068_s27 + $0xc20] sm:$0xff] }
 0x108   : > { %15609 = vst [vmem:[#allocation31_spill] sm:$0xff] %v12452_v10 }
 0x10a   : > { %v12459_v31 = vpop.f32.mrf.mxu0  ;;  %9983 = vmatmul.msk.f32.gmra.mxu1 %vm431_vm1, %v9853_v42 }
 0x10b   : > { %10015 = vmatmul.msk.f32.gmra.mxu2 %vm431_vm1, %v9885_v2  ;;  %v10693_v2 = vld [vmem:[%s12068_s27 + $0x1000] sm:$0xff] }
 0x10c   : > { %10047 = vmatmul.msk.f32.gmra.mxu3 %vm431_vm1, %v9917_v50 }
 0x10d   : > { %9951 = vmatmul.msk.f32.gmra.mxu0 %vm431_vm1, %v9821_v40 }
 0x10e   : > { %v12466_v55 = vpop.f32.mrf.mxu2 }
 0x10f   : > { %15610 = vst [vmem:[#allocation32_spill] sm:$0xff] %v12466_v55  ;;  %v12468_v58 = vpop.f32.mrf.mxu3  ;;  %v12470_v10 = vpop.f32.mrf.mxu1  ;;  %v10181_v55 = vld [vmem:[%s12068_s27 + $0x820] sm:$0xff] }
 0x110   : > { %15611 = vst [vmem:[#allocation33_spill] sm:$0xff] %v12468_v58 }
 0x111   : > { %15612 = vst [vmem:[#allocation34_spill] sm:$0xff] %v12470_v10  ;;  %v10710_v10 = vld [vmem:[%s12068_s27 + $0x1088] sm:$0xff] }
 0x112   : > { %v12475_v42 = vpop.f32.mrf.mxu0  ;;  %10049 = vmatmul.msk.f32.vlgmr.msrb.gmra.mxu1 %vm431_vm1, %v171_v34 }
 0x113   : > { %10307 = vmatmul.msk.f32.vlgmr.msrb.gmra.mxu2 %vm431_vm1, %v10177_v18  ;;  %v10694_v18 = vld [vmem:[%s12068_s27 + $0x1008] sm:$0xff] }
 0x114   : > { %10565 = vmatmul.msk.f32.vlgmr.msrb.gmra.mxu3 %vm431_vm1, %v10435_v4 }
 0x115   : > { %10823 = vmatmul.msk.f32.vlgmr.msrb.gmra.mxu0 %vm431_vm1, %v10693_v2 }
 0x116   : > { %v12482_v50 = vpop.f32.mrf.mxu2 }
 0x117   : > { %15613 = vst [vmem:[#allocation35_spill] sm:$0xff] %v12482_v50  ;;  %v12484_v40 = vpop.f32.mrf.mxu3  ;;  %v12486_v58 = vpop.f32.mrf.mxu1  ;;  %v10438_v50 = vld [vmem:[%s12068_s27 + $0xc18] sm:$0xff] }
 0x118   : > { %15614 = vst [vmem:[#allocation36_spill] sm:$0xff] %v12484_v40 }
 0x119   : > { %15615 = vst [vmem:[#allocation37_spill] sm:$0xff] %v12486_v58  ;;  %v10452_v58 = vld [vmem:[%s12068_s27 + $0xc88] sm:$0xff] }
 0x11a   : > { %v12491_v34 = vpop.f32.mrf.mxu0  ;;  %10050 = vmatmul.msk.f32.gmra.mxu1 %vm431_vm1, %v172_v60 }
 0x11b   : > { %10308 = vmatmul.msk.f32.gmra.mxu2 %vm431_vm1, %v10178_v52  ;;  %v10695_v52 = vld [vmem:[%s12068_s27 + $0x1010] sm:$0xff] }
 0x11c   : > { %10566 = vmatmul.msk.f32.gmra.mxu3 %vm431_vm1, %v10436_v44 }
 0x11d   : > { %10824 = vmatmul.msk.f32.gmra.mxu0 %vm431_vm1, %v10694_v18 }
 0x11e   : > { %v12498_v4 = vpop.f32.mrf.mxu2 }
 0x11f   : > { %15616 = vst [vmem:[#allocation38_spill] sm:$0xff] %v12498_v4  ;;  %v12500_v2 = vpop.f32.mrf.mxu3  ;;  %v12502_v40 = vpop.f32.mrf.mxu1  ;;  %v10180_v4 = vld [vmem:[%s12068_s27 + $0x818] sm:$0xff] }
 0x120   : > { %15617 = vst [vmem:[#allocation39_spill] sm:$0xff] %v12500_v2 }
 0x121   : > { %15618 = vst [vmem:[#allocation40_spill] sm:$0xff] %v12502_v40 }
 0x122   : > { %v12507_v60 = vpop.f32.mrf.mxu0  ;;  %10051 = vmatmul.msk.f32.gmra.mxu1 %vm431_vm1, %v173_v36 }
 0x123   : > { %10309 = vmatmul.msk.f32.gmra.mxu2 %vm431_vm1, %v10179_v28  ;;  %v10696_v28 = vld [vmem:[%s12068_s27 + $0x1018] sm:$0xff] }
 0x124   : > { %10567 = vmatmul.msk.f32.gmra.mxu3 %vm431_vm1, %v10437_v20 }
 0x125   : > { %10825 = vmatmul.msk.f32.gmra.mxu0 %vm431_vm1, %v10695_v52 }
 0x126   : > { %v12514_v44 = vpop.f32.mrf.mxu2 }
 0x127   : > { %15619 = vst [vmem:[#allocation41_spill] sm:$0xff] %v12514_v44  ;;  %v12516_v18 = vpop.f32.mrf.mxu3  ;;  %v12518_v2 = vpop.f32.mrf.mxu1  ;;  %v175_v44 = vld [vmem:[%s12068_s27 + $0x20] sm:$0xff] }
 0x128   : > { %15620 = vst [vmem:[#allocation42_spill] sm:$0xff] %v12516_v18 }
 0x129   : > { %15621 = vst [vmem:[#allocation43_spill] sm:$0xff] %v12518_v2  ;;  %v10194_v2 = vld [vmem:[%s12068_s27 + $0x888] sm:$0xff] }
 0x12a   : > { %v12523_v36 = vpop.f32.mrf.mxu0  ;;  %10052 = vmatmul.msk.f32.gmra.mxu1 %vm431_vm1, %v174_v12 }
 0x12b   : > { %10310 = vmatmul.msk.f32.gmra.mxu2 %vm431_vm1, %v10180_v4  ;;  %v10697_v4 = vld [vmem:[%s12068_s27 + $0x1020] sm:$0xff] }
 0x12c   : > { %10568 = vmatmul.msk.f32.gmra.mxu3 %vm431_vm1, %v10438_v50 }
 0x12d   : > { %10826 = vmatmul.msk.f32.gmra.mxu0 %vm431_vm1, %v10696_v28 }
 0x12e   : > { %v12530_v20 = vpop.f32.mrf.mxu2 }
 0x12f   : > { %15622 = vst [vmem:[#allocation44_spill] sm:$0xff] %v12530_v20  ;;  %v12532_v52 = vpop.f32.mrf.mxu3  ;;  %v12534_v18 = vpop.f32.mrf.mxu1  ;;  %v176_v20 = vld [vmem:[%s12068_s27 + $0x28] sm:$0xff] }
 0x130   : > { %15623 = vst [vmem:[#allocation45_spill] sm:$0xff] %v12532_v52 }
 0x131   : > { %15624 = vst [vmem:[#allocation46_spill] sm:$0xff] %v12534_v18  ;;  %v188_v18 = vld [vmem:[%s12068_s27 + $0x88] sm:$0xff] }
 0x132   : > { %v12539_v12 = vpop.f32.mrf.mxu0  ;;  %10053 = vmatmul.msk.f32.gmra.mxu1 %vm431_vm1, %v175_v44 }
 0x133   : > { %10311 = vmatmul.msk.f32.gmra.mxu2 %vm431_vm1, %v10181_v55  ;;  %v10698_v55 = vld [vmem:[%s12068_s27 + $0x1028] sm:$0xff] }
 0x134   : > { %10569 = vmatmul.msk.f32.gmra.mxu3 %vm431_vm1, %v10439_v8 }
 0x135   : > { %10827 = vmatmul.msk.f32.gmra.mxu0 %vm431_vm1, %v10697_v4 }
 0x136   : > { %v12546_v50 = vpop.f32.mrf.mxu2 }
 0x137   : > { %15625 = vst [vmem:[#allocation47_spill] sm:$0xff] %v12546_v50  ;;  %v12548_v28 = vpop.f32.mrf.mxu3  ;;  %v12550_v52 = vpop.f32.mrf.mxu1  ;;  %v177_v50 = vld [vmem:[%s12068_s27 + $0x30] sm:$0xff] }
 0x138   : > { %15626 = vst [vmem:[#allocation48_spill] sm:$0xff] %v12548_v28 }
 0x139   : > { %15627 = vst [vmem:[#allocation49_spill] sm:$0xff] %v12550_v52 }
 0x13a   : > { %v12555_v44 = vpop.f32.mrf.mxu0  ;;  %10054 = vmatmul.msk.f32.gmra.mxu1 %vm431_vm1, %v176_v20 }
 0x13b   : > { %10312 = vmatmul.msk.f32.gmra.mxu2 %vm431_vm1, %v10182_v15  ;;  %v10699_v15 = vld [vmem:[%s12068_s27 + $0x1030] sm:$0xff] }
 0x13c   : > { %10570 = vmatmul.msk.f32.gmra.mxu3 %vm431_vm1, %v10440_v39 }
 0x13d   : > { %10828 = vmatmul.msk.f32.gmra.mxu0 %vm431_vm1, %v10698_v55 }
 0x13e   : > { %v12562_v8 = vpop.f32.mrf.mxu2 }
 0x13f   : > { %15628 = vst [vmem:[#allocation50_spill] sm:$0xff] %v12562_v8  ;;  %v12564_v4 = vpop.f32.mrf.mxu3  ;;  %v12566_v28 = vpop.f32.mrf.mxu1  ;;  %v178_v8 = vld [vmem:[%s12068_s27 + $0x38] sm:$0xff] }
 0x140   : > { %15629 = vst [vmem:[#allocation51_spill] sm:$0xff] %v12564_v4 }
 0x141   : > { %15630 = vst [vmem:[#allocation52_spill] sm:$0xff] %v12566_v28  ;;  %v10451_v28 = vld [vmem:[%s12068_s27 + $0xc80] sm:$0xff] }
 0x142   : > { %v12571_v20 = vpop.f32.mrf.mxu0  ;;  %10055 = vmatmul.msk.f32.gmra.mxu1 %vm431_vm1, %v177_v50 }
 0x143   : > { %10313 = vmatmul.msk.f32.gmra.mxu2 %vm431_vm1, %v10183_v0  ;;  %v10700_v0 = vld [vmem:[%s12068_s27 + $0x1038] sm:$0xff] }
 0x144   : > { %10571 = vmatmul.msk.f32.gmra.mxu3 %vm431_vm1, %v10441_v48 }
 0x145   : > { %10829 = vmatmul.msk.f32.gmra.mxu0 %vm431_vm1, %v10699_v15 }
 0x146   : > { %v12578_v39 = vpop.f32.mrf.mxu2 }
 0x147   : > { %15631 = vst [vmem:[#allocation53_spill] sm:$0xff] %v12578_v39  ;;  %v12580_v55 = vpop.f32.mrf.mxu3  ;;  %v12582_v4 = vpop.f32.mrf.mxu1  ;;  %v179_v39 = vld [vmem:[%s12068_s27 + $0x40] sm:$0xff] }
 0x148   : > { %15632 = vst [vmem:[#allocation54_spill] sm:$0xff] %v12580_v55 }
 0x149   : > { %15633 = vst [vmem:[#allocation55_spill] sm:$0xff] %v12582_v4  ;;  %v10450_v4 = vld [vmem:[%s12068_s27 + $0xc78] sm:$0xff] }
 0x14a   : > { %v12587_v50 = vpop.f32.mrf.mxu0  ;;  %10056 = vmatmul.msk.f32.gmra.mxu1 %vm431_vm1, %v178_v8 }
 0x14b   : > { %10314 = vmatmul.msk.f32.gmra.mxu2 %vm431_vm1, %v10184_v32  ;;  %v10701_v32 = vld [vmem:[%s12068_s27 + $0x1040] sm:$0xff] }
 0x14c   : > { %10572 = vmatmul.msk.f32.gmra.mxu3 %vm431_vm1, %v10442_v16 }
 0x14d   : > { %10830 = vmatmul.msk.f32.gmra.mxu0 %vm431_vm1, %v10700_v0 }
 0x14e   : > { %v12594_v48 = vpop.f32.mrf.mxu2 }
 0x14f   : > { %15634 = vst [vmem:[#allocation56_spill] sm:$0xff] %v12594_v48  ;;  %v12596_v15 = vpop.f32.mrf.mxu3  ;;  %v12598_v55 = vpop.f32.mrf.mxu1  ;;  %v180_v48 = vld [vmem:[%s12068_s27 + $0x48] sm:$0xff] }
 0x150   : > { %15635 = vst [vmem:[#allocation57_spill] sm:$0xff] %v12596_v15 }
 0x151   : > { %15636 = vst [vmem:[#allocation58_spill] sm:$0xff] %v12598_v55  ;;  %v10449_v55 = vld [vmem:[%s12068_s27 + $0xc70] sm:$0xff] }
 0x152   : > { %v12603_v8 = vpop.f32.mrf.mxu0  ;;  %10057 = vmatmul.msk.f32.gmra.mxu1 %vm431_vm1, %v179_v39 }
 0x153   : > { %10315 = vmatmul.msk.f32.gmra.mxu2 %vm431_vm1, %v10185_v3  ;;  %v10702_v3 = vld [vmem:[%s12068_s27 + $0x1048] sm:$0xff] }
 0x154   : > { %10573 = vmatmul.msk.f32.gmra.mxu3 %vm431_vm1, %v10443_v59 }
 0x155   : > { %10831 = vmatmul.msk.f32.gmra.mxu0 %vm431_vm1, %v10701_v32 }
 0x156   : > { %v12610_v16 = vpop.f32.mrf.mxu2 }
 0x157   : > { %15637 = vst [vmem:[#allocation59_spill] sm:$0xff] %v12610_v16  ;;  %v12612_v0 = vpop.f32.mrf.mxu3  ;;  %v12614_v15 = vpop.f32.mrf.mxu1  ;;  %v181_v16 = vld [vmem:[%s12068_s27 + $0x50] sm:$0xff] }
 0x158   : > { %15638 = vst [vmem:[#allocation60_spill] sm:$0xff] %v12612_v0 }
 0x159   : > { %15639 = vst [vmem:[#allocation61_spill] sm:$0xff] %v12614_v15  ;;  %v10448_v15 = vld [vmem:[%s12068_s27 + $0xc68] sm:$0xff] }
 0x15a   : > { %v12619_v39 = vpop.f32.mrf.mxu0  ;;  %10058 = vmatmul.msk.f32.gmra.mxu1 %vm431_vm1, %v180_v48 }
 0x15b   : > { %10316 = vmatmul.msk.f32.gmra.mxu2 %vm431_vm1, %v10186_v51  ;;  %v10703_v51 = vld [vmem:[%s12068_s27 + $0x1050] sm:$0xff] }
 0x15c   : > { %10574 = vmatmul.msk.f32.gmra.mxu3 %vm431_vm1, %v10444_v43 }
 0x15d   : > { %10832 = vmatmul.msk.f32.gmra.mxu0 %vm431_vm1, %v10702_v3 }
 0x15e   : > { %v12626_v59 = vpop.f32.mrf.mxu2 }
 0x15f   : > { %15640 = vst [vmem:[#allocation62_spill] sm:$0xff] %v12626_v59  ;;  %v12628_v32 = vpop.f32.mrf.mxu3  ;;  %v12630_v0 = vpop.f32.mrf.mxu1  ;;  %v182_v59 = vld [vmem:[%s12068_s27 + $0x58] sm:$0xff] }
 0x160   : > { %15641 = vst [vmem:[#allocation63_spill] sm:$0xff] %v12628_v32 }
 0x161   : > { %15642 = vst [vmem:[#allocation64_spill] sm:$0xff] %v12630_v0  ;;  %v10447_v0 = vld [vmem:[%s12068_s27 + $0xc60] sm:$0xff] }
 0x162   : > { %v12635_v48 = vpop.f32.mrf.mxu0  ;;  %10059 = vmatmul.msk.f32.gmra.mxu1 %vm431_vm1, %v181_v16 }
 0x163   : > { %10317 = vmatmul.msk.f32.gmra.mxu2 %vm431_vm1, %v10187_v35  ;;  %v10704_v35 = vld [vmem:[%s12068_s27 + $0x1058] sm:$0xff] }
 0x164   : > { %10575 = vmatmul.msk.f32.gmra.mxu3 %vm431_vm1, %v10445_v27 }
 0x165   : > { %10833 = vmatmul.msk.f32.gmra.mxu0 %vm431_vm1, %v10703_v51 }
 0x166   : > { %v12642_v43 = vpop.f32.mrf.mxu2 }
 0x167   : > { %15643 = vst [vmem:[#allocation65_spill] sm:$0xff] %v12642_v43  ;;  %v12644_v3 = vpop.f32.mrf.mxu3  ;;  %v12646_v32 = vpop.f32.mrf.mxu1  ;;  %v183_v43 = vld [vmem:[%s12068_s27 + $0x60] sm:$0xff] }
 0x168   : > { %15644 = vst [vmem:[#allocation66_spill] sm:$0xff] %v12644_v3 }
 0x169   : > { %15645 = vst [vmem:[#allocation67_spill] sm:$0xff] %v12646_v32  ;;  %v10189_v32 = vld [vmem:[%s12068_s27 + $0x860] sm:$0xff] }
 0x16a   : > { %v12651_v16 = vpop.f32.mrf.mxu0  ;;  %10060 = vmatmul.msk.f32.gmra.mxu1 %vm431_vm1, %v182_v59 }
 0x16b   : > { %10318 = vmatmul.msk.f32.gmra.mxu2 %vm431_vm1, %v10188_v19  ;;  %v10705_v19 = vld [vmem:[%s12068_s27 + $0x1060] sm:$0xff] }
 0x16c   : > { %10576 = vmatmul.msk.f32.gmra.mxu3 %vm431_vm1, %v10446_v11 }
 0x16d   : > { %10834 = vmatmul.msk.f32.gmra.mxu0 %vm431_vm1, %v10704_v35 }
 0x16e   : > { %v12658_v27 = vpop.f32.mrf.mxu2 }
 0x16f   : > { %15646 = vst [vmem:[#allocation68_spill] sm:$0xff] %v12658_v27  ;;  %v12660_v51 = vpop.f32.mrf.mxu3  ;;  %v12662_v3 = vpop.f32.mrf.mxu1  ;;  %v184_v27 = vld [vmem:[%s12068_s27 + $0x68] sm:$0xff] }
 0x170   : > { %15647 = vst [vmem:[#allocation69_spill] sm:$0xff] %v12660_v51 }
 0x171   : > { %15648 = vst [vmem:[#allocation70_spill] sm:$0xff] %v12662_v3  ;;  %v10190_v3 = vld [vmem:[%s12068_s27 + $0x868] sm:$0xff] }
 0x172   : > { %v12667_v59 = vpop.f32.mrf.mxu0  ;;  %10061 = vmatmul.msk.f32.gmra.mxu1 %vm431_vm1, %v183_v43 }
 0x173   : > { %10319 = vmatmul.msk.f32.gmra.mxu2 %vm431_vm1, %v10189_v32  ;;  %v10706_v32 = vld [vmem:[%s12068_s27 + $0x1068] sm:$0xff] }
 0x174   : > { %10577 = vmatmul.msk.f32.gmra.mxu3 %vm431_vm1, %v10447_v0 }
 0x175   : > { %10835 = vmatmul.msk.f32.gmra.mxu0 %vm431_vm1, %v10705_v19 }
 0x176   : > { %v12674_v11 = vpop.f32.mrf.mxu2 }
 0x177   : > { %15649 = vst [vmem:[#allocation71_spill] sm:$0xff] %v12674_v11  ;;  %v12676_v35 = vpop.f32.mrf.mxu3  ;;  %v12678_v51 = vpop.f32.mrf.mxu1  ;;  %v185_v11 = vld [vmem:[%s12068_s27 + $0x70] sm:$0xff] }
 0x178   : > { %15650 = vst [vmem:[#allocation72_spill] sm:$0xff] %v12676_v35 }
 0x179   : > { %15651 = vst [vmem:[#allocation73_spill] sm:$0xff] %v12678_v51  ;;  %v10191_v51 = vld [vmem:[%s12068_s27 + $0x870] sm:$0xff] }
 0x17a   : > { %v12683_v43 = vpop.f32.mrf.mxu0  ;;  %10062 = vmatmul.msk.f32.gmra.mxu1 %vm431_vm1, %v184_v27 }
 0x17b   : > { %10320 = vmatmul.msk.f32.gmra.mxu2 %vm431_vm1, %v10190_v3  ;;  %v10707_v3 = vld [vmem:[%s12068_s27 + $0x1070] sm:$0xff] }
 0x17c   : > { %10578 = vmatmul.msk.f32.gmra.mxu3 %vm431_vm1, %v10448_v15 }
 0x17d   : > { %10836 = vmatmul.msk.f32.gmra.mxu0 %vm431_vm1, %v10706_v32 }
 0x17e   : > { %v12690_v0 = vpop.f32.mrf.mxu2 }
 0x17f   : > { %15652 = vst [vmem:[#allocation74_spill] sm:$0xff] %v12690_v0  ;;  %v12692_v19 = vpop.f32.mrf.mxu3  ;;  %v12694_v35 = vpop.f32.mrf.mxu1  ;;  %v186_v0 = vld [vmem:[%s12068_s27 + $0x78] sm:$0xff] }
 0x180   : > { %15653 = vst [vmem:[#allocation75_spill] sm:$0xff] %v12692_v19 }
 0x181   : > { %15654 = vst [vmem:[#allocation76_spill] sm:$0xff] %v12694_v35  ;;  %v10192_v35 = vld [vmem:[%s12068_s27 + $0x878] sm:$0xff] }
 0x182   : > { %v12699_v27 = vpop.f32.mrf.mxu0  ;;  %10063 = vmatmul.msk.f32.gmra.mxu1 %vm431_vm1, %v185_v11 }
 0x183   : > { %10321 = vmatmul.msk.f32.gmra.mxu2 %vm431_vm1, %v10191_v51  ;;  %v10708_v51 = vld [vmem:[%s12068_s27 + $0x1078] sm:$0xff] }
 0x184   : > { %10579 = vmatmul.msk.f32.gmra.mxu3 %vm431_vm1, %v10449_v55 }
 0x185   : > { %10837 = vmatmul.msk.f32.gmra.mxu0 %vm431_vm1, %v10707_v3 }
 0x186   : > { %v12706_v15 = vpop.f32.mrf.mxu2 }
 0x187   : > { %15655 = vst [vmem:[#allocation77_spill] sm:$0xff] %v12706_v15  ;;  %v12708_v32 = vpop.f32.mrf.mxu3  ;;  %v12710_v19 = vpop.f32.mrf.mxu1  ;;  %v187_v15 = vld [vmem:[%s12068_s27 + $0x80] sm:$0xff] }
 0x188   : > { %15656 = vst [vmem:[#allocation78_spill] sm:$0xff] %v12708_v32 }
 0x189   : > { %15657 = vst [vmem:[#allocation79_spill] sm:$0xff] %v12710_v19  ;;  %v10193_v19 = vld [vmem:[%s12068_s27 + $0x880] sm:$0xff] }
 0x18a   : > { %v12715_v11 = vpop.f32.mrf.mxu0  ;;  %10064 = vmatmul.msk.f32.gmra.mxu1 %vm431_vm1, %v186_v0  ;;  %v10709_v0 = vld [vmem:[%s12068_s27 + $0x1080] sm:$0xff] }
 0x18b   : > { %10322 = vmatmul.msk.f32.gmra.mxu2 %vm431_vm1, %v10192_v35 }
 0x18c   : > { %10580 = vmatmul.msk.f32.gmra.mxu3 %vm431_vm1, %v10450_v4 }
 0x18d   : > { %10838 = vmatmul.msk.f32.gmra.mxu0 %vm431_vm1, %v10708_v51 }
 0x18e   : > { %v12722_v55 = vpop.f32.mrf.mxu2 }
 0x18f   : > { %15658 = vst [vmem:[#allocation80_spill] sm:$0xff] %v12722_v55  ;;  %v12724_v3 = vpop.f32.mrf.mxu3  ;;  %v1625_v32 = vpop.f32.mrf.mxu1 }
 0x190   : > { %15659 = vst [vmem:[#allocation81_spill] sm:$0xff] %v12724_v3  ;;  %v1626_v4 = vadd.f32 %v1625_v32, %v12203_v9 }
 0x192   : > { %v4638_v52 = vpop.f32.mrf.mxu0  ;;  %10065 = vmatmul.msk.f32.gmra.mxu1 %vm431_vm1, %v187_v15 }
 0x193   : > { %10323 = vmatmul.msk.f32.gmra.mxu2 %vm431_vm1, %v10193_v19 }
 0x194   : > { %10581 = vmatmul.msk.f32.gmra.mxu3 %vm431_vm1, %v10451_v28 }
 0x195   : > { %10839 = vmatmul.msk.f32.gmra.mxu0 %vm431_vm1, %v10709_v0 }
 0x196   : > { %v2544_v35 = vpop.f32.mrf.mxu2 }
 0x197   : > { %v2928_v51 = vadd.f32 %v2544_v35, %v1626_v4  ;;  %v3591_v3 = vpop.f32.mrf.mxu3  ;;  %v1628_v55 = vpop.f32.mrf.mxu1  ;;  %v189_v4 = vld [vmem:[%s12068_s27 + $0x90] sm:$0xff] }
 0x198   : > { %v1629_v9 = vadd.f32 %v1628_v55, %v12219_v17  ;;  %v10195_v35 = vld [vmem:[%s12068_s27 + $0x890] sm:$0xff] }
 0x199   : > { %v3975_v40 = vadd.f32 %v3591_v3, %v2928_v51  ;;  %v10711_v51 = vld [vmem:[%s12068_s27 + $0x1090] sm:$0xff] }
 0x19a   : > { %v4641_v15 = vpop.f32.mrf.mxu0  ;;  %10066 = vmatmul.msk.f32.gmra.mxu1 %vm431_vm1, %v188_v18 }
 0x19b   : > { %v12739_v19 = vadd.f32 %v4638_v52, %v3975_v40  ;;  %10324 = vmatmul.msk.f32.gmra.mxu2 %vm431_vm1, %v10194_v2  ;;  %v10453_v52 = vld [vmem:[%s12068_s27 + $0xc90] sm:$0xff] }
 0x19c   : > { %10582 = vmatmul.msk.f32.gmra.mxu3 %vm431_vm1, %v10452_v58 }
 0x19d   : > { %10840 = vmatmul.msk.f32.gmra.mxu0 %vm431_vm1, %v10710_v10 }
 0x19e   : > { %v2547_v28 = vpop.f32.mrf.mxu2 }
 0x19f   : > { %v2929_v32 = vadd.f32 %v2547_v28, %v1629_v9  ;;  %v3594_v3 = vpop.f32.mrf.mxu3  ;;  %v1631_v0 = vpop.f32.mrf.mxu1  ;;  %v190_v28 = vld [vmem:[%s12068_s27 + $0x98] sm:$0xff] }
 0x1a0   : > { %v1632_v17 = vadd.f32 %v1631_v0, %v12235_v25 }
 0x1a1   : > { %v3976_v40 = vadd.f32 %v3594_v3, %v2929_v32  ;;  %v10196_v32 = vld [vmem:[%s12068_s27 + $0x898] sm:$0xff] }
 0x1a2   : > { %v4644_v18 = vpop.f32.mrf.mxu0  ;;  %10067 = vmatmul.msk.f32.gmra.mxu1 %vm431_vm1, %v189_v4  ;;  %v10454_v3 = vld [vmem:[%s12068_s27 + $0xc98] sm:$0xff] }
 0x1a3   : > { %v12750_v2 = vadd.f32 %v4641_v15, %v3976_v40  ;;  %10325 = vmatmul.msk.f32.gmra.mxu2 %vm431_vm1, %v10195_v35  ;;  %v10712_v40 = vld [vmem:[%s12068_s27 + $0x1098] sm:$0xff] }
 0x1a4   : > { %10583 = vmatmul.msk.f32.gmra.mxu3 %vm431_vm1, %v10453_v52 }
 0x1a5   : > { %10841 = vmatmul.msk.f32.gmra.mxu0 %vm431_vm1, %v10711_v51 }
 0x1a6   : > { %v2550_v10 = vpop.f32.mrf.mxu2 }
 0x1a7   : > { %v2930_v58 = vadd.f32 %v2550_v10, %v1632_v17  ;;  %v3597_v55 = vpop.f32.mrf.mxu3  ;;  %v1634_v9 = vpop.f32.mrf.mxu1  ;;  %v191_v10 = vld [vmem:[%s12068_s27 + $0xa0] sm:$0xff] }
 0x1a8   : > { %v1635_v25 = vadd.f32 %v1634_v9, %v12251_v33 }
 0x1a9   : > { %v3977_v15 = vadd.f32 %v3597_v55, %v2930_v58  ;;  %v10197_v58 = vld [vmem:[%s12068_s27 + $0x8a0] sm:$0xff] }
 0x1aa   : > { %v4647_v4 = vpop.f32.mrf.mxu0  ;;  %10068 = vmatmul.msk.f32.gmra.mxu1 %vm431_vm1, %v190_v28  ;;  %v10455_v55 = vld [vmem:[%s12068_s27 + $0xca0] sm:$0xff] }
 0x1ab   : > { %v12761_v35 = vadd.f32 %v4644_v18, %v3977_v15  ;;  %10326 = vmatmul.msk.f32.gmra.mxu2 %vm431_vm1, %v10196_v32  ;;  %v10713_v15 = vld [vmem:[%s12068_s27 + $0x10a0] sm:$0xff] }
 0x1ac   : > { %10584 = vmatmul.msk.f32.gmra.mxu3 %vm431_vm1, %v10454_v3 }
 0x1ad   : > { %10842 = vmatmul.msk.f32.gmra.mxu0 %vm431_vm1, %v10712_v40 }
 0x1ae   : > { %v2553_v0 = vpop.f32.mrf.mxu2 }
 0x1af   : > { %v2931_v52 = vadd.f32 %v2553_v0, %v1635_v25  ;;  %v3600_v51 = vpop.f32.mrf.mxu3  ;;  %v1637_v17 = vpop.f32.mrf.mxu1  ;;  %v192_v0 = vld [vmem:[%s12068_s27 + $0xa8] sm:$0xff] }
 0x1b0   : > { %v1638_v33 = vadd.f32 %v1637_v17, %v12267_v41 }
 0x1b1   : > { %v3978_v18 = vadd.f32 %v3600_v51, %v2931_v52  ;;  %v10198_v52 = vld [vmem:[%s12068_s27 + $0x8a8] sm:$0xff] }
 0x1b2   : > { %v4650_v28 = vpop.f32.mrf.mxu0  ;;  %10069 = vmatmul.msk.f32.gmra.mxu1 %vm431_vm1, %v191_v10  ;;  %v10456_v51 = vld [vmem:[%s12068_s27 + $0xca8] sm:$0xff] }
 0x1b3   : > { %v12772_v32 = vadd.f32 %v4647_v4, %v3978_v18  ;;  %10327 = vmatmul.msk.f32.gmra.mxu2 %vm431_vm1, %v10197_v58  ;;  %v10714_v18 = vld [vmem:[%s12068_s27 + $0x10a8] sm:$0xff] }
 0x1b4   : > { %10585 = vmatmul.msk.f32.gmra.mxu3 %vm431_vm1, %v10455_v55 }
 0x1b5   : > { %10843 = vmatmul.msk.f32.gmra.mxu0 %vm431_vm1, %v10713_v15 }
 0x1b6   : > { %v2556_v9 = vpop.f32.mrf.mxu2 }
 0x1b7   : > { %v2932_v3 = vadd.f32 %v2556_v9, %v1638_v33  ;;  %v3603_v40 = vpop.f32.mrf.mxu3  ;;  %v1640_v25 = vpop.f32.mrf.mxu1  ;;  %v193_v9 = vld [vmem:[%s12068_s27 + $0xb0] sm:$0xff] }
 0x1b8   : > { %v1641_v41 = vadd.f32 %v1640_v25, %v12283_v49 }
 0x1b9   : > { %v3979_v4 = vadd.f32 %v3603_v40, %v2932_v3  ;;  %v10199_v3 = vld [vmem:[%s12068_s27 + $0x8b0] sm:$0xff] }
 0x1ba   : > { %v4653_v10 = vpop.f32.mrf.mxu0  ;;  %10070 = vmatmul.msk.f32.gmra.mxu1 %vm431_vm1, %v192_v0  ;;  %v10457_v40 = vld [vmem:[%s12068_s27 + $0xcb0] sm:$0xff] }
 0x1bb   : > { %v12783_v58 = vadd.f32 %v4650_v28, %v3979_v4  ;;  %10328 = vmatmul.msk.f32.gmra.mxu2 %vm431_vm1, %v10198_v52  ;;  %v10715_v4 = vld [vmem:[%s12068_s27 + $0x10b0] sm:$0xff] }
 0x1bc   : > { %10586 = vmatmul.msk.f32.gmra.mxu3 %vm431_vm1, %v10456_v51 }
 0x1bd   : > { %10844 = vmatmul.msk.f32.gmra.mxu0 %vm431_vm1, %v10714_v18 }
 0x1be   : > { %v2559_v17 = vpop.f32.mrf.mxu2 }
 0x1bf   : > { %v2933_v55 = vadd.f32 %v2559_v17, %v1641_v41  ;;  %v3606_v15 = vpop.f32.mrf.mxu3  ;;  %v1643_v33 = vpop.f32.mrf.mxu1  ;;  %v194_v17 = vld [vmem:[%s12068_s27 + $0xb8] sm:$0xff] }
 0x1c0   : > { %v1644_v49 = vadd.f32 %v1643_v33, %v12299_v57 }
 0x1c1   : > { %v3980_v28 = vadd.f32 %v3606_v15, %v2933_v55  ;;  %v10200_v55 = vld [vmem:[%s12068_s27 + $0x8b8] sm:$0xff] }
 0x1c2   : > { %v4656_v0 = vpop.f32.mrf.mxu0  ;;  %10071 = vmatmul.msk.f32.gmra.mxu1 %vm431_vm1, %v193_v9  ;;  %v10458_v15 = vld [vmem:[%s12068_s27 + $0xcb8] sm:$0xff] }
 0x1c3   : > { %v12794_v52 = vadd.f32 %v4653_v10, %v3980_v28  ;;  %10329 = vmatmul.msk.f32.gmra.mxu2 %vm431_vm1, %v10199_v3  ;;  %v10716_v28 = vld [vmem:[%s12068_s27 + $0x10b8] sm:$0xff] }
 0x1c4   : > { %10587 = vmatmul.msk.f32.gmra.mxu3 %vm431_vm1, %v10457_v40 }
 0x1c5   : > { %10845 = vmatmul.msk.f32.gmra.mxu0 %vm431_vm1, %v10715_v4 }
 0x1c6   : > { %v2562_v25 = vpop.f32.mrf.mxu2 }
 0x1c7   : > { %v2934_v51 = vadd.f32 %v2562_v25, %v1644_v49  ;;  %v3609_v18 = vpop.f32.mrf.mxu3  ;;  %v1646_v41 = vpop.f32.mrf.mxu1  ;;  %v195_v25 = vld [vmem:[%s12068_s27 + $0xc0] sm:$0xff] }
 0x1c8   : > { %v1647_v57 = vadd.f32 %v1646_v41, %v12315_v1 }
 0x1c9   : > { %v3981_v10 = vadd.f32 %v3609_v18, %v2934_v51  ;;  %v10201_v51 = vld [vmem:[%s12068_s27 + $0x8c0] sm:$0xff] }
 0x1ca   : > { %v4659_v9 = vpop.f32.mrf.mxu0  ;;  %10072 = vmatmul.msk.f32.gmra.mxu1 %vm431_vm1, %v194_v17  ;;  %v10459_v18 = vld [vmem:[%s12068_s27 + $0xcc0] sm:$0xff] }
 0x1cb   : > { %v12805_v3 = vadd.f32 %v4656_v0, %v3981_v10  ;;  %10330 = vmatmul.msk.f32.gmra.mxu2 %vm431_vm1, %v10200_v55  ;;  %v10717_v10 = vld [vmem:[%s12068_s27 + $0x10c0] sm:$0xff] }
 0x1cc   : > { %10588 = vmatmul.msk.f32.gmra.mxu3 %vm431_vm1, %v10458_v15 }
 0x1cd   : > { %10846 = vmatmul.msk.f32.gmra.mxu0 %vm431_vm1, %v10716_v28 }
 0x1ce   : > { %v2565_v33 = vpop.f32.mrf.mxu2 }
 0x1cf   : > { %v2935_v40 = vadd.f32 %v2565_v33, %v1647_v57  ;;  %v3612_v4 = vpop.f32.mrf.mxu3  ;;  %v1649_v49 = vpop.f32.mrf.mxu1  ;;  %v196_v33 = vld [vmem:[%s12068_s27 + $0xc8] sm:$0xff] }
 0x1d0   : > { %v1650_v1 = vadd.f32 %v1649_v49, %v12331_v14 }
 0x1d1   : > { %v3982_v0 = vadd.f32 %v3612_v4, %v2935_v40  ;;  %v10202_v40 = vld [vmem:[%s12068_s27 + $0x8c8] sm:$0xff] }
 0x1d2   : > { %v4662_v17 = vpop.f32.mrf.mxu0  ;;  %10073 = vmatmul.msk.f32.gmra.mxu1 %vm431_vm1, %v195_v25  ;;  %v10460_v4 = vld [vmem:[%s12068_s27 + $0xcc8] sm:$0xff] }
 0x1d3   : > { %v12816_v55 = vadd.f32 %v4659_v9, %v3982_v0  ;;  %10331 = vmatmul.msk.f32.gmra.mxu2 %vm431_vm1, %v10201_v51  ;;  %v10718_v0 = vld [vmem:[%s12068_s27 + $0x10c8] sm:$0xff] }
 0x1d4   : > { %10589 = vmatmul.msk.f32.gmra.mxu3 %vm431_vm1, %v10459_v18 }
 0x1d5   : > { %10847 = vmatmul.msk.f32.gmra.mxu0 %vm431_vm1, %v10717_v10 }
 0x1d6   : > { %v2568_v41 = vpop.f32.mrf.mxu2 }
 0x1d7   : > { %v2936_v15 = vadd.f32 %v2568_v41, %v1650_v1  ;;  %v3615_v28 = vpop.f32.mrf.mxu3  ;;  %v1652_v57 = vpop.f32.mrf.mxu1  ;;  %v197_v41 = vld [vmem:[%s12068_s27 + $0xd0] sm:$0xff] }
 0x1d8   : > { %v1653_v14 = vadd.f32 %v1652_v57, %v12347_v30 }
 0x1d9   : > { %v3983_v9 = vadd.f32 %v3615_v28, %v2936_v15  ;;  %v10203_v15 = vld [vmem:[%s12068_s27 + $0x8d0] sm:$0xff] }
 0x1da   : > { %v4665_v25 = vpop.f32.mrf.mxu0  ;;  %10074 = vmatmul.msk.f32.gmra.mxu1 %vm431_vm1, %v196_v33  ;;  %v10461_v28 = vld [vmem:[%s12068_s27 + $0xcd0] sm:$0xff] }
 0x1db   : > { %v12827_v51 = vadd.f32 %v4662_v17, %v3983_v9  ;;  %10332 = vmatmul.msk.f32.gmra.mxu2 %vm431_vm1, %v10202_v40  ;;  %v10719_v9 = vld [vmem:[%s12068_s27 + $0x10d0] sm:$0xff] }
 0x1dc   : > { %10590 = vmatmul.msk.f32.gmra.mxu3 %vm431_vm1, %v10460_v4 }
 0x1dd   : > { %10848 = vmatmul.msk.f32.gmra.mxu0 %vm431_vm1, %v10718_v0 }
 0x1de   : > { %v2571_v49 = vpop.f32.mrf.mxu2 }
 0x1df   : > { %v2937_v18 = vadd.f32 %v2571_v49, %v1653_v14  ;;  %v3618_v10 = vpop.f32.mrf.mxu3  ;;  %v1655_v1 = vpop.f32.mrf.mxu1  ;;  %v198_v49 = vld [vmem:[%s12068_s27 + $0xd8] sm:$0xff] }
 0x1e0   : > { %v1656_v30 = vadd.f32 %v1655_v1, %v12363_v46 }
 0x1e1   : > { %v3984_v17 = vadd.f32 %v3618_v10, %v2937_v18  ;;  %v10204_v18 = vld [vmem:[%s12068_s27 + $0x8d8] sm:$0xff] }
 0x1e2   : > { %v4668_v33 = vpop.f32.mrf.mxu0  ;;  %10075 = vmatmul.msk.f32.gmra.mxu1 %vm431_vm1, %v197_v41  ;;  %v10462_v10 = vld [vmem:[%s12068_s27 + $0xcd8] sm:$0xff] }
 0x1e3   : > { %v12838_v40 = vadd.f32 %v4665_v25, %v3984_v17  ;;  %10333 = vmatmul.msk.f32.gmra.mxu2 %vm431_vm1, %v10203_v15  ;;  %v10720_v17 = vld [vmem:[%s12068_s27 + $0x10d8] sm:$0xff] }
 0x1e4   : > { %10591 = vmatmul.msk.f32.gmra.mxu3 %vm431_vm1, %v10461_v28 }
 0x1e5   : > { %10849 = vmatmul.msk.f32.gmra.mxu0 %vm431_vm1, %v10719_v9 }
 0x1e6   : > { %v2574_v57 = vpop.f32.mrf.mxu2 }
 0x1e7   : > { %v2938_v4 = vadd.f32 %v2574_v57, %v1656_v30  ;;  %v3621_v0 = vpop.f32.mrf.mxu3  ;;  %v1658_v14 = vpop.f32.mrf.mxu1  ;;  %v199_v57 = vld [vmem:[%s12068_s27 + $0xe0] sm:$0xff] }
 0x1e8   : > { %v1659_v46 = vadd.f32 %v1658_v14, %v12379_v62 }
 0x1e9   : > { %v3985_v25 = vadd.f32 %v3621_v0, %v2938_v4  ;;  %v10205_v4 = vld [vmem:[%s12068_s27 + $0x8e0] sm:$0xff] }
 0x1ea   : > { %v4671_v41 = vpop.f32.mrf.mxu0  ;;  %10076 = vmatmul.msk.f32.gmra.mxu1 %vm431_vm1, %v198_v49  ;;  %v10463_v0 = vld [vmem:[%s12068_s27 + $0xce0] sm:$0xff] }
 0x1eb   : > { %v12849_v15 = vadd.f32 %v4668_v33, %v3985_v25  ;;  %10334 = vmatmul.msk.f32.gmra.mxu2 %vm431_vm1, %v10204_v18  ;;  %v10721_v25 = vld [vmem:[%s12068_s27 + $0x10e0] sm:$0xff] }
 0x1ec   : > { %10592 = vmatmul.msk.f32.gmra.mxu3 %vm431_vm1, %v10462_v10 }
 0x1ed   : > { %10850 = vmatmul.msk.f32.gmra.mxu0 %vm431_vm1, %v10720_v17 }
 0x1ee   : > { %v2577_v1 = vpop.f32.mrf.mxu2 }
 0x1ef   : > { %v2939_v28 = vadd.f32 %v2577_v1, %v1659_v46  ;;  %v3624_v9 = vpop.f32.mrf.mxu3  ;;  %v1661_v30 = vpop.f32.mrf.mxu1  ;;  %v200_v1 = vld [vmem:[%s12068_s27 + $0xe8] sm:$0xff] }
 0x1f0   : > { %v1662_v62 = vadd.f32 %v1661_v30, %v12395_v23 }
 0x1f1   : > { %v3986_v33 = vadd.f32 %v3624_v9, %v2939_v28  ;;  %v10206_v28 = vld [vmem:[%s12068_s27 + $0x8e8] sm:$0xff] }
 0x1f2   : > { %v4674_v49 = vpop.f32.mrf.mxu0  ;;  %10077 = vmatmul.msk.f32.gmra.mxu1 %vm431_vm1, %v199_v57  ;;  %v10464_v9 = vld [vmem:[%s12068_s27 + $0xce8] sm:$0xff] }
 0x1f3   : > { %v12860_v18 = vadd.f32 %v4671_v41, %v3986_v33  ;;  %10335 = vmatmul.msk.f32.gmra.mxu2 %vm431_vm1, %v10205_v4  ;;  %v10722_v33 = vld [vmem:[%s12068_s27 + $0x10e8] sm:$0xff] }
 0x1f4   : > { %10593 = vmatmul.msk.f32.gmra.mxu3 %vm431_vm1, %v10463_v0 }
 0x1f5   : > { %10851 = vmatmul.msk.f32.gmra.mxu0 %vm431_vm1, %v10721_v25 }
 0x1f6   : > { %v2580_v14 = vpop.f32.mrf.mxu2 }
 0x1f7   : > { %v2940_v10 = vadd.f32 %v2580_v14, %v1662_v62  ;;  %v3627_v17 = vpop.f32.mrf.mxu3  ;;  %v1664_v46 = vpop.f32.mrf.mxu1  ;;  %v201_v14 = vld [vmem:[%s12068_s27 + $0xf0] sm:$0xff] }
 0x1f8   : > { %v1665_v23 = vadd.f32 %v1664_v46, %v12423_v63 }
 0x1f9   : > { %v3987_v41 = vadd.f32 %v3627_v17, %v2940_v10  ;;  %v10207_v10 = vld [vmem:[%s12068_s27 + $0x8f0] sm:$0xff] }
 0x1fa   : > { %v4677_v57 = vpop.f32.mrf.mxu0  ;;  %10078 = vmatmul.msk.f32.gmra.mxu1 %vm431_vm1, %v200_v1  ;;  %v10465_v17 = vld [vmem:[%s12068_s27 + $0xcf0] sm:$0xff] }
 0x1fb   : > { %v12871_v4 = vadd.f32 %v4674_v49, %v3987_v41  ;;  %10336 = vmatmul.msk.f32.gmra.mxu2 %vm431_vm1, %v10206_v28  ;;  %v10723_v41 = vld [vmem:[%s12068_s27 + $0x10f0] sm:$0xff] }
 0x1fc   : > { %10594 = vmatmul.msk.f32.gmra.mxu3 %vm431_vm1, %v10464_v9 }
 0x1fd   : > { %10852 = vmatmul.msk.f32.gmra.mxu0 %vm431_vm1, %v10722_v33 }
 0x1fe   : > { %v2583_v30 = vpop.f32.mrf.mxu2 }
 0x1ff   : > { %v2941_v0 = vadd.f32 %v2583_v30, %v1665_v23  ;;  %v3630_v25 = vpop.f32.mrf.mxu3  ;;  %v1667_v62 = vpop.f32.mrf.mxu1  ;;  %v202_v30 = vld [vmem:[%s12068_s27 + $0xf8] sm:$0xff] }
 0x200   : > { %v1668_v63 = vadd.f32 %v1667_v62, %v12443_v56 }
 0x201   : > { %v3988_v49 = vadd.f32 %v3630_v25, %v2941_v0  ;;  %v10208_v0 = vld [vmem:[%s12068_s27 + $0x8f8] sm:$0xff] }
 0x202   : > { %v4680_v1 = vpop.f32.mrf.mxu0  ;;  %10079 = vmatmul.msk.f32.gmra.mxu1 %vm431_vm1, %v201_v14  ;;  %v10466_v25 = vld [vmem:[%s12068_s27 + $0xcf8] sm:$0xff] }
 0x203   : > { %v12882_v28 = vadd.f32 %v4677_v57, %v3988_v49  ;;  %10337 = vmatmul.msk.f32.gmra.mxu2 %vm431_vm1, %v10207_v10  ;;  %v10724_v49 = vld [vmem:[%s12068_s27 + $0x10f8] sm:$0xff] }
 0x204   : > { %10595 = vmatmul.msk.f32.gmra.mxu3 %vm431_vm1, %v10465_v17 }
 0x205   : > { %10853 = vmatmul.msk.f32.gmra.mxu0 %vm431_vm1, %v10723_v41 }
 0x206   : > { %v2586_v46 = vpop.f32.mrf.mxu2 }
 0x207   : > { %v2942_v9 = vadd.f32 %v2586_v46, %v1668_v63  ;;  %v3633_v33 = vpop.f32.mrf.mxu3  ;;  %v1670_v23 = vpop.f32.mrf.mxu1  ;;  %v203_v46 = vld [vmem:[%s12068_s27 + $0x100] sm:$0xff] }
 0x208   : > { %v1671_v56 = vadd.f32 %v1670_v23, %v12459_v31 }
 0x209   : > { %v3989_v57 = vadd.f32 %v3633_v33, %v2942_v9  ;;  %v10209_v9 = vld [vmem:[%s12068_s27 + $0x900] sm:$0xff] }
 0x20a   : > { %v4683_v14 = vpop.f32.mrf.mxu0  ;;  %10080 = vmatmul.msk.f32.gmra.mxu1 %vm431_vm1, %v202_v30  ;;  %v10467_v33 = vld [vmem:[%s12068_s27 + $0xd00] sm:$0xff] }
 0x20b   : > { %v12893_v10 = vadd.f32 %v4680_v1, %v3989_v57  ;;  %10338 = vmatmul.msk.f32.gmra.mxu2 %vm431_vm1, %v10208_v0  ;;  %v10725_v57 = vld [vmem:[%s12068_s27 + $0x1100] sm:$0xff] }
 0x20c   : > { %10596 = vmatmul.msk.f32.gmra.mxu3 %vm431_vm1, %v10466_v25 }
 0x20d   : > { %10854 = vmatmul.msk.f32.gmra.mxu0 %vm431_vm1, %v10724_v49 }
 0x20e   : > { %v2589_v62 = vpop.f32.mrf.mxu2 }
 0x20f   : > { %v2943_v17 = vadd.f32 %v2589_v62, %v1671_v56  ;;  %v3636_v41 = vpop.f32.mrf.mxu3  ;;  %v1673_v63 = vpop.f32.mrf.mxu1  ;;  %v204_v62 = vld [vmem:[%s12068_s27 + $0x108] sm:$0xff] }
 0x210   : > { %v1674_v31 = vadd.f32 %v1673_v63, %v12475_v42 }
 0x211   : > { %v3990_v1 = vadd.f32 %v3636_v41, %v2943_v17  ;;  %v10210_v17 = vld [vmem:[%s12068_s27 + $0x908] sm:$0xff] }
 0x212   : > { %v4686_v30 = vpop.f32.mrf.mxu0  ;;  %10081 = vmatmul.msk.f32.gmra.mxu1 %vm431_vm1, %v203_v46  ;;  %v10468_v41 = vld [vmem:[%s12068_s27 + $0xd08] sm:$0xff] }
 0x213   : > { %v12904_v0 = vadd.f32 %v4683_v14, %v3990_v1  ;;  %10339 = vmatmul.msk.f32.gmra.mxu2 %vm431_vm1, %v10209_v9  ;;  %v10726_v1 = vld [vmem:[%s12068_s27 + $0x1108] sm:$0xff] }
 0x214   : > { %10597 = vmatmul.msk.f32.gmra.mxu3 %vm431_vm1, %v10467_v33 }
 0x215   : > { %10855 = vmatmul.msk.f32.gmra.mxu0 %vm431_vm1, %v10725_v57 }
 0x216   : > { %v2592_v23 = vpop.f32.mrf.mxu2 }
 0x217   : > { %v2944_v25 = vadd.f32 %v2592_v23, %v1674_v31  ;;  %v3639_v49 = vpop.f32.mrf.mxu3  ;;  %v1676_v56 = vpop.f32.mrf.mxu1  ;;  %v205_v23 = vld [vmem:[%s12068_s27 + $0x110] sm:$0xff] }
 0x218   : > { %v1677_v42 = vadd.f32 %v1676_v56, %v12491_v34 }
 0x219   : > { %v3991_v14 = vadd.f32 %v3639_v49, %v2944_v25  ;;  %v10211_v25 = vld [vmem:[%s12068_s27 + $0x910] sm:$0xff] }
 0x21a   : > { %v4689_v46 = vpop.f32.mrf.mxu0  ;;  %10082 = vmatmul.msk.f32.gmra.mxu1 %vm431_vm1, %v204_v62  ;;  %v10469_v49 = vld [vmem:[%s12068_s27 + $0xd10] sm:$0xff] }
 0x21b   : > { %v12915_v9 = vadd.f32 %v4686_v30, %v3991_v14  ;;  %10340 = vmatmul.msk.f32.gmra.mxu2 %vm431_vm1, %v10210_v17  ;;  %v10727_v14 = vld [vmem:[%s12068_s27 + $0x1110] sm:$0xff] }
 0x21c   : > { %10598 = vmatmul.msk.f32.gmra.mxu3 %vm431_vm1, %v10468_v41 }
 0x21d   : > { %10856 = vmatmul.msk.f32.gmra.mxu0 %vm431_vm1, %v10726_v1 }
 0x21e   : > { %v2595_v63 = vpop.f32.mrf.mxu2 }
 0x21f   : > { %v2945_v33 = vadd.f32 %v2595_v63, %v1677_v42  ;;  %v3642_v57 = vpop.f32.mrf.mxu3  ;;  %v1679_v31 = vpop.f32.mrf.mxu1  ;;  %v206_v63 = vld [vmem:[%s12068_s27 + $0x118] sm:$0xff] }
 0x220   : > { %v1680_v34 = vadd.f32 %v1679_v31, %v12507_v60 }
 0x221   : > { %v3992_v30 = vadd.f32 %v3642_v57, %v2945_v33  ;;  %v10212_v33 = vld [vmem:[%s12068_s27 + $0x918] sm:$0xff] }
 0x222   : > { %v4692_v62 = vpop.f32.mrf.mxu0  ;;  %10083 = vmatmul.msk.f32.gmra.mxu1 %vm431_vm1, %v205_v23  ;;  %v10470_v57 = vld [vmem:[%s12068_s27 + $0xd18] sm:$0xff] }
 0x223   : > { %v12926_v17 = vadd.f32 %v4689_v46, %v3992_v30  ;;  %10341 = vmatmul.msk.f32.gmra.mxu2 %vm431_vm1, %v10211_v25  ;;  %v10728_v30 = vld [vmem:[%s12068_s27 + $0x1118] sm:$0xff] }
 0x224   : > { %10599 = vmatmul.msk.f32.gmra.mxu3 %vm431_vm1, %v10469_v49 }
 0x225   : > { %10857 = vmatmul.msk.f32.gmra.mxu0 %vm431_vm1, %v10727_v14 }
 0x226   : > { %v2598_v56 = vpop.f32.mrf.mxu2 }
 0x227   : > { %v2946_v41 = vadd.f32 %v2598_v56, %v1680_v34  ;;  %v3645_v1 = vpop.f32.mrf.mxu3  ;;  %v1682_v42 = vpop.f32.mrf.mxu1  ;;  %v207_v56 = vld [vmem:[%s12068_s27 + $0x120] sm:$0xff] }
 0x228   : > { %v1683_v60 = vadd.f32 %v1682_v42, %v12523_v36 }
 0x229   : > { %v3993_v46 = vadd.f32 %v3645_v1, %v2946_v41  ;;  %v10213_v41 = vld [vmem:[%s12068_s27 + $0x920] sm:$0xff] }
 0x22a   : > { %v4695_v23 = vpop.f32.mrf.mxu0  ;;  %10084 = vmatmul.msk.f32.gmra.mxu1 %vm431_vm1, %v206_v63  ;;  %v10471_v1 = vld [vmem:[%s12068_s27 + $0xd20] sm:$0xff] }
 0x22b   : > { %v12937_v25 = vadd.f32 %v4692_v62, %v3993_v46  ;;  %10342 = vmatmul.msk.f32.gmra.mxu2 %vm431_vm1, %v10212_v33  ;;  %v10729_v46 = vld [vmem:[%s12068_s27 + $0x1120] sm:$0xff] }
 0x22c   : > { %10600 = vmatmul.msk.f32.gmra.mxu3 %vm431_vm1, %v10470_v57 }
 0x22d   : > { %10858 = vmatmul.msk.f32.gmra.mxu0 %vm431_vm1, %v10728_v30 }
 0x22e   : > { %v2601_v31 = vpop.f32.mrf.mxu2 }
 0x22f   : > { %v2947_v49 = vadd.f32 %v2601_v31, %v1683_v60  ;;  %v3648_v14 = vpop.f32.mrf.mxu3  ;;  %v1685_v34 = vpop.f32.mrf.mxu1  ;;  %v208_v31 = vld [vmem:[%s12068_s27 + $0x128] sm:$0xff] }
 0x230   : > { %v1686_v36 = vadd.f32 %v1685_v34, %v12539_v12 }
 0x231   : > { %v3994_v62 = vadd.f32 %v3648_v14, %v2947_v49  ;;  %v10214_v49 = vld [vmem:[%s12068_s27 + $0x928] sm:$0xff] }
 0x232   : > { %v4698_v63 = vpop.f32.mrf.mxu0  ;;  %10085 = vmatmul.msk.f32.gmra.mxu1 %vm431_vm1, %v207_v56  ;;  %v10472_v14 = vld [vmem:[%s12068_s27 + $0xd28] sm:$0xff] }
 0x233   : > { %v12948_v33 = vadd.f32 %v4695_v23, %v3994_v62  ;;  %10343 = vmatmul.msk.f32.gmra.mxu2 %vm431_vm1, %v10213_v41  ;;  %v10730_v62 = vld [vmem:[%s12068_s27 + $0x1128] sm:$0xff] }
 0x234   : > { %10601 = vmatmul.msk.f32.gmra.mxu3 %vm431_vm1, %v10471_v1 }
 0x235   : > { %10859 = vmatmul.msk.f32.gmra.mxu0 %vm431_vm1, %v10729_v46 }
 0x236   : > { %v2604_v42 = vpop.f32.mrf.mxu2 }
 0x237   : > { %v2948_v57 = vadd.f32 %v2604_v42, %v1686_v36  ;;  %v3651_v30 = vpop.f32.mrf.mxu3  ;;  %v1688_v60 = vpop.f32.mrf.mxu1  ;;  %v209_v42 = vld [vmem:[%s12068_s27 + $0x130] sm:$0xff] }
 0x238   : > { %v1689_v12 = vadd.f32 %v1688_v60, %v12555_v44 }
 0x239   : > { %v3995_v23 = vadd.f32 %v3651_v30, %v2948_v57  ;;  %v10215_v57 = vld [vmem:[%s12068_s27 + $0x930] sm:$0xff] }
 0x23a   : > { %v4701_v56 = vpop.f32.mrf.mxu0  ;;  %10086 = vmatmul.msk.f32.gmra.mxu1 %vm431_vm1, %v208_v31  ;;  %v10473_v30 = vld [vmem:[%s12068_s27 + $0xd30] sm:$0xff] }
 0x23b   : > { %v12959_v41 = vadd.f32 %v4698_v63, %v3995_v23  ;;  %10344 = vmatmul.msk.f32.gmra.mxu2 %vm431_vm1, %v10214_v49  ;;  %v10731_v23 = vld [vmem:[%s12068_s27 + $0x1130] sm:$0xff] }
 0x23c   : > { %10602 = vmatmul.msk.f32.gmra.mxu3 %vm431_vm1, %v10472_v14 }
 0x23d   : > { %10860 = vmatmul.msk.f32.gmra.mxu0 %vm431_vm1, %v10730_v62 }
 0x23e   : > { %v2607_v34 = vpop.f32.mrf.mxu2 }
 0x23f   : > { %v2949_v1 = vadd.f32 %v2607_v34, %v1689_v12  ;;  %v3654_v46 = vpop.f32.mrf.mxu3  ;;  %v1691_v36 = vpop.f32.mrf.mxu1  ;;  %v210_v34 = vld [vmem:[%s12068_s27 + $0x138] sm:$0xff] }
 0x240   : > { %v1692_v44 = vadd.f32 %v1691_v36, %v12571_v20 }
 0x241   : > { %v3996_v63 = vadd.f32 %v3654_v46, %v2949_v1  ;;  %v10216_v1 = vld [vmem:[%s12068_s27 + $0x938] sm:$0xff] }
 0x242   : > { %v4704_v31 = vpop.f32.mrf.mxu0  ;;  %10087 = vmatmul.msk.f32.gmra.mxu1 %vm431_vm1, %v209_v42  ;;  %v10474_v46 = vld [vmem:[%s12068_s27 + $0xd38] sm:$0xff] }
 0x243   : > { %v12970_v49 = vadd.f32 %v4701_v56, %v3996_v63  ;;  %10345 = vmatmul.msk.f32.gmra.mxu2 %vm431_vm1, %v10215_v57  ;;  %v10732_v63 = vld [vmem:[%s12068_s27 + $0x1138] sm:$0xff] }
 0x244   : > { %10603 = vmatmul.msk.f32.gmra.mxu3 %vm431_vm1, %v10473_v30 }
 0x245   : > { %10861 = vmatmul.msk.f32.gmra.mxu0 %vm431_vm1, %v10731_v23 }
 0x246   : > { %v2610_v60 = vpop.f32.mrf.mxu2 }
 0x247   : > { %v2950_v14 = vadd.f32 %v2610_v60, %v1692_v44  ;;  %v3657_v62 = vpop.f32.mrf.mxu3  ;;  %v1694_v12 = vpop.f32.mrf.mxu1  ;;  %v211_v60 = vld [vmem:[%s12068_s27 + $0x140] sm:$0xff] }
 0x248   : > { %v1695_v20 = vadd.f32 %v1694_v12, %v12587_v50 }
 0x249   : > { %v3997_v56 = vadd.f32 %v3657_v62, %v2950_v14  ;;  %v10217_v14 = vld [vmem:[%s12068_s27 + $0x940] sm:$0xff] }
 0x24a   : > { %v4707_v42 = vpop.f32.mrf.mxu0  ;;  %10088 = vmatmul.msk.f32.gmra.mxu1 %vm431_vm1, %v210_v34  ;;  %v10475_v62 = vld [vmem:[%s12068_s27 + $0xd40] sm:$0xff] }
 0x24b   : > { %v12981_v57 = vadd.f32 %v4704_v31, %v3997_v56  ;;  %10346 = vmatmul.msk.f32.gmra.mxu2 %vm431_vm1, %v10216_v1  ;;  %v10733_v56 = vld [vmem:[%s12068_s27 + $0x1140] sm:$0xff] }
 0x24c   : > { %10604 = vmatmul.msk.f32.gmra.mxu3 %vm431_vm1, %v10474_v46 }
 0x24d   : > { %10862 = vmatmul.msk.f32.gmra.mxu0 %vm431_vm1, %v10732_v63 }
 0x24e   : > { %v2613_v36 = vpop.f32.mrf.mxu2 }
 0x24f   : > { %v2951_v30 = vadd.f32 %v2613_v36, %v1695_v20  ;;  %v3660_v23 = vpop.f32.mrf.mxu3  ;;  %v1697_v44 = vpop.f32.mrf.mxu1  ;;  %v212_v36 = vld [vmem:[%s12068_s27 + $0x148] sm:$0xff] }
 0x250   : > { %v1698_v50 = vadd.f32 %v1697_v44, %v12603_v8 }
 0x251   : > { %v3998_v31 = vadd.f32 %v3660_v23, %v2951_v30  ;;  %v10218_v30 = vld [vmem:[%s12068_s27 + $0x948] sm:$0xff] }
 0x252   : > { %v4710_v34 = vpop.f32.mrf.mxu0  ;;  %10089 = vmatmul.msk.f32.gmra.mxu1 %vm431_vm1, %v211_v60  ;;  %v10476_v23 = vld [vmem:[%s12068_s27 + $0xd48] sm:$0xff] }
 0x253   : > { %v12992_v1 = vadd.f32 %v4707_v42, %v3998_v31  ;;  %10347 = vmatmul.msk.f32.gmra.mxu2 %vm431_vm1, %v10217_v14  ;;  %v10734_v31 = vld [vmem:[%s12068_s27 + $0x1148] sm:$0xff] }
 0x254   : > { %10605 = vmatmul.msk.f32.gmra.mxu3 %vm431_vm1, %v10475_v62 }
 0x255   : > { %10863 = vmatmul.msk.f32.gmra.mxu0 %vm431_vm1, %v10733_v56 }
 0x256   : > { %v2616_v12 = vpop.f32.mrf.mxu2 }
 0x257   : > { %v2952_v46 = vadd.f32 %v2616_v12, %v1698_v50  ;;  %v3663_v63 = vpop.f32.mrf.mxu3  ;;  %v1700_v20 = vpop.f32.mrf.mxu1  ;;  %v213_v12 = vld [vmem:[%s12068_s27 + $0x150] sm:$0xff] }
 0x258   : > { %v1701_v8 = vadd.f32 %v1700_v20, %v12619_v39 }
 0x259   : > { %v3999_v42 = vadd.f32 %v3663_v63, %v2952_v46  ;;  %v10219_v46 = vld [vmem:[%s12068_s27 + $0x950] sm:$0xff] }
 0x25a   : > { %v4713_v60 = vpop.f32.mrf.mxu0  ;;  %10090 = vmatmul.msk.f32.gmra.mxu1 %vm431_vm1, %v212_v36  ;;  %v10477_v63 = vld [vmem:[%s12068_s27 + $0xd50] sm:$0xff] }
 0x25b   : > { %v13003_v14 = vadd.f32 %v4710_v34, %v3999_v42  ;;  %10348 = vmatmul.msk.f32.gmra.mxu2 %vm431_vm1, %v10218_v30  ;;  %v10735_v42 = vld [vmem:[%s12068_s27 + $0x1150] sm:$0xff] }
 0x25c   : > { %10606 = vmatmul.msk.f32.gmra.mxu3 %vm431_vm1, %v10476_v23 }
 0x25d   : > { %10864 = vmatmul.msk.f32.gmra.mxu0 %vm431_vm1, %v10734_v31 }
 0x25e   : > { %v2619_v44 = vpop.f32.mrf.mxu2 }
 0x25f   : > { %v2953_v62 = vadd.f32 %v2619_v44, %v1701_v8  ;;  %v3666_v56 = vpop.f32.mrf.mxu3  ;;  %v1703_v50 = vpop.f32.mrf.mxu1  ;;  %v214_v44 = vld [vmem:[%s12068_s27 + $0x158] sm:$0xff] }
 0x260   : > { %v1704_v39 = vadd.f32 %v1703_v50, %v12635_v48 }
 0x261   : > { %v4000_v34 = vadd.f32 %v3666_v56, %v2953_v62  ;;  %v10220_v62 = vld [vmem:[%s12068_s27 + $0x958] sm:$0xff] }
 0x262   : > { %v4716_v36 = vpop.f32.mrf.mxu0  ;;  %10091 = vmatmul.msk.f32.gmra.mxu1 %vm431_vm1, %v213_v12  ;;  %v10478_v56 = vld [vmem:[%s12068_s27 + $0xd58] sm:$0xff] }
 0x263   : > { %v13014_v30 = vadd.f32 %v4713_v60, %v4000_v34  ;;  %10349 = vmatmul.msk.f32.gmra.mxu2 %vm431_vm1, %v10219_v46  ;;  %v10736_v34 = vld [vmem:[%s12068_s27 + $0x1158] sm:$0xff] }
 0x264   : > { %10607 = vmatmul.msk.f32.gmra.mxu3 %vm431_vm1, %v10477_v63 }
 0x265   : > { %10865 = vmatmul.msk.f32.gmra.mxu0 %vm431_vm1, %v10735_v42 }
 0x266   : > { %v2622_v20 = vpop.f32.mrf.mxu2 }
 0x267   : > { %v2954_v23 = vadd.f32 %v2622_v20, %v1704_v39  ;;  %v3669_v31 = vpop.f32.mrf.mxu3  ;;  %v1706_v8 = vpop.f32.mrf.mxu1  ;;  %v215_v20 = vld [vmem:[%s12068_s27 + $0x160] sm:$0xff] }
 0x268   : > { %v1707_v48 = vadd.f32 %v1706_v8, %v12651_v16 }
 0x269   : > { %v4001_v60 = vadd.f32 %v3669_v31, %v2954_v23  ;;  %v10221_v23 = vld [vmem:[%s12068_s27 + $0x960] sm:$0xff] }
 0x26a   : > { %v4719_v12 = vpop.f32.mrf.mxu0  ;;  %10092 = vmatmul.msk.f32.gmra.mxu1 %vm431_vm1, %v214_v44  ;;  %v10479_v31 = vld [vmem:[%s12068_s27 + $0xd60] sm:$0xff] }
 0x26b   : > { %v13025_v46 = vadd.f32 %v4716_v36, %v4001_v60  ;;  %10350 = vmatmul.msk.f32.gmra.mxu2 %vm431_vm1, %v10220_v62  ;;  %v10737_v60 = vld [vmem:[%s12068_s27 + $0x1160] sm:$0xff] }
 0x26c   : > { %10608 = vmatmul.msk.f32.gmra.mxu3 %vm431_vm1, %v10478_v56 }
 0x26d   : > { %10866 = vmatmul.msk.f32.gmra.mxu0 %vm431_vm1, %v10736_v34 }
 0x26e   : > { %v2625_v50 = vpop.f32.mrf.mxu2 }
 0x26f   : > { %v2955_v63 = vadd.f32 %v2625_v50, %v1707_v48  ;;  %v3672_v42 = vpop.f32.mrf.mxu3  ;;  %v1709_v39 = vpop.f32.mrf.mxu1  ;;  %v216_v50 = vld [vmem:[%s12068_s27 + $0x168] sm:$0xff] }
 0x270   : > { %v1710_v16 = vadd.f32 %v1709_v39, %v12667_v59 }
 0x271   : > { %v4002_v36 = vadd.f32 %v3672_v42, %v2955_v63  ;;  %v10222_v63 = vld [vmem:[%s12068_s27 + $0x968] sm:$0xff] }
 0x272   : > { %v4722_v44 = vpop.f32.mrf.mxu0  ;;  %10093 = vmatmul.msk.f32.gmra.mxu1 %vm431_vm1, %v215_v20  ;;  %v10480_v42 = vld [vmem:[%s12068_s27 + $0xd68] sm:$0xff] }
 0x273   : > { %v13036_v62 = vadd.f32 %v4719_v12, %v4002_v36  ;;  %10351 = vmatmul.msk.f32.gmra.mxu2 %vm431_vm1, %v10221_v23  ;;  %v10738_v36 = vld [vmem:[%s12068_s27 + $0x1168] sm:$0xff] }
 0x274   : > { %10609 = vmatmul.msk.f32.gmra.mxu3 %vm431_vm1, %v10479_v31 }
 0x275   : > { %10867 = vmatmul.msk.f32.gmra.mxu0 %vm431_vm1, %v10737_v60 }
 0x276   : > { %v2628_v8 = vpop.f32.mrf.mxu2 }
 0x277   : > { %v2956_v56 = vadd.f32 %v2628_v8, %v1710_v16  ;;  %v3675_v34 = vpop.f32.mrf.mxu3  ;;  %v1712_v48 = vpop.f32.mrf.mxu1  ;;  %v217_v8 = vld [vmem:[%s12068_s27 + $0x170] sm:$0xff] }
 0x278   : > { %v1713_v59 = vadd.f32 %v1712_v48, %v12683_v43 }
 0x279   : > { %v4003_v12 = vadd.f32 %v3675_v34, %v2956_v56  ;;  %v10223_v56 = vld [vmem:[%s12068_s27 + $0x970] sm:$0xff] }
 0x27a   : > { %v4725_v20 = vpop.f32.mrf.mxu0  ;;  %10094 = vmatmul.msk.f32.gmra.mxu1 %vm431_vm1, %v216_v50  ;;  %v10481_v34 = vld [vmem:[%s12068_s27 + $0xd70] sm:$0xff] }
 0x27b   : > { %v13047_v23 = vadd.f32 %v4722_v44, %v4003_v12  ;;  %10352 = vmatmul.msk.f32.gmra.mxu2 %vm431_vm1, %v10222_v63  ;;  %v10739_v12 = vld [vmem:[%s12068_s27 + $0x1170] sm:$0xff] }
 0x27c   : > { %10610 = vmatmul.msk.f32.gmra.mxu3 %vm431_vm1, %v10480_v42 }
 0x27d   : > { %10868 = vmatmul.msk.f32.gmra.mxu0 %vm431_vm1, %v10738_v36 }
 0x27e   : > { %v2631_v39 = vpop.f32.mrf.mxu2 }
 0x27f   : > { %v2957_v31 = vadd.f32 %v2631_v39, %v1713_v59  ;;  %v3678_v60 = vpop.f32.mrf.mxu3  ;;  %v1715_v16 = vpop.f32.mrf.mxu1  ;;  %v218_v39 = vld [vmem:[%s12068_s27 + $0x178] sm:$0xff] }
 0x280   : > { %v1716_v43 = vadd.f32 %v1715_v16, %v12699_v27 }
 0x281   : > { %v4004_v44 = vadd.f32 %v3678_v60, %v2957_v31  ;;  %v10224_v31 = vld [vmem:[%s12068_s27 + $0x978] sm:$0xff] }
 0x282   : > { %v4728_v50 = vpop.f32.mrf.mxu0  ;;  %10095 = vmatmul.msk.f32.gmra.mxu1 %vm431_vm1, %v217_v8  ;;  %v10482_v60 = vld [vmem:[%s12068_s27 + $0xd78] sm:$0xff] }
 0x283   : > { %v13058_v63 = vadd.f32 %v4725_v20, %v4004_v44  ;;  %10353 = vmatmul.msk.f32.gmra.mxu2 %vm431_vm1, %v10223_v56  ;;  %v10740_v44 = vld [vmem:[%s12068_s27 + $0x1178] sm:$0xff] }
 0x284   : > { %10611 = vmatmul.msk.f32.gmra.mxu3 %vm431_vm1, %v10481_v34 }
 0x285   : > { %10869 = vmatmul.msk.f32.gmra.mxu0 %vm431_vm1, %v10739_v12 }
 0x286   : > { %v2634_v48 = vpop.f32.mrf.mxu2 }
 0x287   : > { %v2958_v42 = vadd.f32 %v2634_v48, %v1716_v43  ;;  %v3681_v36 = vpop.f32.mrf.mxu3  ;;  %v1718_v59 = vpop.f32.mrf.mxu1  ;;  %v219_v48 = vld [vmem:[%s12068_s27 + $0x180] sm:$0xff] }
 0x288   : > { %v1719_v27 = vadd.f32 %v1718_v59, %v12715_v11 }
 0x289   : > { %v4005_v20 = vadd.f32 %v3681_v36, %v2958_v42  ;;  %v10225_v42 = vld [vmem:[%s12068_s27 + $0x980] sm:$0xff] }
 0x28a   : > { %v4731_v8 = vpop.f32.mrf.mxu0  ;;  %10096 = vmatmul.msk.f32.gmra.mxu1 %vm431_vm1, %v218_v39  ;;  %v10483_v36 = vld [vmem:[%s12068_s27 + $0xd80] sm:$0xff] }
 0x28b   : > { %v13069_v56 = vadd.f32 %v4728_v50, %v4005_v20  ;;  %10354 = vmatmul.msk.f32.gmra.mxu2 %vm431_vm1, %v10224_v31  ;;  %v10741_v20 = vld [vmem:[%s12068_s27 + $0x1180] sm:$0xff] }
 0x28c   : > { %10612 = vmatmul.msk.f32.gmra.mxu3 %vm431_vm1, %v10482_v60 }
 0x28d   : > { %10870 = vmatmul.msk.f32.gmra.mxu0 %vm431_vm1, %v10740_v44 }
 0x28e   : > { %v2637_v16 = vpop.f32.mrf.mxu2 }
 0x28f   : > { %v2959_v34 = vadd.f32 %v2637_v16, %v1719_v27  ;;  %v3684_v12 = vpop.f32.mrf.mxu3  ;;  %v1721_v43 = vpop.f32.mrf.mxu1  ;;  %v220_v16 = vld [vmem:[%s12068_s27 + $0x188] sm:$0xff] }
 0x290   : > { %v1722_v11 = vadd.f32 %v1721_v43, %v12198_v5 }
 0x291   : > { %v4006_v50 = vadd.f32 %v3684_v12, %v2959_v34  ;;  %v10226_v34 = vld [vmem:[%s12068_s27 + $0x988] sm:$0xff] }
 0x292   : > { %v4734_v39 = vpop.f32.mrf.mxu0  ;;  %10097 = vmatmul.msk.f32.gmra.mxu1 %vm431_vm1, %v219_v48  ;;  %v10484_v12 = vld [vmem:[%s12068_s27 + $0xd88] sm:$0xff] }
 0x293   : > { %v13080_v31 = vadd.f32 %v4731_v8, %v4006_v50  ;;  %10355 = vmatmul.msk.f32.gmra.mxu2 %vm431_vm1, %v10225_v42  ;;  %v10742_v50 = vld [vmem:[%s12068_s27 + $0x1188] sm:$0xff] }
 0x294   : > { %10613 = vmatmul.msk.f32.gmra.mxu3 %vm431_vm1, %v10483_v36 }
 0x295   : > { %10871 = vmatmul.msk.f32.gmra.mxu0 %vm431_vm1, %v10741_v20 }
 0x296   : > { %v2640_v59 = vpop.f32.mrf.mxu2 }
 0x297   : > { %v2960_v60 = vadd.f32 %v2640_v59, %v1722_v11  ;;  %v3687_v44 = vpop.f32.mrf.mxu3  ;;  %v1724_v27 = vpop.f32.mrf.mxu1  ;;  %v221_v59 = vld [vmem:[%s12068_s27 + $0x190] sm:$0xff] }
 0x298   : > { %v1725_v5 = vadd.f32 %v1724_v27, %v12214_v13 }
 0x299   : > { %v4007_v8 = vadd.f32 %v3687_v44, %v2960_v60  ;;  %v10227_v60 = vld [vmem:[%s12068_s27 + $0x990] sm:$0xff] }
 0x29a   : > { %v4737_v48 = vpop.f32.mrf.mxu0  ;;  %10098 = vmatmul.msk.f32.gmra.mxu1 %vm431_vm1, %v220_v16  ;;  %v10485_v44 = vld [vmem:[%s12068_s27 + $0xd90] sm:$0xff] }
 0x29b   : > { %v13091_v42 = vadd.f32 %v4734_v39, %v4007_v8  ;;  %10356 = vmatmul.msk.f32.gmra.mxu2 %vm431_vm1, %v10226_v34  ;;  %v10743_v8 = vld [vmem:[%s12068_s27 + $0x1190] sm:$0xff] }
 0x29c   : > { %10614 = vmatmul.msk.f32.gmra.mxu3 %vm431_vm1, %v10484_v12 }
 0x29d   : > { %10872 = vmatmul.msk.f32.gmra.mxu0 %vm431_vm1, %v10742_v50 }
 0x29e   : > { %v2643_v43 = vpop.f32.mrf.mxu2 }
 0x29f   : > { %v2961_v36 = vadd.f32 %v2643_v43, %v1725_v5  ;;  %v3690_v20 = vpop.f32.mrf.mxu3  ;;  %v1727_v11 = vpop.f32.mrf.mxu1  ;;  %v222_v43 = vld [vmem:[%s12068_s27 + $0x198] sm:$0xff] }
 0x2a0   : > { %v1728_v13 = vadd.f32 %v1727_v11, %v12230_v21 }
 0x2a1   : > { %v4008_v39 = vadd.f32 %v3690_v20, %v2961_v36  ;;  %v10228_v36 = vld [vmem:[%s12068_s27 + $0x998] sm:$0xff] }
 0x2a2   : > { %v4740_v16 = vpop.f32.mrf.mxu0  ;;  %10099 = vmatmul.msk.f32.gmra.mxu1 %vm431_vm1, %v221_v59  ;;  %v10486_v20 = vld [vmem:[%s12068_s27 + $0xd98] sm:$0xff] }
 0x2a3   : > { %v13102_v34 = vadd.f32 %v4737_v48, %v4008_v39  ;;  %10357 = vmatmul.msk.f32.gmra.mxu2 %vm431_vm1, %v10227_v60  ;;  %v10744_v39 = vld [vmem:[%s12068_s27 + $0x1198] sm:$0xff] }
 0x2a4   : > { %10615 = vmatmul.msk.f32.gmra.mxu3 %vm431_vm1, %v10485_v44 }
 0x2a5   : > { %10873 = vmatmul.msk.f32.gmra.mxu0 %vm431_vm1, %v10743_v8 }
 0x2a6   : > { %v2646_v27 = vpop.f32.mrf.mxu2 }
 0x2a7   : > { %v2962_v12 = vadd.f32 %v2646_v27, %v1728_v13  ;;  %v3693_v50 = vpop.f32.mrf.mxu3  ;;  %v1730_v5 = vpop.f32.mrf.mxu1  ;;  %v223_v27 = vld [vmem:[%s12068_s27 + $0x1a0] sm:$0xff] }
 0x2a8   : > { %v1731_v21 = vadd.f32 %v1730_v5, %v12246_v29 }
 0x2a9   : > { %v4009_v48 = vadd.f32 %v3693_v50, %v2962_v12  ;;  %v10229_v12 = vld [vmem:[%s12068_s27 + $0x9a0] sm:$0xff] }
 0x2aa   : > { %v4743_v59 = vpop.f32.mrf.mxu0  ;;  %10100 = vmatmul.msk.f32.gmra.mxu1 %vm431_vm1, %v222_v43  ;;  %v10487_v50 = vld [vmem:[%s12068_s27 + $0xda0] sm:$0xff] }
 0x2ab   : > { %v13113_v60 = vadd.f32 %v4740_v16, %v4009_v48  ;;  %10358 = vmatmul.msk.f32.gmra.mxu2 %vm431_vm1, %v10228_v36  ;;  %v10745_v48 = vld [vmem:[%s12068_s27 + $0x11a0] sm:$0xff] }
 0x2ac   : > { %10616 = vmatmul.msk.f32.gmra.mxu3 %vm431_vm1, %v10486_v20 }
 0x2ad   : > { %10874 = vmatmul.msk.f32.gmra.mxu0 %vm431_vm1, %v10744_v39 }
 0x2ae   : > { %v2649_v11 = vpop.f32.mrf.mxu2 }
 0x2af   : > { %v2963_v44 = vadd.f32 %v2649_v11, %v1731_v21  ;;  %v3696_v8 = vpop.f32.mrf.mxu3  ;;  %v1733_v13 = vpop.f32.mrf.mxu1  ;;  %v224_v11 = vld [vmem:[%s12068_s27 + $0x1a8] sm:$0xff] }
 0x2b0   : > { %v1734_v29 = vadd.f32 %v1733_v13, %v12262_v37 }
 0x2b1   : > { %v4010_v16 = vadd.f32 %v3696_v8, %v2963_v44  ;;  %v10230_v44 = vld [vmem:[%s12068_s27 + $0x9a8] sm:$0xff] }
 0x2b2   : > { %v4746_v43 = vpop.f32.mrf.mxu0  ;;  %10101 = vmatmul.msk.f32.gmra.mxu1 %vm431_vm1, %v223_v27  ;;  %v10488_v8 = vld [vmem:[%s12068_s27 + $0xda8] sm:$0xff] }
 0x2b3   : > { %v13124_v36 = vadd.f32 %v4743_v59, %v4010_v16  ;;  %10359 = vmatmul.msk.f32.gmra.mxu2 %vm431_vm1, %v10229_v12  ;;  %v10746_v16 = vld [vmem:[%s12068_s27 + $0x11a8] sm:$0xff] }
 0x2b4   : > { %10617 = vmatmul.msk.f32.gmra.mxu3 %vm431_vm1, %v10487_v50 }
 0x2b5   : > { %10875 = vmatmul.msk.f32.gmra.mxu0 %vm431_vm1, %v10745_v48 }
 0x2b6   : > { %v2652_v5 = vpop.f32.mrf.mxu2 }
 0x2b7   : > { %v2964_v20 = vadd.f32 %v2652_v5, %v1734_v29  ;;  %v3699_v39 = vpop.f32.mrf.mxu3  ;;  %v1736_v21 = vpop.f32.mrf.mxu1  ;;  %v225_v5 = vld [vmem:[%s12068_s27 + $0x1b0] sm:$0xff] }
 0x2b8   : > { %v1737_v37 = vadd.f32 %v1736_v21, %v12278_v45 }
 0x2b9   : > { %v4011_v59 = vadd.f32 %v3699_v39, %v2964_v20  ;;  %v10231_v20 = vld [vmem:[%s12068_s27 + $0x9b0] sm:$0xff] }
 0x2ba   : > { %v4749_v27 = vpop.f32.mrf.mxu0  ;;  %10102 = vmatmul.msk.f32.gmra.mxu1 %vm431_vm1, %v224_v11  ;;  %v10489_v39 = vld [vmem:[%s12068_s27 + $0xdb0] sm:$0xff] }
 0x2bb   : > { %v13135_v12 = vadd.f32 %v4746_v43, %v4011_v59  ;;  %10360 = vmatmul.msk.f32.gmra.mxu2 %vm431_vm1, %v10230_v44  ;;  %v10747_v59 = vld [vmem:[%s12068_s27 + $0x11b0] sm:$0xff] }
 0x2bc   : > { %10618 = vmatmul.msk.f32.gmra.mxu3 %vm431_vm1, %v10488_v8 }
 0x2bd   : > { %10876 = vmatmul.msk.f32.gmra.mxu0 %vm431_vm1, %v10746_v16 }
 0x2be   : > { %v2655_v13 = vpop.f32.mrf.mxu2 }
 0x2bf   : > { %v2965_v50 = vadd.f32 %v2655_v13, %v1737_v37  ;;  %v3702_v48 = vpop.f32.mrf.mxu3  ;;  %v1739_v29 = vpop.f32.mrf.mxu1  ;;  %v226_v13 = vld [vmem:[%s12068_s27 + $0x1b8] sm:$0xff] }
 0x2c0   : > { %v1740_v45 = vadd.f32 %v1739_v29, %v12294_v53 }
 0x2c1   : > { %v4012_v43 = vadd.f32 %v3702_v48, %v2965_v50  ;;  %v10232_v50 = vld [vmem:[%s12068_s27 + $0x9b8] sm:$0xff] }
 0x2c2   : > { %v4752_v11 = vpop.f32.mrf.mxu0  ;;  %10103 = vmatmul.msk.f32.gmra.mxu1 %vm431_vm1, %v225_v5  ;;  %v10490_v48 = vld [vmem:[%s12068_s27 + $0xdb8] sm:$0xff] }
 0x2c3   : > { %v13146_v44 = vadd.f32 %v4749_v27, %v4012_v43  ;;  %10361 = vmatmul.msk.f32.gmra.mxu2 %vm431_vm1, %v10231_v20  ;;  %v10748_v43 = vld [vmem:[%s12068_s27 + $0x11b8] sm:$0xff] }
 0x2c4   : > { %10619 = vmatmul.msk.f32.gmra.mxu3 %vm431_vm1, %v10489_v39 }
 0x2c5   : > { %10877 = vmatmul.msk.f32.gmra.mxu0 %vm431_vm1, %v10747_v59 }
 0x2c6   : > { %v2658_v21 = vpop.f32.mrf.mxu2 }
 0x2c7   : > { %v2966_v8 = vadd.f32 %v2658_v21, %v1740_v45  ;;  %v3705_v16 = vpop.f32.mrf.mxu3  ;;  %v1742_v37 = vpop.f32.mrf.mxu1  ;;  %v227_v21 = vld [vmem:[%s12068_s27 + $0x1c0] sm:$0xff] }
 0x2c8   : > { %v1743_v53 = vadd.f32 %v1742_v37, %v12310_v61 }
 0x2c9   : > { %v4013_v27 = vadd.f32 %v3705_v16, %v2966_v8  ;;  %v10233_v8 = vld [vmem:[%s12068_s27 + $0x9c0] sm:$0xff] }
 0x2ca   : > { %v4755_v5 = vpop.f32.mrf.mxu0  ;;  %10104 = vmatmul.msk.f32.gmra.mxu1 %vm431_vm1, %v226_v13  ;;  %v10491_v16 = vld [vmem:[%s12068_s27 + $0xdc0] sm:$0xff] }
 0x2cb   : > { %v13157_v20 = vadd.f32 %v4752_v11, %v4013_v27  ;;  %10362 = vmatmul.msk.f32.gmra.mxu2 %vm431_vm1, %v10232_v50  ;;  %v10749_v27 = vld [vmem:[%s12068_s27 + $0x11c0] sm:$0xff] }
 0x2cc   : > { %10620 = vmatmul.msk.f32.gmra.mxu3 %vm431_vm1, %v10490_v48 }
 0x2cd   : > { %10878 = vmatmul.msk.f32.gmra.mxu0 %vm431_vm1, %v10748_v43 }
 0x2ce   : > { %v2661_v29 = vpop.f32.mrf.mxu2 }
 0x2cf   : > { %v2967_v39 = vadd.f32 %v2661_v29, %v1743_v53  ;;  %v3708_v59 = vpop.f32.mrf.mxu3  ;;  %v1745_v45 = vpop.f32.mrf.mxu1  ;;  %v228_v29 = vld [vmem:[%s12068_s27 + $0x1c8] sm:$0xff] }
 0x2d0   : > { %v1746_v61 = vadd.f32 %v1745_v45, %v12326_v6 }
 0x2d1   : > { %v4014_v11 = vadd.f32 %v3708_v59, %v2967_v39  ;;  %v10234_v39 = vld [vmem:[%s12068_s27 + $0x9c8] sm:$0xff] }
 0x2d2   : > { %v4758_v13 = vpop.f32.mrf.mxu0  ;;  %10105 = vmatmul.msk.f32.gmra.mxu1 %vm431_vm1, %v227_v21  ;;  %v10492_v59 = vld [vmem:[%s12068_s27 + $0xdc8] sm:$0xff] }
 0x2d3   : > { %v13168_v50 = vadd.f32 %v4755_v5, %v4014_v11  ;;  %10363 = vmatmul.msk.f32.gmra.mxu2 %vm431_vm1, %v10233_v8  ;;  %v10750_v11 = vld [vmem:[%s12068_s27 + $0x11c8] sm:$0xff] }
 0x2d4   : > { %10621 = vmatmul.msk.f32.gmra.mxu3 %vm431_vm1, %v10491_v16 }
 0x2d5   : > { %10879 = vmatmul.msk.f32.gmra.mxu0 %vm431_vm1, %v10749_v27 }
 0x2d6   : > { %v2664_v37 = vpop.f32.mrf.mxu2 }
 0x2d7   : > { %v2968_v48 = vadd.f32 %v2664_v37, %v1746_v61  ;;  %v3711_v43 = vpop.f32.mrf.mxu3  ;;  %v1748_v53 = vpop.f32.mrf.mxu1  ;;  %v229_v37 = vld [vmem:[%s12068_s27 + $0x1d0] sm:$0xff] }
 0x2d8   : > { %v1749_v6 = vadd.f32 %v1748_v53, %v12342_v22 }
 0x2d9   : > { %v4015_v5 = vadd.f32 %v3711_v43, %v2968_v48  ;;  %v10235_v48 = vld [vmem:[%s12068_s27 + $0x9d0] sm:$0xff] }
 0x2da   : > { %v4761_v21 = vpop.f32.mrf.mxu0  ;;  %10106 = vmatmul.msk.f32.gmra.mxu1 %vm431_vm1, %v228_v29  ;;  %v10493_v43 = vld [vmem:[%s12068_s27 + $0xdd0] sm:$0xff] }
 0x2db   : > { %v13179_v8 = vadd.f32 %v4758_v13, %v4015_v5  ;;  %10364 = vmatmul.msk.f32.gmra.mxu2 %vm431_vm1, %v10234_v39  ;;  %v10751_v5 = vld [vmem:[%s12068_s27 + $0x11d0] sm:$0xff] }
 0x2dc   : > { %10622 = vmatmul.msk.f32.gmra.mxu3 %vm431_vm1, %v10492_v59 }
 0x2dd   : > { %10880 = vmatmul.msk.f32.gmra.mxu0 %vm431_vm1, %v10750_v11 }
 0x2de   : > { %v2667_v45 = vpop.f32.mrf.mxu2 }
 0x2df   : > { %v2969_v16 = vadd.f32 %v2667_v45, %v1749_v6  ;;  %v3714_v27 = vpop.f32.mrf.mxu3  ;;  %v1751_v61 = vpop.f32.mrf.mxu1  ;;  %v230_v45 = vld [vmem:[%s12068_s27 + $0x1d8] sm:$0xff] }
 0x2e0   : > { %v1752_v22 = vadd.f32 %v1751_v61, %v12358_v38 }
 0x2e1   : > { %v4016_v13 = vadd.f32 %v3714_v27, %v2969_v16  ;;  %v10236_v16 = vld [vmem:[%s12068_s27 + $0x9d8] sm:$0xff] }
 0x2e2   : > { %v4764_v29 = vpop.f32.mrf.mxu0  ;;  %10107 = vmatmul.msk.f32.gmra.mxu1 %vm431_vm1, %v229_v37  ;;  %v10494_v27 = vld [vmem:[%s12068_s27 + $0xdd8] sm:$0xff] }
 0x2e3   : > { %v13190_v39 = vadd.f32 %v4761_v21, %v4016_v13  ;;  %10365 = vmatmul.msk.f32.gmra.mxu2 %vm431_vm1, %v10235_v48  ;;  %v10752_v13 = vld [vmem:[%s12068_s27 + $0x11d8] sm:$0xff] }
 0x2e4   : > { %10623 = vmatmul.msk.f32.gmra.mxu3 %vm431_vm1, %v10493_v43 }
 0x2e5   : > { %10881 = vmatmul.msk.f32.gmra.mxu0 %vm431_vm1, %v10751_v5 }
 0x2e6   : > { %v2670_v53 = vpop.f32.mrf.mxu2 }
 0x2e7   : > { %v2970_v59 = vadd.f32 %v2670_v53, %v1752_v22  ;;  %v3717_v11 = vpop.f32.mrf.mxu3  ;;  %v1754_v6 = vpop.f32.mrf.mxu1  ;;  %v231_v53 = vld [vmem:[%s12068_s27 + $0x1e0] sm:$0xff] }
 0x2e8   : > { %v1755_v38 = vadd.f32 %v1754_v6, %v12374_v54 }
 0x2e9   : > { %v4017_v21 = vadd.f32 %v3717_v11, %v2970_v59  ;;  %v10237_v59 = vld [vmem:[%s12068_s27 + $0x9e0] sm:$0xff] }
 0x2ea   : > { %v4767_v37 = vpop.f32.mrf.mxu0  ;;  %10108 = vmatmul.msk.f32.gmra.mxu1 %vm431_vm1, %v230_v45  ;;  %v10495_v11 = vld [vmem:[%s12068_s27 + $0xde0] sm:$0xff] }
 0x2eb   : > { %v13201_v48 = vadd.f32 %v4764_v29, %v4017_v21  ;;  %10366 = vmatmul.msk.f32.gmra.mxu2 %vm431_vm1, %v10236_v16  ;;  %v10753_v21 = vld [vmem:[%s12068_s27 + $0x11e0] sm:$0xff] }
 0x2ec   : > { %10624 = vmatmul.msk.f32.gmra.mxu3 %vm431_vm1, %v10494_v27 }
 0x2ed   : > { %10882 = vmatmul.msk.f32.gmra.mxu0 %vm431_vm1, %v10752_v13 }
 0x2ee   : > { %v2673_v61 = vpop.f32.mrf.mxu2 }
 0x2ef   : > { %v2971_v43 = vadd.f32 %v2673_v61, %v1755_v38  ;;  %v3720_v5 = vpop.f32.mrf.mxu3  ;;  %v1757_v22 = vpop.f32.mrf.mxu1  ;;  %v232_v61 = vld [vmem:[%s12068_s27 + $0x1e8] sm:$0xff] }
 0x2f0   : > { %v1758_v54 = vadd.f32 %v1757_v22, %v12390_v7 }
 0x2f1   : > { %v4018_v29 = vadd.f32 %v3720_v5, %v2971_v43  ;;  %v10238_v43 = vld [vmem:[%s12068_s27 + $0x9e8] sm:$0xff] }
 0x2f2   : > { %v4770_v45 = vpop.f32.mrf.mxu0  ;;  %10109 = vmatmul.msk.f32.gmra.mxu1 %vm431_vm1, %v231_v53  ;;  %v10496_v5 = vld [vmem:[%s12068_s27 + $0xde8] sm:$0xff] }
 0x2f3   : > { %v13212_v16 = vadd.f32 %v4767_v37, %v4018_v29  ;;  %10367 = vmatmul.msk.f32.gmra.mxu2 %vm431_vm1, %v10237_v59  ;;  %v10754_v29 = vld [vmem:[%s12068_s27 + $0x11e8] sm:$0xff] }
 0x2f4   : > { %10625 = vmatmul.msk.f32.gmra.mxu3 %vm431_vm1, %v10495_v11 }
 0x2f5   : > { %10883 = vmatmul.msk.f32.gmra.mxu0 %vm431_vm1, %v10753_v21 }
 0x2f6   : > { %v2676_v6 = vpop.f32.mrf.mxu2 }
 0x2f7   : > { %v2972_v27 = vadd.f32 %v2676_v6, %v1758_v54  ;;  %v3723_v13 = vpop.f32.mrf.mxu3  ;;  %v1760_v38 = vpop.f32.mrf.mxu1  ;;  %v233_v6 = vld [vmem:[%s12068_s27 + $0x1f0] sm:$0xff] }
 0x2f8   : > { %v1761_v7 = vadd.f32 %v1760_v38, %v12418_v47 }
 0x2f9   : > { %v4019_v37 = vadd.f32 %v3723_v13, %v2972_v27  ;;  %v10239_v27 = vld [vmem:[%s12068_s27 + $0x9f0] sm:$0xff] }
 0x2fa   : > { %v4773_v53 = vpop.f32.mrf.mxu0  ;;  %10110 = vmatmul.msk.f32.gmra.mxu1 %vm431_vm1, %v232_v61  ;;  %v10497_v13 = vld [vmem:[%s12068_s27 + $0xdf0] sm:$0xff] }
 0x2fb   : > { %v13223_v59 = vadd.f32 %v4770_v45, %v4019_v37  ;;  %10368 = vmatmul.msk.f32.gmra.mxu2 %vm431_vm1, %v10238_v43  ;;  %v10755_v37 = vld [vmem:[%s12068_s27 + $0x11f0] sm:$0xff] }
 0x2fc   : > { %10626 = vmatmul.msk.f32.gmra.mxu3 %vm431_vm1, %v10496_v5 }
 0x2fd   : > { %10884 = vmatmul.msk.f32.gmra.mxu0 %vm431_vm1, %v10754_v29 }
 0x2fe   : > { %v2679_v22 = vpop.f32.mrf.mxu2 }
 0x2ff   : > { %v2973_v11 = vadd.f32 %v2679_v22, %v1761_v7  ;;  %v3726_v21 = vpop.f32.mrf.mxu3  ;;  %v1763_v54 = vpop.f32.mrf.mxu1  ;;  %v234_v22 = vld [vmem:[%s12068_s27 + $0x1f8] sm:$0xff] }
 0x300   : > { %v1764_v47 = vadd.f32 %v1763_v54, %v12438_v26 }
 0x301   : > { %v4020_v45 = vadd.f32 %v3726_v21, %v2973_v11  ;;  %v10240_v11 = vld [vmem:[%s12068_s27 + $0x9f8] sm:$0xff] }
 0x302   : > { %v4776_v61 = vpop.f32.mrf.mxu0  ;;  %10111 = vmatmul.msk.f32.gmra.mxu1 %vm431_vm1, %v233_v6  ;;  %v10498_v21 = vld [vmem:[%s12068_s27 + $0xdf8] sm:$0xff] }
 0x303   : > { %v13234_v43 = vadd.f32 %v4773_v53, %v4020_v45  ;;  %10369 = vmatmul.msk.f32.gmra.mxu2 %vm431_vm1, %v10239_v27  ;;  %v10756_v45 = vld [vmem:[%s12068_s27 + $0x11f8] sm:$0xff] }
 0x304   : > { %10627 = vmatmul.msk.f32.gmra.mxu3 %vm431_vm1, %v10497_v13 }
 0x305   : > { %10885 = vmatmul.msk.f32.gmra.mxu0 %vm431_vm1, %v10755_v37 }
 0x306   : > { %v2682_v38 = vpop.f32.mrf.mxu2 }
 0x307   : > { %v2974_v5 = vadd.f32 %v2682_v38, %v1764_v47  ;;  %v3729_v29 = vpop.f32.mrf.mxu3  ;;  %v1766_v7 = vpop.f32.mrf.mxu1  ;;  %v235_v38 = vld [vmem:[%s12068_s27 + $0x200] sm:$0xff] }
 0x308   : > { %v1767_v26 = vadd.f32 %v1766_v7, %v12454_v24  ;;  %v15661_v24 = vld [vmem:[#allocation34_spill] sm:$0xff] }
 0x309   : > { %v4021_v53 = vadd.f32 %v3729_v29, %v2974_v5  ;;  %v10241_v5 = vld [vmem:[%s12068_s27 + $0xa00] sm:$0xff] }
 0x30a   : > { %v4779_v6 = vpop.f32.mrf.mxu0  ;;  %10112 = vmatmul.msk.f32.gmra.mxu1 %vm431_vm1, %v234_v22  ;;  %v10499_v29 = vld [vmem:[%s12068_s27 + $0xe00] sm:$0xff] }
 0x30b   : > { %v13245_v27 = vadd.f32 %v4776_v61, %v4021_v53  ;;  %10370 = vmatmul.msk.f32.gmra.mxu2 %vm431_vm1, %v10240_v11  ;;  %v10757_v53 = vld [vmem:[%s12068_s27 + $0x1200] sm:$0xff] }
 0x30c   : > { %10628 = vmatmul.msk.f32.gmra.mxu3 %vm431_vm1, %v10498_v21 }
 0x30d   : > { %10886 = vmatmul.msk.f32.gmra.mxu0 %vm431_vm1, %v10756_v45 }
 0x30e   : > { %v2685_v54 = vpop.f32.mrf.mxu2 }
 0x30f   : > { %v2975_v13 = vadd.f32 %v2685_v54, %v1767_v26  ;;  %v3732_v37 = vpop.f32.mrf.mxu3  ;;  %v1769_v47 = vpop.f32.mrf.mxu1 }
 0x310   : > { %v1770_v7 = vadd.f32 %v1769_v47, %v15661_v24  ;;  %v15663_v47 = vld [vmem:[#allocation37_spill] sm:$0xff] }
 0x311   : > { %v4022_v61 = vadd.f32 %v3732_v37, %v2975_v13  ;;  %v236_v13 = vld [vmem:[%s12068_s27 + $0x208] sm:$0xff] }
 0x312   : > { %v4782_v22 = vpop.f32.mrf.mxu0  ;;  %10113 = vmatmul.msk.f32.gmra.mxu1 %vm431_vm1, %v235_v38  ;;  %v10242_v37 = vld [vmem:[%s12068_s27 + $0xa08] sm:$0xff] }
 0x313   : > { %v13256_v11 = vadd.f32 %v4779_v6, %v4022_v61  ;;  %10371 = vmatmul.msk.f32.gmra.mxu2 %vm431_vm1, %v10241_v5  ;;  %v10500_v61 = vld [vmem:[%s12068_s27 + $0xe08] sm:$0xff] }
 0x314   : > { %10629 = vmatmul.msk.f32.gmra.mxu3 %vm431_vm1, %v10499_v29 }
 0x315   : > { %15660 = vst [vmem:[#allocation82_spill] sm:$0xff] %v13256_v11  ;;  %10887 = vmatmul.msk.f32.gmra.mxu0 %vm431_vm1, %v10757_v53  ;;  %v10758_v11 = vld [vmem:[%s12068_s27 + $0x1208] sm:$0xff] }
 0x316   : > { %v2688_v21 = vpop.f32.mrf.mxu2 }
 0x317   : > { %v2976_v45 = vadd.f32 %v2688_v21, %v1770_v7  ;;  %v3735_v26 = vpop.f32.mrf.mxu3  ;;  %v1772_v54 = vpop.f32.mrf.mxu1 }
 0x318   : > { %v1773_v29 = vadd.f32 %v1772_v54, %v15663_v47 }
 0x319   : > { %v4023_v6 = vadd.f32 %v3735_v26, %v2976_v45  ;;  %v237_v45 = vld [vmem:[%s12068_s27 + $0x210] sm:$0xff] }
 0x31a   : > { %v4785_v38 = vpop.f32.mrf.mxu0  ;;  %10114 = vmatmul.msk.f32.gmra.mxu1 %vm431_vm1, %v236_v13  ;;  %v10243_v26 = vld [vmem:[%s12068_s27 + $0xa10] sm:$0xff] }
 0x31b   : > { %v13267_v5 = vadd.f32 %v4782_v22, %v4023_v6  ;;  %10372 = vmatmul.msk.f32.gmra.mxu2 %vm431_vm1, %v10242_v37  ;;  %v10501_v6 = vld [vmem:[%s12068_s27 + $0xe10] sm:$0xff] }
 0x31c   : > { %10630 = vmatmul.msk.f32.gmra.mxu3 %vm431_vm1, %v10500_v61 }
 0x31d   : > { %15662 = vst [vmem:[#allocation34_spill] sm:$0xff] %v13267_v5  ;;  %10888 = vmatmul.msk.f32.gmra.mxu0 %vm431_vm1, %v10758_v11  ;;  %v10759_v5 = vld [vmem:[%s12068_s27 + $0x1210] sm:$0xff] }
 0x31e   : > { %v2691_v53 = vpop.f32.mrf.mxu2  ;;  %v15665_v11 = vld [vmem:[#allocation40_spill] sm:$0xff] }
 0x31f   : > { %v2977_v24 = vadd.f32 %v2691_v53, %v1773_v29  ;;  %v3738_v7 = vpop.f32.mrf.mxu3  ;;  %v1775_v21 = vpop.f32.mrf.mxu1 }
 0x320   : > { %v1776_v54 = vadd.f32 %v1775_v21, %v15665_v11 }
 0x321   : > { %v4024_v22 = vadd.f32 %v3738_v7, %v2977_v24  ;;  %v238_v24 = vld [vmem:[%s12068_s27 + $0x218] sm:$0xff] }
 0x322   : > { %v4788_v13 = vpop.f32.mrf.mxu0  ;;  %10115 = vmatmul.msk.f32.gmra.mxu1 %vm431_vm1, %v237_v45  ;;  %v10244_v7 = vld [vmem:[%s12068_s27 + $0xa18] sm:$0xff] }
 0x323   : > { %v13278_v37 = vadd.f32 %v4785_v38, %v4024_v22  ;;  %10373 = vmatmul.msk.f32.gmra.mxu2 %vm431_vm1, %v10243_v26  ;;  %v10502_v22 = vld [vmem:[%s12068_s27 + $0xe18] sm:$0xff] }
 0x324   : > { %10631 = vmatmul.msk.f32.gmra.mxu3 %vm431_vm1, %v10501_v6 }
 0x325   : > { %15664 = vst [vmem:[#allocation37_spill] sm:$0xff] %v13278_v37  ;;  %10889 = vmatmul.msk.f32.gmra.mxu0 %vm431_vm1, %v10759_v5  ;;  %v10760_v37 = vld [vmem:[%s12068_s27 + $0x1218] sm:$0xff]  ;;  %v15667_v5 = vld [vmem:[#allocation43_spill] sm:$0xff] }
 0x326   : > { %v2694_v61 = vpop.f32.mrf.mxu2 }
 0x327   : > { %v2978_v47 = vadd.f32 %v2694_v61, %v1776_v54  ;;  %v3741_v29 = vpop.f32.mrf.mxu3  ;;  %v1778_v53 = vpop.f32.mrf.mxu1 }
 0x328   : > { %v1779_v21 = vadd.f32 %v1778_v53, %v15667_v5 }
 0x329   : > { %v4025_v38 = vadd.f32 %v3741_v29, %v2978_v47  ;;  %v239_v47 = vld [vmem:[%s12068_s27 + $0x220] sm:$0xff] }
 0x32a   : > { %v4791_v45 = vpop.f32.mrf.mxu0  ;;  %10116 = vmatmul.msk.f32.gmra.mxu1 %vm431_vm1, %v238_v24  ;;  %v10245_v29 = vld [vmem:[%s12068_s27 + $0xa20] sm:$0xff] }
 0x32b   : > { %v13289_v26 = vadd.f32 %v4788_v13, %v4025_v38  ;;  %10374 = vmatmul.msk.f32.gmra.mxu2 %vm431_vm1, %v10244_v7  ;;  %v10503_v38 = vld [vmem:[%s12068_s27 + $0xe20] sm:$0xff] }
 0x32c   : > { %10632 = vmatmul.msk.f32.gmra.mxu3 %vm431_vm1, %v10502_v22 }
 0x32d   : > { %15666 = vst [vmem:[#allocation40_spill] sm:$0xff] %v13289_v26  ;;  %10890 = vmatmul.msk.f32.gmra.mxu0 %vm431_vm1, %v10760_v37  ;;  %v10761_v26 = vld [vmem:[%s12068_s27 + $0x1220] sm:$0xff] }
 0x32e   : > { %v2697_v6 = vpop.f32.mrf.mxu2  ;;  %v15669_v37 = vld [vmem:[#allocation46_spill] sm:$0xff] }
 0x32f   : > { %v2979_v11 = vadd.f32 %v2697_v6, %v1779_v21  ;;  %v3744_v54 = vpop.f32.mrf.mxu3  ;;  %v1781_v61 = vpop.f32.mrf.mxu1 }
 0x330   : > { %v1782_v53 = vadd.f32 %v1781_v61, %v15669_v37 }
 0x331   : > { %v4026_v13 = vadd.f32 %v3744_v54, %v2979_v11  ;;  %v240_v11 = vld [vmem:[%s12068_s27 + $0x228] sm:$0xff] }
 0x332   : > { %v4794_v24 = vpop.f32.mrf.mxu0  ;;  %10117 = vmatmul.msk.f32.gmra.mxu1 %vm431_vm1, %v239_v47  ;;  %v10246_v54 = vld [vmem:[%s12068_s27 + $0xa28] sm:$0xff] }
 0x333   : > { %v13300_v7 = vadd.f32 %v4791_v45, %v4026_v13  ;;  %10375 = vmatmul.msk.f32.gmra.mxu2 %vm431_vm1, %v10245_v29  ;;  %v10504_v13 = vld [vmem:[%s12068_s27 + $0xe28] sm:$0xff] }
 0x334   : > { %10633 = vmatmul.msk.f32.gmra.mxu3 %vm431_vm1, %v10503_v38 }
 0x335   : > { %15668 = vst [vmem:[#allocation43_spill] sm:$0xff] %v13300_v7  ;;  %10891 = vmatmul.msk.f32.gmra.mxu0 %vm431_vm1, %v10761_v26  ;;  %v10762_v7 = vld [vmem:[%s12068_s27 + $0x1228] sm:$0xff]  ;;  %v15671_v26 = vld [vmem:[#allocation49_spill] sm:$0xff] }
 0x336   : > { %v2700_v22 = vpop.f32.mrf.mxu2 }
 0x337   : > { %v2980_v5 = vadd.f32 %v2700_v22, %v1782_v53  ;;  %v3747_v21 = vpop.f32.mrf.mxu3  ;;  %v1784_v6 = vpop.f32.mrf.mxu1 }
 0x338   : > { %v1785_v61 = vadd.f32 %v1784_v6, %v15671_v26 }
 0x339   : > { %v4027_v45 = vadd.f32 %v3747_v21, %v2980_v5  ;;  %v241_v5 = vld [vmem:[%s12068_s27 + $0x230] sm:$0xff] }
 0x33a   : > { %v4797_v47 = vpop.f32.mrf.mxu0  ;;  %10118 = vmatmul.msk.f32.gmra.mxu1 %vm431_vm1, %v240_v11  ;;  %v10247_v21 = vld [vmem:[%s12068_s27 + $0xa30] sm:$0xff] }
 0x33b   : > { %v13311_v29 = vadd.f32 %v4794_v24, %v4027_v45  ;;  %10376 = vmatmul.msk.f32.gmra.mxu2 %vm431_vm1, %v10246_v54  ;;  %v10505_v45 = vld [vmem:[%s12068_s27 + $0xe30] sm:$0xff] }
 0x33c   : > { %10634 = vmatmul.msk.f32.gmra.mxu3 %vm431_vm1, %v10504_v13 }
 0x33d   : > { %15670 = vst [vmem:[#allocation46_spill] sm:$0xff] %v13311_v29  ;;  %10892 = vmatmul.msk.f32.gmra.mxu0 %vm431_vm1, %v10762_v7  ;;  %v10763_v29 = vld [vmem:[%s12068_s27 + $0x1230] sm:$0xff] }
 0x33e   : > { %v2703_v38 = vpop.f32.mrf.mxu2  ;;  %v15673_v7 = vld [vmem:[#allocation52_spill] sm:$0xff] }
 0x33f   : > { %v2981_v37 = vadd.f32 %v2703_v38, %v1785_v61  ;;  %v3750_v53 = vpop.f32.mrf.mxu3  ;;  %v1787_v22 = vpop.f32.mrf.mxu1 }
 0x340   : > { %v1788_v6 = vadd.f32 %v1787_v22, %v15673_v7 }
 0x341   : > { %v4028_v24 = vadd.f32 %v3750_v53, %v2981_v37  ;;  %v242_v37 = vld [vmem:[%s12068_s27 + $0x238] sm:$0xff] }
 0x342   : > { %v4800_v11 = vpop.f32.mrf.mxu0  ;;  %10119 = vmatmul.msk.f32.gmra.mxu1 %vm431_vm1, %v241_v5  ;;  %v10248_v53 = vld [vmem:[%s12068_s27 + $0xa38] sm:$0xff] }
 0x343   : > { %v13322_v54 = vadd.f32 %v4797_v47, %v4028_v24  ;;  %10377 = vmatmul.msk.f32.gmra.mxu2 %vm431_vm1, %v10247_v21  ;;  %v10506_v24 = vld [vmem:[%s12068_s27 + $0xe38] sm:$0xff] }
 0x344   : > { %10635 = vmatmul.msk.f32.gmra.mxu3 %vm431_vm1, %v10505_v45 }
 0x345   : > { %15672 = vst [vmem:[#allocation49_spill] sm:$0xff] %v13322_v54  ;;  %10893 = vmatmul.msk.f32.gmra.mxu0 %vm431_vm1, %v10763_v29  ;;  %v10764_v54 = vld [vmem:[%s12068_s27 + $0x1238] sm:$0xff]  ;;  %v15675_v29 = vld [vmem:[#allocation55_spill] sm:$0xff] }
 0x346   : > { %v2706_v13 = vpop.f32.mrf.mxu2 }
 0x347   : > { %v2982_v26 = vadd.f32 %v2706_v13, %v1788_v6  ;;  %v3753_v61 = vpop.f32.mrf.mxu3  ;;  %v1790_v38 = vpop.f32.mrf.mxu1 }
 0x348   : > { %v1791_v22 = vadd.f32 %v1790_v38, %v15675_v29 }
 0x349   : > { %v4029_v47 = vadd.f32 %v3753_v61, %v2982_v26  ;;  %v243_v26 = vld [vmem:[%s12068_s27 + $0x240] sm:$0xff] }
 0x34a   : > { %v4803_v5 = vpop.f32.mrf.mxu0  ;;  %10120 = vmatmul.msk.f32.gmra.mxu1 %vm431_vm1, %v242_v37  ;;  %v10249_v61 = vld [vmem:[%s12068_s27 + $0xa40] sm:$0xff] }
 0x34b   : > { %v13333_v21 = vadd.f32 %v4800_v11, %v4029_v47  ;;  %10378 = vmatmul.msk.f32.gmra.mxu2 %vm431_vm1, %v10248_v53  ;;  %v10507_v47 = vld [vmem:[%s12068_s27 + $0xe40] sm:$0xff] }
 0x34c   : > { %10636 = vmatmul.msk.f32.gmra.mxu3 %vm431_vm1, %v10506_v24 }
 0x34d   : > { %15674 = vst [vmem:[#allocation52_spill] sm:$0xff] %v13333_v21  ;;  %10894 = vmatmul.msk.f32.gmra.mxu0 %vm431_vm1, %v10764_v54  ;;  %v10765_v21 = vld [vmem:[%s12068_s27 + $0x1240] sm:$0xff] }
 0x34e   : > { %v2709_v45 = vpop.f32.mrf.mxu2  ;;  %v15677_v54 = vld [vmem:[#allocation58_spill] sm:$0xff] }
 0x34f   : > { %v2983_v7 = vadd.f32 %v2709_v45, %v1791_v22  ;;  %v3756_v6 = vpop.f32.mrf.mxu3  ;;  %v1793_v13 = vpop.f32.mrf.mxu1 }
 0x350   : > { %v1794_v38 = vadd.f32 %v1793_v13, %v15677_v54 }
 0x351   : > { %v4030_v11 = vadd.f32 %v3756_v6, %v2983_v7  ;;  %v244_v7 = vld [vmem:[%s12068_s27 + $0x248] sm:$0xff] }
 0x352   : > { %v4806_v37 = vpop.f32.mrf.mxu0  ;;  %10121 = vmatmul.msk.f32.gmra.mxu1 %vm431_vm1, %v243_v26  ;;  %v10250_v6 = vld [vmem:[%s12068_s27 + $0xa48] sm:$0xff] }
 0x353   : > { %v13344_v53 = vadd.f32 %v4803_v5, %v4030_v11  ;;  %10379 = vmatmul.msk.f32.gmra.mxu2 %vm431_vm1, %v10249_v61  ;;  %v10508_v11 = vld [vmem:[%s12068_s27 + $0xe48] sm:$0xff] }
 0x354   : > { %10637 = vmatmul.msk.f32.gmra.mxu3 %vm431_vm1, %v10507_v47 }
 0x355   : > { %15676 = vst [vmem:[#allocation55_spill] sm:$0xff] %v13344_v53  ;;  %10895 = vmatmul.msk.f32.gmra.mxu0 %vm431_vm1, %v10765_v21  ;;  %v10766_v53 = vld [vmem:[%s12068_s27 + $0x1248] sm:$0xff]  ;;  %v15679_v21 = vld [vmem:[#allocation61_spill] sm:$0xff] }
 0x356   : > { %v2712_v24 = vpop.f32.mrf.mxu2 }
 0x357   : > { %v2984_v29 = vadd.f32 %v2712_v24, %v1794_v38  ;;  %v3759_v22 = vpop.f32.mrf.mxu3  ;;  %v1796_v45 = vpop.f32.mrf.mxu1 }
 0x358   : > { %v1797_v13 = vadd.f32 %v1796_v45, %v15679_v21 }
 0x359   : > { %v4031_v5 = vadd.f32 %v3759_v22, %v2984_v29  ;;  %v245_v29 = vld [vmem:[%s12068_s27 + $0x250] sm:$0xff] }
 0x35a   : > { %v4809_v26 = vpop.f32.mrf.mxu0  ;;  %10122 = vmatmul.msk.f32.gmra.mxu1 %vm431_vm1, %v244_v7  ;;  %v10251_v22 = vld [vmem:[%s12068_s27 + $0xa50] sm:$0xff] }
 0x35b   : > { %v13355_v61 = vadd.f32 %v4806_v37, %v4031_v5  ;;  %10380 = vmatmul.msk.f32.gmra.mxu2 %vm431_vm1, %v10250_v6  ;;  %v10509_v5 = vld [vmem:[%s12068_s27 + $0xe50] sm:$0xff] }
 0x35c   : > { %10638 = vmatmul.msk.f32.gmra.mxu3 %vm431_vm1, %v10508_v11 }
 0x35d   : > { %15678 = vst [vmem:[#allocation58_spill] sm:$0xff] %v13355_v61  ;;  %10896 = vmatmul.msk.f32.gmra.mxu0 %vm431_vm1, %v10766_v53  ;;  %v10767_v61 = vld [vmem:[%s12068_s27 + $0x1250] sm:$0xff] }
 0x35e   : > { %v2715_v47 = vpop.f32.mrf.mxu2  ;;  %v15681_v53 = vld [vmem:[#allocation64_spill] sm:$0xff] }
 0x35f   : > { %v2985_v54 = vadd.f32 %v2715_v47, %v1797_v13  ;;  %v3762_v38 = vpop.f32.mrf.mxu3  ;;  %v1799_v24 = vpop.f32.mrf.mxu1 }
 0x360   : > { %v1800_v45 = vadd.f32 %v1799_v24, %v15681_v53 }
 0x361   : > { %v4032_v37 = vadd.f32 %v3762_v38, %v2985_v54  ;;  %v246_v54 = vld [vmem:[%s12068_s27 + $0x258] sm:$0xff] }
 0x362   : > { %v4812_v7 = vpop.f32.mrf.mxu0  ;;  %10123 = vmatmul.msk.f32.gmra.mxu1 %vm431_vm1, %v245_v29  ;;  %v10252_v38 = vld [vmem:[%s12068_s27 + $0xa58] sm:$0xff] }
 0x363   : > { %v13366_v6 = vadd.f32 %v4809_v26, %v4032_v37  ;;  %10381 = vmatmul.msk.f32.gmra.mxu2 %vm431_vm1, %v10251_v22  ;;  %v10510_v37 = vld [vmem:[%s12068_s27 + $0xe58] sm:$0xff] }
 0x364   : > { %10639 = vmatmul.msk.f32.gmra.mxu3 %vm431_vm1, %v10509_v5 }
 0x365   : > { %15680 = vst [vmem:[#allocation61_spill] sm:$0xff] %v13366_v6  ;;  %10897 = vmatmul.msk.f32.gmra.mxu0 %vm431_vm1, %v10767_v61  ;;  %v10768_v6 = vld [vmem:[%s12068_s27 + $0x1258] sm:$0xff]  ;;  %v15683_v61 = vld [vmem:[#allocation67_spill] sm:$0xff] }
 0x366   : > { %v2718_v11 = vpop.f32.mrf.mxu2 }
 0x367   : > { %v2986_v21 = vadd.f32 %v2718_v11, %v1800_v45  ;;  %v3765_v13 = vpop.f32.mrf.mxu3  ;;  %v1802_v47 = vpop.f32.mrf.mxu1 }
 0x368   : > { %v1803_v24 = vadd.f32 %v1802_v47, %v15683_v61 }
 0x369   : > { %v4033_v26 = vadd.f32 %v3765_v13, %v2986_v21  ;;  %v247_v21 = vld [vmem:[%s12068_s27 + $0x260] sm:$0xff] }
 0x36a   : > { %v4815_v29 = vpop.f32.mrf.mxu0  ;;  %10124 = vmatmul.msk.f32.gmra.mxu1 %vm431_vm1, %v246_v54  ;;  %v10253_v13 = vld [vmem:[%s12068_s27 + $0xa60] sm:$0xff] }
 0x36b   : > { %v13377_v22 = vadd.f32 %v4812_v7, %v4033_v26  ;;  %10382 = vmatmul.msk.f32.gmra.mxu2 %vm431_vm1, %v10252_v38  ;;  %v10511_v26 = vld [vmem:[%s12068_s27 + $0xe60] sm:$0xff] }
 0x36c   : > { %10640 = vmatmul.msk.f32.gmra.mxu3 %vm431_vm1, %v10510_v37 }
 0x36d   : > { %15682 = vst [vmem:[#allocation64_spill] sm:$0xff] %v13377_v22  ;;  %10898 = vmatmul.msk.f32.gmra.mxu0 %vm431_vm1, %v10768_v6  ;;  %v10769_v22 = vld [vmem:[%s12068_s27 + $0x1260] sm:$0xff] }
 0x36e   : > { %v2721_v5 = vpop.f32.mrf.mxu2  ;;  %v15685_v6 = vld [vmem:[#allocation70_spill] sm:$0xff] }
 0x36f   : > { %v2987_v53 = vadd.f32 %v2721_v5, %v1803_v24  ;;  %v3768_v45 = vpop.f32.mrf.mxu3  ;;  %v1805_v11 = vpop.f32.mrf.mxu1 }
 0x370   : > { %v1806_v47 = vadd.f32 %v1805_v11, %v15685_v6 }
 0x371   : > { %v4034_v7 = vadd.f32 %v3768_v45, %v2987_v53  ;;  %v248_v53 = vld [vmem:[%s12068_s27 + $0x268] sm:$0xff] }
 0x372   : > { %v4818_v54 = vpop.f32.mrf.mxu0  ;;  %10125 = vmatmul.msk.f32.gmra.mxu1 %vm431_vm1, %v247_v21  ;;  %v10254_v45 = vld [vmem:[%s12068_s27 + $0xa68] sm:$0xff] }
 0x373   : > { %v13388_v38 = vadd.f32 %v4815_v29, %v4034_v7  ;;  %10383 = vmatmul.msk.f32.gmra.mxu2 %vm431_vm1, %v10253_v13  ;;  %v10512_v7 = vld [vmem:[%s12068_s27 + $0xe68] sm:$0xff] }
 0x374   : > { %10641 = vmatmul.msk.f32.gmra.mxu3 %vm431_vm1, %v10511_v26 }
 0x375   : > { %15684 = vst [vmem:[#allocation67_spill] sm:$0xff] %v13388_v38  ;;  %10899 = vmatmul.msk.f32.gmra.mxu0 %vm431_vm1, %v10769_v22  ;;  %v10770_v38 = vld [vmem:[%s12068_s27 + $0x1268] sm:$0xff]  ;;  %v15687_v22 = vld [vmem:[#allocation73_spill] sm:$0xff] }
 0x376   : > { %v2724_v37 = vpop.f32.mrf.mxu2 }
 0x377   : > { %v2988_v61 = vadd.f32 %v2724_v37, %v1806_v47  ;;  %v3771_v24 = vpop.f32.mrf.mxu3  ;;  %v1808_v5 = vpop.f32.mrf.mxu1 }
 0x378   : > { %v1809_v11 = vadd.f32 %v1808_v5, %v15687_v22 }
 0x379   : > { %v4035_v29 = vadd.f32 %v3771_v24, %v2988_v61  ;;  %v249_v61 = vld [vmem:[%s12068_s27 + $0x270] sm:$0xff] }
 0x37a   : > { %v4821_v21 = vpop.f32.mrf.mxu0  ;;  %10126 = vmatmul.msk.f32.gmra.mxu1 %vm431_vm1, %v248_v53  ;;  %v10255_v24 = vld [vmem:[%s12068_s27 + $0xa70] sm:$0xff] }
 0x37b   : > { %v13399_v13 = vadd.f32 %v4818_v54, %v4035_v29  ;;  %10384 = vmatmul.msk.f32.gmra.mxu2 %vm431_vm1, %v10254_v45  ;;  %v10513_v29 = vld [vmem:[%s12068_s27 + $0xe70] sm:$0xff] }
 0x37c   : > { %10642 = vmatmul.msk.f32.gmra.mxu3 %vm431_vm1, %v10512_v7 }
 0x37d   : > { %15686 = vst [vmem:[#allocation70_spill] sm:$0xff] %v13399_v13  ;;  %10900 = vmatmul.msk.f32.gmra.mxu0 %vm431_vm1, %v10770_v38  ;;  %v10771_v13 = vld [vmem:[%s12068_s27 + $0x1270] sm:$0xff] }
 0x37e   : > { %v2727_v26 = vpop.f32.mrf.mxu2  ;;  %v15689_v38 = vld [vmem:[#allocation76_spill] sm:$0xff] }
 0x37f   : > { %v2989_v6 = vadd.f32 %v2727_v26, %v1809_v11  ;;  %v3774_v47 = vpop.f32.mrf.mxu3  ;;  %v1811_v37 = vpop.f32.mrf.mxu1 }
 0x380   : > { %v1812_v5 = vadd.f32 %v1811_v37, %v15689_v38 }
 0x381   : > { %v4036_v54 = vadd.f32 %v3774_v47, %v2989_v6  ;;  %v250_v6 = vld [vmem:[%s12068_s27 + $0x278] sm:$0xff] }
 0x382   : > { %v4824_v53 = vpop.f32.mrf.mxu0  ;;  %10127 = vmatmul.msk.f32.gmra.mxu1 %vm431_vm1, %v249_v61  ;;  %v10256_v47 = vld [vmem:[%s12068_s27 + $0xa78] sm:$0xff] }
 0x383   : > { %v13410_v45 = vadd.f32 %v4821_v21, %v4036_v54  ;;  %10385 = vmatmul.msk.f32.gmra.mxu2 %vm431_vm1, %v10255_v24  ;;  %v10514_v54 = vld [vmem:[%s12068_s27 + $0xe78] sm:$0xff] }
 0x384   : > { %10643 = vmatmul.msk.f32.gmra.mxu3 %vm431_vm1, %v10513_v29 }
 0x385   : > { %15688 = vst [vmem:[#allocation73_spill] sm:$0xff] %v13410_v45  ;;  %10901 = vmatmul.msk.f32.gmra.mxu0 %vm431_vm1, %v10771_v13  ;;  %v10772_v45 = vld [vmem:[%s12068_s27 + $0x1278] sm:$0xff]  ;;  %v15691_v13 = vld [vmem:[#allocation79_spill] sm:$0xff] }
 0x386   : > { %v2730_v7 = vpop.f32.mrf.mxu2 }
 0x387   : > { %v2990_v22 = vadd.f32 %v2730_v7, %v1812_v5  ;;  %v3777_v11 = vpop.f32.mrf.mxu3  ;;  %v1814_v26 = vpop.f32.mrf.mxu1 }
 0x388   : > { %v1815_v37 = vadd.f32 %v1814_v26, %v15691_v13 }
 0x389   : > { %v4037_v21 = vadd.f32 %v3777_v11, %v2990_v22  ;;  %v251_v22 = vld [vmem:[%s12068_s27 + $0x280] sm:$0xff] }
 0x38a   : > { %v4827_v61 = vpop.f32.mrf.mxu0  ;;  %10128 = vmatmul.msk.f32.gmra.mxu1 %vm431_vm1, %v250_v6  ;;  %v10257_v11 = vld [vmem:[%s12068_s27 + $0xa80] sm:$0xff] }
 0x38b   : > { %v13421_v24 = vadd.f32 %v4824_v53, %v4037_v21  ;;  %10386 = vmatmul.msk.f32.gmra.mxu2 %vm431_vm1, %v10256_v47  ;;  %v10515_v21 = vld [vmem:[%s12068_s27 + $0xe80] sm:$0xff] }
 0x38c   : > { %10644 = vmatmul.msk.f32.gmra.mxu3 %vm431_vm1, %v10514_v54 }
 0x38d   : > { %15690 = vst [vmem:[#allocation76_spill] sm:$0xff] %v13421_v24  ;;  %10902 = vmatmul.msk.f32.gmra.mxu0 %vm431_vm1, %v10772_v45  ;;  %v10773_v24 = vld [vmem:[%s12068_s27 + $0x1280] sm:$0xff] }
 0x38e   : > { %v2733_v29 = vpop.f32.mrf.mxu2  ;;  %v15693_v45 = vld [vmem:[#allocation2_spill] sm:$0xff] }
 0x38f   : > { %v2991_v38 = vadd.f32 %v2733_v29, %v1815_v37  ;;  %v3780_v5 = vpop.f32.mrf.mxu3  ;;  %v1817_v7 = vpop.f32.mrf.mxu1 }
 0x390   : > { %v1818_v26 = vadd.f32 %v1817_v7, %v15693_v45 }
 0x391   : > { %v4038_v53 = vadd.f32 %v3780_v5, %v2991_v38  ;;  %v252_v38 = vld [vmem:[%s12068_s27 + $0x288] sm:$0xff] }
 0x392   : > { %v4830_v6 = vpop.f32.mrf.mxu0  ;;  %10129 = vmatmul.msk.f32.gmra.mxu1 %vm431_vm1, %v251_v22  ;;  %v10258_v5 = vld [vmem:[%s12068_s27 + $0xa88] sm:$0xff] }
 0x393   : > { %v13432_v47 = vadd.f32 %v4827_v61, %v4038_v53  ;;  %10387 = vmatmul.msk.f32.gmra.mxu2 %vm431_vm1, %v10257_v11  ;;  %v10516_v53 = vld [vmem:[%s12068_s27 + $0xe88] sm:$0xff] }
 0x394   : > { %10645 = vmatmul.msk.f32.gmra.mxu3 %vm431_vm1, %v10515_v21 }
 0x395   : > { %15692 = vst [vmem:[#allocation79_spill] sm:$0xff] %v13432_v47  ;;  %10903 = vmatmul.msk.f32.gmra.mxu0 %vm431_vm1, %v10773_v24  ;;  %v10774_v47 = vld [vmem:[%s12068_s27 + $0x1288] sm:$0xff]  ;;  %v15695_v24 = vld [vmem:[#allocation4_spill] sm:$0xff] }
 0x396   : > { %v2736_v54 = vpop.f32.mrf.mxu2 }
 0x397   : > { %v2992_v13 = vadd.f32 %v2736_v54, %v1818_v26  ;;  %v3783_v37 = vpop.f32.mrf.mxu3  ;;  %v1820_v29 = vpop.f32.mrf.mxu1 }
 0x398   : > { %v1821_v7 = vadd.f32 %v1820_v29, %v15695_v24 }
 0x399   : > { %v4039_v61 = vadd.f32 %v3783_v37, %v2992_v13  ;;  %v253_v13 = vld [vmem:[%s12068_s27 + $0x290] sm:$0xff] }
 0x39a   : > { %v4833_v22 = vpop.f32.mrf.mxu0  ;;  %10130 = vmatmul.msk.f32.gmra.mxu1 %vm431_vm1, %v252_v38  ;;  %v10259_v37 = vld [vmem:[%s12068_s27 + $0xa90] sm:$0xff] }
 0x39b   : > { %v13443_v11 = vadd.f32 %v4830_v6, %v4039_v61  ;;  %10388 = vmatmul.msk.f32.gmra.mxu2 %vm431_vm1, %v10258_v5  ;;  %v10517_v61 = vld [vmem:[%s12068_s27 + $0xe90] sm:$0xff] }
 0x39c   : > { %10646 = vmatmul.msk.f32.gmra.mxu3 %vm431_vm1, %v10516_v53 }
 0x39d   : > { %15694 = vst [vmem:[#allocation2_spill] sm:$0xff] %v13443_v11  ;;  %10904 = vmatmul.msk.f32.gmra.mxu0 %vm431_vm1, %v10774_v47  ;;  %v10775_v11 = vld [vmem:[%s12068_s27 + $0x1290] sm:$0xff]  ;;  %v15697_v47 = vld [vmem:[#allocation6_spill] sm:$0xff] }
 0x39e   : > { %v2739_v21 = vpop.f32.mrf.mxu2 }
 0x39f   : > { %v2993_v45 = vadd.f32 %v2739_v21, %v1821_v7  ;;  %v3786_v26 = vpop.f32.mrf.mxu3  ;;  %v1823_v54 = vpop.f32.mrf.mxu1 }
 0x3a0   : > { %v1824_v29 = vadd.f32 %v1823_v54, %v15697_v47 }
 0x3a1   : > { %v4040_v6 = vadd.f32 %v3786_v26, %v2993_v45  ;;  %v254_v45 = vld [vmem:[%s12068_s27 + $0x298] sm:$0xff] }
 0x3a2   : > { %v4836_v38 = vpop.f32.mrf.mxu0  ;;  %10131 = vmatmul.msk.f32.gmra.mxu1 %vm431_vm1, %v253_v13  ;;  %v10260_v26 = vld [vmem:[%s12068_s27 + $0xa98] sm:$0xff] }
 0x3a3   : > { %v13454_v5 = vadd.f32 %v4833_v22, %v4040_v6  ;;  %10389 = vmatmul.msk.f32.gmra.mxu2 %vm431_vm1, %v10259_v37  ;;  %v10518_v6 = vld [vmem:[%s12068_s27 + $0xe98] sm:$0xff] }
 0x3a4   : > { %10647 = vmatmul.msk.f32.gmra.mxu3 %vm431_vm1, %v10517_v61 }
 0x3a5   : > { %15696 = vst [vmem:[#allocation4_spill] sm:$0xff] %v13454_v5  ;;  %10905 = vmatmul.msk.f32.gmra.mxu0 %vm431_vm1, %v10775_v11  ;;  %v10776_v5 = vld [vmem:[%s12068_s27 + $0x1298] sm:$0xff]  ;;  %v15699_v11 = vld [vmem:[#allocation8_spill] sm:$0xff] }
 0x3a6   : > { %v2742_v53 = vpop.f32.mrf.mxu2 }
 0x3a7   : > { %v2994_v24 = vadd.f32 %v2742_v53, %v1824_v29  ;;  %v3789_v7 = vpop.f32.mrf.mxu3  ;;  %v1826_v21 = vpop.f32.mrf.mxu1 }
 0x3a8   : > { %v1827_v54 = vadd.f32 %v1826_v21, %v15699_v11 }
 0x3a9   : > { %v4041_v22 = vadd.f32 %v3789_v7, %v2994_v24  ;;  %v255_v24 = vld [vmem:[%s12068_s27 + $0x2a0] sm:$0xff] }
 0x3aa   : > { %v4839_v13 = vpop.f32.mrf.mxu0  ;;  %10132 = vmatmul.msk.f32.gmra.mxu1 %vm431_vm1, %v254_v45  ;;  %v10261_v7 = vld [vmem:[%s12068_s27 + $0xaa0] sm:$0xff] }
 0x3ab   : > { %v13465_v37 = vadd.f32 %v4836_v38, %v4041_v22  ;;  %10390 = vmatmul.msk.f32.gmra.mxu2 %vm431_vm1, %v10260_v26  ;;  %v10519_v22 = vld [vmem:[%s12068_s27 + $0xea0] sm:$0xff] }
 0x3ac   : > { %10648 = vmatmul.msk.f32.gmra.mxu3 %vm431_vm1, %v10518_v6 }
 0x3ad   : > { %15698 = vst [vmem:[#allocation6_spill] sm:$0xff] %v13465_v37  ;;  %10906 = vmatmul.msk.f32.gmra.mxu0 %vm431_vm1, %v10776_v5  ;;  %v10777_v37 = vld [vmem:[%s12068_s27 + $0x12a0] sm:$0xff] }
 0x3ae   : > { %v2745_v61 = vpop.f32.mrf.mxu2  ;;  %v15701_v5 = vld [vmem:[#allocation10_spill] sm:$0xff] }
 0x3af   : > { %v2995_v47 = vadd.f32 %v2745_v61, %v1827_v54  ;;  %v3792_v29 = vpop.f32.mrf.mxu3  ;;  %v1829_v53 = vpop.f32.mrf.mxu1 }
 0x3b0   : > { %v1830_v21 = vadd.f32 %v1829_v53, %v15701_v5 }
 0x3b1   : > { %v4042_v38 = vadd.f32 %v3792_v29, %v2995_v47  ;;  %v256_v47 = vld [vmem:[%s12068_s27 + $0x2a8] sm:$0xff] }
 0x3b2   : > { %v4842_v45 = vpop.f32.mrf.mxu0  ;;  %10133 = vmatmul.msk.f32.gmra.mxu1 %vm431_vm1, %v255_v24  ;;  %v10262_v29 = vld [vmem:[%s12068_s27 + $0xaa8] sm:$0xff] }
 0x3b3   : > { %v13476_v26 = vadd.f32 %v4839_v13, %v4042_v38  ;;  %10391 = vmatmul.msk.f32.gmra.mxu2 %vm431_vm1, %v10261_v7  ;;  %v10520_v38 = vld [vmem:[%s12068_s27 + $0xea8] sm:$0xff] }
 0x3b4   : > { %10649 = vmatmul.msk.f32.gmra.mxu3 %vm431_vm1, %v10519_v22 }
 0x3b5   : > { %15700 = vst [vmem:[#allocation8_spill] sm:$0xff] %v13476_v26  ;;  %10907 = vmatmul.msk.f32.gmra.mxu0 %vm431_vm1, %v10777_v37  ;;  %v10778_v26 = vld [vmem:[%s12068_s27 + $0x12a8] sm:$0xff]  ;;  %v15703_v37 = vld [vmem:[#allocation12_spill] sm:$0xff] }
 0x3b6   : > { %v2748_v6 = vpop.f32.mrf.mxu2 }
 0x3b7   : > { %v2996_v11 = vadd.f32 %v2748_v6, %v1830_v21  ;;  %v3795_v54 = vpop.f32.mrf.mxu3  ;;  %v1832_v61 = vpop.f32.mrf.mxu1 }
 0x3b8   : > { %v1833_v53 = vadd.f32 %v1832_v61, %v15703_v37 }
 0x3b9   : > { %v4043_v13 = vadd.f32 %v3795_v54, %v2996_v11  ;;  %v257_v11 = vld [vmem:[%s12068_s27 + $0x2b0] sm:$0xff] }
 0x3ba   : > { %v4845_v24 = vpop.f32.mrf.mxu0  ;;  %10134 = vmatmul.msk.f32.gmra.mxu1 %vm431_vm1, %v256_v47  ;;  %v10263_v54 = vld [vmem:[%s12068_s27 + $0xab0] sm:$0xff] }
 0x3bb   : > { %v13487_v7 = vadd.f32 %v4842_v45, %v4043_v13  ;;  %10392 = vmatmul.msk.f32.gmra.mxu2 %vm431_vm1, %v10262_v29  ;;  %v10521_v13 = vld [vmem:[%s12068_s27 + $0xeb0] sm:$0xff] }
 0x3bc   : > { %10650 = vmatmul.msk.f32.gmra.mxu3 %vm431_vm1, %v10520_v38 }
 0x3bd   : > { %15702 = vst [vmem:[#allocation10_spill] sm:$0xff] %v13487_v7  ;;  %10908 = vmatmul.msk.f32.gmra.mxu0 %vm431_vm1, %v10778_v26  ;;  %v10779_v7 = vld [vmem:[%s12068_s27 + $0x12b0] sm:$0xff]  ;;  %v15705_v26 = vld [vmem:[#allocation14_spill] sm:$0xff] }
 0x3be   : > { %v2751_v22 = vpop.f32.mrf.mxu2 }
 0x3bf   : > { %v2997_v5 = vadd.f32 %v2751_v22, %v1833_v53  ;;  %v3798_v21 = vpop.f32.mrf.mxu3  ;;  %v1835_v6 = vpop.f32.mrf.mxu1 }
 0x3c0   : > { %v1836_v61 = vadd.f32 %v1835_v6, %v15705_v26 }
 0x3c1   : > { %v4044_v45 = vadd.f32 %v3798_v21, %v2997_v5  ;;  %v258_v5 = vld [vmem:[%s12068_s27 + $0x2b8] sm:$0xff] }
 0x3c2   : > { %v4848_v47 = vpop.f32.mrf.mxu0  ;;  %10135 = vmatmul.msk.f32.gmra.mxu1 %vm431_vm1, %v257_v11  ;;  %v10264_v21 = vld [vmem:[%s12068_s27 + $0xab8] sm:$0xff] }
 0x3c3   : > { %v13498_v29 = vadd.f32 %v4845_v24, %v4044_v45  ;;  %10393 = vmatmul.msk.f32.gmra.mxu2 %vm431_vm1, %v10263_v54  ;;  %v10522_v45 = vld [vmem:[%s12068_s27 + $0xeb8] sm:$0xff] }
 0x3c4   : > { %10651 = vmatmul.msk.f32.gmra.mxu3 %vm431_vm1, %v10521_v13 }
 0x3c5   : > { %15704 = vst [vmem:[#allocation12_spill] sm:$0xff] %v13498_v29  ;;  %10909 = vmatmul.msk.f32.gmra.mxu0 %vm431_vm1, %v10779_v7  ;;  %v10780_v29 = vld [vmem:[%s12068_s27 + $0x12b8] sm:$0xff]  ;;  %v15707_v7 = vld [vmem:[#allocation16_spill] sm:$0xff] }
 0x3c6   : > { %v2754_v38 = vpop.f32.mrf.mxu2 }
 0x3c7   : > { %v2998_v37 = vadd.f32 %v2754_v38, %v1836_v61  ;;  %v3801_v53 = vpop.f32.mrf.mxu3  ;;  %v1838_v22 = vpop.f32.mrf.mxu1 }
 0x3c8   : > { %v1839_v6 = vadd.f32 %v1838_v22, %v15707_v7 }
 0x3c9   : > { %v4045_v24 = vadd.f32 %v3801_v53, %v2998_v37  ;;  %v259_v37 = vld [vmem:[%s12068_s27 + $0x2c0] sm:$0xff] }
 0x3ca   : > { %v4851_v11 = vpop.f32.mrf.mxu0  ;;  %10136 = vmatmul.msk.f32.gmra.mxu1 %vm431_vm1, %v258_v5  ;;  %v10265_v53 = vld [vmem:[%s12068_s27 + $0xac0] sm:$0xff] }
 0x3cb   : > { %v13509_v54 = vadd.f32 %v4848_v47, %v4045_v24  ;;  %10394 = vmatmul.msk.f32.gmra.mxu2 %vm431_vm1, %v10264_v21  ;;  %v10523_v24 = vld [vmem:[%s12068_s27 + $0xec0] sm:$0xff] }
 0x3cc   : > { %10652 = vmatmul.msk.f32.gmra.mxu3 %vm431_vm1, %v10522_v45 }
 0x3cd   : > { %15706 = vst [vmem:[#allocation14_spill] sm:$0xff] %v13509_v54  ;;  %10910 = vmatmul.msk.f32.gmra.mxu0 %vm431_vm1, %v10780_v29  ;;  %v10781_v54 = vld [vmem:[%s12068_s27 + $0x12c0] sm:$0xff] }
 0x3ce   : > { %v2757_v13 = vpop.f32.mrf.mxu2  ;;  %v15709_v29 = vld [vmem:[#allocation18_spill] sm:$0xff] }
 0x3cf   : > { %v2999_v26 = vadd.f32 %v2757_v13, %v1839_v6  ;;  %v3804_v61 = vpop.f32.mrf.mxu3  ;;  %v1841_v38 = vpop.f32.mrf.mxu1 }
 0x3d0   : > { %v1842_v22 = vadd.f32 %v1841_v38, %v15709_v29 }
 0x3d1   : > { %v4046_v47 = vadd.f32 %v3804_v61, %v2999_v26  ;;  %v260_v26 = vld [vmem:[%s12068_s27 + $0x2c8] sm:$0xff] }
 0x3d2   : > { %v4854_v5 = vpop.f32.mrf.mxu0  ;;  %10137 = vmatmul.msk.f32.gmra.mxu1 %vm431_vm1, %v259_v37  ;;  %v10266_v61 = vld [vmem:[%s12068_s27 + $0xac8] sm:$0xff] }
 0x3d3   : > { %v13520_v21 = vadd.f32 %v4851_v11, %v4046_v47  ;;  %10395 = vmatmul.msk.f32.gmra.mxu2 %vm431_vm1, %v10265_v53  ;;  %v10524_v47 = vld [vmem:[%s12068_s27 + $0xec8] sm:$0xff] }
 0x3d4   : > { %10653 = vmatmul.msk.f32.gmra.mxu3 %vm431_vm1, %v10523_v24 }
 0x3d5   : > { %15708 = vst [vmem:[#allocation16_spill] sm:$0xff] %v13520_v21  ;;  %10911 = vmatmul.msk.f32.gmra.mxu0 %vm431_vm1, %v10781_v54  ;;  %v10782_v21 = vld [vmem:[%s12068_s27 + $0x12c8] sm:$0xff]  ;;  %v15711_v54 = vld [vmem:[#allocation20_spill] sm:$0xff] }
 0x3d6   : > { %v2760_v45 = vpop.f32.mrf.mxu2 }
 0x3d7   : > { %v3000_v7 = vadd.f32 %v2760_v45, %v1842_v22  ;;  %v3807_v6 = vpop.f32.mrf.mxu3  ;;  %v1844_v13 = vpop.f32.mrf.mxu1 }
 0x3d8   : > { %v1845_v38 = vadd.f32 %v1844_v13, %v15711_v54 }
 0x3d9   : > { %v4047_v11 = vadd.f32 %v3807_v6, %v3000_v7  ;;  %v261_v7 = vld [vmem:[%s12068_s27 + $0x2d0] sm:$0xff] }
 0x3da   : > { %v4857_v37 = vpop.f32.mrf.mxu0  ;;  %10138 = vmatmul.msk.f32.gmra.mxu1 %vm431_vm1, %v260_v26  ;;  %v10267_v6 = vld [vmem:[%s12068_s27 + $0xad0] sm:$0xff] }
 0x3db   : > { %v13531_v53 = vadd.f32 %v4854_v5, %v4047_v11  ;;  %10396 = vmatmul.msk.f32.gmra.mxu2 %vm431_vm1, %v10266_v61  ;;  %v10525_v11 = vld [vmem:[%s12068_s27 + $0xed0] sm:$0xff] }
 0x3dc   : > { %10654 = vmatmul.msk.f32.gmra.mxu3 %vm431_vm1, %v10524_v47 }
 0x3dd   : > { %15710 = vst [vmem:[#allocation18_spill] sm:$0xff] %v13531_v53  ;;  %10912 = vmatmul.msk.f32.gmra.mxu0 %vm431_vm1, %v10782_v21  ;;  %v10783_v53 = vld [vmem:[%s12068_s27 + $0x12d0] sm:$0xff]  ;;  %v15713_v21 = vld [vmem:[#allocation22_spill] sm:$0xff] }
 0x3de   : > { %v2763_v24 = vpop.f32.mrf.mxu2 }
 0x3df   : > { %v3001_v29 = vadd.f32 %v2763_v24, %v1845_v38  ;;  %v3810_v22 = vpop.f32.mrf.mxu3  ;;  %v1847_v45 = vpop.f32.mrf.mxu1 }
 0x3e0   : > { %v1848_v13 = vadd.f32 %v1847_v45, %v15713_v21 }
 0x3e1   : > { %v4048_v5 = vadd.f32 %v3810_v22, %v3001_v29  ;;  %v262_v29 = vld [vmem:[%s12068_s27 + $0x2d8] sm:$0xff] }
 0x3e2   : > { %v4860_v26 = vpop.f32.mrf.mxu0  ;;  %10139 = vmatmul.msk.f32.gmra.mxu1 %vm431_vm1, %v261_v7  ;;  %v10268_v22 = vld [vmem:[%s12068_s27 + $0xad8] sm:$0xff] }
 0x3e3   : > { %v13542_v61 = vadd.f32 %v4857_v37, %v4048_v5  ;;  %10397 = vmatmul.msk.f32.gmra.mxu2 %vm431_vm1, %v10267_v6  ;;  %v10526_v5 = vld [vmem:[%s12068_s27 + $0xed8] sm:$0xff] }
 0x3e4   : > { %10655 = vmatmul.msk.f32.gmra.mxu3 %vm431_vm1, %v10525_v11 }
 0x3e5   : > { %15712 = vst [vmem:[#allocation20_spill] sm:$0xff] %v13542_v61  ;;  %10913 = vmatmul.msk.f32.gmra.mxu0 %vm431_vm1, %v10783_v53  ;;  %v10784_v61 = vld [vmem:[%s12068_s27 + $0x12d8] sm:$0xff]  ;;  %v15715_v53 = vld [vmem:[#allocation24_spill] sm:$0xff] }
 0x3e6   : > { %v2766_v47 = vpop.f32.mrf.mxu2 }
 0x3e7   : > { %v3002_v54 = vadd.f32 %v2766_v47, %v1848_v13  ;;  %v3813_v38 = vpop.f32.mrf.mxu3  ;;  %v1850_v24 = vpop.f32.mrf.mxu1 }
 0x3e8   : > { %v1851_v45 = vadd.f32 %v1850_v24, %v15715_v53 }
 0x3e9   : > { %v4049_v37 = vadd.f32 %v3813_v38, %v3002_v54  ;;  %v263_v54 = vld [vmem:[%s12068_s27 + $0x2e0] sm:$0xff] }
 0x3ea   : > { %v4863_v7 = vpop.f32.mrf.mxu0  ;;  %10140 = vmatmul.msk.f32.gmra.mxu1 %vm431_vm1, %v262_v29  ;;  %v10269_v38 = vld [vmem:[%s12068_s27 + $0xae0] sm:$0xff] }
 0x3eb   : > { %v13553_v6 = vadd.f32 %v4860_v26, %v4049_v37  ;;  %10398 = vmatmul.msk.f32.gmra.mxu2 %vm431_vm1, %v10268_v22  ;;  %v10527_v37 = vld [vmem:[%s12068_s27 + $0xee0] sm:$0xff] }
 0x3ec   : > { %10656 = vmatmul.msk.f32.gmra.mxu3 %vm431_vm1, %v10526_v5 }
 0x3ed   : > { %15714 = vst [vmem:[#allocation22_spill] sm:$0xff] %v13553_v6  ;;  %10914 = vmatmul.msk.f32.gmra.mxu0 %vm431_vm1, %v10784_v61  ;;  %v10785_v6 = vld [vmem:[%s12068_s27 + $0x12e0] sm:$0xff] }
 0x3ee   : > { %v2769_v11 = vpop.f32.mrf.mxu2  ;;  %v15717_v61 = vld [vmem:[#allocation26_spill] sm:$0xff] }
 0x3ef   : > { %v3003_v21 = vadd.f32 %v2769_v11, %v1851_v45  ;;  %v3816_v13 = vpop.f32.mrf.mxu3  ;;  %v1853_v47 = vpop.f32.mrf.mxu1 }
 0x3f0   : > { %v1854_v24 = vadd.f32 %v1853_v47, %v15717_v61 }
 0x3f1   : > { %v4050_v26 = vadd.f32 %v3816_v13, %v3003_v21  ;;  %v264_v21 = vld [vmem:[%s12068_s27 + $0x2e8] sm:$0xff] }
 0x3f2   : > { %v4866_v29 = vpop.f32.mrf.mxu0  ;;  %10141 = vmatmul.msk.f32.gmra.mxu1 %vm431_vm1, %v263_v54  ;;  %v10270_v13 = vld [vmem:[%s12068_s27 + $0xae8] sm:$0xff] }
 0x3f3   : > { %v13564_v22 = vadd.f32 %v4863_v7, %v4050_v26  ;;  %10399 = vmatmul.msk.f32.gmra.mxu2 %vm431_vm1, %v10269_v38  ;;  %v10528_v26 = vld [vmem:[%s12068_s27 + $0xee8] sm:$0xff] }
 0x3f4   : > { %10657 = vmatmul.msk.f32.gmra.mxu3 %vm431_vm1, %v10527_v37 }
 0x3f5   : > { %15716 = vst [vmem:[#allocation24_spill] sm:$0xff] %v13564_v22  ;;  %10915 = vmatmul.msk.f32.gmra.mxu0 %vm431_vm1, %v10785_v6  ;;  %v10786_v22 = vld [vmem:[%s12068_s27 + $0x12e8] sm:$0xff]  ;;  %v15719_v6 = vld [vmem:[#allocation28_spill] sm:$0xff] }
 0x3f6   : > { %v2772_v5 = vpop.f32.mrf.mxu2 }
 0x3f7   : > { %v3004_v53 = vadd.f32 %v2772_v5, %v1854_v24  ;;  %v3819_v45 = vpop.f32.mrf.mxu3  ;;  %v1856_v11 = vpop.f32.mrf.mxu1 }
 0x3f8   : > { %v1857_v47 = vadd.f32 %v1856_v11, %v15719_v6 }
 0x3f9   : > { %v4051_v7 = vadd.f32 %v3819_v45, %v3004_v53  ;;  %v265_v53 = vld [vmem:[%s12068_s27 + $0x2f0] sm:$0xff] }
 0x3fa   : > { %v4869_v54 = vpop.f32.mrf.mxu0  ;;  %10142 = vmatmul.msk.f32.gmra.mxu1 %vm431_vm1, %v264_v21  ;;  %v10271_v45 = vld [vmem:[%s12068_s27 + $0xaf0] sm:$0xff] }
 0x3fb   : > { %v13575_v38 = vadd.f32 %v4866_v29, %v4051_v7  ;;  %10400 = vmatmul.msk.f32.gmra.mxu2 %vm431_vm1, %v10270_v13  ;;  %v10529_v7 = vld [vmem:[%s12068_s27 + $0xef0] sm:$0xff] }
 0x3fc   : > { %10658 = vmatmul.msk.f32.gmra.mxu3 %vm431_vm1, %v10528_v26 }
 0x3fd   : > { %15718 = vst [vmem:[#allocation26_spill] sm:$0xff] %v13575_v38  ;;  %10916 = vmatmul.msk.f32.gmra.mxu0 %vm431_vm1, %v10786_v22  ;;  %v10787_v38 = vld [vmem:[%s12068_s27 + $0x12f0] sm:$0xff]  ;;  %v15721_v22 = vld [vmem:[#allocation30_spill] sm:$0xff] }
 0x3fe   : > { %v2775_v37 = vpop.f32.mrf.mxu2 }
 0x3ff   : > { %v3005_v61 = vadd.f32 %v2775_v37, %v1857_v47  ;;  %v3822_v24 = vpop.f32.mrf.mxu3  ;;  %v1859_v5 = vpop.f32.mrf.mxu1 }
 0x400   : > { %v1860_v11 = vadd.f32 %v1859_v5, %v15721_v22 }
 0x401   : > { %v4052_v29 = vadd.f32 %v3822_v24, %v3005_v61  ;;  %v266_v61 = vld [vmem:[%s12068_s27 + $0x2f8] sm:$0xff] }
 0x402   : > { %v4872_v21 = vpop.f32.mrf.mxu0  ;;  %10143 = vmatmul.msk.f32.gmra.mxu1 %vm431_vm1, %v265_v53  ;;  %v10272_v24 = vld [vmem:[%s12068_s27 + $0xaf8] sm:$0xff] }
 0x403   : > { %v13586_v13 = vadd.f32 %v4869_v54, %v4052_v29  ;;  %10401 = vmatmul.msk.f32.gmra.mxu2 %vm431_vm1, %v10271_v45  ;;  %v10530_v29 = vld [vmem:[%s12068_s27 + $0xef8] sm:$0xff] }
 0x404   : > { %10659 = vmatmul.msk.f32.gmra.mxu3 %vm431_vm1, %v10529_v7 }
 0x405   : > { %15720 = vst [vmem:[#allocation28_spill] sm:$0xff] %v13586_v13  ;;  %10917 = vmatmul.msk.f32.gmra.mxu0 %vm431_vm1, %v10787_v38  ;;  %v10788_v13 = vld [vmem:[%s12068_s27 + $0x12f8] sm:$0xff]  ;;  %v15723_v38 = vld [vmem:[#allocation32_spill] sm:$0xff] }
 0x406   : > { %v2778_v26 = vpop.f32.mrf.mxu2 }
 0x407   : > { %v3006_v6 = vadd.f32 %v2778_v26, %v1860_v11  ;;  %v3825_v47 = vpop.f32.mrf.mxu3  ;;  %v1862_v37 = vpop.f32.mrf.mxu1 }
 0x408   : > { %v1863_v5 = vadd.f32 %v1862_v37, %v15723_v38 }
 0x409   : > { %v4053_v54 = vadd.f32 %v3825_v47, %v3006_v6  ;;  %v267_v6 = vld [vmem:[%s12068_s27 + $0x300] sm:$0xff] }
 0x40a   : > { %v4875_v53 = vpop.f32.mrf.mxu0  ;;  %10144 = vmatmul.msk.f32.gmra.mxu1 %vm431_vm1, %v266_v61  ;;  %v10273_v47 = vld [vmem:[%s12068_s27 + $0xb00] sm:$0xff] }
 0x40b   : > { %v13597_v45 = vadd.f32 %v4872_v21, %v4053_v54  ;;  %10402 = vmatmul.msk.f32.gmra.mxu2 %vm431_vm1, %v10272_v24  ;;  %v10531_v54 = vld [vmem:[%s12068_s27 + $0xf00] sm:$0xff] }
 0x40c   : > { %10660 = vmatmul.msk.f32.gmra.mxu3 %vm431_vm1, %v10530_v29 }
 0x40d   : > { %15722 = vst [vmem:[#allocation30_spill] sm:$0xff] %v13597_v45  ;;  %10918 = vmatmul.msk.f32.gmra.mxu0 %vm431_vm1, %v10788_v13  ;;  %v10789_v45 = vld [vmem:[%s12068_s27 + $0x1300] sm:$0xff]  ;;  %v15725_v13 = vld [vmem:[#allocation35_spill] sm:$0xff] }
 0x40e   : > { %v2781_v7 = vpop.f32.mrf.mxu2 }
 0x40f   : > { %v3007_v22 = vadd.f32 %v2781_v7, %v1863_v5  ;;  %v3828_v11 = vpop.f32.mrf.mxu3  ;;  %v1865_v26 = vpop.f32.mrf.mxu1 }
 0x410   : > { %v1866_v37 = vadd.f32 %v1865_v26, %v15725_v13 }
 0x411   : > { %v4054_v21 = vadd.f32 %v3828_v11, %v3007_v22  ;;  %v268_v22 = vld [vmem:[%s12068_s27 + $0x308] sm:$0xff] }
 0x412   : > { %v4878_v61 = vpop.f32.mrf.mxu0  ;;  %10145 = vmatmul.msk.f32.gmra.mxu1 %vm431_vm1, %v267_v6  ;;  %v10274_v11 = vld [vmem:[%s12068_s27 + $0xb08] sm:$0xff] }
 0x413   : > { %v13608_v24 = vadd.f32 %v4875_v53, %v4054_v21  ;;  %10403 = vmatmul.msk.f32.gmra.mxu2 %vm431_vm1, %v10273_v47  ;;  %v10532_v21 = vld [vmem:[%s12068_s27 + $0xf08] sm:$0xff] }
 0x414   : > { %10661 = vmatmul.msk.f32.gmra.mxu3 %vm431_vm1, %v10531_v54 }
 0x415   : > { %15724 = vst [vmem:[#allocation32_spill] sm:$0xff] %v13608_v24  ;;  %10919 = vmatmul.msk.f32.gmra.mxu0 %vm431_vm1, %v10789_v45  ;;  %v10790_v24 = vld [vmem:[%s12068_s27 + $0x1308] sm:$0xff]  ;;  %v15727_v45 = vld [vmem:[#allocation38_spill] sm:$0xff] }
 0x416   : > { %v2784_v29 = vpop.f32.mrf.mxu2 }
 0x417   : > { %v3008_v38 = vadd.f32 %v2784_v29, %v1866_v37  ;;  %v3831_v5 = vpop.f32.mrf.mxu3  ;;  %v1868_v7 = vpop.f32.mrf.mxu1 }
 0x418   : > { %v1869_v26 = vadd.f32 %v1868_v7, %v15727_v45 }
 0x419   : > { %v4055_v53 = vadd.f32 %v3831_v5, %v3008_v38  ;;  %v269_v38 = vld [vmem:[%s12068_s27 + $0x310] sm:$0xff] }
 0x41a   : > { %v4881_v6 = vpop.f32.mrf.mxu0  ;;  %10146 = vmatmul.msk.f32.gmra.mxu1 %vm431_vm1, %v268_v22  ;;  %v10275_v5 = vld [vmem:[%s12068_s27 + $0xb10] sm:$0xff] }
 0x41b   : > { %v13619_v47 = vadd.f32 %v4878_v61, %v4055_v53  ;;  %10404 = vmatmul.msk.f32.gmra.mxu2 %vm431_vm1, %v10274_v11  ;;  %v10533_v53 = vld [vmem:[%s12068_s27 + $0xf10] sm:$0xff] }
 0x41c   : > { %10662 = vmatmul.msk.f32.gmra.mxu3 %vm431_vm1, %v10532_v21 }
 0x41d   : > { %15726 = vst [vmem:[#allocation35_spill] sm:$0xff] %v13619_v47  ;;  %10920 = vmatmul.msk.f32.gmra.mxu0 %vm431_vm1, %v10790_v24  ;;  %v10791_v47 = vld [vmem:[%s12068_s27 + $0x1310] sm:$0xff]  ;;  %v15729_v24 = vld [vmem:[#allocation41_spill] sm:$0xff] }
 0x41e   : > { %v2787_v54 = vpop.f32.mrf.mxu2 }
 0x41f   : > { %v3009_v13 = vadd.f32 %v2787_v54, %v1869_v26  ;;  %v3834_v37 = vpop.f32.mrf.mxu3  ;;  %v1871_v29 = vpop.f32.mrf.mxu1 }
 0x420   : > { %v1872_v7 = vadd.f32 %v1871_v29, %v15729_v24 }
 0x421   : > { %v4056_v61 = vadd.f32 %v3834_v37, %v3009_v13  ;;  %v270_v13 = vld [vmem:[%s12068_s27 + $0x318] sm:$0xff] }
 0x422   : > { %v4884_v22 = vpop.f32.mrf.mxu0  ;;  %10147 = vmatmul.msk.f32.gmra.mxu1 %vm431_vm1, %v269_v38  ;;  %v10276_v37 = vld [vmem:[%s12068_s27 + $0xb18] sm:$0xff] }
 0x423   : > { %v13630_v11 = vadd.f32 %v4881_v6, %v4056_v61  ;;  %10405 = vmatmul.msk.f32.gmra.mxu2 %vm431_vm1, %v10275_v5  ;;  %v10534_v61 = vld [vmem:[%s12068_s27 + $0xf18] sm:$0xff] }
 0x424   : > { %10663 = vmatmul.msk.f32.gmra.mxu3 %vm431_vm1, %v10533_v53 }
 0x425   : > { %15728 = vst [vmem:[#allocation38_spill] sm:$0xff] %v13630_v11  ;;  %10921 = vmatmul.msk.f32.gmra.mxu0 %vm431_vm1, %v10791_v47  ;;  %v10792_v11 = vld [vmem:[%s12068_s27 + $0x1318] sm:$0xff]  ;;  %v15731_v47 = vld [vmem:[#allocation44_spill] sm:$0xff] }
 0x426   : > { %v2790_v21 = vpop.f32.mrf.mxu2 }
 0x427   : > { %v3010_v45 = vadd.f32 %v2790_v21, %v1872_v7  ;;  %v3837_v26 = vpop.f32.mrf.mxu3  ;;  %v1874_v54 = vpop.f32.mrf.mxu1 }
 0x428   : > { %v1875_v29 = vadd.f32 %v1874_v54, %v15731_v47 }
 0x429   : > { %v4057_v6 = vadd.f32 %v3837_v26, %v3010_v45  ;;  %v271_v45 = vld [vmem:[%s12068_s27 + $0x320] sm:$0xff] }
 0x42a   : > { %v4887_v38 = vpop.f32.mrf.mxu0  ;;  %10148 = vmatmul.msk.f32.gmra.mxu1 %vm431_vm1, %v270_v13  ;;  %v10277_v26 = vld [vmem:[%s12068_s27 + $0xb20] sm:$0xff] }
 0x42b   : > { %v13641_v5 = vadd.f32 %v4884_v22, %v4057_v6  ;;  %10406 = vmatmul.msk.f32.gmra.mxu2 %vm431_vm1, %v10276_v37  ;;  %v10535_v6 = vld [vmem:[%s12068_s27 + $0xf20] sm:$0xff] }
 0x42c   : > { %10664 = vmatmul.msk.f32.gmra.mxu3 %vm431_vm1, %v10534_v61 }
 0x42d   : > { %15730 = vst [vmem:[#allocation41_spill] sm:$0xff] %v13641_v5  ;;  %10922 = vmatmul.msk.f32.gmra.mxu0 %vm431_vm1, %v10792_v11  ;;  %v10793_v5 = vld [vmem:[%s12068_s27 + $0x1320] sm:$0xff]  ;;  %v15733_v11 = vld [vmem:[#allocation47_spill] sm:$0xff] }
 0x42e   : > { %v2793_v53 = vpop.f32.mrf.mxu2 }
 0x42f   : > { %v3011_v24 = vadd.f32 %v2793_v53, %v1875_v29  ;;  %v3840_v7 = vpop.f32.mrf.mxu3  ;;  %v1877_v21 = vpop.f32.mrf.mxu1 }
 0x430   : > { %v1878_v54 = vadd.f32 %v1877_v21, %v15733_v11 }
 0x431   : > { %v4058_v22 = vadd.f32 %v3840_v7, %v3011_v24  ;;  %v272_v24 = vld [vmem:[%s12068_s27 + $0x328] sm:$0xff] }
 0x432   : > { %v4890_v13 = vpop.f32.mrf.mxu0  ;;  %10149 = vmatmul.msk.f32.gmra.mxu1 %vm431_vm1, %v271_v45  ;;  %v10278_v7 = vld [vmem:[%s12068_s27 + $0xb28] sm:$0xff] }
 0x433   : > { %v13652_v37 = vadd.f32 %v4887_v38, %v4058_v22  ;;  %10407 = vmatmul.msk.f32.gmra.mxu2 %vm431_vm1, %v10277_v26  ;;  %v10536_v22 = vld [vmem:[%s12068_s27 + $0xf28] sm:$0xff] }
 0x434   : > { %10665 = vmatmul.msk.f32.gmra.mxu3 %vm431_vm1, %v10535_v6 }
 0x435   : > { %15732 = vst [vmem:[#allocation44_spill] sm:$0xff] %v13652_v37  ;;  %10923 = vmatmul.msk.f32.gmra.mxu0 %vm431_vm1, %v10793_v5  ;;  %v10794_v37 = vld [vmem:[%s12068_s27 + $0x1328] sm:$0xff]  ;;  %v15735_v5 = vld [vmem:[#allocation50_spill] sm:$0xff] }
 0x436   : > { %v2796_v61 = vpop.f32.mrf.mxu2 }
 0x437   : > { %v3012_v47 = vadd.f32 %v2796_v61, %v1878_v54  ;;  %v3843_v29 = vpop.f32.mrf.mxu3  ;;  %v1880_v53 = vpop.f32.mrf.mxu1 }
 0x438   : > { %v1881_v21 = vadd.f32 %v1880_v53, %v15735_v5 }
 0x439   : > { %v4059_v38 = vadd.f32 %v3843_v29, %v3012_v47  ;;  %v273_v47 = vld [vmem:[%s12068_s27 + $0x330] sm:$0xff] }
 0x43a   : > { %v4893_v45 = vpop.f32.mrf.mxu0  ;;  %10150 = vmatmul.msk.f32.gmra.mxu1 %vm431_vm1, %v272_v24  ;;  %v10279_v29 = vld [vmem:[%s12068_s27 + $0xb30] sm:$0xff] }
 0x43b   : > { %v13663_v26 = vadd.f32 %v4890_v13, %v4059_v38  ;;  %10408 = vmatmul.msk.f32.gmra.mxu2 %vm431_vm1, %v10278_v7  ;;  %v10537_v38 = vld [vmem:[%s12068_s27 + $0xf30] sm:$0xff] }
 0x43c   : > { %10666 = vmatmul.msk.f32.gmra.mxu3 %vm431_vm1, %v10536_v22 }
 0x43d   : > { %15734 = vst [vmem:[#allocation47_spill] sm:$0xff] %v13663_v26  ;;  %10924 = vmatmul.msk.f32.gmra.mxu0 %vm431_vm1, %v10794_v37  ;;  %v10795_v26 = vld [vmem:[%s12068_s27 + $0x1330] sm:$0xff]  ;;  %v15737_v37 = vld [vmem:[#allocation53_spill] sm:$0xff] }
 0x43e   : > { %v2799_v6 = vpop.f32.mrf.mxu2 }
 0x43f   : > { %v3013_v11 = vadd.f32 %v2799_v6, %v1881_v21  ;;  %v3846_v54 = vpop.f32.mrf.mxu3  ;;  %v1883_v61 = vpop.f32.mrf.mxu1 }
 0x440   : > { %v1884_v53 = vadd.f32 %v1883_v61, %v15737_v37 }
 0x441   : > { %v4060_v13 = vadd.f32 %v3846_v54, %v3013_v11  ;;  %v274_v11 = vld [vmem:[%s12068_s27 + $0x338] sm:$0xff] }
 0x442   : > { %v4896_v24 = vpop.f32.mrf.mxu0  ;;  %10151 = vmatmul.msk.f32.gmra.mxu1 %vm431_vm1, %v273_v47  ;;  %v10280_v54 = vld [vmem:[%s12068_s27 + $0xb38] sm:$0xff] }
 0x443   : > { %v13674_v7 = vadd.f32 %v4893_v45, %v4060_v13  ;;  %10409 = vmatmul.msk.f32.gmra.mxu2 %vm431_vm1, %v10279_v29  ;;  %v10538_v13 = vld [vmem:[%s12068_s27 + $0xf38] sm:$0xff] }
 0x444   : > { %10667 = vmatmul.msk.f32.gmra.mxu3 %vm431_vm1, %v10537_v38 }
 0x445   : > { %15736 = vst [vmem:[#allocation50_spill] sm:$0xff] %v13674_v7  ;;  %10925 = vmatmul.msk.f32.gmra.mxu0 %vm431_vm1, %v10795_v26  ;;  %v10796_v7 = vld [vmem:[%s12068_s27 + $0x1338] sm:$0xff]  ;;  %v15739_v26 = vld [vmem:[#allocation56_spill] sm:$0xff] }
 0x446   : > { %v2802_v22 = vpop.f32.mrf.mxu2 }
 0x447   : > { %v3014_v5 = vadd.f32 %v2802_v22, %v1884_v53  ;;  %v3849_v21 = vpop.f32.mrf.mxu3  ;;  %v1886_v6 = vpop.f32.mrf.mxu1 }
 0x448   : > { %v1887_v61 = vadd.f32 %v1886_v6, %v15739_v26 }
 0x449   : > { %v4061_v45 = vadd.f32 %v3849_v21, %v3014_v5  ;;  %v275_v5 = vld [vmem:[%s12068_s27 + $0x340] sm:$0xff] }
 0x44a   : > { %v4899_v47 = vpop.f32.mrf.mxu0  ;;  %10152 = vmatmul.msk.f32.gmra.mxu1 %vm431_vm1, %v274_v11  ;;  %v10281_v21 = vld [vmem:[%s12068_s27 + $0xb40] sm:$0xff] }
 0x44b   : > { %v13685_v29 = vadd.f32 %v4896_v24, %v4061_v45  ;;  %10410 = vmatmul.msk.f32.gmra.mxu2 %vm431_vm1, %v10280_v54  ;;  %v10539_v45 = vld [vmem:[%s12068_s27 + $0xf40] sm:$0xff] }
 0x44c   : > { %10668 = vmatmul.msk.f32.gmra.mxu3 %vm431_vm1, %v10538_v13 }
 0x44d   : > { %15738 = vst [vmem:[#allocation53_spill] sm:$0xff] %v13685_v29  ;;  %10926 = vmatmul.msk.f32.gmra.mxu0 %vm431_vm1, %v10796_v7  ;;  %v10797_v29 = vld [vmem:[%s12068_s27 + $0x1340] sm:$0xff]  ;;  %v15741_v7 = vld [vmem:[#allocation59_spill] sm:$0xff] }
 0x44e   : > { %v2805_v38 = vpop.f32.mrf.mxu2 }
 0x44f   : > { %v3015_v37 = vadd.f32 %v2805_v38, %v1887_v61  ;;  %v3852_v53 = vpop.f32.mrf.mxu3  ;;  %v1889_v22 = vpop.f32.mrf.mxu1 }
 0x450   : > { %v1890_v6 = vadd.f32 %v1889_v22, %v15741_v7 }
 0x451   : > { %v4062_v24 = vadd.f32 %v3852_v53, %v3015_v37  ;;  %v276_v37 = vld [vmem:[%s12068_s27 + $0x348] sm:$0xff] }
 0x452   : > { %v4902_v11 = vpop.f32.mrf.mxu0  ;;  %10153 = vmatmul.msk.f32.gmra.mxu1 %vm431_vm1, %v275_v5  ;;  %v10282_v53 = vld [vmem:[%s12068_s27 + $0xb48] sm:$0xff] }
 0x453   : > { %v13696_v54 = vadd.f32 %v4899_v47, %v4062_v24  ;;  %10411 = vmatmul.msk.f32.gmra.mxu2 %vm431_vm1, %v10281_v21  ;;  %v10540_v24 = vld [vmem:[%s12068_s27 + $0xf48] sm:$0xff] }
 0x454   : > { %10669 = vmatmul.msk.f32.gmra.mxu3 %vm431_vm1, %v10539_v45 }
 0x455   : > { %15740 = vst [vmem:[#allocation56_spill] sm:$0xff] %v13696_v54  ;;  %10927 = vmatmul.msk.f32.gmra.mxu0 %vm431_vm1, %v10797_v29  ;;  %v10798_v54 = vld [vmem:[%s12068_s27 + $0x1348] sm:$0xff]  ;;  %v15743_v29 = vld [vmem:[#allocation62_spill] sm:$0xff] }
 0x456   : > { %v2808_v13 = vpop.f32.mrf.mxu2 }
 0x457   : > { %v3016_v26 = vadd.f32 %v2808_v13, %v1890_v6  ;;  %v3855_v61 = vpop.f32.mrf.mxu3  ;;  %v1892_v38 = vpop.f32.mrf.mxu1 }
 0x458   : > { %v1893_v22 = vadd.f32 %v1892_v38, %v15743_v29 }
 0x459   : > { %v4063_v47 = vadd.f32 %v3855_v61, %v3016_v26  ;;  %v277_v26 = vld [vmem:[%s12068_s27 + $0x350] sm:$0xff] }
 0x45a   : > { %v4905_v5 = vpop.f32.mrf.mxu0  ;;  %10154 = vmatmul.msk.f32.gmra.mxu1 %vm431_vm1, %v276_v37  ;;  %v10283_v61 = vld [vmem:[%s12068_s27 + $0xb50] sm:$0xff] }
 0x45b   : > { %v13707_v21 = vadd.f32 %v4902_v11, %v4063_v47  ;;  %10412 = vmatmul.msk.f32.gmra.mxu2 %vm431_vm1, %v10282_v53  ;;  %v10541_v47 = vld [vmem:[%s12068_s27 + $0xf50] sm:$0xff] }
 0x45c   : > { %10670 = vmatmul.msk.f32.gmra.mxu3 %vm431_vm1, %v10540_v24 }
 0x45d   : > { %15742 = vst [vmem:[#allocation59_spill] sm:$0xff] %v13707_v21  ;;  %10928 = vmatmul.msk.f32.gmra.mxu0 %vm431_vm1, %v10798_v54  ;;  %v10799_v21 = vld [vmem:[%s12068_s27 + $0x1350] sm:$0xff]  ;;  %v15745_v54 = vld [vmem:[#allocation65_spill] sm:$0xff] }
 0x45e   : > { %v2811_v45 = vpop.f32.mrf.mxu2 }
 0x45f   : > { %v3017_v7 = vadd.f32 %v2811_v45, %v1893_v22  ;;  %v3858_v6 = vpop.f32.mrf.mxu3  ;;  %v1895_v13 = vpop.f32.mrf.mxu1 }
 0x460   : > { %v1896_v38 = vadd.f32 %v1895_v13, %v15745_v54 }
 0x461   : > { %v4064_v11 = vadd.f32 %v3858_v6, %v3017_v7  ;;  %v278_v7 = vld [vmem:[%s12068_s27 + $0x358] sm:$0xff] }
 0x462   : > { %v4908_v37 = vpop.f32.mrf.mxu0  ;;  %10155 = vmatmul.msk.f32.gmra.mxu1 %vm431_vm1, %v277_v26  ;;  %v10284_v6 = vld [vmem:[%s12068_s27 + $0xb58] sm:$0xff] }
 0x463   : > { %v13718_v53 = vadd.f32 %v4905_v5, %v4064_v11  ;;  %10413 = vmatmul.msk.f32.gmra.mxu2 %vm431_vm1, %v10283_v61  ;;  %v10542_v11 = vld [vmem:[%s12068_s27 + $0xf58] sm:$0xff] }
 0x464   : > { %10671 = vmatmul.msk.f32.gmra.mxu3 %vm431_vm1, %v10541_v47 }
 0x465   : > { %15744 = vst [vmem:[#allocation62_spill] sm:$0xff] %v13718_v53  ;;  %10929 = vmatmul.msk.f32.gmra.mxu0 %vm431_vm1, %v10799_v21  ;;  %v10800_v53 = vld [vmem:[%s12068_s27 + $0x1358] sm:$0xff]  ;;  %v15747_v21 = vld [vmem:[#allocation68_spill] sm:$0xff] }
 0x466   : > { %v2814_v24 = vpop.f32.mrf.mxu2 }
 0x467   : > { %v3018_v29 = vadd.f32 %v2814_v24, %v1896_v38  ;;  %v3861_v22 = vpop.f32.mrf.mxu3  ;;  %v1898_v45 = vpop.f32.mrf.mxu1 }
 0x468   : > { %v1899_v13 = vadd.f32 %v1898_v45, %v15747_v21 }
 0x469   : > { %v4065_v5 = vadd.f32 %v3861_v22, %v3018_v29  ;;  %v279_v29 = vld [vmem:[%s12068_s27 + $0x360] sm:$0xff] }
 0x46a   : > { %v4911_v26 = vpop.f32.mrf.mxu0  ;;  %10156 = vmatmul.msk.f32.gmra.mxu1 %vm431_vm1, %v278_v7  ;;  %v10285_v22 = vld [vmem:[%s12068_s27 + $0xb60] sm:$0xff] }
 0x46b   : > { %v13729_v61 = vadd.f32 %v4908_v37, %v4065_v5  ;;  %10414 = vmatmul.msk.f32.gmra.mxu2 %vm431_vm1, %v10284_v6  ;;  %v10543_v5 = vld [vmem:[%s12068_s27 + $0xf60] sm:$0xff] }
 0x46c   : > { %10672 = vmatmul.msk.f32.gmra.mxu3 %vm431_vm1, %v10542_v11 }
 0x46d   : > { %15746 = vst [vmem:[#allocation65_spill] sm:$0xff] %v13729_v61  ;;  %10930 = vmatmul.msk.f32.gmra.mxu0 %vm431_vm1, %v10800_v53  ;;  %v10801_v61 = vld [vmem:[%s12068_s27 + $0x1360] sm:$0xff]  ;;  %v15749_v53 = vld [vmem:[#allocation71_spill] sm:$0xff] }
 0x46e   : > { %v2817_v47 = vpop.f32.mrf.mxu2 }
 0x46f   : > { %v3019_v54 = vadd.f32 %v2817_v47, %v1899_v13  ;;  %v3864_v38 = vpop.f32.mrf.mxu3  ;;  %v1901_v24 = vpop.f32.mrf.mxu1 }
 0x470   : > { %v1902_v45 = vadd.f32 %v1901_v24, %v15749_v53 }
 0x471   : > { %v4066_v37 = vadd.f32 %v3864_v38, %v3019_v54  ;;  %v280_v54 = vld [vmem:[%s12068_s27 + $0x368] sm:$0xff] }
 0x472   : > { %v4914_v7 = vpop.f32.mrf.mxu0  ;;  %10157 = vmatmul.msk.f32.gmra.mxu1 %vm431_vm1, %v279_v29  ;;  %v10286_v38 = vld [vmem:[%s12068_s27 + $0xb68] sm:$0xff] }
 0x473   : > { %v13740_v6 = vadd.f32 %v4911_v26, %v4066_v37  ;;  %10415 = vmatmul.msk.f32.gmra.mxu2 %vm431_vm1, %v10285_v22  ;;  %v10544_v37 = vld [vmem:[%s12068_s27 + $0xf68] sm:$0xff] }
 0x474   : > { %10673 = vmatmul.msk.f32.gmra.mxu3 %vm431_vm1, %v10543_v5 }
 0x475   : > { %15748 = vst [vmem:[#allocation68_spill] sm:$0xff] %v13740_v6  ;;  %10931 = vmatmul.msk.f32.gmra.mxu0 %vm431_vm1, %v10801_v61  ;;  %v10802_v6 = vld [vmem:[%s12068_s27 + $0x1368] sm:$0xff]  ;;  %v15751_v61 = vld [vmem:[#allocation74_spill] sm:$0xff] }
 0x476   : > { %v2820_v11 = vpop.f32.mrf.mxu2 }
 0x477   : > { %v3020_v21 = vadd.f32 %v2820_v11, %v1902_v45  ;;  %v3867_v13 = vpop.f32.mrf.mxu3  ;;  %v1904_v47 = vpop.f32.mrf.mxu1 }
 0x478   : > { %v1905_v24 = vadd.f32 %v1904_v47, %v15751_v61 }
 0x479   : > { %v4067_v26 = vadd.f32 %v3867_v13, %v3020_v21  ;;  %v281_v21 = vld [vmem:[%s12068_s27 + $0x370] sm:$0xff] }
 0x47a   : > { %v4917_v29 = vpop.f32.mrf.mxu0  ;;  %10158 = vmatmul.msk.f32.gmra.mxu1 %vm431_vm1, %v280_v54  ;;  %v10287_v13 = vld [vmem:[%s12068_s27 + $0xb70] sm:$0xff] }
 0x47b   : > { %v13751_v22 = vadd.f32 %v4914_v7, %v4067_v26  ;;  %10416 = vmatmul.msk.f32.gmra.mxu2 %vm431_vm1, %v10286_v38  ;;  %v10545_v26 = vld [vmem:[%s12068_s27 + $0xf70] sm:$0xff] }
 0x47c   : > { %10674 = vmatmul.msk.f32.gmra.mxu3 %vm431_vm1, %v10544_v37 }
 0x47d   : > { %15750 = vst [vmem:[#allocation71_spill] sm:$0xff] %v13751_v22  ;;  %10932 = vmatmul.msk.f32.gmra.mxu0 %vm431_vm1, %v10802_v6  ;;  %v10803_v22 = vld [vmem:[%s12068_s27 + $0x1370] sm:$0xff]  ;;  %v15753_v6 = vld [vmem:[#allocation77_spill] sm:$0xff] }
 0x47e   : > { %v2823_v5 = vpop.f32.mrf.mxu2 }
 0x47f   : > { %v3021_v53 = vadd.f32 %v2823_v5, %v1905_v24  ;;  %v3870_v45 = vpop.f32.mrf.mxu3  ;;  %v1907_v11 = vpop.f32.mrf.mxu1 }
 0x480   : > { %v1908_v47 = vadd.f32 %v1907_v11, %v15753_v6 }
 0x481   : > { %v4068_v7 = vadd.f32 %v3870_v45, %v3021_v53  ;;  %v282_v53 = vld [vmem:[%s12068_s27 + $0x378] sm:$0xff] }
 0x482   : > { %v4920_v54 = vpop.f32.mrf.mxu0  ;;  %10159 = vmatmul.msk.f32.gmra.mxu1 %vm431_vm1, %v281_v21  ;;  %v10288_v45 = vld [vmem:[%s12068_s27 + $0xb78] sm:$0xff] }
 0x483   : > { %v13762_v38 = vadd.f32 %v4917_v29, %v4068_v7  ;;  %10417 = vmatmul.msk.f32.gmra.mxu2 %vm431_vm1, %v10287_v13  ;;  %v10546_v7 = vld [vmem:[%s12068_s27 + $0xf78] sm:$0xff] }
 0x484   : > { %10675 = vmatmul.msk.f32.gmra.mxu3 %vm431_vm1, %v10545_v26 }
 0x485   : > { %15752 = vst [vmem:[#allocation74_spill] sm:$0xff] %v13762_v38  ;;  %10933 = vmatmul.msk.f32.gmra.mxu0 %vm431_vm1, %v10803_v22  ;;  %v10804_v38 = vld [vmem:[%s12068_s27 + $0x1378] sm:$0xff]  ;;  %v15755_v22 = vld [vmem:[#allocation80_spill] sm:$0xff] }
 0x486   : > { %v2826_v37 = vpop.f32.mrf.mxu2 }
 0x487   : > { %v3022_v61 = vadd.f32 %v2826_v37, %v1908_v47  ;;  %v3873_v24 = vpop.f32.mrf.mxu3  ;;  %v1910_v5 = vpop.f32.mrf.mxu1 }
 0x488   : > { %v1911_v11 = vadd.f32 %v1910_v5, %v15755_v22 }
 0x489   : > { %v4069_v29 = vadd.f32 %v3873_v24, %v3022_v61  ;;  %v283_v61 = vld [vmem:[%s12068_s27 + $0x380] sm:$0xff] }
 0x48a   : > { %v4923_v21 = vpop.f32.mrf.mxu0  ;;  %10160 = vmatmul.msk.f32.gmra.mxu1 %vm431_vm1, %v282_v53  ;;  %v10289_v24 = vld [vmem:[%s12068_s27 + $0xb80] sm:$0xff] }
 0x48b   : > { %v13773_v13 = vadd.f32 %v4920_v54, %v4069_v29  ;;  %10418 = vmatmul.msk.f32.gmra.mxu2 %vm431_vm1, %v10288_v45  ;;  %v10547_v29 = vld [vmem:[%s12068_s27 + $0xf80] sm:$0xff] }
 0x48c   : > { %10676 = vmatmul.msk.f32.gmra.mxu3 %vm431_vm1, %v10546_v7 }
 0x48d   : > { %15754 = vst [vmem:[#allocation77_spill] sm:$0xff] %v13773_v13  ;;  %10934 = vmatmul.msk.f32.gmra.mxu0 %vm431_vm1, %v10804_v38  ;;  %v10805_v13 = vld [vmem:[%s12068_s27 + $0x1380] sm:$0xff]  ;;  %v15757_v38 = vld [vmem:[#allocation3_spill] sm:$0xff] }
 0x48e   : > { %v2829_v26 = vpop.f32.mrf.mxu2 }
 0x48f   : > { %v3023_v6 = vadd.f32 %v2829_v26, %v1911_v11  ;;  %v3876_v47 = vpop.f32.mrf.mxu3  ;;  %v1913_v37 = vpop.f32.mrf.mxu1 }
 0x490   : > { %v1914_v5 = vadd.f32 %v1913_v37, %v15757_v38 }
 0x491   : > { %v4070_v54 = vadd.f32 %v3876_v47, %v3023_v6  ;;  %v284_v6 = vld [vmem:[%s12068_s27 + $0x388] sm:$0xff] }
 0x492   : > { %v4926_v53 = vpop.f32.mrf.mxu0  ;;  %10161 = vmatmul.msk.f32.gmra.mxu1 %vm431_vm1, %v283_v61  ;;  %v10290_v47 = vld [vmem:[%s12068_s27 + $0xb88] sm:$0xff] }
 0x493   : > { %v13784_v45 = vadd.f32 %v4923_v21, %v4070_v54  ;;  %10419 = vmatmul.msk.f32.gmra.mxu2 %vm431_vm1, %v10289_v24  ;;  %v10548_v54 = vld [vmem:[%s12068_s27 + $0xf88] sm:$0xff] }
 0x494   : > { %10677 = vmatmul.msk.f32.gmra.mxu3 %vm431_vm1, %v10547_v29 }
 0x495   : > { %15756 = vst [vmem:[#allocation80_spill] sm:$0xff] %v13784_v45  ;;  %10935 = vmatmul.msk.f32.gmra.mxu0 %vm431_vm1, %v10805_v13  ;;  %v10806_v45 = vld [vmem:[%s12068_s27 + $0x1388] sm:$0xff]  ;;  %v15759_v13 = vld [vmem:[#allocation5_spill] sm:$0xff] }
 0x496   : > { %v2832_v7 = vpop.f32.mrf.mxu2 }
 0x497   : > { %v3024_v22 = vadd.f32 %v2832_v7, %v1914_v5  ;;  %v3879_v11 = vpop.f32.mrf.mxu3  ;;  %v1916_v26 = vpop.f32.mrf.mxu1 }
 0x498   : > { %v1917_v37 = vadd.f32 %v1916_v26, %v15759_v13 }
 0x499   : > { %v4071_v21 = vadd.f32 %v3879_v11, %v3024_v22  ;;  %v285_v22 = vld [vmem:[%s12068_s27 + $0x390] sm:$0xff] }
 0x49a   : > { %v4929_v61 = vpop.f32.mrf.mxu0  ;;  %10162 = vmatmul.msk.f32.gmra.mxu1 %vm431_vm1, %v284_v6  ;;  %v10291_v11 = vld [vmem:[%s12068_s27 + $0xb90] sm:$0xff] }
 0x49b   : > { %v13795_v24 = vadd.f32 %v4926_v53, %v4071_v21  ;;  %10420 = vmatmul.msk.f32.gmra.mxu2 %vm431_vm1, %v10290_v47  ;;  %v10549_v21 = vld [vmem:[%s12068_s27 + $0xf90] sm:$0xff] }
 0x49c   : > { %10678 = vmatmul.msk.f32.gmra.mxu3 %vm431_vm1, %v10548_v54 }
 0x49d   : > { %15758 = vst [vmem:[#allocation3_spill] sm:$0xff] %v13795_v24  ;;  %10936 = vmatmul.msk.f32.gmra.mxu0 %vm431_vm1, %v10806_v45  ;;  %v10807_v24 = vld [vmem:[%s12068_s27 + $0x1390] sm:$0xff]  ;;  %v15761_v45 = vld [vmem:[#allocation7_spill] sm:$0xff] }
 0x49e   : > { %v2835_v29 = vpop.f32.mrf.mxu2 }
 0x49f   : > { %v3025_v38 = vadd.f32 %v2835_v29, %v1917_v37  ;;  %v3882_v5 = vpop.f32.mrf.mxu3  ;;  %v1919_v7 = vpop.f32.mrf.mxu1 }
 0x4a0   : > { %v1920_v26 = vadd.f32 %v1919_v7, %v15761_v45 }
 0x4a1   : > { %v4072_v53 = vadd.f32 %v3882_v5, %v3025_v38  ;;  %v286_v38 = vld [vmem:[%s12068_s27 + $0x398] sm:$0xff] }
 0x4a2   : > { %v4932_v6 = vpop.f32.mrf.mxu0  ;;  %10163 = vmatmul.msk.f32.gmra.mxu1 %vm431_vm1, %v285_v22  ;;  %v10292_v5 = vld [vmem:[%s12068_s27 + $0xb98] sm:$0xff] }
 0x4a3   : > { %v13806_v47 = vadd.f32 %v4929_v61, %v4072_v53  ;;  %10421 = vmatmul.msk.f32.gmra.mxu2 %vm431_vm1, %v10291_v11  ;;  %v10550_v53 = vld [vmem:[%s12068_s27 + $0xf98] sm:$0xff] }
 0x4a4   : > { %10679 = vmatmul.msk.f32.gmra.mxu3 %vm431_vm1, %v10549_v21 }
 0x4a5   : > { %15760 = vst [vmem:[#allocation5_spill] sm:$0xff] %v13806_v47  ;;  %10937 = vmatmul.msk.f32.gmra.mxu0 %vm431_vm1, %v10807_v24  ;;  %v10808_v47 = vld [vmem:[%s12068_s27 + $0x1398] sm:$0xff] }
 0x4a6   : > { %v2838_v54 = vpop.f32.mrf.mxu2  ;;  %v15763_v24 = vld [vmem:[#allocation9_spill] sm:$0xff] }
 0x4a7   : > { %v3026_v13 = vadd.f32 %v2838_v54, %v1920_v26  ;;  %v3885_v37 = vpop.f32.mrf.mxu3  ;;  %v1922_v29 = vpop.f32.mrf.mxu1 }
 0x4a8   : > { %v1923_v7 = vadd.f32 %v1922_v29, %v15763_v24 }
 0x4a9   : > { %v4073_v61 = vadd.f32 %v3885_v37, %v3026_v13  ;;  %v287_v13 = vld [vmem:[%s12068_s27 + $0x3a0] sm:$0xff] }
 0x4aa   : > { %v4935_v22 = vpop.f32.mrf.mxu0  ;;  %10164 = vmatmul.msk.f32.gmra.mxu1 %vm431_vm1, %v286_v38  ;;  %v10293_v37 = vld [vmem:[%s12068_s27 + $0xba0] sm:$0xff] }
 0x4ab   : > { %v13817_v11 = vadd.f32 %v4932_v6, %v4073_v61  ;;  %10422 = vmatmul.msk.f32.gmra.mxu2 %vm431_vm1, %v10292_v5  ;;  %v10551_v61 = vld [vmem:[%s12068_s27 + $0xfa0] sm:$0xff] }
 0x4ac   : > { %10680 = vmatmul.msk.f32.gmra.mxu3 %vm431_vm1, %v10550_v53 }
 0x4ad   : > { %15762 = vst [vmem:[#allocation7_spill] sm:$0xff] %v13817_v11  ;;  %10938 = vmatmul.msk.f32.gmra.mxu0 %vm431_vm1, %v10808_v47  ;;  %v10809_v11 = vld [vmem:[%s12068_s27 + $0x13a0] sm:$0xff]  ;;  %v15765_v47 = vld [vmem:[#allocation11_spill] sm:$0xff] }
 0x4ae   : > { %v2841_v21 = vpop.f32.mrf.mxu2 }
 0x4af   : > { %v3027_v45 = vadd.f32 %v2841_v21, %v1923_v7  ;;  %v3888_v26 = vpop.f32.mrf.mxu3  ;;  %v1925_v54 = vpop.f32.mrf.mxu1 }
 0x4b0   : > { %v1926_v29 = vadd.f32 %v1925_v54, %v15765_v47 }
 0x4b1   : > { %v4074_v6 = vadd.f32 %v3888_v26, %v3027_v45  ;;  %v288_v45 = vld [vmem:[%s12068_s27 + $0x3a8] sm:$0xff] }
 0x4b2   : > { %v4938_v38 = vpop.f32.mrf.mxu0  ;;  %10165 = vmatmul.msk.f32.gmra.mxu1 %vm431_vm1, %v287_v13  ;;  %v10294_v26 = vld [vmem:[%s12068_s27 + $0xba8] sm:$0xff] }
 0x4b3   : > { %v13828_v5 = vadd.f32 %v4935_v22, %v4074_v6  ;;  %10423 = vmatmul.msk.f32.gmra.mxu2 %vm431_vm1, %v10293_v37  ;;  %v10552_v6 = vld [vmem:[%s12068_s27 + $0xfa8] sm:$0xff] }
 0x4b4   : > { %10681 = vmatmul.msk.f32.gmra.mxu3 %vm431_vm1, %v10551_v61 }
 0x4b5   : > { %15764 = vst [vmem:[#allocation9_spill] sm:$0xff] %v13828_v5  ;;  %10939 = vmatmul.msk.f32.gmra.mxu0 %vm431_vm1, %v10809_v11  ;;  %v10810_v5 = vld [vmem:[%s12068_s27 + $0x13a8] sm:$0xff]  ;;  %v15767_v11 = vld [vmem:[#allocation13_spill] sm:$0xff] }
 0x4b6   : > { %v2844_v53 = vpop.f32.mrf.mxu2 }
 0x4b7   : > { %v3028_v24 = vadd.f32 %v2844_v53, %v1926_v29  ;;  %v3891_v7 = vpop.f32.mrf.mxu3  ;;  %v1928_v21 = vpop.f32.mrf.mxu1 }
 0x4b8   : > { %v1929_v54 = vadd.f32 %v1928_v21, %v15767_v11 }
 0x4b9   : > { %v4075_v22 = vadd.f32 %v3891_v7, %v3028_v24  ;;  %v289_v24 = vld [vmem:[%s12068_s27 + $0x3b0] sm:$0xff] }
 0x4ba   : > { %v4941_v13 = vpop.f32.mrf.mxu0  ;;  %10166 = vmatmul.msk.f32.gmra.mxu1 %vm431_vm1, %v288_v45  ;;  %v10295_v7 = vld [vmem:[%s12068_s27 + $0xbb0] sm:$0xff] }
 0x4bb   : > { %v13839_v37 = vadd.f32 %v4938_v38, %v4075_v22  ;;  %10424 = vmatmul.msk.f32.gmra.mxu2 %vm431_vm1, %v10294_v26  ;;  %v10553_v22 = vld [vmem:[%s12068_s27 + $0xfb0] sm:$0xff] }
 0x4bc   : > { %10682 = vmatmul.msk.f32.gmra.mxu3 %vm431_vm1, %v10552_v6 }
 0x4bd   : > { %15766 = vst [vmem:[#allocation11_spill] sm:$0xff] %v13839_v37  ;;  %10940 = vmatmul.msk.f32.gmra.mxu0 %vm431_vm1, %v10810_v5  ;;  %v10811_v37 = vld [vmem:[%s12068_s27 + $0x13b0] sm:$0xff]  ;;  %v15769_v5 = vld [vmem:[#allocation15_spill] sm:$0xff] }
 0x4be   : > { %v2847_v61 = vpop.f32.mrf.mxu2 }
 0x4bf   : > { %v3029_v47 = vadd.f32 %v2847_v61, %v1929_v54  ;;  %v3894_v29 = vpop.f32.mrf.mxu3  ;;  %v1931_v53 = vpop.f32.mrf.mxu1 }
 0x4c0   : > { %v1932_v21 = vadd.f32 %v1931_v53, %v15769_v5 }
 0x4c1   : > { %v4076_v38 = vadd.f32 %v3894_v29, %v3029_v47  ;;  %v290_v47 = vld [vmem:[%s12068_s27 + $0x3b8] sm:$0xff] }
 0x4c2   : > { %v4944_v45 = vpop.f32.mrf.mxu0  ;;  %10167 = vmatmul.msk.f32.gmra.mxu1 %vm431_vm1, %v289_v24  ;;  %v10296_v29 = vld [vmem:[%s12068_s27 + $0xbb8] sm:$0xff] }
 0x4c3   : > { %v13850_v26 = vadd.f32 %v4941_v13, %v4076_v38  ;;  %10425 = vmatmul.msk.f32.gmra.mxu2 %vm431_vm1, %v10295_v7  ;;  %v10554_v38 = vld [vmem:[%s12068_s27 + $0xfb8] sm:$0xff] }
 0x4c4   : > { %10683 = vmatmul.msk.f32.gmra.mxu3 %vm431_vm1, %v10553_v22 }
 0x4c5   : > { %15768 = vst [vmem:[#allocation13_spill] sm:$0xff] %v13850_v26  ;;  %10941 = vmatmul.msk.f32.gmra.mxu0 %vm431_vm1, %v10811_v37  ;;  %v10812_v26 = vld [vmem:[%s12068_s27 + $0x13b8] sm:$0xff] }
 0x4c6   : > { %v2850_v6 = vpop.f32.mrf.mxu2  ;;  %v15771_v37 = vld [vmem:[#allocation17_spill] sm:$0xff] }
 0x4c7   : > { %v3030_v11 = vadd.f32 %v2850_v6, %v1932_v21  ;;  %v3897_v54 = vpop.f32.mrf.mxu3  ;;  %v1934_v61 = vpop.f32.mrf.mxu1 }
 0x4c8   : > { %v1935_v53 = vadd.f32 %v1934_v61, %v15771_v37 }
 0x4c9   : > { %v4077_v13 = vadd.f32 %v3897_v54, %v3030_v11  ;;  %v291_v11 = vld [vmem:[%s12068_s27 + $0x3c0] sm:$0xff] }
 0x4ca   : > { %v4947_v24 = vpop.f32.mrf.mxu0  ;;  %10168 = vmatmul.msk.f32.gmra.mxu1 %vm431_vm1, %v290_v47  ;;  %v10297_v54 = vld [vmem:[%s12068_s27 + $0xbc0] sm:$0xff] }
 0x4cb   : > { %v13861_v7 = vadd.f32 %v4944_v45, %v4077_v13  ;;  %10426 = vmatmul.msk.f32.gmra.mxu2 %vm431_vm1, %v10296_v29  ;;  %v10555_v13 = vld [vmem:[%s12068_s27 + $0xfc0] sm:$0xff] }
 0x4cc   : > { %10684 = vmatmul.msk.f32.gmra.mxu3 %vm431_vm1, %v10554_v38 }
 0x4cd   : > { %15770 = vst [vmem:[#allocation15_spill] sm:$0xff] %v13861_v7  ;;  %10942 = vmatmul.msk.f32.gmra.mxu0 %vm431_vm1, %v10812_v26  ;;  %v10813_v7 = vld [vmem:[%s12068_s27 + $0x13c0] sm:$0xff]  ;;  %v15773_v26 = vld [vmem:[#allocation19_spill] sm:$0xff] }
 0x4ce   : > { %v2853_v22 = vpop.f32.mrf.mxu2 }
 0x4cf   : > { %v3031_v5 = vadd.f32 %v2853_v22, %v1935_v53  ;;  %v3900_v21 = vpop.f32.mrf.mxu3  ;;  %v1937_v6 = vpop.f32.mrf.mxu1 }
 0x4d0   : > { %v1938_v61 = vadd.f32 %v1937_v6, %v15773_v26 }
 0x4d1   : > { %v4078_v45 = vadd.f32 %v3900_v21, %v3031_v5  ;;  %v292_v5 = vld [vmem:[%s12068_s27 + $0x3c8] sm:$0xff] }
 0x4d2   : > { %v4950_v47 = vpop.f32.mrf.mxu0  ;;  %10169 = vmatmul.msk.f32.gmra.mxu1 %vm431_vm1, %v291_v11  ;;  %v10298_v21 = vld [vmem:[%s12068_s27 + $0xbc8] sm:$0xff] }
 0x4d3   : > { %v13872_v29 = vadd.f32 %v4947_v24, %v4078_v45  ;;  %10427 = vmatmul.msk.f32.gmra.mxu2 %vm431_vm1, %v10297_v54  ;;  %v10556_v45 = vld [vmem:[%s12068_s27 + $0xfc8] sm:$0xff] }
 0x4d4   : > { %10685 = vmatmul.msk.f32.gmra.mxu3 %vm431_vm1, %v10555_v13 }
 0x4d5   : > { %15772 = vst [vmem:[#allocation17_spill] sm:$0xff] %v13872_v29  ;;  %10943 = vmatmul.msk.f32.gmra.mxu0 %vm431_vm1, %v10813_v7  ;;  %v10814_v29 = vld [vmem:[%s12068_s27 + $0x13c8] sm:$0xff]  ;;  %v15775_v7 = vld [vmem:[#allocation21_spill] sm:$0xff] }
 0x4d6   : > { %v2856_v38 = vpop.f32.mrf.mxu2 }
 0x4d7   : > { %v3032_v37 = vadd.f32 %v2856_v38, %v1938_v61  ;;  %v3903_v53 = vpop.f32.mrf.mxu3  ;;  %v1940_v22 = vpop.f32.mrf.mxu1 }
 0x4d8   : > { %v1941_v6 = vadd.f32 %v1940_v22, %v15775_v7 }
 0x4d9   : > { %v4079_v24 = vadd.f32 %v3903_v53, %v3032_v37  ;;  %v293_v37 = vld [vmem:[%s12068_s27 + $0x3d0] sm:$0xff] }
 0x4da   : > { %v4953_v11 = vpop.f32.mrf.mxu0  ;;  %10170 = vmatmul.msk.f32.gmra.mxu1 %vm431_vm1, %v292_v5  ;;  %v10299_v53 = vld [vmem:[%s12068_s27 + $0xbd0] sm:$0xff] }
 0x4db   : > { %v13883_v54 = vadd.f32 %v4950_v47, %v4079_v24  ;;  %10428 = vmatmul.msk.f32.gmra.mxu2 %vm431_vm1, %v10298_v21  ;;  %v10557_v24 = vld [vmem:[%s12068_s27 + $0xfd0] sm:$0xff] }
 0x4dc   : > { %10686 = vmatmul.msk.f32.gmra.mxu3 %vm431_vm1, %v10556_v45 }
 0x4dd   : > { %15774 = vst [vmem:[#allocation19_spill] sm:$0xff] %v13883_v54  ;;  %10944 = vmatmul.msk.f32.gmra.mxu0 %vm431_vm1, %v10814_v29  ;;  %v10815_v54 = vld [vmem:[%s12068_s27 + $0x13d0] sm:$0xff]  ;;  %v15777_v29 = vld [vmem:[#allocation23_spill] sm:$0xff] }
 0x4de   : > { %v2859_v13 = vpop.f32.mrf.mxu2 }
 0x4df   : > { %v3033_v26 = vadd.f32 %v2859_v13, %v1941_v6  ;;  %v3906_v61 = vpop.f32.mrf.mxu3  ;;  %v1943_v38 = vpop.f32.mrf.mxu1 }
 0x4e0   : > { %v1944_v22 = vadd.f32 %v1943_v38, %v15777_v29 }
 0x4e1   : > { %v4080_v47 = vadd.f32 %v3906_v61, %v3033_v26  ;;  %v294_v26 = vld [vmem:[%s12068_s27 + $0x3d8] sm:$0xff] }
 0x4e2   : > { %v4956_v5 = vpop.f32.mrf.mxu0  ;;  %10171 = vmatmul.msk.f32.gmra.mxu1 %vm431_vm1, %v293_v37  ;;  %v10300_v61 = vld [vmem:[%s12068_s27 + $0xbd8] sm:$0xff] }
 0x4e3   : > { %v13894_v21 = vadd.f32 %v4953_v11, %v4080_v47  ;;  %10429 = vmatmul.msk.f32.gmra.mxu2 %vm431_vm1, %v10299_v53  ;;  %v10558_v47 = vld [vmem:[%s12068_s27 + $0xfd8] sm:$0xff] }
 0x4e4   : > { %10687 = vmatmul.msk.f32.gmra.mxu3 %vm431_vm1, %v10557_v24 }
 0x4e5   : > { %15776 = vst [vmem:[#allocation21_spill] sm:$0xff] %v13894_v21  ;;  %10945 = vmatmul.msk.f32.gmra.mxu0 %vm431_vm1, %v10815_v54  ;;  %v10816_v21 = vld [vmem:[%s12068_s27 + $0x13d8] sm:$0xff] }
 0x4e6   : > { %v2862_v45 = vpop.f32.mrf.mxu2  ;;  %v15779_v54 = vld [vmem:[#allocation25_spill] sm:$0xff] }
 0x4e7   : > { %v3034_v7 = vadd.f32 %v2862_v45, %v1944_v22  ;;  %v3909_v6 = vpop.f32.mrf.mxu3  ;;  %v1946_v13 = vpop.f32.mrf.mxu1 }
 0x4e8   : > { %v1947_v38 = vadd.f32 %v1946_v13, %v15779_v54 }
 0x4e9   : > { %v4081_v11 = vadd.f32 %v3909_v6, %v3034_v7  ;;  %v295_v7 = vld [vmem:[%s12068_s27 + $0x3e0] sm:$0xff] }
 0x4ea   : > { %v4959_v37 = vpop.f32.mrf.mxu0  ;;  %10172 = vmatmul.msk.f32.gmra.mxu1 %vm431_vm1, %v294_v26  ;;  %v10301_v6 = vld [vmem:[%s12068_s27 + $0xbe0] sm:$0xff] }
 0x4eb   : > { %v13905_v53 = vadd.f32 %v4956_v5, %v4081_v11  ;;  %10430 = vmatmul.msk.f32.gmra.mxu2 %vm431_vm1, %v10300_v61  ;;  %v10559_v11 = vld [vmem:[%s12068_s27 + $0xfe0] sm:$0xff] }
 0x4ec   : > { %10688 = vmatmul.msk.f32.gmra.mxu3 %vm431_vm1, %v10558_v47 }
 0x4ed   : > { %15778 = vst [vmem:[#allocation23_spill] sm:$0xff] %v13905_v53  ;;  %10946 = vmatmul.msk.f32.gmra.mxu0 %vm431_vm1, %v10816_v21  ;;  %v10817_v53 = vld [vmem:[%s12068_s27 + $0x13e0] sm:$0xff]  ;;  %v15781_v21 = vld [vmem:[#allocation27_spill] sm:$0xff] }
 0x4ee   : > { %v2865_v24 = vpop.f32.mrf.mxu2 }
 0x4ef   : > { %v3035_v29 = vadd.f32 %v2865_v24, %v1947_v38  ;;  %v3912_v22 = vpop.f32.mrf.mxu3  ;;  %v1949_v45 = vpop.f32.mrf.mxu1 }
 0x4f0   : > { %v1950_v13 = vadd.f32 %v1949_v45, %v15781_v21 }
 0x4f1   : > { %v4082_v5 = vadd.f32 %v3912_v22, %v3035_v29  ;;  %v296_v29 = vld [vmem:[%s12068_s27 + $0x3e8] sm:$0xff] }
 0x4f2   : > { %v4962_v26 = vpop.f32.mrf.mxu0  ;;  %10173 = vmatmul.msk.f32.gmra.mxu1 %vm431_vm1, %v295_v7  ;;  %v10302_v22 = vld [vmem:[%s12068_s27 + $0xbe8] sm:$0xff] }
 0x4f3   : > { %v13916_v61 = vadd.f32 %v4959_v37, %v4082_v5  ;;  %10431 = vmatmul.msk.f32.gmra.mxu2 %vm431_vm1, %v10301_v6  ;;  %v10560_v5 = vld [vmem:[%s12068_s27 + $0xfe8] sm:$0xff] }
 0x4f4   : > { %10689 = vmatmul.msk.f32.gmra.mxu3 %vm431_vm1, %v10559_v11 }
 0x4f5   : > { %15780 = vst [vmem:[#allocation25_spill] sm:$0xff] %v13916_v61  ;;  %10947 = vmatmul.msk.f32.gmra.mxu0 %vm431_vm1, %v10817_v53  ;;  %v10818_v61 = vld [vmem:[%s12068_s27 + $0x13e8] sm:$0xff]  ;;  %v15783_v53 = vld [vmem:[#allocation29_spill] sm:$0xff] }
 0x4f6   : > { %v2868_v47 = vpop.f32.mrf.mxu2 }
 0x4f7   : > { %v3036_v54 = vadd.f32 %v2868_v47, %v1950_v13  ;;  %v3915_v38 = vpop.f32.mrf.mxu3  ;;  %v1952_v24 = vpop.f32.mrf.mxu1 }
 0x4f8   : > { %v1953_v45 = vadd.f32 %v1952_v24, %v15783_v53 }
 0x4f9   : > { %v4083_v37 = vadd.f32 %v3915_v38, %v3036_v54  ;;  %v297_v54 = vld [vmem:[%s12068_s27 + $0x3f0] sm:$0xff] }
 0x4fa   : > { %v4965_v7 = vpop.f32.mrf.mxu0  ;;  %10174 = vmatmul.msk.f32.gmra.mxu1 %vm431_vm1, %v296_v29  ;;  %v10303_v38 = vld [vmem:[%s12068_s27 + $0xbf0] sm:$0xff] }
 0x4fb   : > { %v13927_v6 = vadd.f32 %v4962_v26, %v4083_v37  ;;  %10432 = vmatmul.msk.f32.gmra.mxu2 %vm431_vm1, %v10302_v22  ;;  %v10561_v37 = vld [vmem:[%s12068_s27 + $0xff0] sm:$0xff] }
 0x4fc   : > { %10690 = vmatmul.msk.f32.gmra.mxu3 %vm431_vm1, %v10560_v5 }
 0x4fd   : > { %15782 = vst [vmem:[#allocation27_spill] sm:$0xff] %v13927_v6  ;;  %10948 = vmatmul.msk.f32.gmra.mxu0 %vm431_vm1, %v10818_v61  ;;  %v10819_v6 = vld [vmem:[%s12068_s27 + $0x13f0] sm:$0xff]  ;;  %v15785_v61 = vld [vmem:[#allocation31_spill] sm:$0xff] }
 0x4fe   : > { %v2871_v11 = vpop.f32.mrf.mxu2 }
 0x4ff   : > { %v3037_v21 = vadd.f32 %v2871_v11, %v1953_v45  ;;  %v3918_v13 = vpop.f32.mrf.mxu3  ;;  %v1955_v47 = vpop.f32.mrf.mxu1 }
 0x500   : > { %v1956_v24 = vadd.f32 %v1955_v47, %v15785_v61 }
 0x501   : > { %v4084_v26 = vadd.f32 %v3918_v13, %v3037_v21  ;;  %v298_v21 = vld [vmem:[%s12068_s27 + $0x3f8] sm:$0xff] }
 0x502   : > { %v4968_v29 = vpop.f32.mrf.mxu0  ;;  %10175 = vmatmul.msk.f32.gmra.mxu1 %vm431_vm1, %v297_v54  ;;  %v10304_v13 = vld [vmem:[%s12068_s27 + $0xbf8] sm:$0xff] }
 0x503   : > { %v13938_v22 = vadd.f32 %v4965_v7, %v4084_v26  ;;  %10433 = vmatmul.msk.f32.gmra.mxu2 %vm431_vm1, %v10303_v38  ;;  %v10562_v26 = vld [vmem:[%s12068_s27 + $0xff8] sm:$0xff] }
 0x504   : > { %10691 = vmatmul.msk.f32.gmra.mxu3 %vm431_vm1, %v10561_v37 }
 0x505   : > { %15784 = vst [vmem:[#allocation29_spill] sm:$0xff] %v13938_v22  ;;  %10949 = vmatmul.msk.f32.gmra.mxu0 %vm431_vm1, %v10819_v6  ;;  %v10820_v22 = vld [vmem:[%s12068_s27 + $0x13f8] sm:$0xff] }
 0x506   : > { %v2874_v5 = vpop.f32.mrf.mxu2  ;;  %v15787_v6 = vld [vmem:[#allocation33_spill] sm:$0xff] }
 0x507   : > { %v3038_v53 = vadd.f32 %v2874_v5, %v1956_v24  ;;  %v3921_v45 = vpop.f32.mrf.mxu3  ;;  %v1958_v11 = vpop.f32.mrf.mxu1 }
 0x508   : > { %v1959_v47 = vadd.f32 %v1958_v11, %v15787_v6 }
 0x509   : > { %v4085_v7 = vadd.f32 %v3921_v45, %v3038_v53  ;;  %v10951_v53 = vld [vmem:[%s12068_s27 + $0x1400] sm:$0xff] }
 0x50a   : > { %v4971_v54 = vpop.f32.mrf.mxu0  ;;  %10176 = vmatmul.msk.f32.gmra.mxu1 %vm431_vm1, %v298_v21  ;;  %v11209_v45 = vld [vmem:[%s12068_s27 + $0x1800] sm:$0xff] }
 0x50b   : > { %v13949_v38 = vadd.f32 %v4968_v29, %v4085_v7  ;;  %10434 = vmatmul.msk.f32.gmra.mxu2 %vm431_vm1, %v10304_v13  ;;  %v11467_v7 = vld [vmem:[%s12068_s27 + $0x1c00] sm:$0xff] }
 0x50c   : > { %10692 = vmatmul.msk.f32.gmra.mxu3 %vm431_vm1, %v10562_v26 }
 0x50d   : > { %15786 = vst [vmem:[#allocation31_spill] sm:$0xff] %v13949_v38  ;;  %10950 = vmatmul.msk.f32.gmra.mxu0 %vm431_vm1, %v10820_v22  ;;  %v11725_v38 = vld [vmem:[%s12068_s27 + $0x2000] sm:$0xff]  ;;  %v15789_v22 = vld [vmem:[#allocation36_spill] sm:$0xff] }
 0x50e   : > { %v2877_v37 = vpop.f32.mrf.mxu2 }
 0x50f   : > { %v3039_v61 = vadd.f32 %v2877_v37, %v1959_v47  ;;  %v3924_v24 = vpop.f32.mrf.mxu3  ;;  %v1961_v5 = vpop.f32.mrf.mxu1 }
 0x510   : > { %v1962_v11 = vadd.f32 %v1961_v5, %v15789_v22 }
 0x511   : > { %v4086_v29 = vadd.f32 %v3924_v24, %v3039_v61  ;;  %v10952_v61 = vld [vmem:[%s12068_s27 + $0x1408] sm:$0xff] }
 0x512   : > { %v4974_v21 = vpop.f32.mrf.mxu0  ;;  %11081 = vmatmul.msk.f32.vlgmr.msra.gmra.mxu1 %vm431_vm1, %v10951_v53  ;;  %v11210_v24 = vld [vmem:[%s12068_s27 + $0x1808] sm:$0xff] }
 0x513   : > { %v13960_v13 = vadd.f32 %v4971_v54, %v4086_v29  ;;  %11339 = vmatmul.msk.f32.vlgmr.msra.gmra.mxu2 %vm431_vm1, %v11209_v45  ;;  %v11468_v29 = vld [vmem:[%s12068_s27 + $0x1c08] sm:$0xff] }
 0x514   : > { %11597 = vmatmul.msk.f32.vlgmr.msra.gmra.mxu3 %vm431_vm1, %v11467_v7 }
 0x515   : > { %15788 = vst [vmem:[#allocation33_spill] sm:$0xff] %v13960_v13  ;;  %11855 = vmatmul.msk.f32.vlgmr.msra.gmra.mxu0 %vm431_vm1, %v11725_v38  ;;  %v11726_v13 = vld [vmem:[%s12068_s27 + $0x2008] sm:$0xff] }
 0x516   : > { %v2880_v26 = vpop.f32.mrf.mxu2  ;;  %v15791_v38 = vld [vmem:[#allocation39_spill] sm:$0xff] }
 0x517   : > { %v3040_v6 = vadd.f32 %v2880_v26, %v1962_v11  ;;  %v3927_v47 = vpop.f32.mrf.mxu3  ;;  %v1964_v37 = vpop.f32.mrf.mxu1 }
 0x518   : > { %v1965_v5 = vadd.f32 %v1964_v37, %v15791_v38 }
 0x519   : > { %v4087_v54 = vadd.f32 %v3927_v47, %v3040_v6  ;;  %v10953_v6 = vld [vmem:[%s12068_s27 + $0x1410] sm:$0xff] }
 0x51a   : > { %v4977_v53 = vpop.f32.mrf.mxu0  ;;  %11082 = vmatmul.msk.f32.gmra.mxu1 %vm431_vm1, %v10952_v61  ;;  %v11211_v47 = vld [vmem:[%s12068_s27 + $0x1810] sm:$0xff] }
 0x51b   : > { %v13971_v45 = vadd.f32 %v4974_v21, %v4087_v54  ;;  %11340 = vmatmul.msk.f32.gmra.mxu2 %vm431_vm1, %v11210_v24  ;;  %v11469_v54 = vld [vmem:[%s12068_s27 + $0x1c10] sm:$0xff] }
 0x51c   : > { %11598 = vmatmul.msk.f32.gmra.mxu3 %vm431_vm1, %v11468_v29 }
 0x51d   : > { %15790 = vst [vmem:[#allocation36_spill] sm:$0xff] %v13971_v45  ;;  %11856 = vmatmul.msk.f32.gmra.mxu0 %vm431_vm1, %v11726_v13  ;;  %v11727_v45 = vld [vmem:[%s12068_s27 + $0x2010] sm:$0xff]  ;;  %v15793_v13 = vld [vmem:[#allocation42_spill] sm:$0xff] }
 0x51e   : > { %v2883_v7 = vpop.f32.mrf.mxu2 }
 0x51f   : > { %v3041_v22 = vadd.f32 %v2883_v7, %v1965_v5  ;;  %v3930_v11 = vpop.f32.mrf.mxu3  ;;  %v1967_v26 = vpop.f32.mrf.mxu1 }
 0x520   : > { %v1968_v37 = vadd.f32 %v1967_v26, %v15793_v13 }
 0x521   : > { %v4088_v21 = vadd.f32 %v3930_v11, %v3041_v22  ;;  %v10954_v22 = vld [vmem:[%s12068_s27 + $0x1418] sm:$0xff] }
 0x522   : > { %v4980_v61 = vpop.f32.mrf.mxu0  ;;  %11083 = vmatmul.msk.f32.gmra.mxu1 %vm431_vm1, %v10953_v6  ;;  %v11212_v11 = vld [vmem:[%s12068_s27 + $0x1818] sm:$0xff] }
 0x523   : > { %v13982_v24 = vadd.f32 %v4977_v53, %v4088_v21  ;;  %11341 = vmatmul.msk.f32.gmra.mxu2 %vm431_vm1, %v11211_v47  ;;  %v11470_v21 = vld [vmem:[%s12068_s27 + $0x1c18] sm:$0xff] }
 0x524   : > { %11599 = vmatmul.msk.f32.gmra.mxu3 %vm431_vm1, %v11469_v54 }
 0x525   : > { %15792 = vst [vmem:[#allocation39_spill] sm:$0xff] %v13982_v24  ;;  %11857 = vmatmul.msk.f32.gmra.mxu0 %vm431_vm1, %v11727_v45  ;;  %v11728_v24 = vld [vmem:[%s12068_s27 + $0x2018] sm:$0xff] }
 0x526   : > { %v2886_v29 = vpop.f32.mrf.mxu2  ;;  %v15795_v45 = vld [vmem:[#allocation45_spill] sm:$0xff] }
 0x527   : > { %v3042_v38 = vadd.f32 %v2886_v29, %v1968_v37  ;;  %v3933_v5 = vpop.f32.mrf.mxu3  ;;  %v1970_v7 = vpop.f32.mrf.mxu1 }
 0x528   : > { %v1971_v26 = vadd.f32 %v1970_v7, %v15795_v45 }
 0x529   : > { %v4089_v53 = vadd.f32 %v3933_v5, %v3042_v38  ;;  %v10955_v38 = vld [vmem:[%s12068_s27 + $0x1420] sm:$0xff] }
 0x52a   : > { %v4983_v6 = vpop.f32.mrf.mxu0  ;;  %11084 = vmatmul.msk.f32.gmra.mxu1 %vm431_vm1, %v10954_v22  ;;  %v11213_v5 = vld [vmem:[%s12068_s27 + $0x1820] sm:$0xff] }
 0x52b   : > { %v13993_v47 = vadd.f32 %v4980_v61, %v4089_v53  ;;  %11342 = vmatmul.msk.f32.gmra.mxu2 %vm431_vm1, %v11212_v11  ;;  %v11471_v53 = vld [vmem:[%s12068_s27 + $0x1c20] sm:$0xff] }
 0x52c   : > { %11600 = vmatmul.msk.f32.gmra.mxu3 %vm431_vm1, %v11470_v21 }
 0x52d   : > { %15794 = vst [vmem:[#allocation42_spill] sm:$0xff] %v13993_v47  ;;  %11858 = vmatmul.msk.f32.gmra.mxu0 %vm431_vm1, %v11728_v24  ;;  %v11729_v47 = vld [vmem:[%s12068_s27 + $0x2020] sm:$0xff]  ;;  %v15797_v24 = vld [vmem:[#allocation48_spill] sm:$0xff] }
 0x52e   : > { %v2889_v54 = vpop.f32.mrf.mxu2 }
 0x52f   : > { %v3043_v13 = vadd.f32 %v2889_v54, %v1971_v26  ;;  %v3936_v37 = vpop.f32.mrf.mxu3  ;;  %v1973_v29 = vpop.f32.mrf.mxu1 }
 0x530   : > { %v1974_v7 = vadd.f32 %v1973_v29, %v15797_v24 }
 0x531   : > { %v4090_v61 = vadd.f32 %v3936_v37, %v3043_v13  ;;  %v10956_v13 = vld [vmem:[%s12068_s27 + $0x1428] sm:$0xff] }
 0x532   : > { %v4986_v22 = vpop.f32.mrf.mxu0  ;;  %11085 = vmatmul.msk.f32.gmra.mxu1 %vm431_vm1, %v10955_v38  ;;  %v11214_v37 = vld [vmem:[%s12068_s27 + $0x1828] sm:$0xff] }
 0x533   : > { %v14004_v11 = vadd.f32 %v4983_v6, %v4090_v61  ;;  %11343 = vmatmul.msk.f32.gmra.mxu2 %vm431_vm1, %v11213_v5  ;;  %v11472_v61 = vld [vmem:[%s12068_s27 + $0x1c28] sm:$0xff] }
 0x534   : > { %11601 = vmatmul.msk.f32.gmra.mxu3 %vm431_vm1, %v11471_v53 }
 0x535   : > { %15796 = vst [vmem:[#allocation45_spill] sm:$0xff] %v14004_v11  ;;  %11859 = vmatmul.msk.f32.gmra.mxu0 %vm431_vm1, %v11729_v47  ;;  %v11730_v11 = vld [vmem:[%s12068_s27 + $0x2028] sm:$0xff] }
 0x536   : > { %v2892_v21 = vpop.f32.mrf.mxu2  ;;  %v15799_v47 = vld [vmem:[#allocation51_spill] sm:$0xff] }
 0x537   : > { %v3044_v45 = vadd.f32 %v2892_v21, %v1974_v7  ;;  %v3939_v26 = vpop.f32.mrf.mxu3  ;;  %v1976_v54 = vpop.f32.mrf.mxu1 }
 0x538   : > { %v1977_v29 = vadd.f32 %v1976_v54, %v15799_v47 }
 0x539   : > { %v4091_v6 = vadd.f32 %v3939_v26, %v3044_v45  ;;  %v10957_v45 = vld [vmem:[%s12068_s27 + $0x1430] sm:$0xff] }
 0x53a   : > { %v4989_v38 = vpop.f32.mrf.mxu0  ;;  %11086 = vmatmul.msk.f32.gmra.mxu1 %vm431_vm1, %v10956_v13  ;;  %v11215_v26 = vld [vmem:[%s12068_s27 + $0x1830] sm:$0xff] }
 0x53b   : > { %v14015_v5 = vadd.f32 %v4986_v22, %v4091_v6  ;;  %11344 = vmatmul.msk.f32.gmra.mxu2 %vm431_vm1, %v11214_v37  ;;  %v11473_v6 = vld [vmem:[%s12068_s27 + $0x1c30] sm:$0xff] }
 0x53c   : > { %11602 = vmatmul.msk.f32.gmra.mxu3 %vm431_vm1, %v11472_v61 }
 0x53d   : > { %15798 = vst [vmem:[#allocation48_spill] sm:$0xff] %v14015_v5  ;;  %11860 = vmatmul.msk.f32.gmra.mxu0 %vm431_vm1, %v11730_v11  ;;  %v11731_v5 = vld [vmem:[%s12068_s27 + $0x2030] sm:$0xff]  ;;  %v15801_v11 = vld [vmem:[#allocation54_spill] sm:$0xff] }
 0x53e   : > { %v2895_v53 = vpop.f32.mrf.mxu2 }
 0x53f   : > { %v3045_v24 = vadd.f32 %v2895_v53, %v1977_v29  ;;  %v3942_v7 = vpop.f32.mrf.mxu3  ;;  %v1979_v21 = vpop.f32.mrf.mxu1 }
 0x540   : > { %v1980_v54 = vadd.f32 %v1979_v21, %v15801_v11 }
 0x541   : > { %v4092_v22 = vadd.f32 %v3942_v7, %v3045_v24  ;;  %v10958_v24 = vld [vmem:[%s12068_s27 + $0x1438] sm:$0xff] }
 0x542   : > { %v4992_v13 = vpop.f32.mrf.mxu0  ;;  %11087 = vmatmul.msk.f32.gmra.mxu1 %vm431_vm1, %v10957_v45  ;;  %v11216_v7 = vld [vmem:[%s12068_s27 + $0x1838] sm:$0xff] }
 0x543   : > { %v14026_v37 = vadd.f32 %v4989_v38, %v4092_v22  ;;  %11345 = vmatmul.msk.f32.gmra.mxu2 %vm431_vm1, %v11215_v26  ;;  %v11474_v22 = vld [vmem:[%s12068_s27 + $0x1c38] sm:$0xff] }
 0x544   : > { %11603 = vmatmul.msk.f32.gmra.mxu3 %vm431_vm1, %v11473_v6 }
 0x545   : > { %15800 = vst [vmem:[#allocation51_spill] sm:$0xff] %v14026_v37  ;;  %11861 = vmatmul.msk.f32.gmra.mxu0 %vm431_vm1, %v11731_v5  ;;  %v11732_v37 = vld [vmem:[%s12068_s27 + $0x2038] sm:$0xff] }
 0x546   : > { %v2898_v61 = vpop.f32.mrf.mxu2  ;;  %v15803_v5 = vld [vmem:[#allocation57_spill] sm:$0xff] }
 0x547   : > { %v3046_v47 = vadd.f32 %v2898_v61, %v1980_v54  ;;  %v3945_v29 = vpop.f32.mrf.mxu3  ;;  %v1982_v53 = vpop.f32.mrf.mxu1 }
 0x548   : > { %v1983_v21 = vadd.f32 %v1982_v53, %v15803_v5 }
 0x549   : > { %v4093_v38 = vadd.f32 %v3945_v29, %v3046_v47  ;;  %v10959_v47 = vld [vmem:[%s12068_s27 + $0x1440] sm:$0xff] }
 0x54a   : > { %v4995_v45 = vpop.f32.mrf.mxu0  ;;  %11088 = vmatmul.msk.f32.gmra.mxu1 %vm431_vm1, %v10958_v24  ;;  %v11217_v29 = vld [vmem:[%s12068_s27 + $0x1840] sm:$0xff] }
 0x54b   : > { %v14037_v26 = vadd.f32 %v4992_v13, %v4093_v38  ;;  %11346 = vmatmul.msk.f32.gmra.mxu2 %vm431_vm1, %v11216_v7  ;;  %v11475_v38 = vld [vmem:[%s12068_s27 + $0x1c40] sm:$0xff] }
 0x54c   : > { %11604 = vmatmul.msk.f32.gmra.mxu3 %vm431_vm1, %v11474_v22 }
 0x54d   : > { %15802 = vst [vmem:[#allocation54_spill] sm:$0xff] %v14037_v26  ;;  %11862 = vmatmul.msk.f32.gmra.mxu0 %vm431_vm1, %v11732_v37  ;;  %v11733_v26 = vld [vmem:[%s12068_s27 + $0x2040] sm:$0xff]  ;;  %v15805_v37 = vld [vmem:[#allocation60_spill] sm:$0xff] }
 0x54e   : > { %v2901_v6 = vpop.f32.mrf.mxu2 }
 0x54f   : > { %v3047_v11 = vadd.f32 %v2901_v6, %v1983_v21  ;;  %v3948_v54 = vpop.f32.mrf.mxu3  ;;  %v1985_v61 = vpop.f32.mrf.mxu1 }
 0x550   : > { %v1986_v53 = vadd.f32 %v1985_v61, %v15805_v37 }
 0x551   : > { %v4094_v13 = vadd.f32 %v3948_v54, %v3047_v11  ;;  %v10960_v11 = vld [vmem:[%s12068_s27 + $0x1448] sm:$0xff] }
 0x552   : > { %v4998_v24 = vpop.f32.mrf.mxu0  ;;  %11089 = vmatmul.msk.f32.gmra.mxu1 %vm431_vm1, %v10959_v47  ;;  %v11218_v54 = vld [vmem:[%s12068_s27 + $0x1848] sm:$0xff] }
 0x553   : > { %v14048_v7 = vadd.f32 %v4995_v45, %v4094_v13  ;;  %11347 = vmatmul.msk.f32.gmra.mxu2 %vm431_vm1, %v11217_v29  ;;  %v11476_v13 = vld [vmem:[%s12068_s27 + $0x1c48] sm:$0xff] }
 0x554   : > { %11605 = vmatmul.msk.f32.gmra.mxu3 %vm431_vm1, %v11475_v38 }
 0x555   : > { %15804 = vst [vmem:[#allocation57_spill] sm:$0xff] %v14048_v7  ;;  %11863 = vmatmul.msk.f32.gmra.mxu0 %vm431_vm1, %v11733_v26  ;;  %v11734_v7 = vld [vmem:[%s12068_s27 + $0x2048] sm:$0xff] }
 0x556   : > { %v2904_v22 = vpop.f32.mrf.mxu2  ;;  %v15807_v26 = vld [vmem:[#allocation63_spill] sm:$0xff] }
 0x557   : > { %v3048_v5 = vadd.f32 %v2904_v22, %v1986_v53  ;;  %v3951_v21 = vpop.f32.mrf.mxu3  ;;  %v1988_v6 = vpop.f32.mrf.mxu1 }
 0x558   : > { %v1989_v61 = vadd.f32 %v1988_v6, %v15807_v26 }
 0x559   : > { %v4095_v45 = vadd.f32 %v3951_v21, %v3048_v5  ;;  %v10961_v5 = vld [vmem:[%s12068_s27 + $0x1450] sm:$0xff] }
 0x55a   : > { %v5001_v47 = vpop.f32.mrf.mxu0  ;;  %11090 = vmatmul.msk.f32.gmra.mxu1 %vm431_vm1, %v10960_v11  ;;  %v11219_v21 = vld [vmem:[%s12068_s27 + $0x1850] sm:$0xff] }
 0x55b   : > { %v14059_v29 = vadd.f32 %v4998_v24, %v4095_v45  ;;  %11348 = vmatmul.msk.f32.gmra.mxu2 %vm431_vm1, %v11218_v54  ;;  %v11477_v45 = vld [vmem:[%s12068_s27 + $0x1c50] sm:$0xff] }
 0x55c   : > { %11606 = vmatmul.msk.f32.gmra.mxu3 %vm431_vm1, %v11476_v13 }
 0x55d   : > { %15806 = vst [vmem:[#allocation60_spill] sm:$0xff] %v14059_v29  ;;  %11864 = vmatmul.msk.f32.gmra.mxu0 %vm431_vm1, %v11734_v7  ;;  %v11735_v29 = vld [vmem:[%s12068_s27 + $0x2050] sm:$0xff]  ;;  %v15809_v7 = vld [vmem:[#allocation66_spill] sm:$0xff] }
 0x55e   : > { %v2907_v38 = vpop.f32.mrf.mxu2 }
 0x55f   : > { %v3049_v37 = vadd.f32 %v2907_v38, %v1989_v61  ;;  %v3954_v53 = vpop.f32.mrf.mxu3  ;;  %v1991_v22 = vpop.f32.mrf.mxu1 }
 0x560   : > { %v1992_v6 = vadd.f32 %v1991_v22, %v15809_v7 }
 0x561   : > { %v4096_v24 = vadd.f32 %v3954_v53, %v3049_v37  ;;  %v10962_v37 = vld [vmem:[%s12068_s27 + $0x1458] sm:$0xff] }
 0x562   : > { %v5004_v11 = vpop.f32.mrf.mxu0  ;;  %11091 = vmatmul.msk.f32.gmra.mxu1 %vm431_vm1, %v10961_v5  ;;  %v11220_v53 = vld [vmem:[%s12068_s27 + $0x1858] sm:$0xff] }
 0x563   : > { %v14070_v54 = vadd.f32 %v5001_v47, %v4096_v24  ;;  %11349 = vmatmul.msk.f32.gmra.mxu2 %vm431_vm1, %v11219_v21  ;;  %v11478_v24 = vld [vmem:[%s12068_s27 + $0x1c58] sm:$0xff] }
 0x564   : > { %11607 = vmatmul.msk.f32.gmra.mxu3 %vm431_vm1, %v11477_v45 }
 0x565   : > { %15808 = vst [vmem:[#allocation63_spill] sm:$0xff] %v14070_v54  ;;  %11865 = vmatmul.msk.f32.gmra.mxu0 %vm431_vm1, %v11735_v29  ;;  %v11736_v54 = vld [vmem:[%s12068_s27 + $0x2058] sm:$0xff] }
 0x566   : > { %v2910_v13 = vpop.f32.mrf.mxu2  ;;  %v15811_v29 = vld [vmem:[#allocation69_spill] sm:$0xff] }
 0x567   : > { %v3050_v26 = vadd.f32 %v2910_v13, %v1992_v6  ;;  %v3957_v61 = vpop.f32.mrf.mxu3  ;;  %v1994_v38 = vpop.f32.mrf.mxu1 }
 0x568   : > { %v1995_v22 = vadd.f32 %v1994_v38, %v15811_v29 }
 0x569   : > { %v4097_v47 = vadd.f32 %v3957_v61, %v3050_v26  ;;  %v10963_v26 = vld [vmem:[%s12068_s27 + $0x1460] sm:$0xff] }
 0x56a   : > { %v5007_v5 = vpop.f32.mrf.mxu0  ;;  %11092 = vmatmul.msk.f32.gmra.mxu1 %vm431_vm1, %v10962_v37  ;;  %v11221_v61 = vld [vmem:[%s12068_s27 + $0x1860] sm:$0xff] }
 0x56b   : > { %v14081_v21 = vadd.f32 %v5004_v11, %v4097_v47  ;;  %11350 = vmatmul.msk.f32.gmra.mxu2 %vm431_vm1, %v11220_v53  ;;  %v11479_v47 = vld [vmem:[%s12068_s27 + $0x1c60] sm:$0xff] }
 0x56c   : > { %11608 = vmatmul.msk.f32.gmra.mxu3 %vm431_vm1, %v11478_v24 }
 0x56d   : > { %15810 = vst [vmem:[#allocation66_spill] sm:$0xff] %v14081_v21  ;;  %11866 = vmatmul.msk.f32.gmra.mxu0 %vm431_vm1, %v11736_v54  ;;  %v11737_v21 = vld [vmem:[%s12068_s27 + $0x2060] sm:$0xff]  ;;  %v15813_v54 = vld [vmem:[#allocation72_spill] sm:$0xff] }
 0x56e   : > { %v2913_v45 = vpop.f32.mrf.mxu2 }
 0x56f   : > { %v3051_v7 = vadd.f32 %v2913_v45, %v1995_v22  ;;  %v3960_v6 = vpop.f32.mrf.mxu3  ;;  %v1997_v13 = vpop.f32.mrf.mxu1 }
 0x570   : > { %v1998_v38 = vadd.f32 %v1997_v13, %v15813_v54 }
 0x571   : > { %v4098_v11 = vadd.f32 %v3960_v6, %v3051_v7  ;;  %v10964_v7 = vld [vmem:[%s12068_s27 + $0x1468] sm:$0xff] }
 0x572   : > { %v5010_v37 = vpop.f32.mrf.mxu0  ;;  %11093 = vmatmul.msk.f32.gmra.mxu1 %vm431_vm1, %v10963_v26  ;;  %v11222_v6 = vld [vmem:[%s12068_s27 + $0x1868] sm:$0xff] }
 0x573   : > { %v14092_v53 = vadd.f32 %v5007_v5, %v4098_v11  ;;  %11351 = vmatmul.msk.f32.gmra.mxu2 %vm431_vm1, %v11221_v61  ;;  %v11480_v11 = vld [vmem:[%s12068_s27 + $0x1c68] sm:$0xff] }
 0x574   : > { %11609 = vmatmul.msk.f32.gmra.mxu3 %vm431_vm1, %v11479_v47 }
 0x575   : > { %15812 = vst [vmem:[#allocation69_spill] sm:$0xff] %v14092_v53  ;;  %11867 = vmatmul.msk.f32.gmra.mxu0 %vm431_vm1, %v11737_v21  ;;  %v11738_v53 = vld [vmem:[%s12068_s27 + $0x2068] sm:$0xff] }
 0x576   : > { %v2916_v24 = vpop.f32.mrf.mxu2  ;;  %v15815_v21 = vld [vmem:[#allocation75_spill] sm:$0xff] }
 0x577   : > { %v3052_v29 = vadd.f32 %v2916_v24, %v1998_v38  ;;  %v3963_v22 = vpop.f32.mrf.mxu3  ;;  %v2000_v45 = vpop.f32.mrf.mxu1 }
 0x578   : > { %v2001_v13 = vadd.f32 %v2000_v45, %v15815_v21 }
 0x579   : > { %v4099_v5 = vadd.f32 %v3963_v22, %v3052_v29  ;;  %v10965_v29 = vld [vmem:[%s12068_s27 + $0x1470] sm:$0xff] }
 0x57a   : > { %v5013_v26 = vpop.f32.mrf.mxu0  ;;  %11094 = vmatmul.msk.f32.gmra.mxu1 %vm431_vm1, %v10964_v7  ;;  %v11223_v22 = vld [vmem:[%s12068_s27 + $0x1870] sm:$0xff] }
 0x57b   : > { %v14103_v61 = vadd.f32 %v5010_v37, %v4099_v5  ;;  %11352 = vmatmul.msk.f32.gmra.mxu2 %vm431_vm1, %v11222_v6  ;;  %v11481_v5 = vld [vmem:[%s12068_s27 + $0x1c70] sm:$0xff] }
 0x57c   : > { %11610 = vmatmul.msk.f32.gmra.mxu3 %vm431_vm1, %v11480_v11 }
 0x57d   : > { %15814 = vst [vmem:[#allocation72_spill] sm:$0xff] %v14103_v61  ;;  %11868 = vmatmul.msk.f32.gmra.mxu0 %vm431_vm1, %v11738_v53  ;;  %v11739_v61 = vld [vmem:[%s12068_s27 + $0x2070] sm:$0xff]  ;;  %v15817_v53 = vld [vmem:[#allocation78_spill] sm:$0xff] }
 0x57e   : > { %v2919_v47 = vpop.f32.mrf.mxu2 }
 0x57f   : > { %v3053_v54 = vadd.f32 %v2919_v47, %v2001_v13  ;;  %v3966_v38 = vpop.f32.mrf.mxu3  ;;  %v2003_v24 = vpop.f32.mrf.mxu1 }
 0x580   : > { %v2004_v45 = vadd.f32 %v2003_v24, %v15817_v53 }
 0x581   : > { %v4100_v37 = vadd.f32 %v3966_v38, %v3053_v54  ;;  %v10966_v54 = vld [vmem:[%s12068_s27 + $0x1478] sm:$0xff] }
 0x582   : > { %v5016_v7 = vpop.f32.mrf.mxu0  ;;  %11095 = vmatmul.msk.f32.gmra.mxu1 %vm431_vm1, %v10965_v29  ;;  %v11224_v38 = vld [vmem:[%s12068_s27 + $0x1878] sm:$0xff] }
 0x583   : > { %v14114_v6 = vadd.f32 %v5013_v26, %v4100_v37  ;;  %11353 = vmatmul.msk.f32.gmra.mxu2 %vm431_vm1, %v11223_v22  ;;  %v11482_v37 = vld [vmem:[%s12068_s27 + $0x1c78] sm:$0xff] }
 0x584   : > { %11611 = vmatmul.msk.f32.gmra.mxu3 %vm431_vm1, %v11481_v5 }
 0x585   : > { %15816 = vst [vmem:[#allocation75_spill] sm:$0xff] %v14114_v6  ;;  %11869 = vmatmul.msk.f32.gmra.mxu0 %vm431_vm1, %v11739_v61  ;;  %v11740_v6 = vld [vmem:[%s12068_s27 + $0x2078] sm:$0xff] }
 0x586   : > { %v2922_v11 = vpop.f32.mrf.mxu2  ;;  %v15819_v61 = vld [vmem:[#allocation81_spill] sm:$0xff] }
 0x587   : > { %v3054_v21 = vadd.f32 %v2922_v11, %v2004_v45  ;;  %v3969_v13 = vpop.f32.mrf.mxu3  ;;  %v2006_v47 = vpop.f32.mrf.mxu1 }
 0x588   : > { %v2007_v24 = vadd.f32 %v2006_v47, %v15819_v61 }
 0x589   : > { %v4101_v26 = vadd.f32 %v3969_v13, %v3054_v21  ;;  %v10967_v21 = vld [vmem:[%s12068_s27 + $0x1480] sm:$0xff] }
 0x58a   : > { %v5019_v29 = vpop.f32.mrf.mxu0  ;;  %11096 = vmatmul.msk.f32.gmra.mxu1 %vm431_vm1, %v10966_v54  ;;  %v11225_v13 = vld [vmem:[%s12068_s27 + $0x1880] sm:$0xff] }
 0x58b   : > { %v14125_v22 = vadd.f32 %v5016_v7, %v4101_v26  ;;  %11354 = vmatmul.msk.f32.gmra.mxu2 %vm431_vm1, %v11224_v38  ;;  %v11483_v26 = vld [vmem:[%s12068_s27 + $0x1c80] sm:$0xff] }
 0x58c   : > { %11612 = vmatmul.msk.f32.gmra.mxu3 %vm431_vm1, %v11482_v37  ;;  %v11741_v54 = vld [vmem:[%s12068_s27 + $0x2080] sm:$0xff] }
 0x58d   : > { %15818 = vst [vmem:[#allocation78_spill] sm:$0xff] %v14125_v22  ;;  %11870 = vmatmul.msk.f32.gmra.mxu0 %vm431_vm1, %v11740_v6 }
 0x58e   : > { %v2925_v5 = vpop.f32.mrf.mxu2 }
 0x58f   : > { %v3055_v53 = vadd.f32 %v2925_v5, %v2007_v24  ;;  %v3972_v45 = vpop.f32.mrf.mxu3  ;;  %v5685_v11 = vpop.f32.mrf.mxu1  ;;  %v10968_v5 = vld [vmem:[%s12068_s27 + $0x1488] sm:$0xff] }
 0x590   : > { %v6069_v6 = vadd.f32 %v5685_v11, %v12739_v19 }
 0x591   : > { %v4102_v7 = vadd.f32 %v3972_v45, %v3055_v53  ;;  %v11226_v53 = vld [vmem:[%s12068_s27 + $0x1888] sm:$0xff]  ;;  %v14148_v45 = vld [vmem:[%s15578_s2] ss:$0 sm:$0xff] }
 0x592   : > { %v8826_v22 = vpop.f32.mrf.mxu0  ;;  %11097 = vmatmul.msk.f32.gmra.mxu1 %vm431_vm1, %v10967_v21  ;;  %v11484_v21 = vld [vmem:[%s12068_s27 + $0x1c88] sm:$0xff] }
 0x593   : > { %v14136_v38 = vadd.f32 %v5019_v29, %v4102_v7  ;;  %11355 = vmatmul.msk.f32.gmra.mxu2 %vm431_vm1, %v11225_v13  ;;  %v11742_v7 = vld [vmem:[%s12068_s27 + $0x2088] sm:$0xff] }
 0x594   : > { %11613 = vmatmul.msk.f32.gmra.mxu3 %vm431_vm1, %v11483_v26 }
 0x595   : > { %11871 = vmatmul.msk.f32.gmra.mxu0 %vm431_vm1, %v11741_v54 }
 0x596   : > { %v6732_v47 = vpop.f32.mrf.mxu2 }
 0x597   : > { %v7116_v37 = vadd.f32 %v6732_v47, %v6069_v6  ;;  %v7779_v61 = vpop.f32.mrf.mxu3  ;;  %v5688_v24 = vpop.f32.mrf.mxu1 }
 0x598   : > { %v6070_v19 = vadd.f32 %v5688_v24, %v12750_v2  ;;  %v11485_v2 = vld [vmem:[%s12068_s27 + $0x1c90] sm:$0xff] }
 0x599   : > { %v8163_v29 = vadd.f32 %v7779_v61, %v7116_v37  ;;  %v10969_v61 = vld [vmem:[%s12068_s27 + $0x1490] sm:$0xff] }
 0x59a   : > { %v8829_v13 = vpop.f32.mrf.mxu0  ;;  %11098 = vmatmul.msk.f32.gmra.mxu1 %vm431_vm1, %v10968_v5  ;;  %v11227_v5 = vld [vmem:[%s12068_s27 + $0x1890] sm:$0xff] }
 0x59b   : > { %v9210_v26 = vadd.f32 %v8826_v22, %v8163_v29  ;;  %11356 = vmatmul.msk.f32.gmra.mxu2 %vm431_vm1, %v11226_v53  ;;  %v11743_v29 = vld [vmem:[%s12068_s27 + $0x2090] sm:$0xff] }
 0x59c   : > { %11614 = vmatmul.msk.f32.gmra.mxu3 %vm431_vm1, %v11484_v21 }
 0x59d   : > { %11872 = vmatmul.msk.f32.gmra.mxu0 %vm431_vm1, %v11742_v7  ;;  %v9342_v11 = vadd.f32 %v14148_v45, %v9210_v26 }
 0x59e   : > { %v6735_v22 = vpop.f32.mrf.mxu2 }
 0x59f   : > { %v9470_v54 = vmax.f32 %v9342_v11, 0.0  ;;  %v7117_v6 = vadd.f32 %v6735_v22, %v6070_v19  ;;  %v7782_v47 = vpop.f32.mrf.mxu3  ;;  %v5691_v37 = vpop.f32.mrf.mxu1 }
 0x5a0   : > { %v6071_v7 = vadd.f32 %v5691_v37, %v12761_v35 }
 0x5a1   : > { %9599 = vst.msk [vmem:[%s14162_s13] sm:$0xff] %vm9598_vm2, %v9470_v54  ;;  %v8164_v53 = vadd.f32 %v7782_v47, %v7117_v6  ;;  %v11228_v47 = vld [vmem:[%s12068_s27 + $0x1898] sm:$0xff] }
 0x5a2   : > { %v8832_v24 = vpop.f32.mrf.mxu0  ;;  %11099 = vmatmul.msk.f32.gmra.mxu1 %vm431_vm1, %v10969_v61 }
 0x5a3   : > { %v9211_v21 = vadd.f32 %v8829_v13, %v8164_v53  ;;  %11357 = vmatmul.msk.f32.gmra.mxu2 %vm431_vm1, %v11227_v5  ;;  %v10970_v13 = vld [vmem:[%s12068_s27 + $0x1498] sm:$0xff] }
 0x5a4   : > { %11615 = vmatmul.msk.f32.gmra.mxu3 %vm431_vm1, %v11485_v2  ;;  %v11486_v5 = vld [vmem:[%s12068_s27 + $0x1c98] sm:$0xff] }
 0x5a5   : > { %11873 = vmatmul.msk.f32.gmra.mxu0 %vm431_vm1, %v11743_v29  ;;  %v9343_v26 = vadd.f32 %v14148_v45, %v9211_v21  ;;  %v11744_v2 = vld [vmem:[%s12068_s27 + $0x2098] sm:$0xff] }
 0x5a6   : > { %v6738_v19 = vpop.f32.mrf.mxu2 }
 0x5a7   : > { %v9471_v11 = vmax.f32 %v9343_v26, 0.0  ;;  %v7118_v22 = vadd.f32 %v6738_v19, %v6071_v7  ;;  %v7785_v54 = vpop.f32.mrf.mxu3  ;;  %v5694_v6 = vpop.f32.mrf.mxu1 }
 0x5a8   : > { %v6072_v35 = vadd.f32 %v5694_v6, %v12772_v32 }
 0x5a9   : > { %9600 = vst.msk [vmem:[%s14162_s13 + $0x8] sm:$0xff] %vm9598_vm2, %v9471_v11  ;;  %v8165_v61 = vadd.f32 %v7785_v54, %v7118_v22  ;;  %v11229_v22 = vld [vmem:[%s12068_s27 + $0x18a0] sm:$0xff] }
 0x5aa   : > { %v8835_v53 = vpop.f32.mrf.mxu0  ;;  %11100 = vmatmul.msk.f32.gmra.mxu1 %vm431_vm1, %v10970_v13  ;;  %v11487_v13 = vld [vmem:[%s12068_s27 + $0x1ca0] sm:$0xff] }
 0x5ab   : > { %v9212_v29 = vadd.f32 %v8832_v24, %v8165_v61  ;;  %11358 = vmatmul.msk.f32.gmra.mxu2 %vm431_vm1, %v11228_v47  ;;  %v10971_v24 = vld [vmem:[%s12068_s27 + $0x14a0] sm:$0xff] }
 0x5ac   : > { %11616 = vmatmul.msk.f32.gmra.mxu3 %vm431_vm1, %v11486_v5  ;;  %v11745_v61 = vld [vmem:[%s12068_s27 + $0x20a0] sm:$0xff] }
 0x5ad   : > { %11874 = vmatmul.msk.f32.gmra.mxu0 %vm431_vm1, %v11744_v2  ;;  %v9344_v37 = vadd.f32 %v14148_v45, %v9212_v29 }
 0x5ae   : > { %v6741_v21 = vpop.f32.mrf.mxu2 }
 0x5af   : > { %v9472_v7 = vmax.f32 %v9344_v37, 0.0  ;;  %v7119_v26 = vadd.f32 %v6741_v21, %v6072_v35  ;;  %v7788_v19 = vpop.f32.mrf.mxu3  ;;  %v5697_v11 = vpop.f32.mrf.mxu1 }
 0x5b0   : > { %v6073_v32 = vadd.f32 %v5697_v11, %v12783_v58 }
 0x5b1   : > { %9601 = vst.msk [vmem:[%s14162_s13 + $0x10] sm:$0xff] %vm9598_vm2, %v9472_v7  ;;  %v8166_v54 = vadd.f32 %v7788_v19, %v7119_v26  ;;  %v11230_v7 = vld [vmem:[%s12068_s27 + $0x18a8] sm:$0xff] }
 0x5b2   : > { %v8838_v47 = vpop.f32.mrf.mxu0  ;;  %11101 = vmatmul.msk.f32.gmra.mxu1 %vm431_vm1, %v10971_v24  ;;  %v11488_v19 = vld [vmem:[%s12068_s27 + $0x1ca8] sm:$0xff] }
 0x5b3   : > { %v9213_v5 = vadd.f32 %v8835_v53, %v8166_v54  ;;  %11359 = vmatmul.msk.f32.gmra.mxu2 %vm431_vm1, %v11229_v22  ;;  %v10972_v53 = vld [vmem:[%s12068_s27 + $0x14a8] sm:$0xff] }
 0x5b4   : > { %11617 = vmatmul.msk.f32.gmra.mxu3 %vm431_vm1, %v11487_v13  ;;  %v11746_v22 = vld [vmem:[%s12068_s27 + $0x20a8] sm:$0xff] }
 0x5b5   : > { %11875 = vmatmul.msk.f32.gmra.mxu0 %vm431_vm1, %v11745_v61  ;;  %v9345_v6 = vadd.f32 %v14148_v45, %v9213_v5 }
 0x5b6   : > { %v6744_v2 = vpop.f32.mrf.mxu2 }
 0x5b7   : > { %v9473_v29 = vmax.f32 %v9345_v6, 0.0  ;;  %v7120_v35 = vadd.f32 %v6744_v2, %v6073_v32  ;;  %v7791_v37 = vpop.f32.mrf.mxu3  ;;  %v5700_v21 = vpop.f32.mrf.mxu1  ;;  %v11231_v2 = vld [vmem:[%s12068_s27 + $0x18b0] sm:$0xff] }
 0x5b8   : > { %v6074_v58 = vadd.f32 %v5700_v21, %v12794_v52 }
 0x5b9   : > { %9602 = vst.msk [vmem:[%s14162_s13 + $0x18] sm:$0xff] %vm9598_vm2, %v9473_v29  ;;  %v8167_v26 = vadd.f32 %v7791_v37, %v7120_v35  ;;  %v11489_v35 = vld [vmem:[%s12068_s27 + $0x1cb0] sm:$0xff] }
 0x5ba   : > { %v8841_v24 = vpop.f32.mrf.mxu0  ;;  %11102 = vmatmul.msk.f32.gmra.mxu1 %vm431_vm1, %v10972_v53  ;;  %v11747_v53 = vld [vmem:[%s12068_s27 + $0x20b0] sm:$0xff] }
 0x5bb   : > { %v9214_v54 = vadd.f32 %v8838_v47, %v8167_v26  ;;  %11360 = vmatmul.msk.f32.gmra.mxu2 %vm431_vm1, %v11230_v7  ;;  %v10973_v47 = vld [vmem:[%s12068_s27 + $0x14b0] sm:$0xff] }
 0x5bc   : > { %11618 = vmatmul.msk.f32.gmra.mxu3 %vm431_vm1, %v11488_v19 }
 0x5bd   : > { %11876 = vmatmul.msk.f32.gmra.mxu0 %vm431_vm1, %v11746_v22  ;;  %v9346_v11 = vadd.f32 %v14148_v45, %v9214_v54 }
 0x5be   : > { %v6747_v13 = vpop.f32.mrf.mxu2 }
 0x5bf   : > { %v9474_v61 = vmax.f32 %v9346_v11, 0.0  ;;  %v7121_v5 = vadd.f32 %v6747_v13, %v6074_v58  ;;  %v7794_v32 = vpop.f32.mrf.mxu3  ;;  %v5703_v6 = vpop.f32.mrf.mxu1  ;;  %v11232_v11 = vld [vmem:[%s12068_s27 + $0x18b8] sm:$0xff] }
 0x5c0   : > { %v6075_v52 = vadd.f32 %v5703_v6, %v12805_v3 }
 0x5c1   : > { %9603 = vst.msk [vmem:[%s14162_s13 + $0x20] sm:$0xff] %vm9598_vm2, %v9474_v61  ;;  %v8168_v29 = vadd.f32 %v7794_v32, %v7121_v5  ;;  %v11490_v61 = vld [vmem:[%s12068_s27 + $0x1cb8] sm:$0xff] }
 0x5c2   : > { %v8844_v37 = vpop.f32.mrf.mxu0  ;;  %11103 = vmatmul.msk.f32.gmra.mxu1 %vm431_vm1, %v10973_v47  ;;  %v11748_v32 = vld [vmem:[%s12068_s27 + $0x20b8] sm:$0xff] }
 0x5c3   : > { %v9215_v7 = vadd.f32 %v8841_v24, %v8168_v29  ;;  %11361 = vmatmul.msk.f32.gmra.mxu2 %vm431_vm1, %v11231_v2  ;;  %v10974_v24 = vld [vmem:[%s12068_s27 + $0x14b8] sm:$0xff] }
 0x5c4   : > { %11619 = vmatmul.msk.f32.gmra.mxu3 %vm431_vm1, %v11489_v35 }
 0x5c5   : > { %11877 = vmatmul.msk.f32.gmra.mxu0 %vm431_vm1, %v11747_v53  ;;  %v9347_v21 = vadd.f32 %v14148_v45, %v9215_v7 }
 0x5c6   : > { %v6750_v26 = vpop.f32.mrf.mxu2 }
 0x5c7   : > { %v9475_v19 = vmax.f32 %v9347_v21, 0.0  ;;  %v7122_v22 = vadd.f32 %v6750_v26, %v6075_v52  ;;  %v7797_v54 = vpop.f32.mrf.mxu3  ;;  %v5706_v58 = vpop.f32.mrf.mxu1  ;;  %v11233_v52 = vld [vmem:[%s12068_s27 + $0x18c0] sm:$0xff] }
 0x5c8   : > { %v6076_v3 = vadd.f32 %v5706_v58, %v12816_v55  ;;  %v11491_v26 = vld [vmem:[%s12068_s27 + $0x1cc0] sm:$0xff] }
 0x5c9   : > { %9604 = vst.msk [vmem:[%s14162_s13 + $0x28] sm:$0xff] %vm9598_vm2, %v9475_v19  ;;  %v8169_v13 = vadd.f32 %v7797_v54, %v7122_v22  ;;  %v11749_v22 = vld [vmem:[%s12068_s27 + $0x20c0] sm:$0xff] }
 0x5ca   : > { %v8847_v5 = vpop.f32.mrf.mxu0  ;;  %11104 = vmatmul.msk.f32.gmra.mxu1 %vm431_vm1, %v10974_v24 }
 0x5cb   : > { %v9216_v47 = vadd.f32 %v8844_v37, %v8169_v13  ;;  %11362 = vmatmul.msk.f32.gmra.mxu2 %vm431_vm1, %v11232_v11  ;;  %v10975_v37 = vld [vmem:[%s12068_s27 + $0x14c0] sm:$0xff] }
 0x5cc   : > { %11620 = vmatmul.msk.f32.gmra.mxu3 %vm431_vm1, %v11490_v61 }
 0x5cd   : > { %11878 = vmatmul.msk.f32.gmra.mxu0 %vm431_vm1, %v11748_v32  ;;  %v9348_v6 = vadd.f32 %v14148_v45, %v9216_v47  ;;  %v11234_v47 = vld [vmem:[%s12068_s27 + $0x18c8] sm:$0xff] }
 0x5ce   : > { %v6753_v2 = vpop.f32.mrf.mxu2 }
 0x5cf   : > { %v9476_v29 = vmax.f32 %v9348_v6, 0.0  ;;  %v7123_v35 = vadd.f32 %v6753_v2, %v6076_v3  ;;  %v7800_v53 = vpop.f32.mrf.mxu3  ;;  %v5709_v7 = vpop.f32.mrf.mxu1  ;;  %v11492_v6 = vld [vmem:[%s12068_s27 + $0x1cc8] sm:$0xff] }
 0x5d0   : > { %v6077_v55 = vadd.f32 %v5709_v7, %v12827_v51 }
 0x5d1   : > { %9605 = vst.msk [vmem:[%s14162_s13 + $0x30] sm:$0xff] %vm9598_vm2, %v9476_v29  ;;  %v8170_v21 = vadd.f32 %v7800_v53, %v7123_v35  ;;  %v11750_v29 = vld [vmem:[%s12068_s27 + $0x20c8] sm:$0xff] }
 0x5d2   : > { %v8850_v19 = vpop.f32.mrf.mxu0  ;;  %11105 = vmatmul.msk.f32.gmra.mxu1 %vm431_vm1, %v10975_v37 }
 0x5d3   : > { %v9217_v54 = vadd.f32 %v8847_v5, %v8170_v21  ;;  %11363 = vmatmul.msk.f32.gmra.mxu2 %vm431_vm1, %v11233_v52  ;;  %v10976_v5 = vld [vmem:[%s12068_s27 + $0x14c8] sm:$0xff] }
 0x5d4   : > { %11621 = vmatmul.msk.f32.gmra.mxu3 %vm431_vm1, %v11491_v26 }
 0x5d5   : > { %11879 = vmatmul.msk.f32.gmra.mxu0 %vm431_vm1, %v11749_v22  ;;  %v9349_v58 = vadd.f32 %v14148_v45, %v9217_v54  ;;  %v11235_v22 = vld [vmem:[%s12068_s27 + $0x18d0] sm:$0xff] }
 0x5d6   : > { %v6756_v24 = vpop.f32.mrf.mxu2 }
 0x5d7   : > { %v9477_v11 = vmax.f32 %v9349_v58, 0.0  ;;  %v7124_v13 = vadd.f32 %v6756_v24, %v6077_v55  ;;  %v7803_v61 = vpop.f32.mrf.mxu3  ;;  %v5712_v32 = vpop.f32.mrf.mxu1  ;;  %v11493_v55 = vld [vmem:[%s12068_s27 + $0x1cd0] sm:$0xff] }
 0x5d8   : > { %v6078_v51 = vadd.f32 %v5712_v32, %v12838_v40  ;;  %v11751_v24 = vld [vmem:[%s12068_s27 + $0x20d0] sm:$0xff] }
 0x5d9   : > { %9606 = vst.msk [vmem:[%s14162_s13 + $0x38] sm:$0xff] %vm9598_vm2, %v9477_v11  ;;  %v8171_v3 = vadd.f32 %v7803_v61, %v7124_v13 }
 0x5da   : > { %v8853_v2 = vpop.f32.mrf.mxu0  ;;  %11106 = vmatmul.msk.f32.gmra.mxu1 %vm431_vm1, %v10976_v5 }
 0x5db   : > { %v9218_v35 = vadd.f32 %v8850_v19, %v8171_v3  ;;  %11364 = vmatmul.msk.f32.gmra.mxu2 %vm431_vm1, %v11234_v47  ;;  %v10977_v19 = vld [vmem:[%s12068_s27 + $0x14d0] sm:$0xff] }
 0x5dc   : > { %11622 = vmatmul.msk.f32.gmra.mxu3 %vm431_vm1, %v11492_v6  ;;  %v10978_v6 = vld [vmem:[%s12068_s27 + $0x14d8] sm:$0xff] }
 0x5dd   : > { %11880 = vmatmul.msk.f32.gmra.mxu0 %vm431_vm1, %v11750_v29  ;;  %v9350_v53 = vadd.f32 %v14148_v45, %v9218_v35  ;;  %v11494_v35 = vld [vmem:[%s12068_s27 + $0x1cd8] sm:$0xff] }
 0x5de   : > { %v6759_v7 = vpop.f32.mrf.mxu2 }
 0x5df   : > { %v9478_v37 = vmax.f32 %v9350_v53, 0.0  ;;  %v7125_v52 = vadd.f32 %v6759_v7, %v6078_v51  ;;  %v7806_v21 = vpop.f32.mrf.mxu3  ;;  %v5715_v26 = vpop.f32.mrf.mxu1  ;;  %v11752_v53 = vld [vmem:[%s12068_s27 + $0x20d8] sm:$0xff] }
 0x5e0   : > { %v6079_v40 = vadd.f32 %v5715_v26, %v12849_v15 }
 0x5e1   : > { %9607 = vst.msk [vmem:[%s14162_s13 + $0x40] sm:$0xff] %vm9598_vm2, %v9478_v37  ;;  %v8172_v54 = vadd.f32 %v7806_v21, %v7125_v52 }
 0x5e2   : > { %v8856_v58 = vpop.f32.mrf.mxu0  ;;  %11107 = vmatmul.msk.f32.gmra.mxu1 %vm431_vm1, %v10977_v19 }
 0x5e3   : > { %v9219_v11 = vadd.f32 %v8853_v2, %v8172_v54  ;;  %11365 = vmatmul.msk.f32.gmra.mxu2 %vm431_vm1, %v11235_v22  ;;  %v11236_v2 = vld [vmem:[%s12068_s27 + $0x18d8] sm:$0xff]  ;;  %v10979_v54 = vld [vmem:[%s12068_s27 + $0x14e0] sm:$0xff] }
 0x5e4   : > { %11623 = vmatmul.msk.f32.gmra.mxu3 %vm431_vm1, %v11493_v55  ;;  %v11237_v55 = vld [vmem:[%s12068_s27 + $0x18e0] sm:$0xff] }
 0x5e5   : > { %11881 = vmatmul.msk.f32.gmra.mxu0 %vm431_vm1, %v11751_v24  ;;  %v9351_v13 = vadd.f32 %v14148_v45, %v9219_v11  ;;  %v11495_v24 = vld [vmem:[%s12068_s27 + $0x1ce0] sm:$0xff] }
 0x5e6   : > { %v6762_v61 = vpop.f32.mrf.mxu2 }
 0x5e7   : > { %v9479_v32 = vmax.f32 %v9351_v13, 0.0  ;;  %v7126_v5 = vadd.f32 %v6762_v61, %v6079_v40  ;;  %v7809_v47 = vpop.f32.mrf.mxu3  ;;  %v5718_v3 = vpop.f32.mrf.mxu1  ;;  %v11753_v40 = vld [vmem:[%s12068_s27 + $0x20e0] sm:$0xff] }
 0x5e8   : > { %v6080_v15 = vadd.f32 %v5718_v3, %v12860_v18 }
 0x5e9   : > { %9608 = vst.msk [vmem:[%s14162_s13 + $0x48] sm:$0xff] %vm9598_vm2, %v9479_v32  ;;  %v8173_v29 = vadd.f32 %v7809_v47, %v7126_v5 }
 0x5ea   : > { %v8859_v51 = vpop.f32.mrf.mxu0  ;;  %11108 = vmatmul.msk.f32.gmra.mxu1 %vm431_vm1, %v10978_v6 }
 0x5eb   : > { %v9220_v7 = vadd.f32 %v8856_v58, %v8173_v29  ;;  %11366 = vmatmul.msk.f32.gmra.mxu2 %vm431_vm1, %v11236_v2  ;;  %v10980_v2 = vld [vmem:[%s12068_s27 + $0x14e8] sm:$0xff] }
 0x5ec   : > { %11624 = vmatmul.msk.f32.gmra.mxu3 %vm431_vm1, %v11494_v35  ;;  %v11238_v29 = vld [vmem:[%s12068_s27 + $0x18e8] sm:$0xff] }
 0x5ed   : > { %11882 = vmatmul.msk.f32.gmra.mxu0 %vm431_vm1, %v11752_v53  ;;  %v9352_v37 = vadd.f32 %v14148_v45, %v9220_v7  ;;  %v11754_v7 = vld [vmem:[%s12068_s27 + $0x20e8] sm:$0xff] }
 0x5ee   : > { %v6765_v52 = vpop.f32.mrf.mxu2 }
 0x5ef   : > { %v9480_v21 = vmax.f32 %v9352_v37, 0.0  ;;  %v7127_v26 = vadd.f32 %v6765_v52, %v6080_v15  ;;  %v7812_v19 = vpop.f32.mrf.mxu3  ;;  %v5721_v22 = vpop.f32.mrf.mxu1 }
 0x5f0   : > { %v6081_v18 = vadd.f32 %v5721_v22, %v12871_v4 }
 0x5f1   : > { %9609 = vst.msk [vmem:[%s14162_s13 + $0x50] sm:$0xff] %vm9598_vm2, %v9480_v21  ;;  %v8174_v58 = vadd.f32 %v7812_v19, %v7127_v26 }
 0x5f2   : > { %v8862_v11 = vpop.f32.mrf.mxu0  ;;  %11109 = vmatmul.msk.f32.gmra.mxu1 %vm431_vm1, %v10979_v54  ;;  %v10981_v54 = vld [vmem:[%s12068_s27 + $0x14f0] sm:$0xff] }
 0x5f3   : > { %v9221_v13 = vadd.f32 %v8859_v51, %v8174_v58  ;;  %11367 = vmatmul.msk.f32.gmra.mxu2 %vm431_vm1, %v11237_v55  ;;  %v11496_v51 = vld [vmem:[%s12068_s27 + $0x1ce8] sm:$0xff]  ;;  %v11239_v55 = vld [vmem:[%s12068_s27 + $0x18f0] sm:$0xff] }
 0x5f4   : > { %11625 = vmatmul.msk.f32.gmra.mxu3 %vm431_vm1, %v11495_v24  ;;  %v11497_v24 = vld [vmem:[%s12068_s27 + $0x1cf0] sm:$0xff] }
 0x5f5   : > { %11883 = vmatmul.msk.f32.gmra.mxu0 %vm431_vm1, %v11753_v40  ;;  %v9353_v61 = vadd.f32 %v14148_v45, %v9221_v13  ;;  %v11755_v40 = vld [vmem:[%s12068_s27 + $0x20f0] sm:$0xff] }
 0x5f6   : > { %v6768_v32 = vpop.f32.mrf.mxu2 }
 0x5f7   : > { %v9481_v5 = vmax.f32 %v9353_v61, 0.0  ;;  %v7128_v47 = vadd.f32 %v6768_v32, %v6081_v18  ;;  %v7815_v3 = vpop.f32.mrf.mxu3  ;;  %v5724_v6 = vpop.f32.mrf.mxu1 }
 0x5f8   : > { %v6082_v4 = vadd.f32 %v5724_v6, %v12882_v28  ;;  %v10982_v6 = vld [vmem:[%s12068_s27 + $0x14f8] sm:$0xff] }
 0x5f9   : > { %9610 = vst.msk [vmem:[%s14162_s13 + $0x58] sm:$0xff] %vm9598_vm2, %v9481_v5  ;;  %v8175_v35 = vadd.f32 %v7815_v3, %v7128_v47 }
 0x5fa   : > { %v8865_v53 = vpop.f32.mrf.mxu0  ;;  %11110 = vmatmul.msk.f32.gmra.mxu1 %vm431_vm1, %v10980_v2  ;;  %v11240_v2 = vld [vmem:[%s12068_s27 + $0x18f8] sm:$0xff] }
 0x5fb   : > { %v9222_v15 = vadd.f32 %v8862_v11, %v8175_v35  ;;  %11368 = vmatmul.msk.f32.gmra.mxu2 %vm431_vm1, %v11238_v29  ;;  %v11498_v35 = vld [vmem:[%s12068_s27 + $0x1cf8] sm:$0xff] }
 0x5fc   : > { %11626 = vmatmul.msk.f32.gmra.mxu3 %vm431_vm1, %v11496_v51 }
 0x5fd   : > { %11884 = vmatmul.msk.f32.gmra.mxu0 %vm431_vm1, %v11754_v7  ;;  %v9354_v37 = vadd.f32 %v14148_v45, %v9222_v15 }
 0x5fe   : > { %v6771_v52 = vpop.f32.mrf.mxu2 }
 0x5ff   : > { %v9482_v21 = vmax.f32 %v9354_v37, 0.0  ;;  %v7129_v26 = vadd.f32 %v6771_v52, %v6082_v4  ;;  %v7818_v19 = vpop.f32.mrf.mxu3  ;;  %v5727_v22 = vpop.f32.mrf.mxu1 }
 0x600   : > { %v6083_v28 = vadd.f32 %v5727_v22, %v12893_v10  ;;  %v11241_v22 = vld [vmem:[%s12068_s27 + $0x1900] sm:$0xff] }
 0x601   : > { %9611 = vst.msk [vmem:[%s14162_s13 + $0x60] sm:$0xff] %vm9598_vm2, %v9482_v21  ;;  %v8176_v58 = vadd.f32 %v7818_v19, %v7129_v26  ;;  %v10983_v19 = vld [vmem:[%s12068_s27 + $0x1500] sm:$0xff] }
 0x602   : > { %v8868_v11 = vpop.f32.mrf.mxu0  ;;  %11111 = vmatmul.msk.f32.gmra.mxu1 %vm431_vm1, %v10981_v54 }
 0x603   : > { %v9223_v13 = vadd.f32 %v8865_v53, %v8176_v58  ;;  %11369 = vmatmul.msk.f32.gmra.mxu2 %vm431_vm1, %v11239_v55  ;;  %v11756_v53 = vld [vmem:[%s12068_s27 + $0x20f8] sm:$0xff]  ;;  %v11499_v55 = vld [vmem:[%s12068_s27 + $0x1d00] sm:$0xff] }
 0x604   : > { %11627 = vmatmul.msk.f32.gmra.mxu3 %vm431_vm1, %v11497_v24  ;;  %v11757_v24 = vld [vmem:[%s12068_s27 + $0x2100] sm:$0xff] }
 0x605   : > { %11885 = vmatmul.msk.f32.gmra.mxu0 %vm431_vm1, %v11755_v40  ;;  %v9355_v18 = vadd.f32 %v14148_v45, %v9223_v13 }
 0x606   : > { %v6774_v61 = vpop.f32.mrf.mxu2 }
 0x607   : > { %v9483_v32 = vmax.f32 %v9355_v18, 0.0  ;;  %v7130_v5 = vadd.f32 %v6774_v61, %v6083_v28  ;;  %v7821_v47 = vpop.f32.mrf.mxu3  ;;  %v5730_v3 = vpop.f32.mrf.mxu1 }
 0x608   : > { %v6084_v10 = vadd.f32 %v5730_v3, %v12904_v0 }
 0x609   : > { %9612 = vst.msk [vmem:[%s14162_s13 + $0x68] sm:$0xff] %vm9598_vm2, %v9483_v32  ;;  %v8177_v29 = vadd.f32 %v7821_v47, %v7130_v5  ;;  %v10984_v5 = vld [vmem:[%s12068_s27 + $0x1508] sm:$0xff] }
 0x60a   : > { %v8871_v51 = vpop.f32.mrf.mxu0  ;;  %11112 = vmatmul.msk.f32.gmra.mxu1 %vm431_vm1, %v10982_v6  ;;  %v11242_v47 = vld [vmem:[%s12068_s27 + $0x1908] sm:$0xff] }
 0x60b   : > { %v9224_v7 = vadd.f32 %v8868_v11, %v8177_v29  ;;  %11370 = vmatmul.msk.f32.gmra.mxu2 %vm431_vm1, %v11240_v2  ;;  %v11500_v6 = vld [vmem:[%s12068_s27 + $0x1d08] sm:$0xff] }
 0x60c   : > { %11628 = vmatmul.msk.f32.gmra.mxu3 %vm431_vm1, %v11498_v35  ;;  %v11758_v29 = vld [vmem:[%s12068_s27 + $0x2108] sm:$0xff] }
 0x60d   : > { %11886 = vmatmul.msk.f32.gmra.mxu0 %vm431_vm1, %v11756_v53  ;;  %v9356_v15 = vadd.f32 %v14148_v45, %v9224_v7 }
 0x60e   : > { %v6777_v4 = vpop.f32.mrf.mxu2 }
 0x60f   : > { %v9484_v37 = vmax.f32 %v9356_v15, 0.0  ;;  %v7131_v52 = vadd.f32 %v6777_v4, %v6084_v10  ;;  %v7824_v21 = vpop.f32.mrf.mxu3  ;;  %v5733_v26 = vpop.f32.mrf.mxu1 }
 0x610   : > { %v6085_v0 = vadd.f32 %v5733_v26, %v12915_v9  ;;  %v11501_v26 = vld [vmem:[%s12068_s27 + $0x1d10] sm:$0xff] }
 0x611   : > { %9613 = vst.msk [vmem:[%s14162_s13 + $0x70] sm:$0xff] %vm9598_vm2, %v9484_v37  ;;  %v8178_v54 = vadd.f32 %v7824_v21, %v7131_v52  ;;  %v10985_v37 = vld [vmem:[%s12068_s27 + $0x1510] sm:$0xff] }
 0x612   : > { %v8874_v58 = vpop.f32.mrf.mxu0  ;;  %11113 = vmatmul.msk.f32.gmra.mxu1 %vm431_vm1, %v10983_v19  ;;  %v11243_v52 = vld [vmem:[%s12068_s27 + $0x1910] sm:$0xff] }
 0x613   : > { %v9225_v11 = vadd.f32 %v8871_v51, %v8178_v54  ;;  %11371 = vmatmul.msk.f32.gmra.mxu2 %vm431_vm1, %v11241_v22  ;;  %v11759_v22 = vld [vmem:[%s12068_s27 + $0x2110] sm:$0xff] }
 0x614   : > { %11629 = vmatmul.msk.f32.gmra.mxu3 %vm431_vm1, %v11499_v55 }
 0x615   : > { %11887 = vmatmul.msk.f32.gmra.mxu0 %vm431_vm1, %v11757_v24  ;;  %v9357_v40 = vadd.f32 %v14148_v45, %v9225_v11 }
 0x616   : > { %v6780_v13 = vpop.f32.mrf.mxu2 }
 0x617   : > { %v9485_v28 = vmax.f32 %v9357_v40, 0.0  ;;  %v7132_v18 = vadd.f32 %v6780_v13, %v6085_v0  ;;  %v7827_v61 = vpop.f32.mrf.mxu3  ;;  %v5736_v32 = vpop.f32.mrf.mxu1  ;;  %v10986_v13 = vld [vmem:[%s12068_s27 + $0x1518] sm:$0xff] }
 0x618   : > { %v6086_v9 = vadd.f32 %v5736_v32, %v12926_v17 }
 0x619   : > { %9614 = vst.msk [vmem:[%s14162_s13 + $0x78] sm:$0xff] %vm9598_vm2, %v9485_v28  ;;  %v8179_v3 = vadd.f32 %v7827_v61, %v7132_v18  ;;  %v11244_v28 = vld [vmem:[%s12068_s27 + $0x1918] sm:$0xff] }
 0x61a   : > { %v8877_v2 = vpop.f32.mrf.mxu0  ;;  %11114 = vmatmul.msk.f32.gmra.mxu1 %vm431_vm1, %v10984_v5  ;;  %v11502_v61 = vld [vmem:[%s12068_s27 + $0x1d18] sm:$0xff] }
 0x61b   : > { %v9226_v35 = vadd.f32 %v8874_v58, %v8179_v3  ;;  %11372 = vmatmul.msk.f32.gmra.mxu2 %vm431_vm1, %v11242_v47  ;;  %v11760_v5 = vld [vmem:[%s12068_s27 + $0x2118] sm:$0xff] }
 0x61c   : > { %11630 = vmatmul.msk.f32.gmra.mxu3 %vm431_vm1, %v11500_v6 }
 0x61d   : > { %11888 = vmatmul.msk.f32.gmra.mxu0 %vm431_vm1, %v11758_v29  ;;  %v9358_v51 = vadd.f32 %v14148_v45, %v9226_v35 }
 0x61e   : > { %v6783_v53 = vpop.f32.mrf.mxu2 }
 0x61f   : > { %v9486_v7 = vmax.f32 %v9358_v51, 0.0  ;;  %v7133_v10 = vadd.f32 %v6783_v53, %v6086_v9  ;;  %v7830_v15 = vpop.f32.mrf.mxu3  ;;  %v5739_v4 = vpop.f32.mrf.mxu1  ;;  %v10987_v51 = vld [vmem:[%s12068_s27 + $0x1520] sm:$0xff] }
 0x620   : > { %v6087_v17 = vadd.f32 %v5739_v4, %v12937_v25  ;;  %v11245_v53 = vld [vmem:[%s12068_s27 + $0x1920] sm:$0xff] }
 0x621   : > { %9615 = vst.msk [vmem:[%s14162_s13 + $0x80] sm:$0xff] %vm9598_vm2, %v9486_v7  ;;  %v8180_v21 = vadd.f32 %v7830_v15, %v7133_v10  ;;  %v11503_v10 = vld [vmem:[%s12068_s27 + $0x1d20] sm:$0xff] }
 0x622   : > { %v8880_v19 = vpop.f32.mrf.mxu0  ;;  %11115 = vmatmul.msk.f32.gmra.mxu1 %vm431_vm1, %v10985_v37  ;;  %v11761_v4 = vld [vmem:[%s12068_s27 + $0x2120] sm:$0xff] }
 0x623   : > { %v9227_v54 = vadd.f32 %v8877_v2, %v8180_v21  ;;  %11373 = vmatmul.msk.f32.gmra.mxu2 %vm431_vm1, %v11243_v52 }
 0x624   : > { %11631 = vmatmul.msk.f32.gmra.mxu3 %vm431_vm1, %v11501_v26 }
 0x625   : > { %11889 = vmatmul.msk.f32.gmra.mxu0 %vm431_vm1, %v11759_v22  ;;  %v9359_v55 = vadd.f32 %v14148_v45, %v9227_v54 }
 0x626   : > { %v6786_v58 = vpop.f32.mrf.mxu2 }
 0x627   : > { %v9487_v24 = vmax.f32 %v9359_v55, 0.0  ;;  %v7134_v11 = vadd.f32 %v6786_v58, %v6087_v17  ;;  %v7833_v0 = vpop.f32.mrf.mxu3  ;;  %v5742_v40 = vpop.f32.mrf.mxu1  ;;  %v10988_v17 = vld [vmem:[%s12068_s27 + $0x1528] sm:$0xff] }
 0x628   : > { %v6088_v25 = vadd.f32 %v5742_v40, %v12948_v33  ;;  %v11246_v55 = vld [vmem:[%s12068_s27 + $0x1928] sm:$0xff] }
 0x629   : > { %9616 = vst.msk [vmem:[%s14162_s13 + $0x88] sm:$0xff] %vm9598_vm2, %v9487_v24  ;;  %v8181_v18 = vadd.f32 %v7833_v0, %v7134_v11  ;;  %v11504_v24 = vld [vmem:[%s12068_s27 + $0x1d28] sm:$0xff] }
 0x62a   : > { %v8883_v32 = vpop.f32.mrf.mxu0  ;;  %11116 = vmatmul.msk.f32.gmra.mxu1 %vm431_vm1, %v10986_v13  ;;  %v11762_v0 = vld [vmem:[%s12068_s27 + $0x2128] sm:$0xff] }
 0x62b   : > { %v9228_v47 = vadd.f32 %v8880_v19, %v8181_v18  ;;  %11374 = vmatmul.msk.f32.gmra.mxu2 %vm431_vm1, %v11244_v28 }
 0x62c   : > { %11632 = vmatmul.msk.f32.gmra.mxu3 %vm431_vm1, %v11502_v61 }
 0x62d   : > { %11890 = vmatmul.msk.f32.gmra.mxu0 %vm431_vm1, %v11760_v5  ;;  %v9360_v3 = vadd.f32 %v14148_v45, %v9228_v47  ;;  %v10989_v47 = vld [vmem:[%s12068_s27 + $0x1530] sm:$0xff] }
 0x62e   : > { %v6789_v6 = vpop.f32.mrf.mxu2 }
 0x62f   : > { %v9488_v2 = vmax.f32 %v9360_v3, 0.0  ;;  %v7135_v29 = vadd.f32 %v6789_v6, %v6088_v25  ;;  %v7836_v35 = vpop.f32.mrf.mxu3  ;;  %v5745_v9 = vpop.f32.mrf.mxu1  ;;  %v11247_v25 = vld [vmem:[%s12068_s27 + $0x1930] sm:$0xff] }
 0x630   : > { %v6089_v33 = vadd.f32 %v5745_v9, %v12959_v41  ;;  %v11505_v6 = vld [vmem:[%s12068_s27 + $0x1d30] sm:$0xff] }
 0x631   : > { %9617 = vst.msk [vmem:[%s14162_s13 + $0x90] sm:$0xff] %vm9598_vm2, %v9488_v2  ;;  %v8182_v7 = vadd.f32 %v7836_v35, %v7135_v29  ;;  %v11763_v29 = vld [vmem:[%s12068_s27 + $0x2130] sm:$0xff] }
 0x632   : > { %v8886_v15 = vpop.f32.mrf.mxu0  ;;  %11117 = vmatmul.msk.f32.gmra.mxu1 %vm431_vm1, %v10987_v51 }
 0x633   : > { %v9229_v37 = vadd.f32 %v8883_v32, %v8182_v7  ;;  %11375 = vmatmul.msk.f32.gmra.mxu2 %vm431_vm1, %v11245_v53 }
 0x634   : > { %11633 = vmatmul.msk.f32.gmra.mxu3 %vm431_vm1, %v11503_v10 }
 0x635   : > { %11891 = vmatmul.msk.f32.gmra.mxu0 %vm431_vm1, %v11761_v4  ;;  %v9361_v52 = vadd.f32 %v14148_v45, %v9229_v37  ;;  %v10990_v4 = vld [vmem:[%s12068_s27 + $0x1538] sm:$0xff] }
 0x636   : > { %v6792_v21 = vpop.f32.mrf.mxu2  ;;  %v11248_v37 = vld [vmem:[%s12068_s27 + $0x1938] sm:$0xff] }
 0x637   : > { %v9489_v26 = vmax.f32 %v9361_v52, 0.0  ;;  %v7136_v19 = vadd.f32 %v6792_v21, %v6089_v33  ;;  %v7839_v22 = vpop.f32.mrf.mxu3  ;;  %v5748_v54 = vpop.f32.mrf.mxu1  ;;  %v11506_v52 = vld [vmem:[%s12068_s27 + $0x1d38] sm:$0xff] }
 0x638   : > { %v6090_v41 = vadd.f32 %v5748_v54, %v12970_v49 }
 0x639   : > { %9618 = vst.msk [vmem:[%s14162_s13 + $0x98] sm:$0xff] %vm9598_vm2, %v9489_v26  ;;  %v8183_v58 = vadd.f32 %v7839_v22, %v7136_v19  ;;  %v11764_v26 = vld [vmem:[%s12068_s27 + $0x2138] sm:$0xff] }
 0x63a   : > { %v8889_v11 = vpop.f32.mrf.mxu0  ;;  %11118 = vmatmul.msk.f32.gmra.mxu1 %vm431_vm1, %v10988_v17 }
 0x63b   : > { %v9230_v40 = vadd.f32 %v8886_v15, %v8183_v58  ;;  %11376 = vmatmul.msk.f32.gmra.mxu2 %vm431_vm1, %v11246_v55 }
 0x63c   : > { %11634 = vmatmul.msk.f32.gmra.mxu3 %vm431_vm1, %v11504_v24 }
 0x63d   : > { %11892 = vmatmul.msk.f32.gmra.mxu0 %vm431_vm1, %v11762_v0  ;;  %v9362_v13 = vadd.f32 %v14148_v45, %v9230_v40  ;;  %v11249_v0 = vld [vmem:[%s12068_s27 + $0x1940] sm:$0xff] }
 0x63e   : > { %v6795_v28 = vpop.f32.mrf.mxu2 }
 0x63f   : > { %v9490_v18 = vmax.f32 %v9362_v13, 0.0  ;;  %v7137_v61 = vadd.f32 %v6795_v28, %v6090_v41  ;;  %v7842_v32 = vpop.f32.mrf.mxu3  ;;  %v5751_v5 = vpop.f32.mrf.mxu1  ;;  %v11507_v41 = vld [vmem:[%s12068_s27 + $0x1d40] sm:$0xff] }
 0x640   : > { %v6091_v49 = vadd.f32 %v5751_v5, %v12981_v57  ;;  %v11765_v28 = vld [vmem:[%s12068_s27 + $0x2140] sm:$0xff] }
 0x641   : > { %9619 = vst.msk [vmem:[%s14162_s13 + $0xa0] sm:$0xff] %vm9598_vm2, %v9490_v18  ;;  %v8184_v3 = vadd.f32 %v7842_v32, %v7137_v61 }
 0x642   : > { %v8892_v2 = vpop.f32.mrf.mxu0  ;;  %11119 = vmatmul.msk.f32.gmra.mxu1 %vm431_vm1, %v10989_v47 }
 0x643   : > { %v9231_v35 = vadd.f32 %v8889_v11, %v8184_v3  ;;  %11377 = vmatmul.msk.f32.gmra.mxu2 %vm431_vm1, %v11247_v25  ;;  %v10991_v11 = vld [vmem:[%s12068_s27 + $0x1540] sm:$0xff] }
 0x644   : > { %11635 = vmatmul.msk.f32.gmra.mxu3 %vm431_vm1, %v11505_v6  ;;  %v10992_v6 = vld [vmem:[%s12068_s27 + $0x1548] sm:$0xff] }
 0x645   : > { %11893 = vmatmul.msk.f32.gmra.mxu0 %vm431_vm1, %v11763_v29  ;;  %v9363_v9 = vadd.f32 %v14148_v45, %v9231_v35  ;;  %v11508_v35 = vld [vmem:[%s12068_s27 + $0x1d48] sm:$0xff] }
 0x646   : > { %v6798_v51 = vpop.f32.mrf.mxu2 }
 0x647   : > { %v9491_v53 = vmax.f32 %v9363_v9, 0.0  ;;  %v7138_v7 = vadd.f32 %v6798_v51, %v6091_v49  ;;  %v7845_v10 = vpop.f32.mrf.mxu3  ;;  %v5754_v15 = vpop.f32.mrf.mxu1  ;;  %v11766_v9 = vld [vmem:[%s12068_s27 + $0x2148] sm:$0xff] }
 0x648   : > { %v6092_v57 = vadd.f32 %v5754_v15, %v12992_v1 }
 0x649   : > { %9620 = vst.msk [vmem:[%s14162_s13 + $0xa8] sm:$0xff] %vm9598_vm2, %v9491_v53  ;;  %v8185_v33 = vadd.f32 %v7845_v10, %v7138_v7 }
 0x64a   : > { %v8895_v21 = vpop.f32.mrf.mxu0  ;;  %11120 = vmatmul.msk.f32.gmra.mxu1 %vm431_vm1, %v10990_v4 }
 0x64b   : > { %v9232_v19 = vadd.f32 %v8892_v2, %v8185_v33  ;;  %11378 = vmatmul.msk.f32.gmra.mxu2 %vm431_vm1, %v11248_v37  ;;  %v11250_v2 = vld [vmem:[%s12068_s27 + $0x1948] sm:$0xff]  ;;  %v10993_v33 = vld [vmem:[%s12068_s27 + $0x1550] sm:$0xff] }
 0x64c   : > { %11636 = vmatmul.msk.f32.gmra.mxu3 %vm431_vm1, %v11506_v52  ;;  %v11251_v52 = vld [vmem:[%s12068_s27 + $0x1950] sm:$0xff] }
 0x64d   : > { %11894 = vmatmul.msk.f32.gmra.mxu0 %vm431_vm1, %v11764_v26  ;;  %v9364_v22 = vadd.f32 %v14148_v45, %v9232_v19  ;;  %v11509_v26 = vld [vmem:[%s12068_s27 + $0x1d50] sm:$0xff] }
 0x64e   : > { %v6801_v54 = vpop.f32.mrf.mxu2 }
 0x64f   : > { %v9492_v17 = vmax.f32 %v9364_v22, 0.0  ;;  %v7139_v55 = vadd.f32 %v6801_v54, %v6092_v57  ;;  %v7848_v58 = vpop.f32.mrf.mxu3  ;;  %v5757_v24 = vpop.f32.mrf.mxu1  ;;  %v11767_v57 = vld [vmem:[%s12068_s27 + $0x2150] sm:$0xff] }
 0x650   : > { %v6093_v1 = vadd.f32 %v5757_v24, %v13003_v14 }
 0x651   : > { %9621 = vst.msk [vmem:[%s14162_s13 + $0xb0] sm:$0xff] %vm9598_vm2, %v9492_v17  ;;  %v8186_v40 = vadd.f32 %v7848_v58, %v7139_v55 }
 0x652   : > { %v8898_v13 = vpop.f32.mrf.mxu0  ;;  %11121 = vmatmul.msk.f32.gmra.mxu1 %vm431_vm1, %v10991_v11 }
 0x653   : > { %v9233_v18 = vadd.f32 %v8895_v21, %v8186_v40  ;;  %11379 = vmatmul.msk.f32.gmra.mxu2 %vm431_vm1, %v11249_v0  ;;  %v10994_v0 = vld [vmem:[%s12068_s27 + $0x1558] sm:$0xff] }
 0x654   : > { %11637 = vmatmul.msk.f32.gmra.mxu3 %vm431_vm1, %v11507_v41  ;;  %v11252_v40 = vld [vmem:[%s12068_s27 + $0x1958] sm:$0xff] }
 0x655   : > { %11895 = vmatmul.msk.f32.gmra.mxu0 %vm431_vm1, %v11765_v28  ;;  %v9365_v61 = vadd.f32 %v14148_v45, %v9233_v18  ;;  %v11768_v18 = vld [vmem:[%s12068_s27 + $0x2158] sm:$0xff] }
 0x656   : > { %v6804_v32 = vpop.f32.mrf.mxu2 }
 0x657   : > { %v9493_v5 = vmax.f32 %v9365_v61, 0.0  ;;  %v7140_v47 = vadd.f32 %v6804_v32, %v6093_v1  ;;  %v7851_v25 = vpop.f32.mrf.mxu3  ;;  %v5760_v3 = vpop.f32.mrf.mxu1 }
 0x658   : > { %v6094_v14 = vadd.f32 %v5760_v3, %v13014_v30 }
 0x659   : > { %9622 = vst.msk [vmem:[%s14162_s13 + $0xb8] sm:$0xff] %vm9598_vm2, %v9493_v5  ;;  %v8187_v29 = vadd.f32 %v7851_v25, %v7140_v47 }
 0x65a   : > { %v8901_v49 = vpop.f32.mrf.mxu0  ;;  %11122 = vmatmul.msk.f32.gmra.mxu1 %vm431_vm1, %v10992_v6  ;;  %v10995_v6 = vld [vmem:[%s12068_s27 + $0x1560] sm:$0xff] }
 0x65b   : > { %v9234_v51 = vadd.f32 %v8898_v13, %v8187_v29  ;;  %11380 = vmatmul.msk.f32.gmra.mxu2 %vm431_vm1, %v11250_v2  ;;  %v11510_v13 = vld [vmem:[%s12068_s27 + $0x1d58] sm:$0xff]  ;;  %v11253_v2 = vld [vmem:[%s12068_s27 + $0x1960] sm:$0xff] }
 0x65c   : > { %11638 = vmatmul.msk.f32.gmra.mxu3 %vm431_vm1, %v11508_v35  ;;  %v11511_v35 = vld [vmem:[%s12068_s27 + $0x1d60] sm:$0xff] }
 0x65d   : > { %11896 = vmatmul.msk.f32.gmra.mxu0 %vm431_vm1, %v11766_v9  ;;  %v9366_v53 = vadd.f32 %v14148_v45, %v9234_v51  ;;  %v11769_v9 = vld [vmem:[%s12068_s27 + $0x2160] sm:$0xff] }
 0x65e   : > { %v6807_v7 = vpop.f32.mrf.mxu2 }
 0x65f   : > { %v9494_v10 = vmax.f32 %v9366_v53, 0.0  ;;  %v7141_v15 = vadd.f32 %v6807_v7, %v6094_v14  ;;  %v7854_v4 = vpop.f32.mrf.mxu3  ;;  %v5763_v37 = vpop.f32.mrf.mxu1 }
 0x660   : > { %v6095_v30 = vadd.f32 %v5763_v37, %v13025_v46  ;;  %v10996_v37 = vld [vmem:[%s12068_s27 + $0x1568] sm:$0xff] }
 0x661   : > { %9623 = vst.msk [vmem:[%s14162_s13 + $0xc0] sm:$0xff] %vm9598_vm2, %v9494_v10  ;;  %v8188_v21 = vadd.f32 %v7854_v4, %v7141_v15 }
 0x662   : > { %v8904_v19 = vpop.f32.mrf.mxu0  ;;  %11123 = vmatmul.msk.f32.gmra.mxu1 %vm431_vm1, %v10993_v33  ;;  %v11254_v33 = vld [vmem:[%s12068_s27 + $0x1968] sm:$0xff] }
 0x663   : > { %v9235_v22 = vadd.f32 %v8901_v49, %v8188_v21  ;;  %11381 = vmatmul.msk.f32.gmra.mxu2 %vm431_vm1, %v11251_v52  ;;  %v11512_v21 = vld [vmem:[%s12068_s27 + $0x1d68] sm:$0xff] }
 0x664   : > { %11639 = vmatmul.msk.f32.gmra.mxu3 %vm431_vm1, %v11509_v26  ;;  %v11770_v26 = vld [vmem:[%s12068_s27 + $0x2168] sm:$0xff] }
 0x665   : > { %11897 = vmatmul.msk.f32.gmra.mxu0 %vm431_vm1, %v11767_v57  ;;  %v9367_v54 = vadd.f32 %v14148_v45, %v9235_v22 }
 0x666   : > { %v6810_v17 = vpop.f32.mrf.mxu2 }
 0x667   : > { %v9495_v55 = vmax.f32 %v9367_v54, 0.0  ;;  %v7142_v58 = vadd.f32 %v6810_v17, %v6095_v30  ;;  %v7857_v24 = vpop.f32.mrf.mxu3  ;;  %v5766_v11 = vpop.f32.mrf.mxu1 }
 0x668   : > { %v6096_v46 = vadd.f32 %v5766_v11, %v13036_v62  ;;  %v11255_v11 = vld [vmem:[%s12068_s27 + $0x1970] sm:$0xff] }
 0x669   : > { %9624 = vst.msk [vmem:[%s14162_s13 + $0xc8] sm:$0xff] %vm9598_vm2, %v9495_v55  ;;  %v8189_v41 = vadd.f32 %v7857_v24, %v7142_v58  ;;  %v10997_v24 = vld [vmem:[%s12068_s27 + $0x1570] sm:$0xff] }
 0x66a   : > { %v8907_v28 = vpop.f32.mrf.mxu0  ;;  %11124 = vmatmul.msk.f32.gmra.mxu1 %vm431_vm1, %v10994_v0 }
 0x66b   : > { %v9236_v1 = vadd.f32 %v8904_v19, %v8189_v41  ;;  %11382 = vmatmul.msk.f32.gmra.mxu2 %vm431_vm1, %v11252_v40  ;;  %v11513_v40 = vld [vmem:[%s12068_s27 + $0x1d70] sm:$0xff] }
 0x66c   : > { %11640 = vmatmul.msk.f32.gmra.mxu3 %vm431_vm1, %v11510_v13  ;;  %v11771_v13 = vld [vmem:[%s12068_s27 + $0x2170] sm:$0xff] }
 0x66d   : > { %11898 = vmatmul.msk.f32.gmra.mxu0 %vm431_vm1, %v11768_v18  ;;  %v9368_v61 = vadd.f32 %v14148_v45, %v9236_v1  ;;  %v14490_v45 = vld [vmem:[%s15578_s2] ss:$0 sm:$0xff] }
 0x66e   : > { %v6813_v32 = vpop.f32.mrf.mxu2 }
 0x66f   : > { %v9496_v5 = vmax.f32 %v9368_v61, 0.0  ;;  %v7143_v47 = vadd.f32 %v6813_v32, %v6096_v46  ;;  %v7860_v25 = vpop.f32.mrf.mxu3  ;;  %v5769_v3 = vpop.f32.mrf.mxu1 }
 0x670   : > { %v6097_v62 = vadd.f32 %v5769_v3, %v13047_v23 }
 0x671   : > { %9625 = vst.msk [vmem:[%s14162_s13 + $0xd0] sm:$0xff] %vm9598_vm2, %v9496_v5  ;;  %v8190_v29 = vadd.f32 %v7860_v25, %v7143_v47  ;;  %v10998_v47 = vld [vmem:[%s12068_s27 + $0x1578] sm:$0xff] }
 0x672   : > { %v8910_v49 = vpop.f32.mrf.mxu0  ;;  %11125 = vmatmul.msk.f32.gmra.mxu1 %vm431_vm1, %v10995_v6  ;;  %v11256_v25 = vld [vmem:[%s12068_s27 + $0x1978] sm:$0xff] }
 0x673   : > { %v9237_v51 = vadd.f32 %v8907_v28, %v8190_v29  ;;  %11383 = vmatmul.msk.f32.gmra.mxu2 %vm431_vm1, %v11253_v2  ;;  %v11514_v6 = vld [vmem:[%s12068_s27 + $0x1d78] sm:$0xff] }
 0x674   : > { %11641 = vmatmul.msk.f32.gmra.mxu3 %vm431_vm1, %v11511_v35  ;;  %v11772_v29 = vld [vmem:[%s12068_s27 + $0x2178] sm:$0xff] }
 0x675   : > { %11899 = vmatmul.msk.f32.gmra.mxu0 %vm431_vm1, %v11769_v9  ;;  %v9369_v14 = vadd.f32 %v14490_v45, %v9237_v51 }
 0x676   : > { %v6816_v53 = vpop.f32.mrf.mxu2 }
 0x677   : > { %v9497_v7 = vmax.f32 %v9369_v14, 0.0  ;;  %v7144_v10 = vadd.f32 %v6816_v53, %v6097_v62  ;;  %v7863_v15 = vpop.f32.mrf.mxu3  ;;  %v5772_v4 = vpop.f32.mrf.mxu1 }
 0x678   : > { %v6098_v57 = vadd.f32 %v5772_v4, %v13058_v63  ;;  %v11515_v4 = vld [vmem:[%s12068_s27 + $0x1d80] sm:$0xff] }
 0x679   : > { %9626 = vst.msk [vmem:[%s14162_s13 + $0xd8] sm:$0xff] %vm9598_vm2, %v9497_v7  ;;  %v8191_v52 = vadd.f32 %v7863_v15, %v7144_v10  ;;  %v10999_v7 = vld [vmem:[%s12068_s27 + $0x1580] sm:$0xff] }
 0x67a   : > { %v8913_v23 = vpop.f32.mrf.mxu0  ;;  %11126 = vmatmul.msk.f32.gmra.mxu1 %vm431_vm1, %v10996_v37  ;;  %v11257_v10 = vld [vmem:[%s12068_s27 + $0x1980] sm:$0xff] }
 0x67b   : > { %v9238_v19 = vadd.f32 %v8910_v49, %v8191_v52  ;;  %11384 = vmatmul.msk.f32.gmra.mxu2 %vm431_vm1, %v11254_v33  ;;  %v11773_v33 = vld [vmem:[%s12068_s27 + $0x2180] sm:$0xff] }
 0x67c   : > { %11642 = vmatmul.msk.f32.gmra.mxu3 %vm431_vm1, %v11512_v21 }
 0x67d   : > { %11900 = vmatmul.msk.f32.gmra.mxu0 %vm431_vm1, %v11770_v26  ;;  %v9370_v22 = vadd.f32 %v14490_v45, %v9238_v19 }
 0x67e   : > { %v6819_v30 = vpop.f32.mrf.mxu2 }
 0x67f   : > { %v9498_v54 = vmax.f32 %v9370_v22, 0.0  ;;  %v7145_v17 = vadd.f32 %v6819_v30, %v6098_v57  ;;  %v7866_v55 = vpop.f32.mrf.mxu3  ;;  %v5775_v58 = vpop.f32.mrf.mxu1  ;;  %v11000_v30 = vld [vmem:[%s12068_s27 + $0x1588] sm:$0xff] }
 0x680   : > { %v6099_v63 = vadd.f32 %v5775_v58, %v13069_v56 }
 0x681   : > { %9627 = vst.msk [vmem:[%s14162_s13 + $0xe0] sm:$0xff] %vm9598_vm2, %v9498_v54  ;;  %v8192_v0 = vadd.f32 %v7866_v55, %v7145_v17  ;;  %v11258_v54 = vld [vmem:[%s12068_s27 + $0x1988] sm:$0xff] }
 0x682   : > { %v8916_v41 = vpop.f32.mrf.mxu0  ;;  %11127 = vmatmul.msk.f32.gmra.mxu1 %vm431_vm1, %v10997_v24  ;;  %v11516_v55 = vld [vmem:[%s12068_s27 + $0x1d88] sm:$0xff] }
 0x683   : > { %v9239_v28 = vadd.f32 %v8913_v23, %v8192_v0  ;;  %11385 = vmatmul.msk.f32.gmra.mxu2 %vm431_vm1, %v11255_v11  ;;  %v11774_v24 = vld [vmem:[%s12068_s27 + $0x2188] sm:$0xff] }
 0x684   : > { %11643 = vmatmul.msk.f32.gmra.mxu3 %vm431_vm1, %v11513_v40 }
 0x685   : > { %11901 = vmatmul.msk.f32.gmra.mxu0 %vm431_vm1, %v11771_v13  ;;  %v9371_v18 = vadd.f32 %v14490_v45, %v9239_v28 }
 0x686   : > { %v6822_v1 = vpop.f32.mrf.mxu2 }
 0x687   : > { %v9499_v46 = vmax.f32 %v9371_v18, 0.0  ;;  %v7146_v61 = vadd.f32 %v6822_v1, %v6099_v63  ;;  %v7869_v32 = vpop.f32.mrf.mxu3  ;;  %v5778_v5 = vpop.f32.mrf.mxu1  ;;  %v11001_v18 = vld [vmem:[%s12068_s27 + $0x1590] sm:$0xff] }
 0x688   : > { %v6100_v56 = vadd.f32 %v5778_v5, %v13080_v31  ;;  %v11259_v1 = vld [vmem:[%s12068_s27 + $0x1990] sm:$0xff] }
 0x689   : > { %9628 = vst.msk [vmem:[%s14162_s13 + $0xe8] sm:$0xff] %vm9598_vm2, %v9499_v46  ;;  %v8193_v3 = vadd.f32 %v7869_v32, %v7146_v61  ;;  %v11517_v61 = vld [vmem:[%s12068_s27 + $0x1d90] sm:$0xff] }
 0x68a   : > { %v8919_v2 = vpop.f32.mrf.mxu0  ;;  %11128 = vmatmul.msk.f32.gmra.mxu1 %vm431_vm1, %v10998_v47  ;;  %v11775_v5 = vld [vmem:[%s12068_s27 + $0x2190] sm:$0xff] }
 0x68b   : > { %v9240_v35 = vadd.f32 %v8916_v41, %v8193_v3  ;;  %11386 = vmatmul.msk.f32.gmra.mxu2 %vm431_vm1, %v11256_v25 }
 0x68c   : > { %11644 = vmatmul.msk.f32.gmra.mxu3 %vm431_vm1, %v11514_v6 }
 0x68d   : > { %11902 = vmatmul.msk.f32.gmra.mxu0 %vm431_vm1, %v11772_v29  ;;  %v9372_v49 = vadd.f32 %v14490_v45, %v9240_v35 }
 0x68e   : > { %v6825_v9 = vpop.f32.mrf.mxu2 }
 0x68f   : > { %v9500_v51 = vmax.f32 %v9372_v49, 0.0  ;;  %v7147_v62 = vadd.f32 %v6825_v9, %v6100_v56  ;;  %v7872_v14 = vpop.f32.mrf.mxu3  ;;  %v5781_v53 = vpop.f32.mrf.mxu1  ;;  %v11002_v56 = vld [vmem:[%s12068_s27 + $0x1598] sm:$0xff] }
 0x690   : > { %v6101_v31 = vadd.f32 %v5781_v53, %v13091_v42  ;;  %v11260_v49 = vld [vmem:[%s12068_s27 + $0x1998] sm:$0xff] }
 0x691   : > { %9629 = vst.msk [vmem:[%s14162_s13 + $0xf0] sm:$0xff] %vm9598_vm2, %v9500_v51  ;;  %v8194_v15 = vadd.f32 %v7872_v14, %v7147_v62  ;;  %v11518_v51 = vld [vmem:[%s12068_s27 + $0x1d98] sm:$0xff] }
 0x692   : > { %v8922_v37 = vpop.f32.mrf.mxu0  ;;  %11129 = vmatmul.msk.f32.gmra.mxu1 %vm431_vm1, %v10999_v7  ;;  %v11776_v14 = vld [vmem:[%s12068_s27 + $0x2198] sm:$0xff] }
 0x693   : > { %v9241_v52 = vadd.f32 %v8919_v2, %v8194_v15  ;;  %11387 = vmatmul.msk.f32.gmra.mxu2 %vm431_vm1, %v11257_v10 }
 0x694   : > { %11645 = vmatmul.msk.f32.gmra.mxu3 %vm431_vm1, %v11515_v4 }
 0x695   : > { %11903 = vmatmul.msk.f32.gmra.mxu0 %vm431_vm1, %v11773_v33  ;;  %v9373_v21 = vadd.f32 %v14490_v45, %v9241_v52  ;;  %v11003_v52 = vld [vmem:[%s12068_s27 + $0x15a0] sm:$0xff] }
 0x696   : > { %v6828_v23 = vpop.f32.mrf.mxu2 }
 0x697   : > { %v9501_v26 = vmax.f32 %v9373_v21, 0.0  ;;  %v7148_v19 = vadd.f32 %v6828_v23, %v6101_v31  ;;  %v7875_v57 = vpop.f32.mrf.mxu3  ;;  %v5784_v22 = vpop.f32.mrf.mxu1  ;;  %v11261_v31 = vld [vmem:[%s12068_s27 + $0x19a0] sm:$0xff] }
 0x698   : > { %v6102_v42 = vadd.f32 %v5784_v22, %v13102_v34  ;;  %v11519_v23 = vld [vmem:[%s12068_s27 + $0x1da0] sm:$0xff] }
 0x699   : > { %9630 = vst.msk [vmem:[%s14162_s13 + $0xf8] sm:$0xff] %vm9598_vm2, %v9501_v26  ;;  %v8195_v17 = vadd.f32 %v7875_v57, %v7148_v19  ;;  %v11777_v19 = vld [vmem:[%s12068_s27 + $0x21a0] sm:$0xff] }
 0x69a   : > { %v8925_v58 = vpop.f32.mrf.mxu0  ;;  %11130 = vmatmul.msk.f32.gmra.mxu1 %vm431_vm1, %v11000_v30 }
 0x69b   : > { %v9242_v11 = vadd.f32 %v8922_v37, %v8195_v17  ;;  %11388 = vmatmul.msk.f32.gmra.mxu2 %vm431_vm1, %v11258_v54 }
 0x69c   : > { %11646 = vmatmul.msk.f32.gmra.mxu3 %vm431_vm1, %v11516_v55 }
 0x69d   : > { %11904 = vmatmul.msk.f32.gmra.mxu0 %vm431_vm1, %v11774_v24  ;;  %v9374_v0 = vadd.f32 %v14490_v45, %v9242_v11  ;;  %v11004_v24 = vld [vmem:[%s12068_s27 + $0x15a8] sm:$0xff] }
 0x69e   : > { %v6831_v40 = vpop.f32.mrf.mxu2  ;;  %v11262_v11 = vld [vmem:[%s12068_s27 + $0x19a8] sm:$0xff] }
 0x69f   : > { %v9502_v41 = vmax.f32 %v9374_v0, 0.0  ;;  %v7149_v13 = vadd.f32 %v6831_v40, %v6102_v42  ;;  %v7878_v28 = vpop.f32.mrf.mxu3  ;;  %v5787_v63 = vpop.f32.mrf.mxu1  ;;  %v11520_v0 = vld [vmem:[%s12068_s27 + $0x1da8] sm:$0xff] }
 0x6a0   : > { %v6103_v34 = vadd.f32 %v5787_v63, %v13113_v60 }
 0x6a1   : > { %9631 = vst.msk [vmem:[%s14162_s13 + $0x100] sm:$0xff] %vm9598_vm2, %v9502_v41  ;;  %v8196_v46 = vadd.f32 %v7878_v28, %v7149_v13  ;;  %v11778_v41 = vld [vmem:[%s12068_s27 + $0x21a8] sm:$0xff] }
 0x6a2   : > { %v8928_v32 = vpop.f32.mrf.mxu0  ;;  %11131 = vmatmul.msk.f32.gmra.mxu1 %vm431_vm1, %v11001_v18 }
 0x6a3   : > { %v9243_v47 = vadd.f32 %v8925_v58, %v8196_v46  ;;  %11389 = vmatmul.msk.f32.gmra.mxu2 %vm431_vm1, %v11259_v1 }
 0x6a4   : > { %11647 = vmatmul.msk.f32.gmra.mxu3 %vm431_vm1, %v11517_v61 }
 0x6a5   : > { %11905 = vmatmul.msk.f32.gmra.mxu0 %vm431_vm1, %v11775_v5  ;;  %v9375_v25 = vadd.f32 %v14490_v45, %v9243_v47  ;;  %v11263_v5 = vld [vmem:[%s12068_s27 + $0x19b0] sm:$0xff] }
 0x6a6   : > { %v6834_v3 = vpop.f32.mrf.mxu2 }
 0x6a7   : > { %v9503_v6 = vmax.f32 %v9375_v25, 0.0  ;;  %v7150_v2 = vadd.f32 %v6834_v3, %v6103_v34  ;;  %v7881_v29 = vpop.f32.mrf.mxu3  ;;  %v5790_v35 = vpop.f32.mrf.mxu1  ;;  %v11521_v34 = vld [vmem:[%s12068_s27 + $0x1db0] sm:$0xff] }
 0x6a8   : > { %v6104_v60 = vadd.f32 %v5790_v35, %v13124_v36  ;;  %v11779_v3 = vld [vmem:[%s12068_s27 + $0x21b0] sm:$0xff] }
 0x6a9   : > { %9632 = vst.msk [vmem:[%s14162_s13 + $0x108] sm:$0xff] %vm9598_vm2, %v9503_v6  ;;  %v8197_v9 = vadd.f32 %v7881_v29, %v7150_v2 }
 0x6aa   : > { %v8931_v62 = vpop.f32.mrf.mxu0  ;;  %11132 = vmatmul.msk.f32.gmra.mxu1 %vm431_vm1, %v11002_v56 }
 0x6ab   : > { %v9244_v53 = vadd.f32 %v8928_v32, %v8197_v9  ;;  %11390 = vmatmul.msk.f32.gmra.mxu2 %vm431_vm1, %v11260_v49  ;;  %v11005_v32 = vld [vmem:[%s12068_s27 + $0x15b0] sm:$0xff] }
 0x6ac   : > { %11648 = vmatmul.msk.f32.gmra.mxu3 %vm431_vm1, %v11518_v51  ;;  %v11006_v51 = vld [vmem:[%s12068_s27 + $0x15b8] sm:$0xff] }
 0x6ad   : > { %11906 = vmatmul.msk.f32.gmra.mxu0 %vm431_vm1, %v11776_v14  ;;  %v9376_v7 = vadd.f32 %v14490_v45, %v9244_v53  ;;  %v11522_v53 = vld [vmem:[%s12068_s27 + $0x1db8] sm:$0xff] }
 0x6ae   : > { %v6837_v10 = vpop.f32.mrf.mxu2 }
 0x6af   : > { %v9504_v15 = vmax.f32 %v9376_v7, 0.0  ;;  %v7151_v4 = vadd.f32 %v6837_v10, %v6104_v60  ;;  %v7884_v37 = vpop.f32.mrf.mxu3  ;;  %v5793_v33 = vpop.f32.mrf.mxu1  ;;  %v11780_v7 = vld [vmem:[%s12068_s27 + $0x21b8] sm:$0xff] }
 0x6b0   : > { %v6105_v36 = vadd.f32 %v5793_v33, %v13135_v12 }
 0x6b1   : > { %9633 = vst.msk [vmem:[%s14162_s13 + $0x110] sm:$0xff] %vm9598_vm2, %v9504_v15  ;;  %v8198_v21 = vadd.f32 %v7884_v37, %v7151_v4 }
 0x6b2   : > { %v8934_v26 = vpop.f32.mrf.mxu0  ;;  %11133 = vmatmul.msk.f32.gmra.mxu1 %vm431_vm1, %v11003_v52 }
 0x6b3   : > { %v9245_v57 = vadd.f32 %v8931_v62, %v8198_v21  ;;  %11391 = vmatmul.msk.f32.gmra.mxu2 %vm431_vm1, %v11261_v31  ;;  %v11264_v62 = vld [vmem:[%s12068_s27 + $0x19b8] sm:$0xff]  ;;  %v11007_v21 = vld [vmem:[%s12068_s27 + $0x15c0] sm:$0xff] }
 0x6b4   : > { %11649 = vmatmul.msk.f32.gmra.mxu3 %vm431_vm1, %v11519_v23  ;;  %v11265_v23 = vld [vmem:[%s12068_s27 + $0x19c0] sm:$0xff] }
 0x6b5   : > { %11907 = vmatmul.msk.f32.gmra.mxu0 %vm431_vm1, %v11777_v19  ;;  %v9377_v22 = vadd.f32 %v14490_v45, %v9245_v57  ;;  %v11523_v19 = vld [vmem:[%s12068_s27 + $0x1dc0] sm:$0xff] }
 0x6b6   : > { %v6840_v30 = vpop.f32.mrf.mxu2 }
 0x6b7   : > { %v9505_v54 = vmax.f32 %v9377_v22, 0.0  ;;  %v7152_v17 = vadd.f32 %v6840_v30, %v6105_v36  ;;  %v7887_v55 = vpop.f32.mrf.mxu3  ;;  %v5796_v58 = vpop.f32.mrf.mxu1  ;;  %v11781_v36 = vld [vmem:[%s12068_s27 + $0x21c0] sm:$0xff] }
 0x6b8   : > { %v6106_v12 = vadd.f32 %v5796_v58, %v13146_v44 }
 0x6b9   : > { %9634 = vst.msk [vmem:[%s14162_s13 + $0x118] sm:$0xff] %vm9598_vm2, %v9505_v54  ;;  %v8199_v42 = vadd.f32 %v7887_v55, %v7152_v17 }
 0x6ba   : > { %v8937_v40 = vpop.f32.mrf.mxu0  ;;  %11134 = vmatmul.msk.f32.gmra.mxu1 %vm431_vm1, %v11004_v24 }
 0x6bb   : > { %v9246_v13 = vadd.f32 %v8934_v26, %v8199_v42  ;;  %11392 = vmatmul.msk.f32.gmra.mxu2 %vm431_vm1, %v11262_v11  ;;  %v11008_v11 = vld [vmem:[%s12068_s27 + $0x15c8] sm:$0xff] }
 0x6bc   : > { %11650 = vmatmul.msk.f32.gmra.mxu3 %vm431_vm1, %v11520_v0  ;;  %v11266_v42 = vld [vmem:[%s12068_s27 + $0x19c8] sm:$0xff] }
 0x6bd   : > { %11908 = vmatmul.msk.f32.gmra.mxu0 %vm431_vm1, %v11778_v41  ;;  %v9378_v28 = vadd.f32 %v14490_v45, %v9246_v13  ;;  %v11782_v13 = vld [vmem:[%s12068_s27 + $0x21c8] sm:$0xff] }
 0x6be   : > { %v6843_v63 = vpop.f32.mrf.mxu2 }
 0x6bf   : > { %v9506_v18 = vmax.f32 %v9378_v28, 0.0  ;;  %v7153_v1 = vadd.f32 %v6843_v63, %v6106_v12  ;;  %v7890_v46 = vpop.f32.mrf.mxu3  ;;  %v5799_v61 = vpop.f32.mrf.mxu1 }
 0x6c0   : > { %v6107_v44 = vadd.f32 %v5799_v61, %v13157_v20 }
 0x6c1   : > { %9635 = vst.msk [vmem:[%s14162_s13 + $0x120] sm:$0xff] %vm9598_vm2, %v9506_v18  ;;  %v8200_v47 = vadd.f32 %v7890_v46, %v7153_v1 }
 0x6c2   : > { %v8940_v25 = vpop.f32.mrf.mxu0  ;;  %11135 = vmatmul.msk.f32.gmra.mxu1 %vm431_vm1, %v11005_v32  ;;  %v11009_v32 = vld [vmem:[%s12068_s27 + $0x15d0] sm:$0xff] }
 0x6c3   : > { %v9247_v6 = vadd.f32 %v8937_v40, %v8200_v47  ;;  %11393 = vmatmul.msk.f32.gmra.mxu2 %vm431_vm1, %v11263_v5  ;;  %v11524_v40 = vld [vmem:[%s12068_s27 + $0x1dc8] sm:$0xff]  ;;  %v11267_v5 = vld [vmem:[%s12068_s27 + $0x19d0] sm:$0xff] }
 0x6c4   : > { %11651 = vmatmul.msk.f32.gmra.mxu3 %vm431_vm1, %v11521_v34  ;;  %v11525_v34 = vld [vmem:[%s12068_s27 + $0x1dd0] sm:$0xff] }
 0x6c5   : > { %11909 = vmatmul.msk.f32.gmra.mxu0 %vm431_vm1, %v11779_v3  ;;  %v9379_v2 = vadd.f32 %v14490_v45, %v9247_v6  ;;  %v11783_v3 = vld [vmem:[%s12068_s27 + $0x21d0] sm:$0xff] }
 0x6c6   : > { %v6846_v29 = vpop.f32.mrf.mxu2 }
 0x6c7   : > { %v9507_v35 = vmax.f32 %v9379_v2, 0.0  ;;  %v7154_v56 = vadd.f32 %v6846_v29, %v6107_v44  ;;  %v7893_v49 = vpop.f32.mrf.mxu3  ;;  %v5802_v9 = vpop.f32.mrf.mxu1 }
 0x6c8   : > { %v6108_v20 = vadd.f32 %v5802_v9, %v13168_v50  ;;  %v11010_v9 = vld [vmem:[%s12068_s27 + $0x15d8] sm:$0xff] }
 0x6c9   : > { %9636 = vst.msk [vmem:[%s14162_s13 + $0x128] sm:$0xff] %vm9598_vm2, %v9507_v35  ;;  %v8201_v14 = vadd.f32 %v7893_v49, %v7154_v56 }
 0x6ca   : > { %v8943_v60 = vpop.f32.mrf.mxu0  ;;  %11136 = vmatmul.msk.f32.gmra.mxu1 %vm431_vm1, %v11006_v51  ;;  %v11268_v51 = vld [vmem:[%s12068_s27 + $0x19d8] sm:$0xff] }
 0x6cb   : > { %v9248_v10 = vadd.f32 %v8940_v25, %v8201_v14  ;;  %11394 = vmatmul.msk.f32.gmra.mxu2 %vm431_vm1, %v11264_v62  ;;  %v11526_v14 = vld [vmem:[%s12068_s27 + $0x1dd8] sm:$0xff] }
 0x6cc   : > { %11652 = vmatmul.msk.f32.gmra.mxu3 %vm431_vm1, %v11522_v53 }
 0x6cd   : > { %11910 = vmatmul.msk.f32.gmra.mxu0 %vm431_vm1, %v11780_v7  ;;  %v9380_v15 = vadd.f32 %v14490_v45, %v9248_v10 }
 0x6ce   : > { %v6849_v4 = vpop.f32.mrf.mxu2 }
 0x6cf   : > { %v9508_v37 = vmax.f32 %v9380_v15, 0.0  ;;  %v7155_v33 = vadd.f32 %v6849_v4, %v6108_v20  ;;  %v7896_v52 = vpop.f32.mrf.mxu3  ;;  %v5805_v31 = vpop.f32.mrf.mxu1 }
 0x6d0   : > { %v6109_v50 = vadd.f32 %v5805_v31, %v13179_v8  ;;  %v11269_v31 = vld [vmem:[%s12068_s27 + $0x19e0] sm:$0xff] }
 0x6d1   : > { %9637 = vst.msk [vmem:[%s14162_s13 + $0x130] sm:$0xff] %vm9598_vm2, %v9508_v37  ;;  %v8202_v26 = vadd.f32 %v7896_v52, %v7155_v33  ;;  %v11011_v52 = vld [vmem:[%s12068_s27 + $0x15e0] sm:$0xff] }
 0x6d2   : > { %v8946_v57 = vpop.f32.mrf.mxu0  ;;  %11137 = vmatmul.msk.f32.gmra.mxu1 %vm431_vm1, %v11007_v21 }
 0x6d3   : > { %v9249_v22 = vadd.f32 %v8943_v60, %v8202_v26  ;;  %11395 = vmatmul.msk.f32.gmra.mxu2 %vm431_vm1, %v11265_v23  ;;  %v11784_v60 = vld [vmem:[%s12068_s27 + $0x21d8] sm:$0xff]  ;;  %v11527_v23 = vld [vmem:[%s12068_s27 + $0x1de0] sm:$0xff] }
 0x6d4   : > { %11653 = vmatmul.msk.f32.gmra.mxu3 %vm431_vm1, %v11523_v19  ;;  %v11785_v19 = vld [vmem:[%s12068_s27 + $0x21e0] sm:$0xff] }
 0x6d5   : > { %11911 = vmatmul.msk.f32.gmra.mxu0 %vm431_vm1, %v11781_v36  ;;  %v9381_v30 = vadd.f32 %v14490_v45, %v9249_v22 }
 0x6d6   : > { %v6852_v54 = vpop.f32.mrf.mxu2 }
 0x6d7   : > { %v9509_v17 = vmax.f32 %v9381_v30, 0.0  ;;  %v7156_v55 = vadd.f32 %v6852_v54, %v6109_v50  ;;  %v7899_v58 = vpop.f32.mrf.mxu3  ;;  %v5808_v24 = vpop.f32.mrf.mxu1 }
 0x6d8   : > { %v6110_v8 = vadd.f32 %v5808_v24, %v13190_v39 }
 0x6d9   : > { %9638 = vst.msk [vmem:[%s14162_s13 + $0x138] sm:$0xff] %vm9598_vm2, %v9509_v17  ;;  %v8203_v0 = vadd.f32 %v7899_v58, %v7156_v55  ;;  %v11012_v55 = vld [vmem:[%s12068_s27 + $0x15e8] sm:$0xff] }
 0x6da   : > { %v8949_v41 = vpop.f32.mrf.mxu0  ;;  %11138 = vmatmul.msk.f32.gmra.mxu1 %vm431_vm1, %v11008_v11  ;;  %v11270_v58 = vld [vmem:[%s12068_s27 + $0x19e8] sm:$0xff] }
 0x6db   : > { %v9250_v12 = vadd.f32 %v8946_v57, %v8203_v0  ;;  %11396 = vmatmul.msk.f32.gmra.mxu2 %vm431_vm1, %v11266_v42  ;;  %v11528_v11 = vld [vmem:[%s12068_s27 + $0x1de8] sm:$0xff] }
 0x6dc   : > { %11654 = vmatmul.msk.f32.gmra.mxu3 %vm431_vm1, %v11524_v40  ;;  %v11786_v0 = vld [vmem:[%s12068_s27 + $0x21e8] sm:$0xff] }
 0x6dd   : > { %11912 = vmatmul.msk.f32.gmra.mxu0 %vm431_vm1, %v11782_v13  ;;  %v9382_v28 = vadd.f32 %v14490_v45, %v9250_v12 }
 0x6de   : > { %v6855_v63 = vpop.f32.mrf.mxu2 }
 0x6df   : > { %v9510_v18 = vmax.f32 %v9382_v28, 0.0  ;;  %v7157_v1 = vadd.f32 %v6855_v63, %v6110_v8  ;;  %v7902_v46 = vpop.f32.mrf.mxu3  ;;  %v5811_v61 = vpop.f32.mrf.mxu1 }
 0x6e0   : > { %v6111_v39 = vadd.f32 %v5811_v61, %v13201_v48  ;;  %v11529_v61 = vld [vmem:[%s12068_s27 + $0x1df0] sm:$0xff] }
 0x6e1   : > { %9639 = vst.msk [vmem:[%s14162_s13 + $0x140] sm:$0xff] %vm9598_vm2, %v9510_v18  ;;  %v8204_v47 = vadd.f32 %v7902_v46, %v7157_v1  ;;  %v11013_v18 = vld [vmem:[%s12068_s27 + $0x15f0] sm:$0xff] }
 0x6e2   : > { %v8952_v25 = vpop.f32.mrf.mxu0  ;;  %11139 = vmatmul.msk.f32.gmra.mxu1 %vm431_vm1, %v11009_v32  ;;  %v11271_v1 = vld [vmem:[%s12068_s27 + $0x19f0] sm:$0xff] }
 0x6e3   : > { %v9251_v6 = vadd.f32 %v8949_v41, %v8204_v47  ;;  %11397 = vmatmul.msk.f32.gmra.mxu2 %vm431_vm1, %v11267_v5  ;;  %v11787_v5 = vld [vmem:[%s12068_s27 + $0x21f0] sm:$0xff] }
 0x6e4   : > { %11655 = vmatmul.msk.f32.gmra.mxu3 %vm431_vm1, %v11525_v34 }
 0x6e5   : > { %11913 = vmatmul.msk.f32.gmra.mxu0 %vm431_vm1, %v11783_v3  ;;  %v9383_v44 = vadd.f32 %v14490_v45, %v9251_v6 }
 0x6e6   : > { %v6858_v2 = vpop.f32.mrf.mxu2 }
 0x6e7   : > { %v9511_v29 = vmax.f32 %v9383_v44, 0.0  ;;  %v7158_v35 = vadd.f32 %v6858_v2, %v6111_v39  ;;  %v7905_v56 = vpop.f32.mrf.mxu3  ;;  %v5814_v49 = vpop.f32.mrf.mxu1  ;;  %v11014_v2 = vld [vmem:[%s12068_s27 + $0x15f8] sm:$0xff] }
 0x6e8   : > { %v6112_v48 = vadd.f32 %v5814_v49, %v13212_v16 }
 0x6e9   : > { %9640 = vst.msk [vmem:[%s14162_s13 + $0x148] sm:$0xff] %vm9598_vm2, %v9511_v29  ;;  %v8205_v62 = vadd.f32 %v7905_v56, %v7158_v35  ;;  %v11272_v29 = vld [vmem:[%s12068_s27 + $0x19f8] sm:$0xff] }
 0x6ea   : > { %v8955_v53 = vpop.f32.mrf.mxu0  ;;  %11140 = vmatmul.msk.f32.gmra.mxu1 %vm431_vm1, %v11010_v9  ;;  %v11530_v56 = vld [vmem:[%s12068_s27 + $0x1df8] sm:$0xff] }
 0x6eb   : > { %v9252_v7 = vadd.f32 %v8952_v25, %v8205_v62  ;;  %11398 = vmatmul.msk.f32.gmra.mxu2 %vm431_vm1, %v11268_v51  ;;  %v11788_v9 = vld [vmem:[%s12068_s27 + $0x21f8] sm:$0xff] }
 0x6ec   : > { %11656 = vmatmul.msk.f32.gmra.mxu3 %vm431_vm1, %v11526_v14 }
 0x6ed   : > { %11914 = vmatmul.msk.f32.gmra.mxu0 %vm431_vm1, %v11784_v60  ;;  %v9384_v10 = vadd.f32 %v14490_v45, %v9252_v7 }
 0x6ee   : > { %v6861_v20 = vpop.f32.mrf.mxu2 }
 0x6ef   : > { %v9512_v15 = vmax.f32 %v9384_v10, 0.0  ;;  %v7159_v4 = vadd.f32 %v6861_v20, %v6112_v48  ;;  %v7908_v37 = vpop.f32.mrf.mxu3  ;;  %v5817_v33 = vpop.f32.mrf.mxu1  ;;  %v11015_v20 = vld [vmem:[%s12068_s27 + $0x1600] sm:$0xff] }
 0x6f0   : > { %v6113_v16 = vadd.f32 %v5817_v33, %v13223_v59 }
 0x6f1   : > { %9641 = vst.msk [vmem:[%s14162_s13 + $0x150] sm:$0xff] %vm9598_vm2, %v9512_v15  ;;  %v8206_v21 = vadd.f32 %v7908_v37, %v7159_v4  ;;  %v11273_v15 = vld [vmem:[%s12068_s27 + $0x1a00] sm:$0xff] }
 0x6f2   : > { %v8958_v26 = vpop.f32.mrf.mxu0  ;;  %11141 = vmatmul.msk.f32.gmra.mxu1 %vm431_vm1, %v11011_v52  ;;  %v11531_v37 = vld [vmem:[%s12068_s27 + $0x1e00] sm:$0xff] }
 0x6f3   : > { %v9253_v57 = vadd.f32 %v8955_v53, %v8206_v21  ;;  %11399 = vmatmul.msk.f32.gmra.mxu2 %vm431_vm1, %v11269_v31  ;;  %v11789_v52 = vld [vmem:[%s12068_s27 + $0x2200] sm:$0xff] }
 0x6f4   : > { %11657 = vmatmul.msk.f32.gmra.mxu3 %vm431_vm1, %v11527_v23  ;;  %v15821_v21 = vld [vmem:[#allocation34_spill] sm:$0xff] }
 0x6f5   : > { %11915 = vmatmul.msk.f32.gmra.mxu0 %vm431_vm1, %v11785_v19  ;;  %v9385_v36 = vadd.f32 %v14490_v45, %v9253_v57 }
 0x6f6   : > { %v6864_v22 = vpop.f32.mrf.mxu2 }
 0x6f7   : > { %v9513_v50 = vmax.f32 %v9385_v36, 0.0  ;;  %v7160_v30 = vadd.f32 %v6864_v22, %v6113_v16  ;;  %v7911_v54 = vpop.f32.mrf.mxu3  ;;  %v5820_v17 = vpop.f32.mrf.mxu1 }
 0x6f8   : > { %v6114_v59 = vadd.f32 %v5820_v17, %v13234_v43  ;;  %v11532_v17 = vld [vmem:[%s12068_s27 + $0x1e08] sm:$0xff] }
 0x6f9   : > { %9642 = vst.msk [vmem:[%s14162_s13 + $0x158] sm:$0xff] %vm9598_vm2, %v9513_v50  ;;  %v8207_v24 = vadd.f32 %v7911_v54, %v7160_v30  ;;  %v11016_v50 = vld [vmem:[%s12068_s27 + $0x1608] sm:$0xff] }
 0x6fa   : > { %v8961_v42 = vpop.f32.mrf.mxu0  ;;  %11142 = vmatmul.msk.f32.gmra.mxu1 %vm431_vm1, %v11012_v55  ;;  %v11274_v30 = vld [vmem:[%s12068_s27 + $0x1a08] sm:$0xff] }
 0x6fb   : > { %v9254_v40 = vadd.f32 %v8958_v26, %v8207_v24  ;;  %11400 = vmatmul.msk.f32.gmra.mxu2 %vm431_vm1, %v11270_v58  ;;  %v11790_v58 = vld [vmem:[%s12068_s27 + $0x2208] sm:$0xff] }
 0x6fc   : > { %11658 = vmatmul.msk.f32.gmra.mxu3 %vm431_vm1, %v11528_v11  ;;  %v15822_v11 = vld [vmem:[#allocation37_spill] sm:$0xff] }
 0x6fd   : > { %11916 = vmatmul.msk.f32.gmra.mxu0 %vm431_vm1, %v11786_v0  ;;  %v9386_v41 = vadd.f32 %v14490_v45, %v9254_v40 }
 0x6fe   : > { %v6867_v13 = vpop.f32.mrf.mxu2 }
 0x6ff   : > { %v9514_v12 = vmax.f32 %v9386_v41, 0.0  ;;  %v7161_v8 = vadd.f32 %v6867_v13, %v6114_v59  ;;  %v7914_v28 = vpop.f32.mrf.mxu3  ;;  %v5823_v63 = vpop.f32.mrf.mxu1 }
 0x700   : > { %v6115_v43 = vadd.f32 %v5823_v63, %v13245_v27  ;;  %v15820_v27 = vld [vmem:[#allocation82_spill] sm:$0xff] }
 0x701   : > { %9643 = vst.msk [vmem:[%s14162_s13 + $0x160] sm:$0xff] %vm9598_vm2, %v9514_v12  ;;  %v8208_v46 = vadd.f32 %v7914_v28, %v7161_v8  ;;  %v11017_v8 = vld [vmem:[%s12068_s27 + $0x1610] sm:$0xff] }
 0x702   : > { %v8964_v32 = vpop.f32.mrf.mxu0  ;;  %11143 = vmatmul.msk.f32.gmra.mxu1 %vm431_vm1, %v11013_v18  ;;  %v11275_v28 = vld [vmem:[%s12068_s27 + $0x1a10] sm:$0xff] }
 0x703   : > { %v9255_v47 = vadd.f32 %v8961_v42, %v8208_v46  ;;  %11401 = vmatmul.msk.f32.gmra.mxu2 %vm431_vm1, %v11271_v1  ;;  %v11533_v18 = vld [vmem:[%s12068_s27 + $0x1e10] sm:$0xff] }
 0x704   : > { %11659 = vmatmul.msk.f32.gmra.mxu3 %vm431_vm1, %v11529_v61  ;;  %v11791_v46 = vld [vmem:[%s12068_s27 + $0x2210] sm:$0xff] }
 0x705   : > { %11917 = vmatmul.msk.f32.gmra.mxu0 %vm431_vm1, %v11787_v5  ;;  %v9387_v34 = vadd.f32 %v14490_v45, %v9255_v47 }
 0x706   : > { %v6870_v25 = vpop.f32.mrf.mxu2 }
 0x707   : > { %v9515_v3 = vmax.f32 %v9387_v34, 0.0  ;;  %v7162_v6 = vadd.f32 %v6870_v25, %v6115_v43  ;;  %v7917_v39 = vpop.f32.mrf.mxu3  ;;  %v5826_v44 = vpop.f32.mrf.mxu1 }
 0x708   : > { %v6116_v62 = vadd.f32 %v5826_v44, %v15820_v27  ;;  %v11276_v44 = vld [vmem:[%s12068_s27 + $0x1a18] sm:$0xff] }
 0x709   : > { %9644 = vst.msk [vmem:[%s14162_s13 + $0x168] sm:$0xff] %vm9598_vm2, %v9515_v3  ;;  %v8209_v35 = vadd.f32 %v7917_v39, %v7162_v6  ;;  %v11018_v39 = vld [vmem:[%s12068_s27 + $0x1618] sm:$0xff] }
 0x70a   : > { %v8967_v49 = vpop.f32.mrf.mxu0  ;;  %11144 = vmatmul.msk.f32.gmra.mxu1 %vm431_vm1, %v11014_v2 }
 0x70b   : > { %v9256_v51 = vadd.f32 %v8964_v32, %v8209_v35  ;;  %11402 = vmatmul.msk.f32.gmra.mxu2 %vm431_vm1, %v11272_v29  ;;  %v15823_v32 = vld [vmem:[#allocation40_spill] sm:$0xff]  ;;  %v11534_v29 = vld [vmem:[%s12068_s27 + $0x1e18] sm:$0xff] }
 0x70c   : > { %11660 = vmatmul.msk.f32.gmra.mxu3 %vm431_vm1, %v11530_v56  ;;  %v11792_v56 = vld [vmem:[%s12068_s27 + $0x2218] sm:$0xff] }
 0x70d   : > { %11918 = vmatmul.msk.f32.gmra.mxu0 %vm431_vm1, %v11788_v9  ;;  %v9388_v14 = vadd.f32 %v14490_v45, %v9256_v51  ;;  %v15824_v9 = vld [vmem:[#allocation43_spill] sm:$0xff] }
 0x70e   : > { %v6873_v53 = vpop.f32.mrf.mxu2 }
 0x70f   : > { %v9516_v60 = vmax.f32 %v9388_v14, 0.0  ;;  %v7163_v7 = vadd.f32 %v6873_v53, %v6116_v62  ;;  %v7920_v48 = vpop.f32.mrf.mxu3  ;;  %v5829_v10 = vpop.f32.mrf.mxu1 }
 0x710   : > { %v6117_v23 = vadd.f32 %v5829_v10, %v15821_v21  ;;  %v11277_v10 = vld [vmem:[%s12068_s27 + $0x1a20] sm:$0xff] }
 0x711   : > { %9645 = vst.msk [vmem:[%s14162_s13 + $0x170] sm:$0xff] %vm9598_vm2, %v9516_v60  ;;  %v8210_v4 = vadd.f32 %v7920_v48, %v7163_v7  ;;  %v11019_v48 = vld [vmem:[%s12068_s27 + $0x1620] sm:$0xff] }
 0x712   : > { %v8970_v33 = vpop.f32.mrf.mxu0  ;;  %11145 = vmatmul.msk.f32.gmra.mxu1 %vm431_vm1, %v11015_v20 }
 0x713   : > { %v9257_v31 = vadd.f32 %v8967_v49, %v8210_v4  ;;  %11403 = vmatmul.msk.f32.gmra.mxu2 %vm431_vm1, %v11273_v15  ;;  %v11535_v15 = vld [vmem:[%s12068_s27 + $0x1e20] sm:$0xff] }
 0x714   : > { %11661 = vmatmul.msk.f32.gmra.mxu3 %vm431_vm1, %v11531_v37  ;;  %v11793_v37 = vld [vmem:[%s12068_s27 + $0x2220] sm:$0xff] }
 0x715   : > { %11919 = vmatmul.msk.f32.gmra.mxu0 %vm431_vm1, %v11789_v52  ;;  %v9389_v26 = vadd.f32 %v14490_v45, %v9257_v31  ;;  %v15825_v52 = vld [vmem:[#allocation46_spill] sm:$0xff] }
 0x716   : > { %v6876_v19 = vpop.f32.mrf.mxu2 }
 0x717   : > { %v9517_v57 = vmax.f32 %v9389_v26, 0.0  ;;  %v7164_v16 = vadd.f32 %v6876_v19, %v6117_v23  ;;  %v7923_v36 = vpop.f32.mrf.mxu3  ;;  %v5832_v22 = vpop.f32.mrf.mxu1 }
 0x718   : > { %v6118_v42 = vadd.f32 %v5832_v22, %v15822_v11  ;;  %v11278_v22 = vld [vmem:[%s12068_s27 + $0x1a28] sm:$0xff] }
 0x719   : > { %9646 = vst.msk [vmem:[%s14162_s13 + $0x178] sm:$0xff] %vm9598_vm2, %v9517_v57  ;;  %v8211_v54 = vadd.f32 %v7923_v36, %v7164_v16  ;;  %v11020_v36 = vld [vmem:[%s12068_s27 + $0x1628] sm:$0xff] }
 0x71a   : > { %v8973_v55 = vpop.f32.mrf.mxu0  ;;  %11146 = vmatmul.msk.f32.gmra.mxu1 %vm431_vm1, %v11016_v50 }
 0x71b   : > { %v9258_v24 = vadd.f32 %v8970_v33, %v8211_v54  ;;  %11404 = vmatmul.msk.f32.gmra.mxu2 %vm431_vm1, %v11274_v30  ;;  %v11536_v30 = vld [vmem:[%s12068_s27 + $0x1e28] sm:$0xff] }
 0x71c   : > { %11662 = vmatmul.msk.f32.gmra.mxu3 %vm431_vm1, %v11532_v17  ;;  %v11794_v17 = vld [vmem:[%s12068_s27 + $0x2228] sm:$0xff] }
 0x71d   : > { %11920 = vmatmul.msk.f32.gmra.mxu0 %vm431_vm1, %v11790_v58  ;;  %v9390_v0 = vadd.f32 %v14490_v45, %v9258_v24  ;;  %v15826_v58 = vld [vmem:[#allocation49_spill] sm:$0xff] }
 0x71e   : > { %v6879_v40 = vpop.f32.mrf.mxu2 }
 0x71f   : > { %v9518_v59 = vmax.f32 %v9390_v0, 0.0  ;;  %v7165_v41 = vadd.f32 %v6879_v40, %v6118_v42  ;;  %v7926_v13 = vpop.f32.mrf.mxu3  ;;  %v5835_v12 = vpop.f32.mrf.mxu1 }
 0x720   : > { %v6119_v5 = vadd.f32 %v5835_v12, %v15823_v32  ;;  %v11279_v12 = vld [vmem:[%s12068_s27 + $0x1a30] sm:$0xff] }
 0x721   : > { %9647 = vst.msk [vmem:[%s14162_s13 + $0x180] sm:$0xff] %vm9598_vm2, %v9518_v59  ;;  %v8212_v63 = vadd.f32 %v7926_v13, %v7165_v41  ;;  %v11021_v13 = vld [vmem:[%s12068_s27 + $0x1630] sm:$0xff] }
 0x722   : > { %v8976_v1 = vpop.f32.mrf.mxu0  ;;  %11147 = vmatmul.msk.f32.gmra.mxu1 %vm431_vm1, %v11017_v8 }
 0x723   : > { %v9259_v61 = vadd.f32 %v8973_v55, %v8212_v63  ;;  %11405 = vmatmul.msk.f32.gmra.mxu2 %vm431_vm1, %v11275_v28  ;;  %v11537_v28 = vld [vmem:[%s12068_s27 + $0x1e30] sm:$0xff] }
 0x724   : > { %11663 = vmatmul.msk.f32.gmra.mxu3 %vm431_vm1, %v11533_v18  ;;  %v11795_v18 = vld [vmem:[%s12068_s27 + $0x2230] sm:$0xff] }
 0x725   : > { %11921 = vmatmul.msk.f32.gmra.mxu0 %vm431_vm1, %v11791_v46  ;;  %v9391_v47 = vadd.f32 %v14490_v45, %v9259_v61  ;;  %v15827_v46 = vld [vmem:[#allocation52_spill] sm:$0xff] }
 0x726   : > { %v6882_v43 = vpop.f32.mrf.mxu2 }
 0x727   : > { %v9519_v34 = vmax.f32 %v9391_v47, 0.0  ;;  %v7166_v25 = vadd.f32 %v6882_v43, %v6119_v5  ;;  %v7929_v3 = vpop.f32.mrf.mxu3  ;;  %v5838_v6 = vpop.f32.mrf.mxu1 }
 0x728   : > { %v6120_v51 = vadd.f32 %v5838_v6, %v15824_v9  ;;  %v11280_v6 = vld [vmem:[%s12068_s27 + $0x1a38] sm:$0xff] }
 0x729   : > { %9648 = vst.msk [vmem:[%s14162_s13 + $0x188] sm:$0xff] %vm9598_vm2, %v9519_v34  ;;  %v8213_v2 = vadd.f32 %v7929_v3, %v7166_v25  ;;  %v11022_v3 = vld [vmem:[%s12068_s27 + $0x1638] sm:$0xff] }
 0x72a   : > { %v8979_v35 = vpop.f32.mrf.mxu0  ;;  %11148 = vmatmul.msk.f32.gmra.mxu1 %vm431_vm1, %v11018_v39 }
 0x72b   : > { %v9260_v49 = vadd.f32 %v8976_v1, %v8213_v2  ;;  %11406 = vmatmul.msk.f32.gmra.mxu2 %vm431_vm1, %v11276_v44  ;;  %v11538_v44 = vld [vmem:[%s12068_s27 + $0x1e38] sm:$0xff] }
 0x72c   : > { %11664 = vmatmul.msk.f32.gmra.mxu3 %vm431_vm1, %v11534_v29  ;;  %v11796_v29 = vld [vmem:[%s12068_s27 + $0x2238] sm:$0xff] }
 0x72d   : > { %11922 = vmatmul.msk.f32.gmra.mxu0 %vm431_vm1, %v11792_v56  ;;  %v9392_v27 = vadd.f32 %v14490_v45, %v9260_v49  ;;  %v14819_v49 = vld [vmem:[%s15578_s2] ss:$0 sm:$0xff] }
 0x72e   : > { %v6885_v62 = vpop.f32.mrf.mxu2 }
 0x72f   : > { %v9520_v14 = vmax.f32 %v9392_v27, 0.0  ;;  %v7167_v53 = vadd.f32 %v6885_v62, %v6120_v51  ;;  %v7932_v60 = vpop.f32.mrf.mxu3  ;;  %v5841_v7 = vpop.f32.mrf.mxu1 }
 0x730   : > { %v6121_v31 = vadd.f32 %v5841_v7, %v15825_v52  ;;  %v11281_v7 = vld [vmem:[%s12068_s27 + $0x1a40] sm:$0xff] }
 0x731   : > { %9649 = vst.msk [vmem:[%s14162_s13 + $0x190] sm:$0xff] %vm9598_vm2, %v9520_v14  ;;  %v8214_v20 = vadd.f32 %v7932_v60, %v7167_v53  ;;  %v11023_v60 = vld [vmem:[%s12068_s27 + $0x1640] sm:$0xff] }
 0x732   : > { %v8982_v4 = vpop.f32.mrf.mxu0  ;;  %11149 = vmatmul.msk.f32.gmra.mxu1 %vm431_vm1, %v11019_v48 }
 0x733   : > { %v9261_v33 = vadd.f32 %v8979_v35, %v8214_v20  ;;  %11407 = vmatmul.msk.f32.gmra.mxu2 %vm431_vm1, %v11277_v10  ;;  %v11539_v10 = vld [vmem:[%s12068_s27 + $0x1e40] sm:$0xff] }
 0x734   : > { %11665 = vmatmul.msk.f32.gmra.mxu3 %vm431_vm1, %v11535_v15  ;;  %v11797_v15 = vld [vmem:[%s12068_s27 + $0x2240] sm:$0xff] }
 0x735   : > { %11923 = vmatmul.msk.f32.gmra.mxu0 %vm431_vm1, %v11793_v37  ;;  %v9393_v21 = vadd.f32 %v14490_v45, %v9261_v33  ;;  %v15829_v37 = vld [vmem:[#allocation58_spill] sm:$0xff] }
 0x736   : > { %v6888_v23 = vpop.f32.mrf.mxu2 }
 0x737   : > { %v9521_v26 = vmax.f32 %v9393_v21, 0.0  ;;  %v7168_v19 = vadd.f32 %v6888_v23, %v6121_v31  ;;  %v7935_v57 = vpop.f32.mrf.mxu3  ;;  %v5844_v16 = vpop.f32.mrf.mxu1 }
 0x738   : > { %v6122_v24 = vadd.f32 %v5844_v16, %v15826_v58  ;;  %v11282_v16 = vld [vmem:[%s12068_s27 + $0x1a48] sm:$0xff] }
 0x739   : > { %9650 = vst.msk [vmem:[%s14162_s13 + $0x198] sm:$0xff] %vm9598_vm2, %v9521_v26  ;;  %v8215_v50 = vadd.f32 %v7935_v57, %v7168_v19  ;;  %v11024_v57 = vld [vmem:[%s12068_s27 + $0x1648] sm:$0xff] }
 0x73a   : > { %v8985_v54 = vpop.f32.mrf.mxu0  ;;  %11150 = vmatmul.msk.f32.gmra.mxu1 %vm431_vm1, %v11020_v36 }
 0x73b   : > { %v9262_v55 = vadd.f32 %v8982_v4, %v8215_v50  ;;  %11408 = vmatmul.msk.f32.gmra.mxu2 %vm431_vm1, %v11278_v22  ;;  %v11540_v22 = vld [vmem:[%s12068_s27 + $0x1e48] sm:$0xff] }
 0x73c   : > { %11666 = vmatmul.msk.f32.gmra.mxu3 %vm431_vm1, %v11536_v30  ;;  %v11798_v30 = vld [vmem:[%s12068_s27 + $0x2248] sm:$0xff] }
 0x73d   : > { %11924 = vmatmul.msk.f32.gmra.mxu0 %vm431_vm1, %v11794_v17  ;;  %v9394_v11 = vadd.f32 %v14490_v45, %v9262_v55  ;;  %v15830_v17 = vld [vmem:[#allocation61_spill] sm:$0xff] }
 0x73e   : > { %v6891_v42 = vpop.f32.mrf.mxu2 }
 0x73f   : > { %v9522_v0 = vmax.f32 %v9394_v11, 0.0  ;;  %v7169_v40 = vadd.f32 %v6891_v42, %v6122_v24  ;;  %v7938_v59 = vpop.f32.mrf.mxu3  ;;  %v5847_v41 = vpop.f32.mrf.mxu1 }
 0x740   : > { %v6123_v61 = vadd.f32 %v5847_v41, %v15827_v46  ;;  %v11283_v41 = vld [vmem:[%s12068_s27 + $0x1a50] sm:$0xff] }
 0x741   : > { %9651 = vst.msk [vmem:[%s14162_s13 + $0x1a0] sm:$0xff] %vm9598_vm2, %v9522_v0  ;;  %v8216_v8 = vadd.f32 %v7938_v59, %v7169_v40  ;;  %v11025_v59 = vld [vmem:[%s12068_s27 + $0x1650] sm:$0xff] }
 0x742   : > { %v8988_v63 = vpop.f32.mrf.mxu0  ;;  %11151 = vmatmul.msk.f32.gmra.mxu1 %vm431_vm1, %v11021_v13 }
 0x743   : > { %v9263_v1 = vadd.f32 %v8985_v54, %v8216_v8  ;;  %11409 = vmatmul.msk.f32.gmra.mxu2 %vm431_vm1, %v11279_v12  ;;  %v11541_v12 = vld [vmem:[%s12068_s27 + $0x1e50] sm:$0xff] }
 0x744   : > { %11667 = vmatmul.msk.f32.gmra.mxu3 %vm431_vm1, %v11537_v28  ;;  %v11799_v28 = vld [vmem:[%s12068_s27 + $0x2250] sm:$0xff] }
 0x745   : > { %11925 = vmatmul.msk.f32.gmra.mxu0 %vm431_vm1, %v11795_v18  ;;  %v9395_v32 = vadd.f32 %v14490_v45, %v9263_v1  ;;  %v15828_v45 = vld [vmem:[#allocation55_spill] sm:$0xff]  ;;  %v15831_v18 = vld [vmem:[#allocation64_spill] sm:$0xff] }
 0x746   : > { %v6894_v5 = vpop.f32.mrf.mxu2 }
 0x747   : > { %v9523_v47 = vmax.f32 %v9395_v32, 0.0  ;;  %v7170_v43 = vadd.f32 %v6894_v5, %v6123_v61  ;;  %v7941_v34 = vpop.f32.mrf.mxu3  ;;  %v5850_v25 = vpop.f32.mrf.mxu1 }
 0x748   : > { %v6124_v56 = vadd.f32 %v5850_v25, %v15828_v45  ;;  %v11284_v25 = vld [vmem:[%s12068_s27 + $0x1a58] sm:$0xff] }
 0x749   : > { %9652 = vst.msk [vmem:[%s14162_s13 + $0x1a8] sm:$0xff] %vm9598_vm2, %v9523_v47  ;;  %v8217_v39 = vadd.f32 %v7941_v34, %v7170_v43  ;;  %v11026_v34 = vld [vmem:[%s12068_s27 + $0x1658] sm:$0xff] }
 0x74a   : > { %v8991_v2 = vpop.f32.mrf.mxu0  ;;  %11152 = vmatmul.msk.f32.gmra.mxu1 %vm431_vm1, %v11022_v3 }
 0x74b   : > { %v9264_v35 = vadd.f32 %v8988_v63, %v8217_v39  ;;  %11410 = vmatmul.msk.f32.gmra.mxu2 %vm431_vm1, %v11280_v6  ;;  %v11542_v6 = vld [vmem:[%s12068_s27 + $0x1e58] sm:$0xff] }
 0x74c   : > { %11668 = vmatmul.msk.f32.gmra.mxu3 %vm431_vm1, %v11538_v44  ;;  %v11800_v44 = vld [vmem:[%s12068_s27 + $0x2258] sm:$0xff] }
 0x74d   : > { %11926 = vmatmul.msk.f32.gmra.mxu0 %vm431_vm1, %v11796_v29  ;;  %v9396_v9 = vadd.f32 %v14819_v49, %v9264_v35  ;;  %v15832_v29 = vld [vmem:[#allocation67_spill] sm:$0xff] }
 0x74e   : > { %v6897_v51 = vpop.f32.mrf.mxu2 }
 0x74f   : > { %v9524_v27 = vmax.f32 %v9396_v9, 0.0  ;;  %v7171_v62 = vadd.f32 %v6897_v51, %v6124_v56  ;;  %v7944_v14 = vpop.f32.mrf.mxu3  ;;  %v5853_v53 = vpop.f32.mrf.mxu1 }
 0x750   : > { %v6125_v33 = vadd.f32 %v5853_v53, %v15829_v37  ;;  %v11285_v53 = vld [vmem:[%s12068_s27 + $0x1a60] sm:$0xff] }
 0x751   : > { %9653 = vst.msk [vmem:[%s14162_s13 + $0x1b0] sm:$0xff] %vm9598_vm2, %v9524_v27  ;;  %v8218_v48 = vadd.f32 %v7944_v14, %v7171_v62  ;;  %v11027_v14 = vld [vmem:[%s12068_s27 + $0x1660] sm:$0xff] }
 0x752   : > { %v8994_v20 = vpop.f32.mrf.mxu0  ;;  %11153 = vmatmul.msk.f32.gmra.mxu1 %vm431_vm1, %v11023_v60 }
 0x753   : > { %v9265_v4 = vadd.f32 %v8991_v2, %v8218_v48  ;;  %11411 = vmatmul.msk.f32.gmra.mxu2 %vm431_vm1, %v11281_v7  ;;  %v11543_v7 = vld [vmem:[%s12068_s27 + $0x1e60] sm:$0xff] }
 0x754   : > { %11669 = vmatmul.msk.f32.gmra.mxu3 %vm431_vm1, %v11539_v10  ;;  %v11801_v10 = vld [vmem:[%s12068_s27 + $0x2260] sm:$0xff] }
 0x755   : > { %11927 = vmatmul.msk.f32.gmra.mxu0 %vm431_vm1, %v11797_v15  ;;  %v9397_v52 = vadd.f32 %v14819_v49, %v9265_v4  ;;  %v15833_v15 = vld [vmem:[#allocation70_spill] sm:$0xff] }
 0x756   : > { %v6900_v31 = vpop.f32.mrf.mxu2 }
 0x757   : > { %v9525_v21 = vmax.f32 %v9397_v52, 0.0  ;;  %v7172_v23 = vadd.f32 %v6900_v31, %v6125_v33  ;;  %v7947_v26 = vpop.f32.mrf.mxu3  ;;  %v5856_v19 = vpop.f32.mrf.mxu1 }
 0x758   : > { %v6126_v55 = vadd.f32 %v5856_v19, %v15830_v17  ;;  %v11286_v19 = vld [vmem:[%s12068_s27 + $0x1a68] sm:$0xff] }
 0x759   : > { %9654 = vst.msk [vmem:[%s14162_s13 + $0x1b8] sm:$0xff] %vm9598_vm2, %v9525_v21  ;;  %v8219_v36 = vadd.f32 %v7947_v26, %v7172_v23  ;;  %v11028_v26 = vld [vmem:[%s12068_s27 + $0x1668] sm:$0xff] }
 0x75a   : > { %v8997_v50 = vpop.f32.mrf.mxu0  ;;  %11154 = vmatmul.msk.f32.gmra.mxu1 %vm431_vm1, %v11024_v57 }
 0x75b   : > { %v9266_v54 = vadd.f32 %v8994_v20, %v8219_v36  ;;  %11412 = vmatmul.msk.f32.gmra.mxu2 %vm431_vm1, %v11282_v16  ;;  %v11544_v16 = vld [vmem:[%s12068_s27 + $0x1e68] sm:$0xff] }
 0x75c   : > { %11670 = vmatmul.msk.f32.gmra.mxu3 %vm431_vm1, %v11540_v22  ;;  %v11802_v22 = vld [vmem:[%s12068_s27 + $0x2268] sm:$0xff] }
 0x75d   : > { %11928 = vmatmul.msk.f32.gmra.mxu0 %vm431_vm1, %v11798_v30  ;;  %v9398_v58 = vadd.f32 %v14819_v49, %v9266_v54  ;;  %v15834_v30 = vld [vmem:[#allocation73_spill] sm:$0xff] }
 0x75e   : > { %v6903_v24 = vpop.f32.mrf.mxu2 }
 0x75f   : > { %v9526_v11 = vmax.f32 %v9398_v58, 0.0  ;;  %v7173_v42 = vadd.f32 %v6903_v24, %v6126_v55  ;;  %v7950_v0 = vpop.f32.mrf.mxu3  ;;  %v5859_v40 = vpop.f32.mrf.mxu1 }
 0x760   : > { %v6127_v1 = vadd.f32 %v5859_v40, %v15831_v18  ;;  %v11287_v40 = vld [vmem:[%s12068_s27 + $0x1a70] sm:$0xff] }
 0x761   : > { %9655 = vst.msk [vmem:[%s14162_s13 + $0x1c0] sm:$0xff] %vm9598_vm2, %v9526_v11  ;;  %v8220_v13 = vadd.f32 %v7950_v0, %v7173_v42  ;;  %v11029_v0 = vld [vmem:[%s12068_s27 + $0x1670] sm:$0xff] }
 0x762   : > { %v9000_v8 = vpop.f32.mrf.mxu0  ;;  %11155 = vmatmul.msk.f32.gmra.mxu1 %vm431_vm1, %v11025_v59 }
 0x763   : > { %v9267_v63 = vadd.f32 %v8997_v50, %v8220_v13  ;;  %11413 = vmatmul.msk.f32.gmra.mxu2 %vm431_vm1, %v11283_v41  ;;  %v11545_v41 = vld [vmem:[%s12068_s27 + $0x1e70] sm:$0xff] }
 0x764   : > { %11671 = vmatmul.msk.f32.gmra.mxu3 %vm431_vm1, %v11541_v12  ;;  %v11803_v12 = vld [vmem:[%s12068_s27 + $0x2270] sm:$0xff] }
 0x765   : > { %11929 = vmatmul.msk.f32.gmra.mxu0 %vm431_vm1, %v11799_v28  ;;  %v9399_v46 = vadd.f32 %v14819_v49, %v9267_v63  ;;  %v15835_v28 = vld [vmem:[#allocation76_spill] sm:$0xff] }
 0x766   : > { %v6906_v61 = vpop.f32.mrf.mxu2 }
 0x767   : > { %v9527_v32 = vmax.f32 %v9399_v46, 0.0  ;;  %v7174_v5 = vadd.f32 %v6906_v61, %v6127_v1  ;;  %v7953_v47 = vpop.f32.mrf.mxu3  ;;  %v5862_v43 = vpop.f32.mrf.mxu1 }
 0x768   : > { %v6128_v35 = vadd.f32 %v5862_v43, %v15832_v29  ;;  %v11288_v43 = vld [vmem:[%s12068_s27 + $0x1a78] sm:$0xff] }
 0x769   : > { %9656 = vst.msk [vmem:[%s14162_s13 + $0x1c8] sm:$0xff] %vm9598_vm2, %v9527_v32  ;;  %v8221_v3 = vadd.f32 %v7953_v47, %v7174_v5  ;;  %v11030_v47 = vld [vmem:[%s12068_s27 + $0x1678] sm:$0xff] }
 0x76a   : > { %v9003_v39 = vpop.f32.mrf.mxu0  ;;  %11156 = vmatmul.msk.f32.gmra.mxu1 %vm431_vm1, %v11026_v34 }
 0x76b   : > { %v9268_v2 = vadd.f32 %v9000_v8, %v8221_v3  ;;  %11414 = vmatmul.msk.f32.gmra.mxu2 %vm431_vm1, %v11284_v25  ;;  %v11546_v25 = vld [vmem:[%s12068_s27 + $0x1e78] sm:$0xff] }
 0x76c   : > { %11672 = vmatmul.msk.f32.gmra.mxu3 %vm431_vm1, %v11542_v6  ;;  %v11804_v6 = vld [vmem:[%s12068_s27 + $0x2278] sm:$0xff] }
 0x76d   : > { %11930 = vmatmul.msk.f32.gmra.mxu0 %vm431_vm1, %v11800_v44  ;;  %v9400_v45 = vadd.f32 %v14819_v49, %v9268_v2  ;;  %v15836_v44 = vld [vmem:[#allocation79_spill] sm:$0xff] }
 0x76e   : > { %v6909_v56 = vpop.f32.mrf.mxu2 }
 0x76f   : > { %v9528_v9 = vmax.f32 %v9400_v45, 0.0  ;;  %v7175_v51 = vadd.f32 %v6909_v56, %v6128_v35  ;;  %v7956_v27 = vpop.f32.mrf.mxu3  ;;  %v5865_v62 = vpop.f32.mrf.mxu1 }
 0x770   : > { %v6129_v4 = vadd.f32 %v5865_v62, %v15833_v15  ;;  %v11289_v62 = vld [vmem:[%s12068_s27 + $0x1a80] sm:$0xff] }
 0x771   : > { %9657 = vst.msk [vmem:[%s14162_s13 + $0x1d0] sm:$0xff] %vm9598_vm2, %v9528_v9  ;;  %v8222_v60 = vadd.f32 %v7956_v27, %v7175_v51  ;;  %v11031_v27 = vld [vmem:[%s12068_s27 + $0x1680] sm:$0xff] }
 0x772   : > { %v9006_v48 = vpop.f32.mrf.mxu0  ;;  %11157 = vmatmul.msk.f32.gmra.mxu1 %vm431_vm1, %v11027_v14 }
 0x773   : > { %v9269_v20 = vadd.f32 %v9003_v39, %v8222_v60  ;;  %11415 = vmatmul.msk.f32.gmra.mxu2 %vm431_vm1, %v11285_v53  ;;  %v11547_v53 = vld [vmem:[%s12068_s27 + $0x1e80] sm:$0xff] }
 0x774   : > { %11673 = vmatmul.msk.f32.gmra.mxu3 %vm431_vm1, %v11543_v7  ;;  %v11805_v7 = vld [vmem:[%s12068_s27 + $0x2280] sm:$0xff] }
 0x775   : > { %11931 = vmatmul.msk.f32.gmra.mxu0 %vm431_vm1, %v11801_v10  ;;  %v9401_v37 = vadd.f32 %v14819_v49, %v9269_v20  ;;  %v15837_v10 = vld [vmem:[#allocation2_spill] sm:$0xff] }
 0x776   : > { %v6912_v33 = vpop.f32.mrf.mxu2 }
 0x777   : > { %v9529_v52 = vmax.f32 %v9401_v37, 0.0  ;;  %v7176_v31 = vadd.f32 %v6912_v33, %v6129_v4  ;;  %v7959_v21 = vpop.f32.mrf.mxu3  ;;  %v5868_v23 = vpop.f32.mrf.mxu1 }
 0x778   : > { %v6130_v54 = vadd.f32 %v5868_v23, %v15834_v30  ;;  %v11290_v23 = vld [vmem:[%s12068_s27 + $0x1a88] sm:$0xff] }
 0x779   : > { %9658 = vst.msk [vmem:[%s14162_s13 + $0x1d8] sm:$0xff] %vm9598_vm2, %v9529_v52  ;;  %v8223_v57 = vadd.f32 %v7959_v21, %v7176_v31  ;;  %v11032_v21 = vld [vmem:[%s12068_s27 + $0x1688] sm:$0xff] }
 0x77a   : > { %v9009_v36 = vpop.f32.mrf.mxu0  ;;  %11158 = vmatmul.msk.f32.gmra.mxu1 %vm431_vm1, %v11028_v26 }
 0x77b   : > { %v9270_v50 = vadd.f32 %v9006_v48, %v8223_v57  ;;  %11416 = vmatmul.msk.f32.gmra.mxu2 %vm431_vm1, %v11286_v19  ;;  %v11548_v19 = vld [vmem:[%s12068_s27 + $0x1e88] sm:$0xff] }
 0x77c   : > { %11674 = vmatmul.msk.f32.gmra.mxu3 %vm431_vm1, %v11544_v16  ;;  %v11806_v16 = vld [vmem:[%s12068_s27 + $0x2288] sm:$0xff] }
 0x77d   : > { %11932 = vmatmul.msk.f32.gmra.mxu0 %vm431_vm1, %v11802_v22  ;;  %v9402_v17 = vadd.f32 %v14819_v49, %v9270_v50  ;;  %v15838_v22 = vld [vmem:[#allocation4_spill] sm:$0xff] }
 0x77e   : > { %v6915_v55 = vpop.f32.mrf.mxu2 }
 0x77f   : > { %v9530_v58 = vmax.f32 %v9402_v17, 0.0  ;;  %v7177_v24 = vadd.f32 %v6915_v55, %v6130_v54  ;;  %v7962_v11 = vpop.f32.mrf.mxu3  ;;  %v5871_v42 = vpop.f32.mrf.mxu1 }
 0x780   : > { %v6131_v63 = vadd.f32 %v5871_v42, %v15835_v28  ;;  %v11291_v42 = vld [vmem:[%s12068_s27 + $0x1a90] sm:$0xff] }
 0x781   : > { %9659 = vst.msk [vmem:[%s14162_s13 + $0x1e0] sm:$0xff] %vm9598_vm2, %v9530_v58  ;;  %v8224_v59 = vadd.f32 %v7962_v11, %v7177_v24  ;;  %v11033_v11 = vld [vmem:[%s12068_s27 + $0x1690] sm:$0xff] }
 0x782   : > { %v9012_v13 = vpop.f32.mrf.mxu0  ;;  %11159 = vmatmul.msk.f32.gmra.mxu1 %vm431_vm1, %v11029_v0 }
 0x783   : > { %v9271_v8 = vadd.f32 %v9009_v36, %v8224_v59  ;;  %11417 = vmatmul.msk.f32.gmra.mxu2 %vm431_vm1, %v11287_v40  ;;  %v11549_v40 = vld [vmem:[%s12068_s27 + $0x1e90] sm:$0xff] }
 0x784   : > { %11675 = vmatmul.msk.f32.gmra.mxu3 %vm431_vm1, %v11545_v41  ;;  %v11807_v41 = vld [vmem:[%s12068_s27 + $0x2290] sm:$0xff] }
 0x785   : > { %11933 = vmatmul.msk.f32.gmra.mxu0 %vm431_vm1, %v11803_v12  ;;  %v9403_v18 = vadd.f32 %v14819_v49, %v9271_v8  ;;  %v15839_v12 = vld [vmem:[#allocation6_spill] sm:$0xff] }
 0x786   : > { %v6918_v1 = vpop.f32.mrf.mxu2 }
 0x787   : > { %v9531_v46 = vmax.f32 %v9403_v18, 0.0  ;;  %v7178_v61 = vadd.f32 %v6918_v1, %v6131_v63  ;;  %v7965_v32 = vpop.f32.mrf.mxu3  ;;  %v5874_v5 = vpop.f32.mrf.mxu1 }
 0x788   : > { %v6132_v2 = vadd.f32 %v5874_v5, %v15836_v44  ;;  %v11292_v5 = vld [vmem:[%s12068_s27 + $0x1a98] sm:$0xff] }
 0x789   : > { %9660 = vst.msk [vmem:[%s14162_s13 + $0x1e8] sm:$0xff] %vm9598_vm2, %v9531_v46  ;;  %v8225_v34 = vadd.f32 %v7965_v32, %v7178_v61  ;;  %v11034_v32 = vld [vmem:[%s12068_s27 + $0x1698] sm:$0xff] }
 0x78a   : > { %v9015_v3 = vpop.f32.mrf.mxu0  ;;  %11160 = vmatmul.msk.f32.gmra.mxu1 %vm431_vm1, %v11030_v47 }
 0x78b   : > { %v9272_v39 = vadd.f32 %v9012_v13, %v8225_v34  ;;  %11418 = vmatmul.msk.f32.gmra.mxu2 %vm431_vm1, %v11288_v43  ;;  %v11550_v43 = vld [vmem:[%s12068_s27 + $0x1e98] sm:$0xff] }
 0x78c   : > { %11676 = vmatmul.msk.f32.gmra.mxu3 %vm431_vm1, %v11546_v25  ;;  %v11808_v25 = vld [vmem:[%s12068_s27 + $0x2298] sm:$0xff] }
 0x78d   : > { %11934 = vmatmul.msk.f32.gmra.mxu0 %vm431_vm1, %v11804_v6  ;;  %v9404_v29 = vadd.f32 %v14819_v49, %v9272_v39  ;;  %v15840_v6 = vld [vmem:[#allocation8_spill] sm:$0xff] }
 0x78e   : > { %v6921_v35 = vpop.f32.mrf.mxu2 }
 0x78f   : > { %v9532_v45 = vmax.f32 %v9404_v29, 0.0  ;;  %v7179_v56 = vadd.f32 %v6921_v35, %v6132_v2  ;;  %v7968_v9 = vpop.f32.mrf.mxu3  ;;  %v5877_v51 = vpop.f32.mrf.mxu1 }
 0x790   : > { %v6133_v20 = vadd.f32 %v5877_v51, %v15837_v10  ;;  %v11293_v51 = vld [vmem:[%s12068_s27 + $0x1aa0] sm:$0xff] }
 0x791   : > { %9661 = vst.msk [vmem:[%s14162_s13 + $0x1f0] sm:$0xff] %vm9598_vm2, %v9532_v45  ;;  %v8226_v14 = vadd.f32 %v7968_v9, %v7179_v56  ;;  %v11035_v9 = vld [vmem:[%s12068_s27 + $0x16a0] sm:$0xff] }
 0x792   : > { %v9018_v60 = vpop.f32.mrf.mxu0  ;;  %11161 = vmatmul.msk.f32.gmra.mxu1 %vm431_vm1, %v11031_v27 }
 0x793   : > { %v9273_v48 = vadd.f32 %v9015_v3, %v8226_v14  ;;  %11419 = vmatmul.msk.f32.gmra.mxu2 %vm431_vm1, %v11289_v62  ;;  %v11551_v62 = vld [vmem:[%s12068_s27 + $0x1ea0] sm:$0xff] }
 0x794   : > { %11677 = vmatmul.msk.f32.gmra.mxu3 %vm431_vm1, %v11547_v53  ;;  %v11809_v53 = vld [vmem:[%s12068_s27 + $0x22a0] sm:$0xff] }
 0x795   : > { %11935 = vmatmul.msk.f32.gmra.mxu0 %vm431_vm1, %v11805_v7  ;;  %v9405_v15 = vadd.f32 %v14819_v49, %v9273_v48  ;;  %v15841_v7 = vld [vmem:[#allocation10_spill] sm:$0xff] }
 0x796   : > { %v6924_v4 = vpop.f32.mrf.mxu2 }
 0x797   : > { %v9533_v37 = vmax.f32 %v9405_v15, 0.0  ;;  %v7180_v33 = vadd.f32 %v6924_v4, %v6133_v20  ;;  %v7971_v52 = vpop.f32.mrf.mxu3  ;;  %v5880_v31 = vpop.f32.mrf.mxu1 }
 0x798   : > { %v6134_v50 = vadd.f32 %v5880_v31, %v15838_v22  ;;  %v11294_v31 = vld [vmem:[%s12068_s27 + $0x1aa8] sm:$0xff] }
 0x799   : > { %9662 = vst.msk [vmem:[%s14162_s13 + $0x1f8] sm:$0xff] %vm9598_vm2, %v9533_v37  ;;  %v8227_v26 = vadd.f32 %v7971_v52, %v7180_v33  ;;  %v11036_v52 = vld [vmem:[%s12068_s27 + $0x16a8] sm:$0xff] }
 0x79a   : > { %v9021_v57 = vpop.f32.mrf.mxu0  ;;  %11162 = vmatmul.msk.f32.gmra.mxu1 %vm431_vm1, %v11032_v21 }
 0x79b   : > { %v9274_v36 = vadd.f32 %v9018_v60, %v8227_v26  ;;  %11420 = vmatmul.msk.f32.gmra.mxu2 %vm431_vm1, %v11290_v23  ;;  %v11552_v23 = vld [vmem:[%s12068_s27 + $0x1ea8] sm:$0xff] }
 0x79c   : > { %11678 = vmatmul.msk.f32.gmra.mxu3 %vm431_vm1, %v11548_v19  ;;  %v11810_v19 = vld [vmem:[%s12068_s27 + $0x22a8] sm:$0xff] }
 0x79d   : > { %11936 = vmatmul.msk.f32.gmra.mxu0 %vm431_vm1, %v11806_v16  ;;  %v9406_v30 = vadd.f32 %v14819_v49, %v9274_v36  ;;  %v15842_v16 = vld [vmem:[#allocation12_spill] sm:$0xff] }
 0x79e   : > { %v6927_v54 = vpop.f32.mrf.mxu2 }
 0x79f   : > { %v9534_v17 = vmax.f32 %v9406_v30, 0.0  ;;  %v7181_v55 = vadd.f32 %v6927_v54, %v6134_v50  ;;  %v7974_v58 = vpop.f32.mrf.mxu3  ;;  %v5883_v24 = vpop.f32.mrf.mxu1 }
 0x7a0   : > { %v6135_v8 = vadd.f32 %v5883_v24, %v15839_v12  ;;  %v11295_v24 = vld [vmem:[%s12068_s27 + $0x1ab0] sm:$0xff] }
 0x7a1   : > { %9663 = vst.msk [vmem:[%s14162_s13 + $0x200] sm:$0xff] %vm9598_vm2, %v9534_v17  ;;  %v8228_v0 = vadd.f32 %v7974_v58, %v7181_v55  ;;  %v11037_v58 = vld [vmem:[%s12068_s27 + $0x16b0] sm:$0xff] }
 0x7a2   : > { %v9024_v59 = vpop.f32.mrf.mxu0  ;;  %11163 = vmatmul.msk.f32.gmra.mxu1 %vm431_vm1, %v11033_v11 }
 0x7a3   : > { %v9275_v13 = vadd.f32 %v9021_v57, %v8228_v0  ;;  %11421 = vmatmul.msk.f32.gmra.mxu2 %vm431_vm1, %v11291_v42  ;;  %v11553_v42 = vld [vmem:[%s12068_s27 + $0x1eb0] sm:$0xff] }
 0x7a4   : > { %11679 = vmatmul.msk.f32.gmra.mxu3 %vm431_vm1, %v11549_v40  ;;  %v11811_v40 = vld [vmem:[%s12068_s27 + $0x22b0] sm:$0xff] }
 0x7a5   : > { %11937 = vmatmul.msk.f32.gmra.mxu0 %vm431_vm1, %v11807_v41  ;;  %v9407_v28 = vadd.f32 %v14819_v49, %v9275_v13  ;;  %v15843_v41 = vld [vmem:[#allocation14_spill] sm:$0xff] }
 0x7a6   : > { %v6930_v63 = vpop.f32.mrf.mxu2 }
 0x7a7   : > { %v9535_v18 = vmax.f32 %v9407_v28, 0.0  ;;  %v7182_v1 = vadd.f32 %v6930_v63, %v6135_v8  ;;  %v7977_v46 = vpop.f32.mrf.mxu3  ;;  %v5886_v61 = vpop.f32.mrf.mxu1 }
 0x7a8   : > { %v6136_v39 = vadd.f32 %v5886_v61, %v15840_v6  ;;  %v11296_v61 = vld [vmem:[%s12068_s27 + $0x1ab8] sm:$0xff] }
 0x7a9   : > { %9664 = vst.msk [vmem:[%s14162_s13 + $0x208] sm:$0xff] %vm9598_vm2, %v9535_v18  ;;  %v8229_v47 = vadd.f32 %v7977_v46, %v7182_v1  ;;  %v11038_v46 = vld [vmem:[%s12068_s27 + $0x16b8] sm:$0xff] }
 0x7aa   : > { %v9027_v34 = vpop.f32.mrf.mxu0  ;;  %11164 = vmatmul.msk.f32.gmra.mxu1 %vm431_vm1, %v11034_v32 }
 0x7ab   : > { %v9276_v3 = vadd.f32 %v9024_v59, %v8229_v47  ;;  %11422 = vmatmul.msk.f32.gmra.mxu2 %vm431_vm1, %v11292_v5  ;;  %v11554_v5 = vld [vmem:[%s12068_s27 + $0x1eb8] sm:$0xff] }
 0x7ac   : > { %11680 = vmatmul.msk.f32.gmra.mxu3 %vm431_vm1, %v11550_v43  ;;  %v11812_v43 = vld [vmem:[%s12068_s27 + $0x22b8] sm:$0xff] }
 0x7ad   : > { %11938 = vmatmul.msk.f32.gmra.mxu0 %vm431_vm1, %v11808_v25  ;;  %v9408_v44 = vadd.f32 %v14819_v49, %v9276_v3  ;;  %v15844_v25 = vld [vmem:[#allocation16_spill] sm:$0xff] }
 0x7ae   : > { %v6933_v2 = vpop.f32.mrf.mxu2 }
 0x7af   : > { %v9536_v29 = vmax.f32 %v9408_v44, 0.0  ;;  %v7183_v35 = vadd.f32 %v6933_v2, %v6136_v39  ;;  %v7980_v45 = vpop.f32.mrf.mxu3  ;;  %v5889_v56 = vpop.f32.mrf.mxu1 }
 0x7b0   : > { %v6137_v48 = vadd.f32 %v5889_v56, %v15841_v7  ;;  %v11297_v56 = vld [vmem:[%s12068_s27 + $0x1ac0] sm:$0xff] }
 0x7b1   : > { %9665 = vst.msk [vmem:[%s14162_s13 + $0x210] sm:$0xff] %vm9598_vm2, %v9536_v29  ;;  %v8230_v27 = vadd.f32 %v7980_v45, %v7183_v35  ;;  %v11039_v45 = vld [vmem:[%s12068_s27 + $0x16c0] sm:$0xff] }
 0x7b2   : > { %v9030_v14 = vpop.f32.mrf.mxu0  ;;  %11165 = vmatmul.msk.f32.gmra.mxu1 %vm431_vm1, %v11035_v9 }
 0x7b3   : > { %v9277_v60 = vadd.f32 %v9027_v34, %v8230_v27  ;;  %11423 = vmatmul.msk.f32.gmra.mxu2 %vm431_vm1, %v11293_v51  ;;  %v11555_v51 = vld [vmem:[%s12068_s27 + $0x1ec0] sm:$0xff] }
 0x7b4   : > { %11681 = vmatmul.msk.f32.gmra.mxu3 %vm431_vm1, %v11551_v62  ;;  %v11813_v62 = vld [vmem:[%s12068_s27 + $0x22c0] sm:$0xff] }
 0x7b5   : > { %11939 = vmatmul.msk.f32.gmra.mxu0 %vm431_vm1, %v11809_v53  ;;  %v9409_v10 = vadd.f32 %v14819_v49, %v9277_v60  ;;  %v15845_v53 = vld [vmem:[#allocation18_spill] sm:$0xff] }
 0x7b6   : > { %v6936_v20 = vpop.f32.mrf.mxu2 }
 0x7b7   : > { %v9537_v15 = vmax.f32 %v9409_v10, 0.0  ;;  %v7184_v4 = vadd.f32 %v6936_v20, %v6137_v48  ;;  %v7983_v37 = vpop.f32.mrf.mxu3  ;;  %v5892_v33 = vpop.f32.mrf.mxu1 }
 0x7b8   : > { %v6138_v36 = vadd.f32 %v5892_v33, %v15842_v16  ;;  %v11298_v33 = vld [vmem:[%s12068_s27 + $0x1ac8] sm:$0xff] }
 0x7b9   : > { %9666 = vst.msk [vmem:[%s14162_s13 + $0x218] sm:$0xff] %vm9598_vm2, %v9537_v15  ;;  %v8231_v21 = vadd.f32 %v7983_v37, %v7184_v4  ;;  %v11040_v37 = vld [vmem:[%s12068_s27 + $0x16c8] sm:$0xff] }
 0x7ba   : > { %v9033_v26 = vpop.f32.mrf.mxu0  ;;  %11166 = vmatmul.msk.f32.gmra.mxu1 %vm431_vm1, %v11036_v52 }
 0x7bb   : > { %v9278_v57 = vadd.f32 %v9030_v14, %v8231_v21  ;;  %11424 = vmatmul.msk.f32.gmra.mxu2 %vm431_vm1, %v11294_v31  ;;  %v11556_v31 = vld [vmem:[%s12068_s27 + $0x1ec8] sm:$0xff] }
 0x7bc   : > { %11682 = vmatmul.msk.f32.gmra.mxu3 %vm431_vm1, %v11552_v23  ;;  %v11814_v23 = vld [vmem:[%s12068_s27 + $0x22c8] sm:$0xff] }
 0x7bd   : > { %11940 = vmatmul.msk.f32.gmra.mxu0 %vm431_vm1, %v11810_v19  ;;  %v9410_v22 = vadd.f32 %v14819_v49, %v9278_v57  ;;  %v15846_v19 = vld [vmem:[#allocation20_spill] sm:$0xff] }
 0x7be   : > { %v6939_v50 = vpop.f32.mrf.mxu2 }
 0x7bf   : > { %v9538_v30 = vmax.f32 %v9410_v22, 0.0  ;;  %v7185_v54 = vadd.f32 %v6939_v50, %v6138_v36  ;;  %v7986_v17 = vpop.f32.mrf.mxu3  ;;  %v5895_v55 = vpop.f32.mrf.mxu1 }
 0x7c0   : > { %v6139_v13 = vadd.f32 %v5895_v55, %v15843_v41  ;;  %v11299_v55 = vld [vmem:[%s12068_s27 + $0x1ad0] sm:$0xff] }
 0x7c1   : > { %9667 = vst.msk [vmem:[%s14162_s13 + $0x220] sm:$0xff] %vm9598_vm2, %v9538_v30  ;;  %v8232_v11 = vadd.f32 %v7986_v17, %v7185_v54  ;;  %v11041_v17 = vld [vmem:[%s12068_s27 + $0x16d0] sm:$0xff] }
 0x7c2   : > { %v9036_v0 = vpop.f32.mrf.mxu0  ;;  %11167 = vmatmul.msk.f32.gmra.mxu1 %vm431_vm1, %v11037_v58 }
 0x7c3   : > { %v9279_v59 = vadd.f32 %v9033_v26, %v8232_v11  ;;  %11425 = vmatmul.msk.f32.gmra.mxu2 %vm431_vm1, %v11295_v24  ;;  %v11557_v24 = vld [vmem:[%s12068_s27 + $0x1ed0] sm:$0xff] }
 0x7c4   : > { %11683 = vmatmul.msk.f32.gmra.mxu3 %vm431_vm1, %v11553_v42  ;;  %v11815_v42 = vld [vmem:[%s12068_s27 + $0x22d0] sm:$0xff] }
 0x7c5   : > { %11941 = vmatmul.msk.f32.gmra.mxu0 %vm431_vm1, %v11811_v40  ;;  %v9411_v12 = vadd.f32 %v14819_v49, %v9279_v59  ;;  %v15847_v40 = vld [vmem:[#allocation22_spill] sm:$0xff] }
 0x7c6   : > { %v6942_v8 = vpop.f32.mrf.mxu2 }
 0x7c7   : > { %v9539_v28 = vmax.f32 %v9411_v12, 0.0  ;;  %v7186_v63 = vadd.f32 %v6942_v8, %v6139_v13  ;;  %v7989_v18 = vpop.f32.mrf.mxu3  ;;  %v5898_v1 = vpop.f32.mrf.mxu1 }
 0x7c8   : > { %v6140_v3 = vadd.f32 %v5898_v1, %v15844_v25  ;;  %v11300_v1 = vld [vmem:[%s12068_s27 + $0x1ad8] sm:$0xff] }
 0x7c9   : > { %9668 = vst.msk [vmem:[%s14162_s13 + $0x228] sm:$0xff] %vm9598_vm2, %v9539_v28  ;;  %v8233_v32 = vadd.f32 %v7989_v18, %v7186_v63  ;;  %v11042_v18 = vld [vmem:[%s12068_s27 + $0x16d8] sm:$0xff] }
 0x7ca   : > { %v9039_v47 = vpop.f32.mrf.mxu0  ;;  %11168 = vmatmul.msk.f32.gmra.mxu1 %vm431_vm1, %v11038_v46 }
 0x7cb   : > { %v9280_v34 = vadd.f32 %v9036_v0, %v8233_v32  ;;  %11426 = vmatmul.msk.f32.gmra.mxu2 %vm431_vm1, %v11296_v61  ;;  %v11558_v61 = vld [vmem:[%s12068_s27 + $0x1ed8] sm:$0xff] }
 0x7cc   : > { %11684 = vmatmul.msk.f32.gmra.mxu3 %vm431_vm1, %v11554_v5  ;;  %v11816_v5 = vld [vmem:[%s12068_s27 + $0x22d8] sm:$0xff] }
 0x7cd   : > { %11942 = vmatmul.msk.f32.gmra.mxu0 %vm431_vm1, %v11812_v43  ;;  %v9412_v6 = vadd.f32 %v14819_v49, %v9280_v34  ;;  %v15848_v43 = vld [vmem:[#allocation24_spill] sm:$0xff] }
 0x7ce   : > { %v6945_v39 = vpop.f32.mrf.mxu2 }
 0x7cf   : > { %v9540_v44 = vmax.f32 %v9412_v6, 0.0  ;;  %v7187_v2 = vadd.f32 %v6945_v39, %v6140_v3  ;;  %v7992_v29 = vpop.f32.mrf.mxu3  ;;  %v5901_v35 = vpop.f32.mrf.mxu1 }
 0x7d0   : > { %v6141_v60 = vadd.f32 %v5901_v35, %v15845_v53  ;;  %v11301_v35 = vld [vmem:[%s12068_s27 + $0x1ae0] sm:$0xff] }
 0x7d1   : > { %9669 = vst.msk [vmem:[%s14162_s13 + $0x230] sm:$0xff] %vm9598_vm2, %v9540_v44  ;;  %v8234_v9 = vadd.f32 %v7992_v29, %v7187_v2  ;;  %v11043_v29 = vld [vmem:[%s12068_s27 + $0x16e0] sm:$0xff] }
 0x7d2   : > { %v9042_v27 = vpop.f32.mrf.mxu0  ;;  %11169 = vmatmul.msk.f32.gmra.mxu1 %vm431_vm1, %v11039_v45 }
 0x7d3   : > { %v9281_v14 = vadd.f32 %v9039_v47, %v8234_v9  ;;  %11427 = vmatmul.msk.f32.gmra.mxu2 %vm431_vm1, %v11297_v56  ;;  %v11559_v56 = vld [vmem:[%s12068_s27 + $0x1ee0] sm:$0xff] }
 0x7d4   : > { %11685 = vmatmul.msk.f32.gmra.mxu3 %vm431_vm1, %v11555_v51  ;;  %v11817_v51 = vld [vmem:[%s12068_s27 + $0x22e0] sm:$0xff] }
 0x7d5   : > { %11943 = vmatmul.msk.f32.gmra.mxu0 %vm431_vm1, %v11813_v62  ;;  %v9413_v7 = vadd.f32 %v14819_v49, %v9281_v14  ;;  %v15849_v62 = vld [vmem:[#allocation26_spill] sm:$0xff] }
 0x7d6   : > { %v6948_v48 = vpop.f32.mrf.mxu2 }
 0x7d7   : > { %v9541_v10 = vmax.f32 %v9413_v7, 0.0  ;;  %v7188_v20 = vadd.f32 %v6948_v48, %v6141_v60  ;;  %v7995_v15 = vpop.f32.mrf.mxu3  ;;  %v5904_v4 = vpop.f32.mrf.mxu1 }
 0x7d8   : > { %v6142_v57 = vadd.f32 %v5904_v4, %v15846_v19  ;;  %v11302_v4 = vld [vmem:[%s12068_s27 + $0x1ae8] sm:$0xff] }
 0x7d9   : > { %9670 = vst.msk [vmem:[%s14162_s13 + $0x238] sm:$0xff] %vm9598_vm2, %v9541_v10  ;;  %v8235_v52 = vadd.f32 %v7995_v15, %v7188_v20  ;;  %v11044_v15 = vld [vmem:[%s12068_s27 + $0x16e8] sm:$0xff] }
 0x7da   : > { %v9045_v21 = vpop.f32.mrf.mxu0  ;;  %11170 = vmatmul.msk.f32.gmra.mxu1 %vm431_vm1, %v11040_v37 }
 0x7db   : > { %v9282_v26 = vadd.f32 %v9042_v27, %v8235_v52  ;;  %11428 = vmatmul.msk.f32.gmra.mxu2 %vm431_vm1, %v11298_v33  ;;  %v11560_v33 = vld [vmem:[%s12068_s27 + $0x1ee8] sm:$0xff] }
 0x7dc   : > { %11686 = vmatmul.msk.f32.gmra.mxu3 %vm431_vm1, %v11556_v31  ;;  %v11818_v31 = vld [vmem:[%s12068_s27 + $0x22e8] sm:$0xff] }
 0x7dd   : > { %11944 = vmatmul.msk.f32.gmra.mxu0 %vm431_vm1, %v11814_v23  ;;  %v9414_v16 = vadd.f32 %v14819_v49, %v9282_v26  ;;  %v15850_v23 = vld [vmem:[#allocation28_spill] sm:$0xff] }
 0x7de   : > { %v6951_v36 = vpop.f32.mrf.mxu2 }
 0x7df   : > { %v9542_v22 = vmax.f32 %v9414_v16, 0.0  ;;  %v7189_v50 = vadd.f32 %v6951_v36, %v6142_v57  ;;  %v7998_v30 = vpop.f32.mrf.mxu3  ;;  %v5907_v54 = vpop.f32.mrf.mxu1 }
 0x7e0   : > { %v6143_v59 = vadd.f32 %v5907_v54, %v15847_v40  ;;  %v11303_v54 = vld [vmem:[%s12068_s27 + $0x1af0] sm:$0xff] }
 0x7e1   : > { %9671 = vst.msk [vmem:[%s14162_s13 + $0x240] sm:$0xff] %vm9598_vm2, %v9542_v22  ;;  %v8236_v58 = vadd.f32 %v7998_v30, %v7189_v50  ;;  %v11045_v30 = vld [vmem:[%s12068_s27 + $0x16f0] sm:$0xff] }
 0x7e2   : > { %v9048_v11 = vpop.f32.mrf.mxu0  ;;  %11171 = vmatmul.msk.f32.gmra.mxu1 %vm431_vm1, %v11041_v17 }
 0x7e3   : > { %v9283_v0 = vadd.f32 %v9045_v21, %v8236_v58  ;;  %11429 = vmatmul.msk.f32.gmra.mxu2 %vm431_vm1, %v11299_v55  ;;  %v11561_v55 = vld [vmem:[%s12068_s27 + $0x1ef0] sm:$0xff] }
 0x7e4   : > { %11687 = vmatmul.msk.f32.gmra.mxu3 %vm431_vm1, %v11557_v24  ;;  %v11819_v24 = vld [vmem:[%s12068_s27 + $0x22f0] sm:$0xff] }
 0x7e5   : > { %11945 = vmatmul.msk.f32.gmra.mxu0 %vm431_vm1, %v11815_v42  ;;  %v9415_v41 = vadd.f32 %v14819_v49, %v9283_v0  ;;  %v15851_v42 = vld [vmem:[#allocation30_spill] sm:$0xff] }
 0x7e6   : > { %v6954_v13 = vpop.f32.mrf.mxu2 }
 0x7e7   : > { %v9543_v12 = vmax.f32 %v9415_v41, 0.0  ;;  %v7190_v8 = vadd.f32 %v6954_v13, %v6143_v59  ;;  %v8001_v28 = vpop.f32.mrf.mxu3  ;;  %v5910_v63 = vpop.f32.mrf.mxu1 }
 0x7e8   : > { %v6144_v34 = vadd.f32 %v5910_v63, %v15848_v43  ;;  %v11304_v63 = vld [vmem:[%s12068_s27 + $0x1af8] sm:$0xff] }
 0x7e9   : > { %9672 = vst.msk [vmem:[%s14162_s13 + $0x248] sm:$0xff] %vm9598_vm2, %v9543_v12  ;;  %v8237_v46 = vadd.f32 %v8001_v28, %v7190_v8  ;;  %v11046_v28 = vld [vmem:[%s12068_s27 + $0x16f8] sm:$0xff] }
 0x7ea   : > { %v9051_v32 = vpop.f32.mrf.mxu0  ;;  %11172 = vmatmul.msk.f32.gmra.mxu1 %vm431_vm1, %v11042_v18 }
 0x7eb   : > { %v9284_v47 = vadd.f32 %v9048_v11, %v8237_v46  ;;  %11430 = vmatmul.msk.f32.gmra.mxu2 %vm431_vm1, %v11300_v1  ;;  %v11562_v1 = vld [vmem:[%s12068_s27 + $0x1ef8] sm:$0xff] }
 0x7ec   : > { %11688 = vmatmul.msk.f32.gmra.mxu3 %vm431_vm1, %v11558_v61  ;;  %v11820_v61 = vld [vmem:[%s12068_s27 + $0x22f8] sm:$0xff] }
 0x7ed   : > { %11946 = vmatmul.msk.f32.gmra.mxu0 %vm431_vm1, %v11816_v5  ;;  %v9416_v25 = vadd.f32 %v14819_v49, %v9284_v47  ;;  %v15852_v5 = vld [vmem:[#allocation32_spill] sm:$0xff] }
 0x7ee   : > { %v6957_v3 = vpop.f32.mrf.mxu2 }
 0x7ef   : > { %v9544_v6 = vmax.f32 %v9416_v25, 0.0  ;;  %v7191_v39 = vadd.f32 %v6957_v3, %v6144_v34  ;;  %v8004_v44 = vpop.f32.mrf.mxu3  ;;  %v5913_v2 = vpop.f32.mrf.mxu1 }
 0x7f0   : > { %v6145_v14 = vadd.f32 %v5913_v2, %v15849_v62  ;;  %v11305_v2 = vld [vmem:[%s12068_s27 + $0x1b00] sm:$0xff] }
 0x7f1   : > { %9673 = vst.msk [vmem:[%s14162_s13 + $0x250] sm:$0xff] %vm9598_vm2, %v9544_v6  ;;  %v8238_v45 = vadd.f32 %v8004_v44, %v7191_v39  ;;  %v11047_v44 = vld [vmem:[%s12068_s27 + $0x1700] sm:$0xff] }
 0x7f2   : > { %v9054_v9 = vpop.f32.mrf.mxu0  ;;  %11173 = vmatmul.msk.f32.gmra.mxu1 %vm431_vm1, %v11043_v29 }
 0x7f3   : > { %v9285_v27 = vadd.f32 %v9051_v32, %v8238_v45  ;;  %11431 = vmatmul.msk.f32.gmra.mxu2 %vm431_vm1, %v11301_v35  ;;  %v11563_v35 = vld [vmem:[%s12068_s27 + $0x1f00] sm:$0xff] }
 0x7f4   : > { %11689 = vmatmul.msk.f32.gmra.mxu3 %vm431_vm1, %v11559_v56  ;;  %v11821_v56 = vld [vmem:[%s12068_s27 + $0x2300] sm:$0xff] }
 0x7f5   : > { %11947 = vmatmul.msk.f32.gmra.mxu0 %vm431_vm1, %v11817_v51  ;;  %v9417_v53 = vadd.f32 %v14819_v49, %v9285_v27  ;;  %v15853_v51 = vld [vmem:[#allocation35_spill] sm:$0xff] }
 0x7f6   : > { %v6960_v60 = vpop.f32.mrf.mxu2 }
 0x7f7   : > { %v9545_v7 = vmax.f32 %v9417_v53, 0.0  ;;  %v7192_v48 = vadd.f32 %v6960_v60, %v6145_v14  ;;  %v8007_v10 = vpop.f32.mrf.mxu3  ;;  %v5916_v20 = vpop.f32.mrf.mxu1 }
 0x7f8   : > { %v6146_v26 = vadd.f32 %v5916_v20, %v15850_v23  ;;  %v11306_v20 = vld [vmem:[%s12068_s27 + $0x1b08] sm:$0xff] }
 0x7f9   : > { %9674 = vst.msk [vmem:[%s14162_s13 + $0x258] sm:$0xff] %vm9598_vm2, %v9545_v7  ;;  %v8239_v37 = vadd.f32 %v8007_v10, %v7192_v48  ;;  %v11048_v10 = vld [vmem:[%s12068_s27 + $0x1708] sm:$0xff] }
 0x7fa   : > { %v9057_v52 = vpop.f32.mrf.mxu0  ;;  %11174 = vmatmul.msk.f32.gmra.mxu1 %vm431_vm1, %v11044_v15 }
 0x7fb   : > { %v9286_v21 = vadd.f32 %v9054_v9, %v8239_v37  ;;  %11432 = vmatmul.msk.f32.gmra.mxu2 %vm431_vm1, %v11302_v4  ;;  %v11564_v4 = vld [vmem:[%s12068_s27 + $0x1f08] sm:$0xff] }
 0x7fc   : > { %11690 = vmatmul.msk.f32.gmra.mxu3 %vm431_vm1, %v11560_v33  ;;  %v11822_v33 = vld [vmem:[%s12068_s27 + $0x2308] sm:$0xff] }
 0x7fd   : > { %11948 = vmatmul.msk.f32.gmra.mxu0 %vm431_vm1, %v11818_v31  ;;  %v9418_v19 = vadd.f32 %v14819_v49, %v9286_v21  ;;  %v15854_v31 = vld [vmem:[#allocation38_spill] sm:$0xff] }
 0x7fe   : > { %v6963_v57 = vpop.f32.mrf.mxu2 }
 0x7ff   : > { %v9546_v16 = vmax.f32 %v9418_v19, 0.0  ;;  %v7193_v36 = vadd.f32 %v6963_v57, %v6146_v26  ;;  %v8010_v22 = vpop.f32.mrf.mxu3  ;;  %v5919_v50 = vpop.f32.mrf.mxu1 }
 0x800   : > { %v6147_v0 = vadd.f32 %v5919_v50, %v15851_v42  ;;  %v11307_v50 = vld [vmem:[%s12068_s27 + $0x1b10] sm:$0xff] }
 0x801   : > { %9675 = vst.msk [vmem:[%s14162_s13 + $0x260] sm:$0xff] %vm9598_vm2, %v9546_v16  ;;  %v8240_v17 = vadd.f32 %v8010_v22, %v7193_v36  ;;  %v11049_v22 = vld [vmem:[%s12068_s27 + $0x1710] sm:$0xff] }
 0x802   : > { %v9060_v58 = vpop.f32.mrf.mxu0  ;;  %11175 = vmatmul.msk.f32.gmra.mxu1 %vm431_vm1, %v11045_v30 }
 0x803   : > { %v9287_v11 = vadd.f32 %v9057_v52, %v8240_v17  ;;  %11433 = vmatmul.msk.f32.gmra.mxu2 %vm431_vm1, %v11303_v54  ;;  %v11565_v54 = vld [vmem:[%s12068_s27 + $0x1f10] sm:$0xff] }
 0x804   : > { %11691 = vmatmul.msk.f32.gmra.mxu3 %vm431_vm1, %v11561_v55  ;;  %v11823_v55 = vld [vmem:[%s12068_s27 + $0x2310] sm:$0xff] }
 0x805   : > { %11949 = vmatmul.msk.f32.gmra.mxu0 %vm431_vm1, %v11819_v24  ;;  %v9419_v40 = vadd.f32 %v14819_v49, %v9287_v11  ;;  %v15148_v11 = vld [vmem:[%s15578_s2] ss:$0 sm:$0xff] }
 0x806   : > { %v6966_v59 = vpop.f32.mrf.mxu2 }
 0x807   : > { %v9547_v41 = vmax.f32 %v9419_v40, 0.0  ;;  %v7194_v13 = vadd.f32 %v6966_v59, %v6147_v0  ;;  %v8013_v12 = vpop.f32.mrf.mxu3  ;;  %v5922_v8 = vpop.f32.mrf.mxu1 }
 0x808   : > { %v6148_v47 = vadd.f32 %v5922_v8, %v15852_v5  ;;  %v11308_v8 = vld [vmem:[%s12068_s27 + $0x1b18] sm:$0xff] }
 0x809   : > { %9676 = vst.msk [vmem:[%s14162_s13 + $0x268] sm:$0xff] %vm9598_vm2, %v9547_v41  ;;  %v8241_v18 = vadd.f32 %v8013_v12, %v7194_v13  ;;  %v11050_v12 = vld [vmem:[%s12068_s27 + $0x1718] sm:$0xff] }
 0x80a   : > { %v9063_v46 = vpop.f32.mrf.mxu0  ;;  %11176 = vmatmul.msk.f32.gmra.mxu1 %vm431_vm1, %v11046_v28 }
 0x80b   : > { %v9288_v32 = vadd.f32 %v9060_v58, %v8241_v18  ;;  %11434 = vmatmul.msk.f32.gmra.mxu2 %vm431_vm1, %v11304_v63  ;;  %v11566_v63 = vld [vmem:[%s12068_s27 + $0x1f18] sm:$0xff] }
 0x80c   : > { %11692 = vmatmul.msk.f32.gmra.mxu3 %vm431_vm1, %v11562_v1  ;;  %v11824_v1 = vld [vmem:[%s12068_s27 + $0x2318] sm:$0xff] }
 0x80d   : > { %11950 = vmatmul.msk.f32.gmra.mxu0 %vm431_vm1, %v11820_v61  ;;  %v9420_v43 = vadd.f32 %v14819_v49, %v9288_v32  ;;  %v15856_v61 = vld [vmem:[#allocation44_spill] sm:$0xff] }
 0x80e   : > { %v6969_v34 = vpop.f32.mrf.mxu2 }
 0x80f   : > { %v9548_v25 = vmax.f32 %v9420_v43, 0.0  ;;  %v7195_v3 = vadd.f32 %v6969_v34, %v6148_v47  ;;  %v8016_v6 = vpop.f32.mrf.mxu3  ;;  %v5925_v39 = vpop.f32.mrf.mxu1 }
 0x810   : > { %v6149_v27 = vadd.f32 %v5925_v39, %v15853_v51  ;;  %v11309_v39 = vld [vmem:[%s12068_s27 + $0x1b20] sm:$0xff] }
 0x811   : > { %9677 = vst.msk [vmem:[%s14162_s13 + $0x270] sm:$0xff] %vm9598_vm2, %v9548_v25  ;;  %v8242_v29 = vadd.f32 %v8016_v6, %v7195_v3  ;;  %v11051_v6 = vld [vmem:[%s12068_s27 + $0x1720] sm:$0xff] }
 0x812   : > { %v9066_v45 = vpop.f32.mrf.mxu0  ;;  %11177 = vmatmul.msk.f32.gmra.mxu1 %vm431_vm1, %v11047_v44 }
 0x813   : > { %v9289_v9 = vadd.f32 %v9063_v46, %v8242_v29  ;;  %11435 = vmatmul.msk.f32.gmra.mxu2 %vm431_vm1, %v11305_v2  ;;  %v11567_v2 = vld [vmem:[%s12068_s27 + $0x1f20] sm:$0xff] }
 0x814   : > { %11693 = vmatmul.msk.f32.gmra.mxu3 %vm431_vm1, %v11563_v35  ;;  %v11825_v35 = vld [vmem:[%s12068_s27 + $0x2320] sm:$0xff] }
 0x815   : > { %11951 = vmatmul.msk.f32.gmra.mxu0 %vm431_vm1, %v11821_v56  ;;  %v9421_v62 = vadd.f32 %v14819_v49, %v9289_v9  ;;  %v15857_v56 = vld [vmem:[#allocation47_spill] sm:$0xff] }
 0x816   : > { %v6972_v14 = vpop.f32.mrf.mxu2 }
 0x817   : > { %v9549_v53 = vmax.f32 %v9421_v62, 0.0  ;;  %v7196_v60 = vadd.f32 %v6972_v14, %v6149_v27  ;;  %v8019_v7 = vpop.f32.mrf.mxu3  ;;  %v5928_v48 = vpop.f32.mrf.mxu1 }
 0x818   : > { %v6150_v21 = vadd.f32 %v5928_v48, %v15854_v31  ;;  %v11310_v48 = vld [vmem:[%s12068_s27 + $0x1b28] sm:$0xff] }
 0x819   : > { %9678 = vst.msk [vmem:[%s14162_s13 + $0x278] sm:$0xff] %vm9598_vm2, %v9549_v53  ;;  %v8243_v15 = vadd.f32 %v8019_v7, %v7196_v60  ;;  %v11052_v7 = vld [vmem:[%s12068_s27 + $0x1728] sm:$0xff] }
 0x81a   : > { %v9069_v37 = vpop.f32.mrf.mxu0  ;;  %11178 = vmatmul.msk.f32.gmra.mxu1 %vm431_vm1, %v11048_v10 }
 0x81b   : > { %v9290_v52 = vadd.f32 %v9066_v45, %v8243_v15  ;;  %11436 = vmatmul.msk.f32.gmra.mxu2 %vm431_vm1, %v11306_v20  ;;  %v11568_v20 = vld [vmem:[%s12068_s27 + $0x1f28] sm:$0xff] }
 0x81c   : > { %11694 = vmatmul.msk.f32.gmra.mxu3 %vm431_vm1, %v11564_v4  ;;  %v11826_v4 = vld [vmem:[%s12068_s27 + $0x2328] sm:$0xff] }
 0x81d   : > { %11952 = vmatmul.msk.f32.gmra.mxu0 %vm431_vm1, %v11822_v33  ;;  %v9422_v23 = vadd.f32 %v14819_v49, %v9290_v52  ;;  %v15855_v49 = vld [vmem:[#allocation41_spill] sm:$0xff]  ;;  %v15858_v33 = vld [vmem:[#allocation50_spill] sm:$0xff] }
 0x81e   : > { %v6975_v26 = vpop.f32.mrf.mxu2 }
 0x81f   : > { %v9550_v19 = vmax.f32 %v9422_v23, 0.0  ;;  %v7197_v57 = vadd.f32 %v6975_v26, %v6150_v21  ;;  %v8022_v16 = vpop.f32.mrf.mxu3  ;;  %v5931_v36 = vpop.f32.mrf.mxu1 }
 0x820   : > { %v6151_v24 = vadd.f32 %v5931_v36, %v15855_v49  ;;  %v11311_v36 = vld [vmem:[%s12068_s27 + $0x1b30] sm:$0xff] }
 0x821   : > { %9679 = vst.msk [vmem:[%s14162_s13 + $0x280] sm:$0xff] %vm9598_vm2, %v9550_v19  ;;  %v8244_v30 = vadd.f32 %v8022_v16, %v7197_v57  ;;  %v11053_v16 = vld [vmem:[%s12068_s27 + $0x1730] sm:$0xff] }
 0x822   : > { %v9072_v17 = vpop.f32.mrf.mxu0  ;;  %11179 = vmatmul.msk.f32.gmra.mxu1 %vm431_vm1, %v11049_v22 }
 0x823   : > { %v9291_v58 = vadd.f32 %v9069_v37, %v8244_v30  ;;  %11437 = vmatmul.msk.f32.gmra.mxu2 %vm431_vm1, %v11307_v50  ;;  %v11569_v50 = vld [vmem:[%s12068_s27 + $0x1f30] sm:$0xff] }
 0x824   : > { %11695 = vmatmul.msk.f32.gmra.mxu3 %vm431_vm1, %v11565_v54  ;;  %v11827_v54 = vld [vmem:[%s12068_s27 + $0x2330] sm:$0xff] }
 0x825   : > { %11953 = vmatmul.msk.f32.gmra.mxu0 %vm431_vm1, %v11823_v55  ;;  %v9423_v42 = vadd.f32 %v15148_v11, %v9291_v58  ;;  %v15859_v55 = vld [vmem:[#allocation53_spill] sm:$0xff] }
 0x826   : > { %v6978_v0 = vpop.f32.mrf.mxu2 }
 0x827   : > { %v9551_v40 = vmax.f32 %v9423_v42, 0.0  ;;  %v7198_v59 = vadd.f32 %v6978_v0, %v6151_v24  ;;  %v8025_v41 = vpop.f32.mrf.mxu3  ;;  %v5934_v13 = vpop.f32.mrf.mxu1 }
 0x828   : > { %v6152_v32 = vadd.f32 %v5934_v13, %v15856_v61  ;;  %v11312_v13 = vld [vmem:[%s12068_s27 + $0x1b38] sm:$0xff] }
 0x829   : > { %9680 = vst.msk [vmem:[%s14162_s13 + $0x288] sm:$0xff] %vm9598_vm2, %v9551_v40  ;;  %v8245_v28 = vadd.f32 %v8025_v41, %v7198_v59  ;;  %v11054_v41 = vld [vmem:[%s12068_s27 + $0x1738] sm:$0xff] }
 0x82a   : > { %v9075_v18 = vpop.f32.mrf.mxu0  ;;  %11180 = vmatmul.msk.f32.gmra.mxu1 %vm431_vm1, %v11050_v12 }
 0x82b   : > { %v9292_v46 = vadd.f32 %v9072_v17, %v8245_v28  ;;  %11438 = vmatmul.msk.f32.gmra.mxu2 %vm431_vm1, %v11308_v8  ;;  %v11570_v8 = vld [vmem:[%s12068_s27 + $0x1f38] sm:$0xff] }
 0x82c   : > { %11696 = vmatmul.msk.f32.gmra.mxu3 %vm431_vm1, %v11566_v63  ;;  %v11828_v63 = vld [vmem:[%s12068_s27 + $0x2338] sm:$0xff] }
 0x82d   : > { %11954 = vmatmul.msk.f32.gmra.mxu0 %vm431_vm1, %v11824_v1  ;;  %v9424_v5 = vadd.f32 %v15148_v11, %v9292_v46  ;;  %v15860_v1 = vld [vmem:[#allocation56_spill] sm:$0xff] }
 0x82e   : > { %v6981_v47 = vpop.f32.mrf.mxu2 }
 0x82f   : > { %v9552_v43 = vmax.f32 %v9424_v5, 0.0  ;;  %v7199_v34 = vadd.f32 %v6981_v47, %v6152_v32  ;;  %v8028_v25 = vpop.f32.mrf.mxu3  ;;  %v5937_v3 = vpop.f32.mrf.mxu1 }
 0x830   : > { %v6153_v9 = vadd.f32 %v5937_v3, %v15857_v56  ;;  %v11313_v3 = vld [vmem:[%s12068_s27 + $0x1b40] sm:$0xff] }
 0x831   : > { %9681 = vst.msk [vmem:[%s14162_s13 + $0x290] sm:$0xff] %vm9598_vm2, %v9552_v43  ;;  %v8246_v44 = vadd.f32 %v8028_v25, %v7199_v34  ;;  %v11055_v25 = vld [vmem:[%s12068_s27 + $0x1740] sm:$0xff] }
 0x832   : > { %v9078_v29 = vpop.f32.mrf.mxu0  ;;  %11181 = vmatmul.msk.f32.gmra.mxu1 %vm431_vm1, %v11051_v6 }
 0x833   : > { %v9293_v45 = vadd.f32 %v9075_v18, %v8246_v44  ;;  %11439 = vmatmul.msk.f32.gmra.mxu2 %vm431_vm1, %v11309_v39  ;;  %v11571_v39 = vld [vmem:[%s12068_s27 + $0x1f40] sm:$0xff] }
 0x834   : > { %11697 = vmatmul.msk.f32.gmra.mxu3 %vm431_vm1, %v11567_v2  ;;  %v11829_v2 = vld [vmem:[%s12068_s27 + $0x2340] sm:$0xff] }
 0x835   : > { %11955 = vmatmul.msk.f32.gmra.mxu0 %vm431_vm1, %v11825_v35  ;;  %v9425_v51 = vadd.f32 %v15148_v11, %v9293_v45  ;;  %v15861_v35 = vld [vmem:[#allocation59_spill] sm:$0xff] }
 0x836   : > { %v6984_v27 = vpop.f32.mrf.mxu2 }
 0x837   : > { %v9553_v62 = vmax.f32 %v9425_v51, 0.0  ;;  %v7200_v14 = vadd.f32 %v6984_v27, %v6153_v9  ;;  %v8031_v53 = vpop.f32.mrf.mxu3  ;;  %v5940_v60 = vpop.f32.mrf.mxu1 }
 0x838   : > { %v6154_v52 = vadd.f32 %v5940_v60, %v15858_v33  ;;  %v11314_v60 = vld [vmem:[%s12068_s27 + $0x1b48] sm:$0xff] }
 0x839   : > { %9682 = vst.msk [vmem:[%s14162_s13 + $0x298] sm:$0xff] %vm9598_vm2, %v9553_v62  ;;  %v8247_v10 = vadd.f32 %v8031_v53, %v7200_v14  ;;  %v11056_v53 = vld [vmem:[%s12068_s27 + $0x1748] sm:$0xff] }
 0x83a   : > { %v9081_v15 = vpop.f32.mrf.mxu0  ;;  %11182 = vmatmul.msk.f32.gmra.mxu1 %vm431_vm1, %v11052_v7 }
 0x83b   : > { %v9294_v37 = vadd.f32 %v9078_v29, %v8247_v10  ;;  %11440 = vmatmul.msk.f32.gmra.mxu2 %vm431_vm1, %v11310_v48  ;;  %v11572_v48 = vld [vmem:[%s12068_s27 + $0x1f48] sm:$0xff] }
 0x83c   : > { %11698 = vmatmul.msk.f32.gmra.mxu3 %vm431_vm1, %v11568_v20  ;;  %v11830_v20 = vld [vmem:[%s12068_s27 + $0x2348] sm:$0xff] }
 0x83d   : > { %11956 = vmatmul.msk.f32.gmra.mxu0 %vm431_vm1, %v11826_v4  ;;  %v9426_v31 = vadd.f32 %v15148_v11, %v9294_v37  ;;  %v15862_v4 = vld [vmem:[#allocation62_spill] sm:$0xff] }
 0x83e   : > { %v6987_v21 = vpop.f32.mrf.mxu2 }
 0x83f   : > { %v9554_v23 = vmax.f32 %v9426_v31, 0.0  ;;  %v7201_v26 = vadd.f32 %v6987_v21, %v6154_v52  ;;  %v8034_v19 = vpop.f32.mrf.mxu3  ;;  %v5943_v57 = vpop.f32.mrf.mxu1 }
 0x840   : > { %v6155_v58 = vadd.f32 %v5943_v57, %v15859_v55  ;;  %v11315_v57 = vld [vmem:[%s12068_s27 + $0x1b50] sm:$0xff] }
 0x841   : > { %9683 = vst.msk [vmem:[%s14162_s13 + $0x2a0] sm:$0xff] %vm9598_vm2, %v9554_v23  ;;  %v8248_v22 = vadd.f32 %v8034_v19, %v7201_v26  ;;  %v11057_v19 = vld [vmem:[%s12068_s27 + $0x1750] sm:$0xff] }
 0x842   : > { %v9084_v30 = vpop.f32.mrf.mxu0  ;;  %11183 = vmatmul.msk.f32.gmra.mxu1 %vm431_vm1, %v11053_v16 }
 0x843   : > { %v9295_v17 = vadd.f32 %v9081_v15, %v8248_v22  ;;  %11441 = vmatmul.msk.f32.gmra.mxu2 %vm431_vm1, %v11311_v36  ;;  %v11573_v36 = vld [vmem:[%s12068_s27 + $0x1f50] sm:$0xff] }
 0x844   : > { %11699 = vmatmul.msk.f32.gmra.mxu3 %vm431_vm1, %v11569_v50  ;;  %v11831_v50 = vld [vmem:[%s12068_s27 + $0x2350] sm:$0xff] }
 0x845   : > { %11957 = vmatmul.msk.f32.gmra.mxu0 %vm431_vm1, %v11827_v54  ;;  %v9427_v49 = vadd.f32 %v15148_v11, %v9295_v17  ;;  %v15863_v54 = vld [vmem:[#allocation65_spill] sm:$0xff] }
 0x846   : > { %v6990_v24 = vpop.f32.mrf.mxu2 }
 0x847   : > { %v9555_v42 = vmax.f32 %v9427_v49, 0.0  ;;  %v7202_v0 = vadd.f32 %v6990_v24, %v6155_v58  ;;  %v8037_v40 = vpop.f32.mrf.mxu3  ;;  %v5946_v59 = vpop.f32.mrf.mxu1 }
 0x848   : > { %v6156_v46 = vadd.f32 %v5946_v59, %v15860_v1  ;;  %v11316_v59 = vld [vmem:[%s12068_s27 + $0x1b58] sm:$0xff] }
 0x849   : > { %9684 = vst.msk [vmem:[%s14162_s13 + $0x2a8] sm:$0xff] %vm9598_vm2, %v9555_v42  ;;  %v8249_v12 = vadd.f32 %v8037_v40, %v7202_v0  ;;  %v11058_v40 = vld [vmem:[%s12068_s27 + $0x1758] sm:$0xff] }
 0x84a   : > { %v9087_v28 = vpop.f32.mrf.mxu0  ;;  %11184 = vmatmul.msk.f32.gmra.mxu1 %vm431_vm1, %v11054_v41 }
 0x84b   : > { %v9296_v18 = vadd.f32 %v9084_v30, %v8249_v12  ;;  %11442 = vmatmul.msk.f32.gmra.mxu2 %vm431_vm1, %v11312_v13  ;;  %v11574_v13 = vld [vmem:[%s12068_s27 + $0x1f58] sm:$0xff] }
 0x84c   : > { %11700 = vmatmul.msk.f32.gmra.mxu3 %vm431_vm1, %v11570_v8  ;;  %v11832_v8 = vld [vmem:[%s12068_s27 + $0x2358] sm:$0xff] }
 0x84d   : > { %11958 = vmatmul.msk.f32.gmra.mxu0 %vm431_vm1, %v11828_v63  ;;  %v9428_v61 = vadd.f32 %v15148_v11, %v9296_v18  ;;  %v15864_v63 = vld [vmem:[#allocation68_spill] sm:$0xff] }
 0x84e   : > { %v6993_v32 = vpop.f32.mrf.mxu2 }
 0x84f   : > { %v9556_v5 = vmax.f32 %v9428_v61, 0.0  ;;  %v7203_v47 = vadd.f32 %v6993_v32, %v6156_v46  ;;  %v8040_v43 = vpop.f32.mrf.mxu3  ;;  %v5949_v34 = vpop.f32.mrf.mxu1 }
 0x850   : > { %v6157_v45 = vadd.f32 %v5949_v34, %v15861_v35  ;;  %v11317_v34 = vld [vmem:[%s12068_s27 + $0x1b60] sm:$0xff] }
 0x851   : > { %9685 = vst.msk [vmem:[%s14162_s13 + $0x2b0] sm:$0xff] %vm9598_vm2, %v9556_v5  ;;  %v8250_v6 = vadd.f32 %v8040_v43, %v7203_v47  ;;  %v11059_v43 = vld [vmem:[%s12068_s27 + $0x1760] sm:$0xff] }
 0x852   : > { %v9090_v44 = vpop.f32.mrf.mxu0  ;;  %11185 = vmatmul.msk.f32.gmra.mxu1 %vm431_vm1, %v11055_v25 }
 0x853   : > { %v9297_v29 = vadd.f32 %v9087_v28, %v8250_v6  ;;  %11443 = vmatmul.msk.f32.gmra.mxu2 %vm431_vm1, %v11313_v3  ;;  %v11575_v3 = vld [vmem:[%s12068_s27 + $0x1f60] sm:$0xff] }
 0x854   : > { %11701 = vmatmul.msk.f32.gmra.mxu3 %vm431_vm1, %v11571_v39  ;;  %v11833_v39 = vld [vmem:[%s12068_s27 + $0x2360] sm:$0xff] }
 0x855   : > { %11959 = vmatmul.msk.f32.gmra.mxu0 %vm431_vm1, %v11829_v2  ;;  %v9429_v56 = vadd.f32 %v15148_v11, %v9297_v29  ;;  %v15865_v2 = vld [vmem:[#allocation71_spill] sm:$0xff] }
 0x856   : > { %v6996_v9 = vpop.f32.mrf.mxu2 }
 0x857   : > { %v9557_v51 = vmax.f32 %v9429_v56, 0.0  ;;  %v7204_v27 = vadd.f32 %v6996_v9, %v6157_v45  ;;  %v8043_v62 = vpop.f32.mrf.mxu3  ;;  %v5952_v14 = vpop.f32.mrf.mxu1 }
 0x858   : > { %v6158_v37 = vadd.f32 %v5952_v14, %v15862_v4  ;;  %v11318_v14 = vld [vmem:[%s12068_s27 + $0x1b68] sm:$0xff] }
 0x859   : > { %9686 = vst.msk [vmem:[%s14162_s13 + $0x2b8] sm:$0xff] %vm9598_vm2, %v9557_v51  ;;  %v8251_v7 = vadd.f32 %v8043_v62, %v7204_v27  ;;  %v11060_v62 = vld [vmem:[%s12068_s27 + $0x1768] sm:$0xff] }
 0x85a   : > { %v9093_v10 = vpop.f32.mrf.mxu0  ;;  %11186 = vmatmul.msk.f32.gmra.mxu1 %vm431_vm1, %v11056_v53 }
 0x85b   : > { %v9298_v15 = vadd.f32 %v9090_v44, %v8251_v7  ;;  %11444 = vmatmul.msk.f32.gmra.mxu2 %vm431_vm1, %v11314_v60  ;;  %v11576_v60 = vld [vmem:[%s12068_s27 + $0x1f68] sm:$0xff] }
 0x85c   : > { %11702 = vmatmul.msk.f32.gmra.mxu3 %vm431_vm1, %v11572_v48  ;;  %v11834_v48 = vld [vmem:[%s12068_s27 + $0x2368] sm:$0xff] }
 0x85d   : > { %11960 = vmatmul.msk.f32.gmra.mxu0 %vm431_vm1, %v11830_v20  ;;  %v9430_v33 = vadd.f32 %v15148_v11, %v9298_v15  ;;  %v15866_v20 = vld [vmem:[#allocation74_spill] sm:$0xff] }
 0x85e   : > { %v6999_v52 = vpop.f32.mrf.mxu2 }
 0x85f   : > { %v9558_v31 = vmax.f32 %v9430_v33, 0.0  ;;  %v7205_v21 = vadd.f32 %v6999_v52, %v6158_v37  ;;  %v8046_v23 = vpop.f32.mrf.mxu3  ;;  %v5955_v26 = vpop.f32.mrf.mxu1 }
 0x860   : > { %v6159_v17 = vadd.f32 %v5955_v26, %v15863_v54  ;;  %v11319_v26 = vld [vmem:[%s12068_s27 + $0x1b70] sm:$0xff] }
 0x861   : > { %9687 = vst.msk [vmem:[%s14162_s13 + $0x2c0] sm:$0xff] %vm9598_vm2, %v9558_v31  ;;  %v8252_v16 = vadd.f32 %v8046_v23, %v7205_v21  ;;  %v11061_v23 = vld [vmem:[%s12068_s27 + $0x1770] sm:$0xff] }
 0x862   : > { %v9096_v22 = vpop.f32.mrf.mxu0  ;;  %11187 = vmatmul.msk.f32.gmra.mxu1 %vm431_vm1, %v11057_v19 }
 0x863   : > { %v9299_v30 = vadd.f32 %v9093_v10, %v8252_v16  ;;  %11445 = vmatmul.msk.f32.gmra.mxu2 %vm431_vm1, %v11315_v57  ;;  %v11577_v57 = vld [vmem:[%s12068_s27 + $0x1f70] sm:$0xff] }
 0x864   : > { %11703 = vmatmul.msk.f32.gmra.mxu3 %vm431_vm1, %v11573_v36  ;;  %v11835_v36 = vld [vmem:[%s12068_s27 + $0x2370] sm:$0xff] }
 0x865   : > { %11961 = vmatmul.msk.f32.gmra.mxu0 %vm431_vm1, %v11831_v50  ;;  %v9431_v55 = vadd.f32 %v15148_v11, %v9299_v30  ;;  %v15867_v50 = vld [vmem:[#allocation77_spill] sm:$0xff] }
 0x866   : > { %v7002_v58 = vpop.f32.mrf.mxu2 }
 0x867   : > { %v9559_v49 = vmax.f32 %v9431_v55, 0.0  ;;  %v7206_v24 = vadd.f32 %v7002_v58, %v6159_v17  ;;  %v8049_v42 = vpop.f32.mrf.mxu3  ;;  %v5958_v0 = vpop.f32.mrf.mxu1 }
 0x868   : > { %v6160_v18 = vadd.f32 %v5958_v0, %v15864_v63  ;;  %v11320_v0 = vld [vmem:[%s12068_s27 + $0x1b78] sm:$0xff] }
 0x869   : > { %9688 = vst.msk [vmem:[%s14162_s13 + $0x2c8] sm:$0xff] %vm9598_vm2, %v9559_v49  ;;  %v8253_v41 = vadd.f32 %v8049_v42, %v7206_v24  ;;  %v11062_v42 = vld [vmem:[%s12068_s27 + $0x1778] sm:$0xff] }
 0x86a   : > { %v9099_v12 = vpop.f32.mrf.mxu0  ;;  %11188 = vmatmul.msk.f32.gmra.mxu1 %vm431_vm1, %v11058_v40 }
 0x86b   : > { %v9300_v28 = vadd.f32 %v9096_v22, %v8253_v41  ;;  %11446 = vmatmul.msk.f32.gmra.mxu2 %vm431_vm1, %v11316_v59  ;;  %v11578_v59 = vld [vmem:[%s12068_s27 + $0x1f78] sm:$0xff] }
 0x86c   : > { %11704 = vmatmul.msk.f32.gmra.mxu3 %vm431_vm1, %v11574_v13  ;;  %v11836_v13 = vld [vmem:[%s12068_s27 + $0x2378] sm:$0xff] }
 0x86d   : > { %11962 = vmatmul.msk.f32.gmra.mxu0 %vm431_vm1, %v11832_v8  ;;  %v9432_v1 = vadd.f32 %v15148_v11, %v9300_v28  ;;  %v15868_v8 = vld [vmem:[#allocation80_spill] sm:$0xff] }
 0x86e   : > { %v7005_v46 = vpop.f32.mrf.mxu2 }
 0x86f   : > { %v9560_v61 = vmax.f32 %v9432_v1, 0.0  ;;  %v7207_v32 = vadd.f32 %v7005_v46, %v6160_v18  ;;  %v8052_v5 = vpop.f32.mrf.mxu3  ;;  %v5961_v47 = vpop.f32.mrf.mxu1 }
 0x870   : > { %v6161_v29 = vadd.f32 %v5961_v47, %v15865_v2  ;;  %v11321_v47 = vld [vmem:[%s12068_s27 + $0x1b80] sm:$0xff] }
 0x871   : > { %9689 = vst.msk [vmem:[%s14162_s13 + $0x2d0] sm:$0xff] %vm9598_vm2, %v9560_v61  ;;  %v8254_v25 = vadd.f32 %v8052_v5, %v7207_v32  ;;  %v11063_v5 = vld [vmem:[%s12068_s27 + $0x1780] sm:$0xff] }
 0x872   : > { %v9102_v6 = vpop.f32.mrf.mxu0  ;;  %11189 = vmatmul.msk.f32.gmra.mxu1 %vm431_vm1, %v11059_v43 }
 0x873   : > { %v9301_v44 = vadd.f32 %v9099_v12, %v8254_v25  ;;  %11447 = vmatmul.msk.f32.gmra.mxu2 %vm431_vm1, %v11317_v34  ;;  %v11579_v34 = vld [vmem:[%s12068_s27 + $0x1f80] sm:$0xff] }
 0x874   : > { %11705 = vmatmul.msk.f32.gmra.mxu3 %vm431_vm1, %v11575_v3  ;;  %v11837_v3 = vld [vmem:[%s12068_s27 + $0x2380] sm:$0xff] }
 0x875   : > { %11963 = vmatmul.msk.f32.gmra.mxu0 %vm431_vm1, %v11833_v39  ;;  %v9433_v35 = vadd.f32 %v15148_v11, %v9301_v44  ;;  %v15869_v39 = vld [vmem:[#allocation3_spill] sm:$0xff] }
 0x876   : > { %v7008_v45 = vpop.f32.mrf.mxu2 }
 0x877   : > { %v9561_v56 = vmax.f32 %v9433_v35, 0.0  ;;  %v7208_v9 = vadd.f32 %v7008_v45, %v6161_v29  ;;  %v8055_v51 = vpop.f32.mrf.mxu3  ;;  %v5964_v27 = vpop.f32.mrf.mxu1 }
 0x878   : > { %v6162_v15 = vadd.f32 %v5964_v27, %v15866_v20  ;;  %v11322_v27 = vld [vmem:[%s12068_s27 + $0x1b88] sm:$0xff] }
 0x879   : > { %9690 = vst.msk [vmem:[%s14162_s13 + $0x2d8] sm:$0xff] %vm9598_vm2, %v9561_v56  ;;  %v8255_v53 = vadd.f32 %v8055_v51, %v7208_v9  ;;  %v11064_v51 = vld [vmem:[%s12068_s27 + $0x1788] sm:$0xff] }
 0x87a   : > { %v9105_v7 = vpop.f32.mrf.mxu0  ;;  %11190 = vmatmul.msk.f32.gmra.mxu1 %vm431_vm1, %v11060_v62 }
 0x87b   : > { %v9302_v10 = vadd.f32 %v9102_v6, %v8255_v53  ;;  %11448 = vmatmul.msk.f32.gmra.mxu2 %vm431_vm1, %v11318_v14  ;;  %v11580_v14 = vld [vmem:[%s12068_s27 + $0x1f88] sm:$0xff] }
 0x87c   : > { %11706 = vmatmul.msk.f32.gmra.mxu3 %vm431_vm1, %v11576_v60  ;;  %v11838_v60 = vld [vmem:[%s12068_s27 + $0x2388] sm:$0xff] }
 0x87d   : > { %11964 = vmatmul.msk.f32.gmra.mxu0 %vm431_vm1, %v11834_v48  ;;  %v9434_v4 = vadd.f32 %v15148_v11, %v9302_v10  ;;  %v15870_v48 = vld [vmem:[#allocation5_spill] sm:$0xff] }
 0x87e   : > { %v7011_v37 = vpop.f32.mrf.mxu2 }
 0x87f   : > { %v9562_v33 = vmax.f32 %v9434_v4, 0.0  ;;  %v7209_v52 = vadd.f32 %v7011_v37, %v6162_v15  ;;  %v8058_v31 = vpop.f32.mrf.mxu3  ;;  %v5967_v21 = vpop.f32.mrf.mxu1 }
 0x880   : > { %v6163_v30 = vadd.f32 %v5967_v21, %v15867_v50  ;;  %v11323_v21 = vld [vmem:[%s12068_s27 + $0x1b90] sm:$0xff] }
 0x881   : > { %9691 = vst.msk [vmem:[%s14162_s13 + $0x2e0] sm:$0xff] %vm9598_vm2, %v9562_v33  ;;  %v8256_v19 = vadd.f32 %v8058_v31, %v7209_v52  ;;  %v11065_v31 = vld [vmem:[%s12068_s27 + $0x1790] sm:$0xff] }
 0x882   : > { %v9108_v16 = vpop.f32.mrf.mxu0  ;;  %11191 = vmatmul.msk.f32.gmra.mxu1 %vm431_vm1, %v11061_v23 }
 0x883   : > { %v9303_v22 = vadd.f32 %v9105_v7, %v8256_v19  ;;  %11449 = vmatmul.msk.f32.gmra.mxu2 %vm431_vm1, %v11319_v26  ;;  %v11581_v26 = vld [vmem:[%s12068_s27 + $0x1f90] sm:$0xff] }
 0x884   : > { %11707 = vmatmul.msk.f32.gmra.mxu3 %vm431_vm1, %v11577_v57  ;;  %v11839_v57 = vld [vmem:[%s12068_s27 + $0x2390] sm:$0xff] }
 0x885   : > { %11965 = vmatmul.msk.f32.gmra.mxu0 %vm431_vm1, %v11835_v36  ;;  %v9435_v54 = vadd.f32 %v15148_v11, %v9303_v22  ;;  %v15871_v36 = vld [vmem:[#allocation7_spill] sm:$0xff] }
 0x886   : > { %v7014_v17 = vpop.f32.mrf.mxu2 }
 0x887   : > { %v9563_v55 = vmax.f32 %v9435_v54, 0.0  ;;  %v7210_v58 = vadd.f32 %v7014_v17, %v6163_v30  ;;  %v8061_v49 = vpop.f32.mrf.mxu3  ;;  %v5970_v24 = vpop.f32.mrf.mxu1 }
 0x888   : > { %v6164_v28 = vadd.f32 %v5970_v24, %v15868_v8  ;;  %v11324_v24 = vld [vmem:[%s12068_s27 + $0x1b98] sm:$0xff] }
 0x889   : > { %9692 = vst.msk [vmem:[%s14162_s13 + $0x2e8] sm:$0xff] %vm9598_vm2, %v9563_v55  ;;  %v8257_v40 = vadd.f32 %v8061_v49, %v7210_v58  ;;  %v11066_v49 = vld [vmem:[%s12068_s27 + $0x1798] sm:$0xff] }
 0x88a   : > { %v9111_v41 = vpop.f32.mrf.mxu0  ;;  %11192 = vmatmul.msk.f32.gmra.mxu1 %vm431_vm1, %v11062_v42 }
 0x88b   : > { %v9304_v12 = vadd.f32 %v9108_v16, %v8257_v40  ;;  %11450 = vmatmul.msk.f32.gmra.mxu2 %vm431_vm1, %v11320_v0  ;;  %v11582_v0 = vld [vmem:[%s12068_s27 + $0x1f98] sm:$0xff] }
 0x88c   : > { %11708 = vmatmul.msk.f32.gmra.mxu3 %vm431_vm1, %v11578_v59  ;;  %v11840_v59 = vld [vmem:[%s12068_s27 + $0x2398] sm:$0xff] }
 0x88d   : > { %11966 = vmatmul.msk.f32.gmra.mxu0 %vm431_vm1, %v11836_v13  ;;  %v9436_v63 = vadd.f32 %v15148_v11, %v9304_v12  ;;  %v15872_v13 = vld [vmem:[#allocation9_spill] sm:$0xff] }
 0x88e   : > { %v7017_v18 = vpop.f32.mrf.mxu2 }
 0x88f   : > { %v9564_v1 = vmax.f32 %v9436_v63, 0.0  ;;  %v7211_v46 = vadd.f32 %v7017_v18, %v6164_v28  ;;  %v8064_v61 = vpop.f32.mrf.mxu3  ;;  %v5973_v32 = vpop.f32.mrf.mxu1 }
 0x890   : > { %v6165_v44 = vadd.f32 %v5973_v32, %v15869_v39  ;;  %v11325_v32 = vld [vmem:[%s12068_s27 + $0x1ba0] sm:$0xff] }
 0x891   : > { %9693 = vst.msk [vmem:[%s14162_s13 + $0x2f0] sm:$0xff] %vm9598_vm2, %v9564_v1  ;;  %v8258_v43 = vadd.f32 %v8064_v61, %v7211_v46  ;;  %v11067_v61 = vld [vmem:[%s12068_s27 + $0x17a0] sm:$0xff] }
 0x892   : > { %v9114_v25 = vpop.f32.mrf.mxu0  ;;  %11193 = vmatmul.msk.f32.gmra.mxu1 %vm431_vm1, %v11063_v5 }
 0x893   : > { %v9305_v6 = vadd.f32 %v9111_v41, %v8258_v43  ;;  %11451 = vmatmul.msk.f32.gmra.mxu2 %vm431_vm1, %v11321_v47  ;;  %v11583_v47 = vld [vmem:[%s12068_s27 + $0x1fa0] sm:$0xff] }
 0x894   : > { %11709 = vmatmul.msk.f32.gmra.mxu3 %vm431_vm1, %v11579_v34  ;;  %v11841_v34 = vld [vmem:[%s12068_s27 + $0x23a0] sm:$0xff] }
 0x895   : > { %11967 = vmatmul.msk.f32.gmra.mxu0 %vm431_vm1, %v11837_v3  ;;  %v9437_v2 = vadd.f32 %v15148_v11, %v9305_v6  ;;  %v15873_v3 = vld [vmem:[#allocation11_spill] sm:$0xff] }
 0x896   : > { %v7020_v29 = vpop.f32.mrf.mxu2 }
 0x897   : > { %v9565_v35 = vmax.f32 %v9437_v2, 0.0  ;;  %v7212_v45 = vadd.f32 %v7020_v29, %v6165_v44  ;;  %v8067_v56 = vpop.f32.mrf.mxu3  ;;  %v5976_v9 = vpop.f32.mrf.mxu1 }
 0x898   : > { %v6166_v10 = vadd.f32 %v5976_v9, %v15870_v48  ;;  %v11326_v9 = vld [vmem:[%s12068_s27 + $0x1ba8] sm:$0xff] }
 0x899   : > { %9694 = vst.msk [vmem:[%s14162_s13 + $0x2f8] sm:$0xff] %vm9598_vm2, %v9565_v35  ;;  %v8259_v62 = vadd.f32 %v8067_v56, %v7212_v45  ;;  %v11068_v56 = vld [vmem:[%s12068_s27 + $0x17a8] sm:$0xff] }
 0x89a   : > { %v9117_v53 = vpop.f32.mrf.mxu0  ;;  %11194 = vmatmul.msk.f32.gmra.mxu1 %vm431_vm1, %v11064_v51 }
 0x89b   : > { %v9306_v7 = vadd.f32 %v9114_v25, %v8259_v62  ;;  %11452 = vmatmul.msk.f32.gmra.mxu2 %vm431_vm1, %v11322_v27  ;;  %v11584_v27 = vld [vmem:[%s12068_s27 + $0x1fa8] sm:$0xff] }
 0x89c   : > { %11710 = vmatmul.msk.f32.gmra.mxu3 %vm431_vm1, %v11580_v14  ;;  %v11842_v14 = vld [vmem:[%s12068_s27 + $0x23a8] sm:$0xff] }
 0x89d   : > { %11968 = vmatmul.msk.f32.gmra.mxu0 %vm431_vm1, %v11838_v60  ;;  %v9438_v20 = vadd.f32 %v15148_v11, %v9306_v7  ;;  %v15874_v60 = vld [vmem:[#allocation13_spill] sm:$0xff] }
 0x89e   : > { %v7023_v15 = vpop.f32.mrf.mxu2 }
 0x89f   : > { %v9566_v4 = vmax.f32 %v9438_v20, 0.0  ;;  %v7213_v37 = vadd.f32 %v7023_v15, %v6166_v10  ;;  %v8070_v33 = vpop.f32.mrf.mxu3  ;;  %v5979_v52 = vpop.f32.mrf.mxu1 }
 0x8a0   : > { %v6167_v22 = vadd.f32 %v5979_v52, %v15871_v36  ;;  %v11327_v52 = vld [vmem:[%s12068_s27 + $0x1bb0] sm:$0xff] }
 0x8a1   : > { %9695 = vst.msk [vmem:[%s14162_s13 + $0x300] sm:$0xff] %vm9598_vm2, %v9566_v4  ;;  %v8260_v23 = vadd.f32 %v8070_v33, %v7213_v37  ;;  %v11069_v33 = vld [vmem:[%s12068_s27 + $0x17b0] sm:$0xff] }
 0x8a2   : > { %v9120_v19 = vpop.f32.mrf.mxu0  ;;  %11195 = vmatmul.msk.f32.gmra.mxu1 %vm431_vm1, %v11065_v31 }
 0x8a3   : > { %v9307_v16 = vadd.f32 %v9117_v53, %v8260_v23  ;;  %11453 = vmatmul.msk.f32.gmra.mxu2 %vm431_vm1, %v11323_v21  ;;  %v11585_v21 = vld [vmem:[%s12068_s27 + $0x1fb0] sm:$0xff] }
 0x8a4   : > { %11711 = vmatmul.msk.f32.gmra.mxu3 %vm431_vm1, %v11581_v26  ;;  %v11843_v26 = vld [vmem:[%s12068_s27 + $0x23b0] sm:$0xff] }
 0x8a5   : > { %11969 = vmatmul.msk.f32.gmra.mxu0 %vm431_vm1, %v11839_v57  ;;  %v9439_v50 = vadd.f32 %v15148_v11, %v9307_v16  ;;  %v15875_v57 = vld [vmem:[#allocation15_spill] sm:$0xff] }
 0x8a6   : > { %v7026_v30 = vpop.f32.mrf.mxu2 }
 0x8a7   : > { %v9567_v54 = vmax.f32 %v9439_v50, 0.0  ;;  %v7214_v17 = vadd.f32 %v7026_v30, %v6167_v22  ;;  %v8073_v55 = vpop.f32.mrf.mxu3  ;;  %v5982_v58 = vpop.f32.mrf.mxu1 }
 0x8a8   : > { %v6168_v12 = vadd.f32 %v5982_v58, %v15872_v13  ;;  %v11328_v58 = vld [vmem:[%s12068_s27 + $0x1bb8] sm:$0xff] }
 0x8a9   : > { %9696 = vst.msk [vmem:[%s14162_s13 + $0x308] sm:$0xff] %vm9598_vm2, %v9567_v54  ;;  %v8261_v42 = vadd.f32 %v8073_v55, %v7214_v17  ;;  %v11070_v55 = vld [vmem:[%s12068_s27 + $0x17b8] sm:$0xff] }
 0x8aa   : > { %v9123_v40 = vpop.f32.mrf.mxu0  ;;  %11196 = vmatmul.msk.f32.gmra.mxu1 %vm431_vm1, %v11066_v49 }
 0x8ab   : > { %v9308_v41 = vadd.f32 %v9120_v19, %v8261_v42  ;;  %11454 = vmatmul.msk.f32.gmra.mxu2 %vm431_vm1, %v11324_v24  ;;  %v11586_v24 = vld [vmem:[%s12068_s27 + $0x1fb8] sm:$0xff] }
 0x8ac   : > { %11712 = vmatmul.msk.f32.gmra.mxu3 %vm431_vm1, %v11582_v0  ;;  %v11844_v0 = vld [vmem:[%s12068_s27 + $0x23b8] sm:$0xff] }
 0x8ad   : > { %11970 = vmatmul.msk.f32.gmra.mxu0 %vm431_vm1, %v11840_v59  ;;  %v9440_v8 = vadd.f32 %v15148_v11, %v9308_v41  ;;  %v15876_v59 = vld [vmem:[#allocation17_spill] sm:$0xff] }
 0x8ae   : > { %v7029_v28 = vpop.f32.mrf.mxu2 }
 0x8af   : > { %v9568_v63 = vmax.f32 %v9440_v8, 0.0  ;;  %v7215_v18 = vadd.f32 %v7029_v28, %v6168_v12  ;;  %v8076_v1 = vpop.f32.mrf.mxu3  ;;  %v5985_v46 = vpop.f32.mrf.mxu1 }
 0x8b0   : > { %v6169_v6 = vadd.f32 %v5985_v46, %v15873_v3  ;;  %v11329_v46 = vld [vmem:[%s12068_s27 + $0x1bc0] sm:$0xff] }
 0x8b1   : > { %9697 = vst.msk [vmem:[%s14162_s13 + $0x310] sm:$0xff] %vm9598_vm2, %v9568_v63  ;;  %v8262_v5 = vadd.f32 %v8076_v1, %v7215_v18  ;;  %v11071_v1 = vld [vmem:[%s12068_s27 + $0x17c0] sm:$0xff] }
 0x8b2   : > { %v9126_v43 = vpop.f32.mrf.mxu0  ;;  %11197 = vmatmul.msk.f32.gmra.mxu1 %vm431_vm1, %v11067_v61 }
 0x8b3   : > { %v9309_v25 = vadd.f32 %v9123_v40, %v8262_v5  ;;  %11455 = vmatmul.msk.f32.gmra.mxu2 %vm431_vm1, %v11325_v32  ;;  %v11587_v32 = vld [vmem:[%s12068_s27 + $0x1fc0] sm:$0xff] }
 0x8b4   : > { %11713 = vmatmul.msk.f32.gmra.mxu3 %vm431_vm1, %v11583_v47  ;;  %v11845_v47 = vld [vmem:[%s12068_s27 + $0x23c0] sm:$0xff] }
 0x8b5   : > { %11971 = vmatmul.msk.f32.gmra.mxu0 %vm431_vm1, %v11841_v34  ;;  %v9441_v39 = vadd.f32 %v15148_v11, %v9309_v25  ;;  %v15877_v34 = vld [vmem:[#allocation19_spill] sm:$0xff] }
 0x8b6   : > { %v7032_v44 = vpop.f32.mrf.mxu2 }
 0x8b7   : > { %v9569_v2 = vmax.f32 %v9441_v39, 0.0  ;;  %v7216_v29 = vadd.f32 %v7032_v44, %v6169_v6  ;;  %v8079_v35 = vpop.f32.mrf.mxu3  ;;  %v5988_v45 = vpop.f32.mrf.mxu1 }
 0x8b8   : > { %v6170_v7 = vadd.f32 %v5988_v45, %v15874_v60  ;;  %v11330_v45 = vld [vmem:[%s12068_s27 + $0x1bc8] sm:$0xff] }
 0x8b9   : > { %9698 = vst.msk [vmem:[%s14162_s13 + $0x318] sm:$0xff] %vm9598_vm2, %v9569_v2  ;;  %v8263_v51 = vadd.f32 %v8079_v35, %v7216_v29  ;;  %v11072_v35 = vld [vmem:[%s12068_s27 + $0x17c8] sm:$0xff] }
 0x8ba   : > { %v9129_v62 = vpop.f32.mrf.mxu0  ;;  %11198 = vmatmul.msk.f32.gmra.mxu1 %vm431_vm1, %v11068_v56 }
 0x8bb   : > { %v9310_v53 = vadd.f32 %v9126_v43, %v8263_v51  ;;  %11456 = vmatmul.msk.f32.gmra.mxu2 %vm431_vm1, %v11326_v9  ;;  %v11588_v9 = vld [vmem:[%s12068_s27 + $0x1fc8] sm:$0xff] }
 0x8bc   : > { %11714 = vmatmul.msk.f32.gmra.mxu3 %vm431_vm1, %v11584_v27  ;;  %v11846_v27 = vld [vmem:[%s12068_s27 + $0x23c8] sm:$0xff] }
 0x8bd   : > { %11972 = vmatmul.msk.f32.gmra.mxu0 %vm431_vm1, %v11842_v14  ;;  %v9442_v48 = vadd.f32 %v15148_v11, %v9310_v53  ;;  %v15878_v14 = vld [vmem:[#allocation21_spill] sm:$0xff] }
 0x8be   : > { %v7035_v10 = vpop.f32.mrf.mxu2 }
 0x8bf   : > { %v9570_v20 = vmax.f32 %v9442_v48, 0.0  ;;  %v7217_v15 = vadd.f32 %v7035_v10, %v6170_v7  ;;  %v8082_v4 = vpop.f32.mrf.mxu3  ;;  %v5991_v37 = vpop.f32.mrf.mxu1 }
 0x8c0   : > { %v6171_v16 = vadd.f32 %v5991_v37, %v15875_v57  ;;  %v11331_v37 = vld [vmem:[%s12068_s27 + $0x1bd0] sm:$0xff] }
 0x8c1   : > { %9699 = vst.msk [vmem:[%s14162_s13 + $0x320] sm:$0xff] %vm9598_vm2, %v9570_v20  ;;  %v8264_v31 = vadd.f32 %v8082_v4, %v7217_v15  ;;  %v11073_v4 = vld [vmem:[%s12068_s27 + $0x17d0] sm:$0xff] }
 0x8c2   : > { %v9132_v23 = vpop.f32.mrf.mxu0  ;;  %11199 = vmatmul.msk.f32.gmra.mxu1 %vm431_vm1, %v11069_v33 }
 0x8c3   : > { %v9311_v19 = vadd.f32 %v9129_v62, %v8264_v31  ;;  %11457 = vmatmul.msk.f32.gmra.mxu2 %vm431_vm1, %v11327_v52  ;;  %v11589_v52 = vld [vmem:[%s12068_s27 + $0x1fd0] sm:$0xff] }
 0x8c4   : > { %11715 = vmatmul.msk.f32.gmra.mxu3 %vm431_vm1, %v11585_v21  ;;  %v11847_v21 = vld [vmem:[%s12068_s27 + $0x23d0] sm:$0xff] }
 0x8c5   : > { %11973 = vmatmul.msk.f32.gmra.mxu0 %vm431_vm1, %v11843_v26  ;;  %v9443_v36 = vadd.f32 %v15148_v11, %v9311_v19  ;;  %v15879_v26 = vld [vmem:[#allocation23_spill] sm:$0xff] }
 0x8c6   : > { %v7038_v22 = vpop.f32.mrf.mxu2 }
 0x8c7   : > { %v9571_v50 = vmax.f32 %v9443_v36, 0.0  ;;  %v7218_v30 = vadd.f32 %v7038_v22, %v6171_v16  ;;  %v8085_v54 = vpop.f32.mrf.mxu3  ;;  %v5994_v17 = vpop.f32.mrf.mxu1 }
 0x8c8   : > { %v6172_v41 = vadd.f32 %v5994_v17, %v15876_v59  ;;  %v11332_v17 = vld [vmem:[%s12068_s27 + $0x1bd8] sm:$0xff] }
 0x8c9   : > { %9700 = vst.msk [vmem:[%s14162_s13 + $0x328] sm:$0xff] %vm9598_vm2, %v9571_v50  ;;  %v8265_v49 = vadd.f32 %v8085_v54, %v7218_v30  ;;  %v11074_v54 = vld [vmem:[%s12068_s27 + $0x17d8] sm:$0xff] }
 0x8ca   : > { %v9135_v42 = vpop.f32.mrf.mxu0  ;;  %11200 = vmatmul.msk.f32.gmra.mxu1 %vm431_vm1, %v11070_v55 }
 0x8cb   : > { %v9312_v40 = vadd.f32 %v9132_v23, %v8265_v49  ;;  %11458 = vmatmul.msk.f32.gmra.mxu2 %vm431_vm1, %v11328_v58  ;;  %v11590_v58 = vld [vmem:[%s12068_s27 + $0x1fd8] sm:$0xff] }
 0x8cc   : > { %11716 = vmatmul.msk.f32.gmra.mxu3 %vm431_vm1, %v11586_v24  ;;  %v11848_v24 = vld [vmem:[%s12068_s27 + $0x23d8] sm:$0xff] }
 0x8cd   : > { %11974 = vmatmul.msk.f32.gmra.mxu0 %vm431_vm1, %v11844_v0  ;;  %v9444_v13 = vadd.f32 %v15148_v11, %v9312_v40  ;;  %v15880_v0 = vld [vmem:[#allocation25_spill] sm:$0xff] }
 0x8ce   : > { %v7041_v12 = vpop.f32.mrf.mxu2 }
 0x8cf   : > { %v9572_v8 = vmax.f32 %v9444_v13, 0.0  ;;  %v7219_v28 = vadd.f32 %v7041_v12, %v6172_v41  ;;  %v8088_v63 = vpop.f32.mrf.mxu3  ;;  %v5997_v18 = vpop.f32.mrf.mxu1 }
 0x8d0   : > { %v6173_v25 = vadd.f32 %v5997_v18, %v15877_v34  ;;  %v11333_v18 = vld [vmem:[%s12068_s27 + $0x1be0] sm:$0xff] }
 0x8d1   : > { %9701 = vst.msk [vmem:[%s14162_s13 + $0x330] sm:$0xff] %vm9598_vm2, %v9572_v8  ;;  %v8266_v61 = vadd.f32 %v8088_v63, %v7219_v28  ;;  %v11075_v63 = vld [vmem:[%s12068_s27 + $0x17e0] sm:$0xff] }
 0x8d2   : > { %v9138_v5 = vpop.f32.mrf.mxu0  ;;  %11201 = vmatmul.msk.f32.gmra.mxu1 %vm431_vm1, %v11071_v1 }
 0x8d3   : > { %v9313_v43 = vadd.f32 %v9135_v42, %v8266_v61  ;;  %11459 = vmatmul.msk.f32.gmra.mxu2 %vm431_vm1, %v11329_v46  ;;  %v11591_v46 = vld [vmem:[%s12068_s27 + $0x1fe0] sm:$0xff] }
 0x8d4   : > { %11717 = vmatmul.msk.f32.gmra.mxu3 %vm431_vm1, %v11587_v32  ;;  %v11849_v32 = vld [vmem:[%s12068_s27 + $0x23e0] sm:$0xff] }
 0x8d5   : > { %11975 = vmatmul.msk.f32.gmra.mxu0 %vm431_vm1, %v11845_v47  ;;  %v9445_v3 = vadd.f32 %v15148_v11, %v9313_v43  ;;  %v15881_v47 = vld [vmem:[#allocation27_spill] sm:$0xff] }
 0x8d6   : > { %v7044_v6 = vpop.f32.mrf.mxu2 }
 0x8d7   : > { %v9573_v39 = vmax.f32 %v9445_v3, 0.0  ;;  %v7220_v44 = vadd.f32 %v7044_v6, %v6173_v25  ;;  %v8091_v2 = vpop.f32.mrf.mxu3  ;;  %v6000_v29 = vpop.f32.mrf.mxu1 }
 0x8d8   : > { %v6174_v53 = vadd.f32 %v6000_v29, %v15878_v14  ;;  %v11334_v29 = vld [vmem:[%s12068_s27 + $0x1be8] sm:$0xff] }
 0x8d9   : > { %9702 = vst.msk [vmem:[%s14162_s13 + $0x338] sm:$0xff] %vm9598_vm2, %v9573_v39  ;;  %v8267_v56 = vadd.f32 %v8091_v2, %v7220_v44  ;;  %v11076_v2 = vld [vmem:[%s12068_s27 + $0x17e8] sm:$0xff] }
 0x8da   : > { %v9141_v51 = vpop.f32.mrf.mxu0  ;;  %11202 = vmatmul.msk.f32.gmra.mxu1 %vm431_vm1, %v11072_v35 }
 0x8db   : > { %v9314_v62 = vadd.f32 %v9138_v5, %v8267_v56  ;;  %11460 = vmatmul.msk.f32.gmra.mxu2 %vm431_vm1, %v11330_v45  ;;  %v11592_v45 = vld [vmem:[%s12068_s27 + $0x1fe8] sm:$0xff] }
 0x8dc   : > { %11718 = vmatmul.msk.f32.gmra.mxu3 %vm431_vm1, %v11588_v9  ;;  %v11850_v9 = vld [vmem:[%s12068_s27 + $0x23e8] sm:$0xff] }
 0x8dd   : > { %11976 = vmatmul.msk.f32.gmra.mxu0 %vm431_vm1, %v11846_v27  ;;  %v9446_v60 = vadd.f32 %v15148_v11, %v9314_v62  ;;  %v15477_v62 = vld [vmem:[%s15578_s2] ss:$0 sm:$0xff] }
 0x8de   : > { %v7047_v7 = vpop.f32.mrf.mxu2 }
 0x8df   : > { %v9574_v48 = vmax.f32 %v9446_v60, 0.0  ;;  %v7221_v10 = vadd.f32 %v7047_v7, %v6174_v53  ;;  %v8094_v20 = vpop.f32.mrf.mxu3  ;;  %v6003_v15 = vpop.f32.mrf.mxu1 }
 0x8e0   : > { %v6175_v19 = vadd.f32 %v6003_v15, %v15879_v26  ;;  %v11335_v15 = vld [vmem:[%s12068_s27 + $0x1bf0] sm:$0xff] }
 0x8e1   : > { %9703 = vst.msk [vmem:[%s14162_s13 + $0x340] sm:$0xff] %vm9598_vm2, %v9574_v48  ;;  %v8268_v33 = vadd.f32 %v8094_v20, %v7221_v10  ;;  %v11077_v20 = vld [vmem:[%s12068_s27 + $0x17f0] sm:$0xff] }
 0x8e2   : > { %v9144_v31 = vpop.f32.mrf.mxu0  ;;  %11203 = vmatmul.msk.f32.gmra.mxu1 %vm431_vm1, %v11073_v4 }
 0x8e3   : > { %v9315_v23 = vadd.f32 %v9141_v51, %v8268_v33  ;;  %11461 = vmatmul.msk.f32.gmra.mxu2 %vm431_vm1, %v11331_v37  ;;  %v11593_v37 = vld [vmem:[%s12068_s27 + $0x1ff0] sm:$0xff] }
 0x8e4   : > { %11719 = vmatmul.msk.f32.gmra.mxu3 %vm431_vm1, %v11589_v52  ;;  %v11851_v52 = vld [vmem:[%s12068_s27 + $0x23f0] sm:$0xff] }
 0x8e5   : > { %11977 = vmatmul.msk.f32.gmra.mxu0 %vm431_vm1, %v11847_v21  ;;  %v9447_v57 = vadd.f32 %v15148_v11, %v9315_v23  ;;  %v15883_v21 = vld [vmem:[#allocation31_spill] sm:$0xff] }
 0x8e6   : > { %v7050_v16 = vpop.f32.mrf.mxu2 }
 0x8e7   : > { %v9575_v36 = vmax.f32 %v9447_v57, 0.0  ;;  %v7222_v22 = vadd.f32 %v7050_v16, %v6175_v19  ;;  %v8097_v50 = vpop.f32.mrf.mxu3  ;;  %v6006_v30 = vpop.f32.mrf.mxu1 }
 0x8e8   : > { %v6176_v40 = vadd.f32 %v6006_v30, %v15880_v0  ;;  %v11336_v30 = vld [vmem:[%s12068_s27 + $0x1bf8] sm:$0xff] }
 0x8e9   : > { %9704 = vst.msk [vmem:[%s14162_s13 + $0x348] sm:$0xff] %vm9598_vm2, %v9575_v36  ;;  %v8269_v55 = vadd.f32 %v8097_v50, %v7222_v22  ;;  %v11078_v50 = vld [vmem:[%s12068_s27 + $0x17f8] sm:$0xff] }
 0x8ea   : > { %v9147_v49 = vpop.f32.mrf.mxu0  ;;  %11204 = vmatmul.msk.f32.gmra.mxu1 %vm431_vm1, %v11074_v54 }
 0x8eb   : > { %v9316_v42 = vadd.f32 %v9144_v31, %v8269_v55  ;;  %11462 = vmatmul.msk.f32.gmra.mxu2 %vm431_vm1, %v11332_v17  ;;  %v11594_v17 = vld [vmem:[%s12068_s27 + $0x1ff8] sm:$0xff] }
 0x8ec   : > { %11720 = vmatmul.msk.f32.gmra.mxu3 %vm431_vm1, %v11590_v58  ;;  %v11852_v58 = vld [vmem:[%s12068_s27 + $0x23f8] sm:$0xff] }
 0x8ed   : > { %11978 = vmatmul.msk.f32.gmra.mxu0 %vm431_vm1, %v11848_v24  ;;  %v9448_v59 = vadd.f32 %v15148_v11, %v9316_v42  ;;  %v15884_v24 = vld [vmem:[#allocation33_spill] sm:$0xff] }
 0x8ee   : > { %v7053_v41 = vpop.f32.mrf.mxu2 }
 0x8ef   : > { %v9576_v13 = vmax.f32 %v9448_v59, 0.0  ;;  %v7223_v12 = vadd.f32 %v7053_v41, %v6176_v40  ;;  %v8100_v8 = vpop.f32.mrf.mxu3  ;;  %v6009_v28 = vpop.f32.mrf.mxu1 }
 0x8f0   : > { %v6177_v43 = vadd.f32 %v6009_v28, %v15881_v47 }
 0x8f1   : > { %9705 = vst.msk [vmem:[%s14162_s13 + $0x350] sm:$0xff] %vm9598_vm2, %v9576_v13  ;;  %v8270_v1 = vadd.f32 %v8100_v8, %v7223_v12 }
 0x8f2   : > { %v9150_v61 = vpop.f32.mrf.mxu0  ;;  %11205 = vmatmul.msk.f32.gmra.mxu1 %vm431_vm1, %v11075_v63 }
 0x8f3   : > { %v9317_v5 = vadd.f32 %v9147_v49, %v8270_v1  ;;  %11463 = vmatmul.msk.f32.gmra.mxu2 %vm431_vm1, %v11333_v18  ;;  %v15885_v18 = vld [vmem:[#allocation36_spill] sm:$0xff] }
 0x8f4   : > { %11721 = vmatmul.msk.f32.gmra.mxu3 %vm431_vm1, %v11591_v46 }
 0x8f5   : > { %11979 = vmatmul.msk.f32.gmra.mxu0 %vm431_vm1, %v11849_v32  ;;  %v9449_v34 = vadd.f32 %v15148_v11, %v9317_v5  ;;  %v15882_v11 = vld [vmem:[#allocation29_spill] sm:$0xff] }
 0x8f6   : > { %v7056_v25 = vpop.f32.mrf.mxu2 }
 0x8f7   : > { %v9577_v3 = vmax.f32 %v9449_v34, 0.0  ;;  %v7224_v6 = vadd.f32 %v7056_v25, %v6177_v43  ;;  %v8103_v39 = vpop.f32.mrf.mxu3  ;;  %v6012_v44 = vpop.f32.mrf.mxu1 }
 0x8f8   : > { %v6178_v27 = vadd.f32 %v6012_v44, %v15882_v11 }
 0x8f9   : > { %9706 = vst.msk [vmem:[%s14162_s13 + $0x358] sm:$0xff] %vm9598_vm2, %v9577_v3  ;;  %v8271_v35 = vadd.f32 %v8103_v39, %v7224_v6  ;;  %v15886_v6 = vld [vmem:[#allocation39_spill] sm:$0xff] }
 0x8fa   : > { %v9153_v56 = vpop.f32.mrf.mxu0  ;;  %11206 = vmatmul.msk.f32.gmra.mxu1 %vm431_vm1, %v11076_v2 }
 0x8fb   : > { %v9318_v51 = vadd.f32 %v9150_v61, %v8271_v35  ;;  %11464 = vmatmul.msk.f32.gmra.mxu2 %vm431_vm1, %v11334_v29 }
 0x8fc   : > { %11722 = vmatmul.msk.f32.gmra.mxu3 %vm431_vm1, %v11592_v45 }
 0x8fd   : > { %11980 = vmatmul.msk.f32.gmra.mxu0 %vm431_vm1, %v11850_v9  ;;  %v9450_v14 = vadd.f32 %v15477_v62, %v9318_v51 }
 0x8fe   : > { %v7059_v53 = vpop.f32.mrf.mxu2 }
 0x8ff   : > { %v9578_v60 = vmax.f32 %v9450_v14, 0.0  ;;  %v7225_v7 = vadd.f32 %v7059_v53, %v6178_v27  ;;  %v8106_v48 = vpop.f32.mrf.mxu3  ;;  %v6015_v10 = vpop.f32.mrf.mxu1  ;;  %v15887_v27 = vld [vmem:[#allocation42_spill] sm:$0xff] }
 0x900   : > { %v6179_v23 = vadd.f32 %v6015_v10, %v15883_v21 }
 0x901   : > { %9707 = vst.msk [vmem:[%s14162_s13 + $0x360] sm:$0xff] %vm9598_vm2, %v9578_v60  ;;  %v8272_v4 = vadd.f32 %v8106_v48, %v7225_v7 }
 0x902   : > { %v9156_v33 = vpop.f32.mrf.mxu0  ;;  %11207 = vmatmul.msk.f32.gmra.mxu1 %vm431_vm1, %v11077_v20 }
 0x903   : > { %v9319_v31 = vadd.f32 %v9153_v56, %v8272_v4  ;;  %11465 = vmatmul.msk.f32.gmra.mxu2 %vm431_vm1, %v11335_v15 }
 0x904   : > { %11723 = vmatmul.msk.f32.gmra.mxu3 %vm431_vm1, %v11593_v37 }
 0x905   : > { %11981 = vmatmul.msk.f32.gmra.mxu0 %vm431_vm1, %v11851_v52  ;;  %v9451_v26 = vadd.f32 %v15477_v62, %v9319_v31 }
 0x906   : > { %v7062_v19 = vpop.f32.mrf.mxu2 }
 0x907   : > { %v9579_v57 = vmax.f32 %v9451_v26, 0.0  ;;  %v7226_v16 = vadd.f32 %v7062_v19, %v6179_v23  ;;  %v8109_v36 = vpop.f32.mrf.mxu3  ;;  %v6018_v22 = vpop.f32.mrf.mxu1 }
 0x908   : > { %v6180_v42 = vadd.f32 %v6018_v22, %v15884_v24 }
 0x909   : > { %9708 = vst.msk [vmem:[%s14162_s13 + $0x368] sm:$0xff] %vm9598_vm2, %v9579_v57  ;;  %v8273_v54 = vadd.f32 %v8109_v36, %v7226_v16 }
 0x90a   : > { %v9159_v55 = vpop.f32.mrf.mxu0  ;;  %11208 = vmatmul.msk.f32.gmra.mxu1 %vm431_vm1, %v11078_v50  ;;  %v15889_v50 = vld [vmem:[#allocation48_spill] sm:$0xff] }
 0x90b   : > { %v9320_v49 = vadd.f32 %v9156_v33, %v8273_v54  ;;  %11466 = vmatmul.msk.f32.gmra.mxu2 %vm431_vm1, %v11336_v30  ;;  %v15888_v33 = vld [vmem:[#allocation45_spill] sm:$0xff] }
 0x90c   : > { %11724 = vmatmul.msk.f32.gmra.mxu3 %vm431_vm1, %v11594_v17 }
 0x90d   : > { %11982 = vmatmul.msk.f32.gmra.mxu0 %vm431_vm1, %v11852_v58  ;;  %v9452_v0 = vadd.f32 %v15477_v62, %v9320_v49 }
 0x90e   : > { %v7065_v40 = vpop.f32.mrf.mxu2 }
 0x90f   : > { %v9580_v59 = vmax.f32 %v9452_v0, 0.0  ;;  %v7227_v41 = vadd.f32 %v7065_v40, %v6180_v42  ;;  %v8112_v13 = vpop.f32.mrf.mxu3  ;;  %v6021_v12 = vpop.f32.mrf.mxu1 }
 0x910   : > { %v6181_v1 = vadd.f32 %v6021_v12, %v15885_v18 }
 0x911   : > { %9709 = vst.msk [vmem:[%s14162_s13 + $0x370] sm:$0xff] %vm9598_vm2, %v9580_v59  ;;  %v8274_v8 = vadd.f32 %v8112_v13, %v7227_v41  ;;  %v15890_v59 = vld [vmem:[#allocation51_spill] sm:$0xff] }
 0x912   : > { %v9162_v28 = vpop.f32.mrf.mxu0 }
 0x913   : > { %v9321_v63 = vadd.f32 %v9159_v55, %v8274_v8 }
 0x915   : > { %v9453_v46 = vadd.f32 %v15477_v62, %v9321_v63 }
 0x916   : > { %v7068_v61 = vpop.f32.mrf.mxu2 }
 0x917   : > { %v9581_v32 = vmax.f32 %v9453_v46, 0.0  ;;  %v7228_v5 = vadd.f32 %v7068_v61, %v6181_v1  ;;  %v8115_v47 = vpop.f32.mrf.mxu3  ;;  %v6024_v43 = vpop.f32.mrf.mxu1 }
 0x918   : > { %v6182_v39 = vadd.f32 %v6024_v43, %v15886_v6 }
 0x919   : > { %9710 = vst.msk [vmem:[%s14162_s13 + $0x378] sm:$0xff] %vm9598_vm2, %v9581_v32  ;;  %v8275_v34 = vadd.f32 %v8115_v47, %v7228_v5  ;;  %v15891_v32 = vld [vmem:[#allocation54_spill] sm:$0xff] }
 0x91a   : > { %v9165_v25 = vpop.f32.mrf.mxu0 }
 0x91b   : > { %v9322_v3 = vadd.f32 %v9162_v28, %v8275_v34 }
 0x91d   : > { %v9454_v44 = vadd.f32 %v15477_v62, %v9322_v3 }
 0x91e   : > { %v7071_v2 = vpop.f32.mrf.mxu2 }
 0x91f   : > { %v9582_v29 = vmax.f32 %v9454_v44, 0.0  ;;  %v7229_v35 = vadd.f32 %v7071_v2, %v6182_v39  ;;  %v8118_v45 = vpop.f32.mrf.mxu3  ;;  %v6027_v56 = vpop.f32.mrf.mxu1 }
 0x920   : > { %v6183_v14 = vadd.f32 %v6027_v56, %v15887_v27 }
 0x921   : > { %9711 = vst.msk [vmem:[%s14162_s13 + $0x380] sm:$0xff] %vm9598_vm2, %v9582_v29  ;;  %v8276_v9 = vadd.f32 %v8118_v45, %v7229_v35  ;;  %v15892_v29 = vld [vmem:[#allocation57_spill] sm:$0xff] }
 0x922   : > { %v9168_v51 = vpop.f32.mrf.mxu0 }
 0x923   : > { %v9323_v11 = vadd.f32 %v9165_v25, %v8276_v9 }
 0x925   : > { %v9455_v53 = vadd.f32 %v15477_v62, %v9323_v11 }
 0x926   : > { %v7074_v60 = vpop.f32.mrf.mxu2 }
 0x927   : > { %v9583_v7 = vmax.f32 %v9455_v53, 0.0  ;;  %v7230_v48 = vadd.f32 %v7074_v60, %v6183_v14  ;;  %v8121_v10 = vpop.f32.mrf.mxu3  ;;  %v6030_v20 = vpop.f32.mrf.mxu1 }
 0x928   : > { %v6184_v52 = vadd.f32 %v6030_v20, %v15888_v33 }
 0x929   : > { %9712 = vst.msk [vmem:[%s14162_s13 + $0x388] sm:$0xff] %vm9598_vm2, %v9583_v7  ;;  %v8277_v15 = vadd.f32 %v8121_v10, %v7230_v48  ;;  %v15893_v7 = vld [vmem:[#allocation60_spill] sm:$0xff] }
 0x92a   : > { %v9171_v4 = vpop.f32.mrf.mxu0 }
 0x92b   : > { %v9324_v37 = vadd.f32 %v9168_v51, %v8277_v15 }
 0x92d   : > { %v9456_v31 = vadd.f32 %v15477_v62, %v9324_v37 }
 0x92e   : > { %v7077_v21 = vpop.f32.mrf.mxu2 }
 0x92f   : > { %v9584_v23 = vmax.f32 %v9456_v31, 0.0  ;;  %v7231_v26 = vadd.f32 %v7077_v21, %v6184_v52  ;;  %v8124_v19 = vpop.f32.mrf.mxu3  ;;  %v6033_v57 = vpop.f32.mrf.mxu1 }
 0x930   : > { %v6185_v30 = vadd.f32 %v6033_v57, %v15889_v50 }
 0x931   : > { %9713 = vst.msk [vmem:[%s14162_s13 + $0x390] sm:$0xff] %vm9598_vm2, %v9584_v23  ;;  %v8278_v16 = vadd.f32 %v8124_v19, %v7231_v26  ;;  %v15894_v23 = vld [vmem:[#allocation63_spill] sm:$0xff] }
 0x932   : > { %v9174_v36 = vpop.f32.mrf.mxu0 }
 0x933   : > { %v9325_v22 = vadd.f32 %v9171_v4, %v8278_v16 }
 0x935   : > { %v9457_v54 = vadd.f32 %v15477_v62, %v9325_v22 }
 0x936   : > { %v7080_v17 = vpop.f32.mrf.mxu2 }
 0x937   : > { %v9585_v55 = vmax.f32 %v9457_v54, 0.0  ;;  %v7232_v58 = vadd.f32 %v7080_v17, %v6185_v30  ;;  %v8127_v49 = vpop.f32.mrf.mxu3  ;;  %v6036_v24 = vpop.f32.mrf.mxu1 }
 0x938   : > { %v6186_v41 = vadd.f32 %v6036_v24, %v15890_v59 }
 0x939   : > { %9714 = vst.msk [vmem:[%s14162_s13 + $0x398] sm:$0xff] %vm9598_vm2, %v9585_v55  ;;  %v8279_v42 = vadd.f32 %v8127_v49, %v7232_v58  ;;  %v15895_v55 = vld [vmem:[#allocation66_spill] sm:$0xff] }
 0x93a   : > { %v9177_v0 = vpop.f32.mrf.mxu0 }
 0x93b   : > { %v9326_v40 = vadd.f32 %v9174_v36, %v8279_v42 }
 0x93d   : > { %v9458_v13 = vadd.f32 %v15477_v62, %v9326_v40 }
 0x93e   : > { %v7083_v12 = vpop.f32.mrf.mxu2 }
 0x93f   : > { %v9586_v8 = vmax.f32 %v9458_v13, 0.0  ;;  %v7233_v28 = vadd.f32 %v7083_v12, %v6186_v41  ;;  %v8130_v63 = vpop.f32.mrf.mxu3  ;;  %v6039_v18 = vpop.f32.mrf.mxu1 }
 0x940   : > { %v6187_v5 = vadd.f32 %v6039_v18, %v15891_v32 }
 0x941   : > { %9715 = vst.msk [vmem:[%s14162_s13 + $0x3a0] sm:$0xff] %vm9598_vm2, %v9586_v8  ;;  %v8280_v1 = vadd.f32 %v8130_v63, %v7233_v28  ;;  %v15896_v8 = vld [vmem:[#allocation69_spill] sm:$0xff] }
 0x942   : > { %v9180_v46 = vpop.f32.mrf.mxu0 }
 0x943   : > { %v9327_v61 = vadd.f32 %v9177_v0, %v8280_v1 }
 0x945   : > { %v9459_v47 = vadd.f32 %v15477_v62, %v9327_v61 }
 0x946   : > { %v7086_v43 = vpop.f32.mrf.mxu2 }
 0x947   : > { %v9587_v34 = vmax.f32 %v9459_v47, 0.0  ;;  %v7234_v25 = vadd.f32 %v7086_v43, %v6187_v5  ;;  %v8133_v3 = vpop.f32.mrf.mxu3  ;;  %v6042_v6 = vpop.f32.mrf.mxu1 }
 0x948   : > { %v6188_v35 = vadd.f32 %v6042_v6, %v15892_v29 }
 0x949   : > { %9716 = vst.msk [vmem:[%s14162_s13 + $0x3a8] sm:$0xff] %vm9598_vm2, %v9587_v34  ;;  %v8281_v39 = vadd.f32 %v8133_v3, %v7234_v25  ;;  %v15897_v34 = vld [vmem:[#allocation72_spill] sm:$0xff] }
 0x94a   : > { %v9183_v44 = vpop.f32.mrf.mxu0 }
 0x94b   : > { %v9328_v2 = vadd.f32 %v9180_v46, %v8281_v39 }
 0x94d   : > { %v9460_v45 = vadd.f32 %v15477_v62, %v9328_v2 }
 0x94e   : > { %v7089_v56 = vpop.f32.mrf.mxu2 }
 0x94f   : > { %v9588_v9 = vmax.f32 %v9460_v45, 0.0  ;;  %v7235_v51 = vadd.f32 %v7089_v56, %v6188_v35  ;;  %v8136_v11 = vpop.f32.mrf.mxu3  ;;  %v6045_v27 = vpop.f32.mrf.mxu1 }
 0x950   : > { %v6189_v48 = vadd.f32 %v6045_v27, %v15893_v7 }
 0x951   : > { %9717 = vst.msk [vmem:[%s14162_s13 + $0x3b0] sm:$0xff] %vm9598_vm2, %v9588_v9  ;;  %v8282_v14 = vadd.f32 %v8136_v11, %v7235_v51  ;;  %v15898_v9 = vld [vmem:[#allocation75_spill] sm:$0xff] }
 0x952   : > { %v9186_v53 = vpop.f32.mrf.mxu0 }
 0x953   : > { %v9329_v60 = vadd.f32 %v9183_v44, %v8282_v14 }
 0x955   : > { %v9461_v10 = vadd.f32 %v15477_v62, %v9329_v60 }
 0x956   : > { %v7092_v20 = vpop.f32.mrf.mxu2 }
 0x957   : > { %v9589_v15 = vmax.f32 %v9461_v10, 0.0  ;;  %v7236_v4 = vadd.f32 %v7092_v20, %v6189_v48  ;;  %v8139_v37 = vpop.f32.mrf.mxu3  ;;  %v6048_v33 = vpop.f32.mrf.mxu1  ;;  %v15899_v20 = vld [vmem:[#allocation78_spill] sm:$0xff] }
 0x958   : > { %v6190_v26 = vadd.f32 %v6048_v33, %v15894_v23 }
 0x959   : > { %9718 = vst.msk [vmem:[%s14162_s13 + $0x3b8] sm:$0xff] %vm9598_vm2, %v9589_v15  ;;  %v8283_v52 = vadd.f32 %v8139_v37, %v7236_v4 }
 0x95a   : > { %v9189_v31 = vpop.f32.mrf.mxu0 }
 0x95b   : > { %v9330_v21 = vadd.f32 %v9186_v53, %v8283_v52 }
 0x95d   : > { %v9462_v19 = vadd.f32 %v15477_v62, %v9330_v21 }
 0x95e   : > { %v7095_v57 = vpop.f32.mrf.mxu2 }
 0x95f   : > { %v9590_v16 = vmax.f32 %v9462_v19, 0.0  ;;  %v7237_v36 = vadd.f32 %v7095_v57, %v6190_v26  ;;  %v8142_v22 = vpop.f32.mrf.mxu3  ;;  %v6051_v50 = vpop.f32.mrf.mxu1 }
 0x960   : > { %v6191_v58 = vadd.f32 %v6051_v50, %v15895_v55 }
 0x961   : > { %9719 = vst.msk [vmem:[%s14162_s13 + $0x3c0] sm:$0xff] %vm9598_vm2, %v9590_v16  ;;  %v8284_v30 = vadd.f32 %v8142_v22, %v7237_v36 }
 0x962   : > { %v9192_v54 = vpop.f32.mrf.mxu0 }
 0x963   : > { %v9331_v17 = vadd.f32 %v9189_v31, %v8284_v30 }
 0x965   : > { %v9463_v49 = vadd.f32 %v15477_v62, %v9331_v17 }
 0x966   : > { %v7098_v24 = vpop.f32.mrf.mxu2 }
 0x967   : > { %v9591_v42 = vmax.f32 %v9463_v49, 0.0  ;;  %v7238_v0 = vadd.f32 %v7098_v24, %v6191_v58  ;;  %v8145_v40 = vpop.f32.mrf.mxu3  ;;  %v6054_v59 = vpop.f32.mrf.mxu1 }
 0x968   : > { %v6192_v28 = vadd.f32 %v6054_v59, %v15896_v8 }
 0x969   : > { %9720 = vst.msk [vmem:[%s14162_s13 + $0x3c8] sm:$0xff] %vm9598_vm2, %v9591_v42  ;;  %v8285_v41 = vadd.f32 %v8145_v40, %v7238_v0 }
 0x96a   : > { %v9195_v13 = vpop.f32.mrf.mxu0 }
 0x96b   : > { %v9332_v12 = vadd.f32 %v9192_v54, %v8285_v41 }
 0x96d   : > { %v9464_v63 = vadd.f32 %v15477_v62, %v9332_v12 }
 0x96e   : > { %v7101_v18 = vpop.f32.mrf.mxu2 }
 0x96f   : > { %v9592_v1 = vmax.f32 %v9464_v63, 0.0  ;;  %v7239_v46 = vadd.f32 %v7101_v18, %v6192_v28  ;;  %v8148_v61 = vpop.f32.mrf.mxu3  ;;  %v6057_v32 = vpop.f32.mrf.mxu1 }
 0x970   : > { %v6193_v25 = vadd.f32 %v6057_v32, %v15897_v34 }
 0x971   : > { %9721 = vst.msk [vmem:[%s14162_s13 + $0x3d0] sm:$0xff] %vm9598_vm2, %v9592_v1  ;;  %v8286_v5 = vadd.f32 %v8148_v61, %v7239_v46 }
 0x972   : > { %v9198_v47 = vpop.f32.mrf.mxu0 }
 0x973   : > { %v9333_v43 = vadd.f32 %v9195_v13, %v8286_v5 }
 0x975   : > { %v9465_v3 = vadd.f32 %v15477_v62, %v9333_v43 }
 0x976   : > { %v7104_v6 = vpop.f32.mrf.mxu2 }
 0x977   : > { %v9593_v39 = vmax.f32 %v9465_v3, 0.0  ;;  %v7240_v44 = vadd.f32 %v7104_v6, %v6193_v25  ;;  %v8151_v2 = vpop.f32.mrf.mxu3  ;;  %v6060_v29 = vpop.f32.mrf.mxu1 }
 0x978   : > { %v6194_v51 = vadd.f32 %v6060_v29, %v15898_v9 }
 0x979   : > { %9722 = vst.msk [vmem:[%s14162_s13 + $0x3d8] sm:$0xff] %vm9598_vm2, %v9593_v39  ;;  %v8287_v35 = vadd.f32 %v8151_v2, %v7240_v44 }
 0x97a   : > { %v9201_v56 = vpop.f32.mrf.mxu0 }
 0x97b   : > { %v9334_v45 = vadd.f32 %v9198_v47, %v8287_v35 }
 0x97d   : > { %v9466_v11 = vadd.f32 %v15477_v62, %v9334_v45 }
 0x97e   : > { %v7107_v27 = vpop.f32.mrf.mxu2 }
 0x97f   : > { %v9594_v14 = vmax.f32 %v9466_v11, 0.0  ;;  %v7241_v53 = vadd.f32 %v7107_v27, %v6194_v51  ;;  %v8154_v60 = vpop.f32.mrf.mxu3  ;;  %v6063_v7 = vpop.f32.mrf.mxu1 }
 0x980   : > { %v6195_v15 = vadd.f32 %v6063_v7, %v15899_v20 }
 0x981   : > { %9723 = vst.msk [vmem:[%s14162_s13 + $0x3e0] sm:$0xff] %vm9598_vm2, %v9594_v14  ;;  %v8288_v48 = vadd.f32 %v8154_v60, %v7241_v53 }
 0x982   : > { %v9204_v33 = vpop.f32.mrf.mxu0 }
 0x983   : > { %v9335_v10 = vadd.f32 %v9201_v56, %v8288_v48 }
 0x985   : > { %v9467_v4 = vadd.f32 %v15477_v62, %v9335_v10 }
 0x986   : > { %v7110_v37 = vpop.f32.mrf.mxu2 }
 0x987   : > { %v9595_v52 = vmax.f32 %v9467_v4, 0.0  ;;  %v7242_v31 = vadd.f32 %v7110_v37, %v6195_v15  ;;  %v8157_v21 = vpop.f32.mrf.mxu3  ;;  %v6066_v26 = vpop.f32.mrf.mxu1 }
 0x988   : > { %v6196_v57 = vadd.f32 %v6066_v26, %v14136_v38 }
 0x989   : > { %9724 = vst.msk [vmem:[%s14162_s13 + $0x3e8] sm:$0xff] %vm9598_vm2, %v9595_v52  ;;  %v8289_v23 = vadd.f32 %v8157_v21, %v7242_v31 }
 0x98a   : > { %v9207_v54 = vpop.f32.mrf.mxu0 }
 0x98b   : > { %v9336_v19 = vadd.f32 %v9204_v33, %v8289_v23 }
 0x98d   : > { %v9468_v16 = vadd.f32 %v15477_v62, %v9336_v19 }
 0x98e   : > { %v7113_v36 = vpop.f32.mrf.mxu2 }
 0x98f   : > { %v9596_v22 = vmax.f32 %v9468_v16, 0.0  ;;  %v7243_v50 = vadd.f32 %v7113_v36, %v6196_v57  ;;  %v8160_v30 = vpop.f32.mrf.mxu3 }
 0x991   : > { %9725 = vst.msk [vmem:[%s14162_s13 + $0x3f0] sm:$0xff] %vm9598_vm2, %v9596_v22  ;;  %v8290_v17 = vadd.f32 %v8160_v30, %v7243_v50 }
 0x993   : > { %v9337_v55 = vadd.f32 %v9207_v54, %v8290_v17 }
 0x995   : > { %v9469_v58 = vadd.f32 %v15477_v62, %v9337_v55 }
 0x997   : > { %v9597_v49 = vmax.f32 %v9469_v58, 0.0 }
 0x999   : > { %9726 = vst.msk [vmem:[%s14162_s13 + $0x3f8] sm:$0xff] %vm9598_vm2, %v9597_v49 }
 0x99a PF: > { %s13_s12 = sadd.s32 1, %s12009_s12  }
 0x99b   : > { %p10_p4 = scmp.ge.s32.totalorder %s13_s12, 4  }
 0x99d   :  { %12 = sbr.rel (!%p10_p4) target bundleno = 1 (0x1), region = 78 }

</bundles_post_ra>
